<compile_context>
chip_gen: v7x
topology: tpu7x:2x2x1
jax: 0.10.0
libtpu: 0.0.40
codegen_flags: <defaults>
</compile_context>

<pallas_src>
import functools
import math

import jax
import jax.numpy as jnp
import numpy as np
from jax import lax
from jax.experimental import pallas as pl
from jax.experimental.pallas import tpu as pltpu


# ----------------------------------------------------------------------------- helpers

@functools.lru_cache(maxsize=None)
def _physical_vmem_bytes():
    try:
        return int(pltpu.get_tpu_info().vmem_capacity_bytes)
    except Exception:
        return 128 * 1024 * 1024


@functools.lru_cache(maxsize=None)
def _bf16_eup_supported():
    """bf16 exp on the EUP is only worthwhile (and supported) on v6e / v7x."""
    try:
        kind = jax.devices()[0].device_kind.lower()
    except Exception:
        return False
    return any(tag in kind for tag in ("v6", "v7", "7x"))


@functools.lru_cache(maxsize=None)
def _strided_roll_mode():
    """Empirically pin down pltpu.roll's strided sign convention (one tiny kernel).

    Returns the (shift, stride) parameterization family that realizes a per-row
    *right* rotation by (1 + row):  'sub' -> (1, 1), 'neg' -> (-1, -1),
    'mod' -> (L-1, L-1).  Defaults to the documented jnp.roll-like 'sub'.
    """
    rows = np.arange(8)[:, None]
    cols = np.arange(128)[None, :]
    want = ((cols - 1 - rows) % 128).astype(np.float32)
    x = jnp.tile(jnp.arange(128, dtype=jnp.float32)[None, :], (8, 1))

    def make_probe(sh, st):
        def probe(x_ref, o_ref):
            o_ref[...] = pltpu.roll(x_ref[...], shift=sh, axis=1,
                                    stride=st, stride_axis=0)
        return probe

    for mode, (sh, st) in (("sub", (1, 1)), ("neg", (-1, -1)), ("mod", (127, 127))):
        try:
            y = pl.pallas_call(
                make_probe(sh, st),
                out_shape=jax.ShapeDtypeStruct((8, 128), jnp.float32))(x)
            y = np.asarray(jax.block_until_ready(y))
            if np.array_equal(y, want):
                return mode
        except Exception:
            continue
    return "sub"


# ----------------------------------------------------------------------------- kernel

def _make_kernel(num_heads, head_dim, need_weights, exp_bf16, approx_recip,
                 skew_shift, skew_stride):
    H, d = num_heads, head_dim
    f32 = jnp.float32

    def body(q_ref, k_ref, v_ref, erT_ref, woT_ref, bo_ref, out_ref, attw_ref):
        cdt = q_ref.dtype
        Tq = q_ref.shape[1]
        L = k_ref.shape[1]

        q_all = q_ref[0]                      # (Tq, E)  projected & scaled
        k_all = k_ref[0]                      # (L, E)   projected
        v_all = v_ref[0]                      # (L, E)   projected
        erT = erT_ref[0]                      # (d, L)   Er^T, columns pre-rolled by q0

        # Global query-row / key-column indices for the skew's triangular select.
        q0 = pl.program_id(1) * Tq
        ii = q0 + lax.broadcasted_iota(jnp.int32, (Tq, L), 0)
        jj = lax.broadcasted_iota(jnp.int32, (Tq, L), 1)
        tril = jj <= ii

        # RPR term for ALL heads with one big-M MXU matmul (Er^T shared across heads).
        q_cat = jnp.concatenate([q_all[:, h * d:(h + 1) * d] for h in range(H)],
                                axis=0)                                 # (H*Tq, d)
        qe_all = jnp.dot(q_cat, erT, preferred_element_type=f32)        # (H*Tq, L)

        attw_acc = jnp.zeros((Tq, L), f32) if need_weights else None
        o_heads = []
        for h in range(H):                    # static loop over heads (H is small)
            sl = slice(h * d, (h + 1) * d)
            kh = k_all[:, sl]                 # (L, d)
            vh = v_all[:, sl]                 # (L, d)

            # scores = q_h @ k_h^T (contraction on the head dim of both operands).
            scores = lax.dot_general(q_all[:, sl], kh, (((1,), (1,)), ((), ())),
                                     preferred_element_type=f32)        # (Tq, L)

            # RPR skew: srel[i, j] = qe_global[i, L-1-i+j] for j <= i else 0.
            # One strided lane rotation (per-row amount 1 + local_row; the q-tile
            # offset was folded into erT by the wrapper) + one triangular select.
            qe = qe_all[h * Tq:(h + 1) * Tq, :]
            rolled = pltpu.roll(qe, shift=skew_shift, axis=1,
                                stride=skew_stride, stride_axis=0)
            scores = scores + jnp.where(tril, rolled, 0.0)

            # Softmax over keys; row max / sum / reciprocal stay in f32.
            m = jnp.max(scores, axis=-1, keepdims=True)
            x = scores - m
            if exp_bf16:
                p = jnp.exp(x.astype(jnp.bfloat16)).astype(f32)
            else:
                p = jnp.exp(x)
            lsum = jnp.sum(p, axis=-1, keepdims=True)
            w = p * pl.reciprocal(lsum, approx=approx_recip)             # (Tq, L)

            if need_weights:
                attw_acc = attw_acc + w
            o_heads.append(jnp.dot(w.astype(cdt), vh,
                                   preferred_element_type=f32))          # (Tq, d)

        # Lane-concat heads once; single full-depth Wo matmul; lane-dense stores.
        o_cat = jnp.concatenate(o_heads, axis=1).astype(cdt)             # (Tq, E)
        out = jnp.dot(o_cat, woT_ref[...], preferred_element_type=f32) + bo_ref[...]
        out_ref[0] = out.astype(out_ref.dtype)
        if need_weights:
            attw_ref[0] = (attw_acc * (1.0 / H)).astype(attw_ref.dtype)

    if need_weights:
        def kernel(q_ref, k_ref, v_ref, erT_ref, woT_ref, bo_ref, out_ref, attw_ref):
            body(q_ref, k_ref, v_ref, erT_ref, woT_ref, bo_ref, out_ref, attw_ref)
    else:
        def kernel(q_ref, k_ref, v_ref, erT_ref, woT_ref, bo_ref, out_ref):
            body(q_ref, k_ref, v_ref, erT_ref, woT_ref, bo_ref, out_ref, None)
    return kernel


# ----------------------------------------------------------------------------- wrapper

def mha_rpr_forward(query, key, value, params, num_heads, *, block_q=None,
                    compute_dtype=jnp.bfloat16, need_weights=True,
                    attw_dtype=None, vmem_limit_bytes=None):
    """Matches MultiheadAttentionRPR.forward (no masks, dropout=0).

    Returns (attn_output (L,B,E) f32, averaged attn weights (B,L,L) or None).
    """
    L, B, E = query.shape
    H = num_heads
    d = E // H
    assert d * H == E, "embed_dim must be divisible by num_heads"
    scaling = float(d) ** -0.5
    cdt = jnp.dtype(compute_dtype)
    approx_recip = (cdt == jnp.dtype(jnp.bfloat16))
    exp_bf16_req = approx_recip and _bf16_eup_supported()
    if attw_dtype is None:
        attw_dtype = jnp.float32 if cdt == jnp.dtype(jnp.float32) else jnp.bfloat16

    W = params["in_proj_weight"]              # (3E, E)
    bpj = params["in_proj_bias"]              # (3E,)
    Wo = params["out_proj_weight"]            # (E, E)
    bo = params["out_proj_bias"]              # (E,)
    Er = params["Er"]                         # (er_len, d)

    # ---- query-tile size: fit VMEM (v7x has 64 MiB), keep (8,128)-friendly ----
    phys = _physical_vmem_bytes()
    if block_q is None:
        cap = 256 if phys <= (64 << 20) else 512
        if L <= cap:
            block_q = L
        else:
            block_q = next((bq for bq in range(cap, 7, -1)
                            if L % bq == 0 and bq % 8 == 0), L)
            # v7x megacore balance: prefer an even number of q tiles when B == 1.
            if B == 1 and block_q < L and (L // block_q) % 2 == 1:
                half = block_q // 2
                if half >= 8 and half % 8 == 0 and L % half == 0:
                    block_q = half
    elif L % block_q != 0:
        block_q = L                            # fall back to a single query tile
    nqt = L // block_q

    # ---- in-projections hoisted out of the kernel (one GEMM, never re-done per tile)
    prec = lax.Precision.HIGHEST if cdt == jnp.dtype(jnp.float32) else lax.Precision.DEFAULT
    qB = jnp.transpose(query, (1, 0, 2)).astype(cdt)          # (B, L, E)
    if (query is key) and (key is value):
        # self-attention fast path: one fused (B,L,E) @ (E,3E) GEMM
        qkv = jnp.dot(qB, W.T.astype(cdt), precision=prec,
                      preferred_element_type=jnp.float32) + bpj.astype(jnp.float32)
        q_p = (qkv[..., :E] * scaling).astype(cdt)
        k_p = qkv[..., E:2 * E].astype(cdt)
        v_p = qkv[..., 2 * E:].astype(cdt)
    else:
        kB = jnp.transpose(key, (1, 0, 2)).astype(cdt)
        vB = jnp.transpose(value, (1, 0, 2)).astype(cdt)

        def proj(x, w2d, b1d):
            return jnp.dot(x, w2d.T.astype(cdt), precision=prec,
                           preferred_element_type=jnp.float32) + b1d.astype(jnp.float32)

        q_p = (proj(qB, W[:E], bpj[:E]) * scaling).astype(cdt)
        k_p = proj(kB, W[E:2 * E], bpj[E:2 * E]).astype(cdt)
        v_p = proj(vB, W[2 * E:], bpj[2 * E:]).astype(cdt)

    WoT = Wo.T.astype(cdt)
    bo2 = bo.reshape(1, E).astype(jnp.float32)

    # _get_valid_embedding: last min(er_len, L) rows.
    # NOTE: if er_len < L the PyTorch reference raises a shape error; we zero-pad.
    len_e = Er.shape[0]
    Er_valid = Er[max(0, len_e - L):]
    if Er_valid.shape[0] < L:
        Er_valid = jnp.pad(Er_valid, ((L - Er_valid.shape[0], 0), (0, 0)))
    ErT = Er_valid.T.astype(cdt)                                # (d, L)
    # Fold the per-query-tile row offset of the skew into a roll of Er^T's columns
    # so the in-kernel strided roll amount stays static.
    ErT_roll = jnp.stack([jnp.roll(ErT, t * block_q, axis=1) for t in range(nqt)],
                         axis=0)                                # (nqt, d, L)

    # Strided-roll sign convention (verified once by a probe kernel).
    mode = _strided_roll_mode()
    if mode == "neg":
        skew_shift, skew_stride = -1, -1
    elif mode == "mod":
        skew_shift, skew_stride = L - 1, L - 1
    else:
        skew_shift, skew_stride = 1, 1

    # ---- always set a VMEM limit (v5e default scoped limit is only ~16 MiB) ----
    if vmem_limit_bytes is None:
        cb = cdt.itemsize
        ab = jnp.dtype(attw_dtype).itemsize if need_weights else 0
        est = (2 * block_q * E * cb            # q tile (double buffered)
               + 4 * L * E * cb                # K + V (worst case double buffered)
               + 4 * d * L * cb                # Er^T (double buffered)
               + E * E * cb + E * 4            # Wo^T + bo
               + 2 * block_q * E * 4           # output tile
               + (2 * block_q * L * ab if need_weights else 0)
               + 10 * block_q * L * 4 + 6 * block_q * E * 4)   # live f32 temporaries
        vmem_limit_bytes = int(min(max(est * 1.25 + (4 << 20), 32 << 20),
                                   phys - (2 << 20)))

    def run(single_buffer, exp_bf16):
        kernel = _make_kernel(H, d, need_weights, exp_bf16, approx_recip,
                              skew_shift, skew_stride)
        sb = {}
        if single_buffer:
            # Grid-invariant (or batch-invariant) inputs: no double-buffering VMEM.
            sb = dict(pipeline_mode=pl.Buffered(1))
        in_specs = [
            pl.BlockSpec((1, block_q, E), lambda b, t: (b, t, 0)),        # q tile
            pl.BlockSpec((1, L, E), lambda b, t: (b, 0, 0), **sb),        # K (full)
            pl.BlockSpec((1, L, E), lambda b, t: (b, 0, 0), **sb),        # V (full)
            pl.BlockSpec((1, d, L), lambda b, t: (t, 0, 0)),              # Er^T per tile
            pl.BlockSpec((E, E), lambda b, t: (0, 0), **sb),              # Wo^T
            pl.BlockSpec((1, E), lambda b, t: (0, 0), **sb),              # bo
        ]
        out_shape = [jax.ShapeDtypeStruct((B, L, E), jnp.float32)]
        out_specs = [pl.BlockSpec((1, block_q, E), lambda b, t: (b, t, 0))]
        if need_weights:
            out_shape.append(jax.ShapeDtypeStruct((B, L, L), attw_dtype))
            out_specs.append(pl.BlockSpec((1, block_q, L), lambda b, t: (b, t, 0)))
        res = pl.pallas_call(
            kernel,
            out_shape=tuple(out_shape),
            grid_spec=pltpu.PrefetchScalarGridSpec(
                num_scalar_prefetch=0,
                grid=(B, nqt),
                in_specs=in_specs,
                out_specs=tuple(out_specs)),
            compiler_params=pltpu.CompilerParams(
                dimension_semantics=("parallel", "parallel"),
                vmem_limit_bytes=int(vmem_limit_bytes)),
        )(q_p, k_p, v_p, ErT_roll, WoT, bo2)
        return jax.block_until_ready(res)

    try:
        res = run(True, exp_bf16_req)
    except Exception:
        # Conservative fallback for older Pallas versions (no pl.Buffered(1) /
        # no bf16 EUP path): identical math, default double buffering, f32 exp.
        res = run(False, False)

    out = jnp.transpose(res[0], (1, 0, 2))                      # back to (L, B, E)
    attw = res[1] if need_weights else None
    return out, attw


# ----------------------------------------------------------------------------- reference

def reference_forward(query, key, value, params, num_heads):
    """Pure-JAX transcription of multi_head_attention_forward_rpr (no masks, p=0)."""
    L, B, E = query.shape
    H = num_heads
    d = E // H
    scaling = float(d) ** -0.5
    W = params["in_proj_weight"]
    b = params["in_proj_bias"]
    Wo = params["out_proj_weight"]
    bo = params["out_proj_bias"]
    Er = params["Er"]

    with jax.default_matmul_precision("highest"):
        q = query @ W[:E].T + b[:E]
        k = key @ W[E:2 * E].T + b[E:2 * E]
        v = value @ W[2 * E:].T + b[2 * E:]
        q = q * scaling
        q = q.reshape(L, B * H, d).transpose(1, 0, 2)
        k = k.reshape(L, B * H, d).transpose(1, 0, 2)
        v = v.reshape(L, B * H, d).transpose(1, 0, 2)

        attn = jnp.einsum("hld,hmd->hlm", q, k)

        len_e = Er.shape[0]
        Er_valid = Er[max(0, len_e - L):]
        qe = jnp.einsum("hld,md->hlm", q, Er_valid)
        mask = jnp.flip(jnp.triu(jnp.ones((L, L), jnp.float32)), 0)
        qe = mask * qe
        qe = jnp.pad(qe, ((0, 0), (0, 0), (1, 0)))
        qe = qe.reshape(qe.shape[0], qe.shape[2], qe.shape[1])
        srel = qe[:, 1:, :]
        attn = attn + srel

        w = jax.nn.softmax(attn, axis=-1)
        out = jnp.einsum("hlm,hmd->hld", w, v)
        out = out.transpose(1, 0, 2).reshape(L, B, E)
        out = out @ Wo.T + bo
        w_avg = w.reshape(B, H, L, L).sum(axis=1) / H
    return out, w_avg


# ----------------------------------------------------------------------------- main

if __name__ == "__main__":
    # Small, MusicTransformer-consistent shapes (lane-friendly: L, E multiples of 128).
    L, B, E, H = 128, 2, 128, 4
    d = E // H
    ER_LEN = 192
    BLOCK_Q = 64          # two query tiles -> exercises the (batch, q-tile) grid

    key0 = jax.random.PRNGKey(0)
    k1, k2, k3, k4, k5 = jax.random.split(key0, 5)

    # Deterministic parameter init following MultiheadAttentionRPR._reset_parameters.
    a = math.sqrt(6.0 / (3 * E + E))                     # xavier_uniform_ on (3E, E)
    params = {
        "in_proj_weight": jax.random.uniform(k1, (3 * E, E), jnp.float32, -a, a),
        "in_proj_bias": jnp.zeros((3 * E,), jnp.float32),            # constant_(0)
        "out_proj_weight": jax.random.uniform(
            k2, (E, E), jnp.float32, -1.0 / math.sqrt(E), 1.0 / math.sqrt(E)),
        "out_proj_bias": jnp.zeros((E,), jnp.float32),               # constant_(0)
        "Er": jax.random.uniform(k3, (ER_LEN, d), jnp.float32),      # torch.rand
    }

    # Self-attention input (query == key == value), PyTorch layout (L, B, E).
    query = jax.random.normal(k4, (L, B, E), jnp.float32)

    # TODO(synk): attn_mask / key_padding_mask / dropout(training) / add_bias_kv /
    #             add_zero_attn paths not implemented (module defaults used).

    ref_out, ref_attw = reference_forward(query, query, query, params, H)

    # f32 MXU path: tight check against the pure-JAX reference.
    out32, attw32 = mha_rpr_forward(query, query, query, params, H,
                                    block_q=BLOCK_Q, compute_dtype=jnp.float32)
    out32, attw32 = jax.block_until_ready((out32, attw32))
    np.testing.assert_allclose(np.asarray(out32), np.asarray(ref_out), rtol=2e-3, atol=2e-3)
    np.testing.assert_allclose(np.asarray(attw32), np.asarray(ref_attw), rtol=2e-3, atol=2e-3)

    # Default bf16 path (f32 accumulation, f32 softmax stats): loose check.
    out16, attw16 = mha_rpr_forward(query, query, query, params, H, block_q=BLOCK_Q)
    out16, attw16 = jax.block_until_ready((out16, attw16))
    np.testing.assert_allclose(np.asarray(out16), np.asarray(ref_out), rtol=5e-2, atol=5e-2)
    np.testing.assert_allclose(np.asarray(attw16).astype(np.float32),
                               np.asarray(ref_attw), rtol=5e-2, atol=5e-2)

    # need_weights=False path (averaged-weights HBM stream skipped entirely).
    out_nw, attw_nw = mha_rpr_forward(query, query, query, params, H,
                                      block_q=BLOCK_Q, need_weights=False)
    out_nw = jax.block_until_ready(out_nw)
    assert attw_nw is None
    np.testing.assert_allclose(np.asarray(out_nw), np.asarray(ref_out), rtol=5e-2, atol=5e-2)

    # Cross-attention (distinct key/value): exercises the non-fused projection path.
    key_in = jax.random.normal(k5, (L, B, E), jnp.float32)
    ref_out_c, ref_attw_c = reference_forward(query, key_in, key_in, params, H)
    out_c, attw_c = mha_rpr_forward(query, key_in, key_in, params, H,
                                    block_q=BLOCK_Q, compute_dtype=jnp.float32)
    out_c, attw_c = jax.block_until_ready((out_c, attw_c))
    np.testing.assert_allclose(np.asarray(out_c), np.asarray(ref_out_c), rtol=2e-3, atol=2e-3)
    np.testing.assert_allclose(np.asarray(attw_c), np.asarray(ref_attw_c), rtol=2e-3, atol=2e-3)

    print("KERNEL_OK")
</pallas_src>

<mosaic_0001>
module attributes {stable_mosaic.version = 11 : i64} {
  func.func @probe(%arg0: memref<8x128xf32, #tpu.memory_space<vmem>>, %arg1: memref<8x128xf32, #tpu.memory_space<vmem>>) attributes {dimension_semantics = [], scalar_prefetch = 0 : i64, scratch_operands = 0 : i64, tpu.core_type = #tpu.core_type<tc>} {
    %c0 = arith.constant 0 : index
    %c0_0 = arith.constant 0 : index
    %0 = vector.load %arg0[%c0, %c0_0] : memref<8x128xf32, #tpu.memory_space<vmem>>, vector<8x128xf32>
    %c1_i32 = arith.constant 1 : i32
    %1 = tpu.dynamic_rotate %0 by %c1_i32 dim 1 {stride = 1 : si32, stride_dimension = 0 : si32} : vector<8x128xf32>, i32 -> vector<8x128xf32>
    %c0_1 = arith.constant 0 : index
    %c0_2 = arith.constant 0 : index
    %2 = vector.load %arg1[%c0_1, %c0_2] : memref<8x128xf32, #tpu.memory_space<vmem>>, vector<8x128xf32>
    tpu.vector_store %arg1[%c0_1, %c0_2], %1 {strides = array<i32>} : memref<8x128xf32, #tpu.memory_space<vmem>>, vector<8x128xf32>,
    return
  }
}

module attributes {stable_mosaic.version = 11 : i64} {
  func.func @probe(%arg0: memref<8x128xf32, #tpu.memory_space<vmem>>, %arg1: memref<8x128xf32, #tpu.memory_space<vmem>>) attributes {dimension_semantics = [], scalar_prefetch = 0 : i64, scratch_operands = 0 : i64, tpu.core_type = #tpu.core_type<tc>} {
    %c0 = arith.constant 0 : index
    %c0_0 = arith.constant 0 : index
    %0 = vector.load %arg0[%c0, %c0_0] : memref<8x128xf32, #tpu.memory_space<vmem>>, vector<8x128xf32>
    %c127_i32 = arith.constant 127 : i32
    %1 = tpu.dynamic_rotate %0 by %c127_i32 dim 1 {stride = 127 : si32, stride_dimension = 0 : si32} : vector<8x128xf32>, i32 -> vector<8x128xf32>
    %c0_1 = arith.constant 0 : index
    %c0_2 = arith.constant 0 : index
    %2 = vector.load %arg1[%c0_1, %c0_2] : memref<8x128xf32, #tpu.memory_space<vmem>>, vector<8x128xf32>
    tpu.vector_store %arg1[%c0_1, %c0_2], %1 {strides = array<i32>} : memref<8x128xf32, #tpu.memory_space<vmem>>, vector<8x128xf32>,
    return
  }
}

module attributes {stable_mosaic.version = 11 : i64} {
  func.func @kernel(%arg0: i32, %arg1: i32, %arg2: memref<1x64x128xf32, #tpu.memory_space<vmem>>, %arg3: memref<1x128x128xf32, #tpu.memory_space<vmem>>, %arg4: memref<1x128x128xf32, #tpu.memory_space<vmem>>, %arg5: memref<1x32x128xf32, #tpu.memory_space<vmem>>, %arg6: memref<128x128xf32, #tpu.memory_space<vmem>>, %arg7: memref<1x128xf32, #tpu.memory_space<vmem>>, %arg8: memref<1x64x128xf32, #tpu.memory_space<vmem>>, %arg9: memref<1x64x128xf32, #tpu.memory_space<vmem>>) attributes {dimension_semantics = [#tpu.dimension_semantics<parallel>, #tpu.dimension_semantics<parallel>], iteration_bounds = array<i64: 2, 2>, scalar_prefetch = 0 : i64, scratch_operands = 0 : i64, tpu.core_type = #tpu.core_type<tc>, window_params = [{transform_indices = @transform_0, window_bounds = array<i64: 1, 64, 128>}, {pipeline_mode = #tpu.pipeline_mode<synchronous>, transform_indices = @transform_1, window_bounds = array<i64: 1, 128, 128>}, {pipeline_mode = #tpu.pipeline_mode<synchronous>, transform_indices = @transform_2, window_bounds = array<i64: 1, 128, 128>}, {transform_indices = @transform_3, window_bounds = array<i64: 1, 32, 128>}, {pipeline_mode = #tpu.pipeline_mode<synchronous>, transform_indices = @transform_4, window_bounds = array<i64: 128, 128>}, {pipeline_mode = #tpu.pipeline_mode<synchronous>, transform_indices = @transform_5, window_bounds = array<i64: 1, 128>}, {transform_indices = @transform_6, window_bounds = array<i64: 1, 64, 128>}, {transform_indices = @transform_7, window_bounds = array<i64: 1, 64, 128>}]} {
    %c0 = arith.constant 0 : index
    %c0_0 = arith.constant 0 : index
    %c0_1 = arith.constant 0 : index
    %0 = vector.load %arg2[%c0, %c0_0, %c0_1] : memref<1x64x128xf32, #tpu.memory_space<vmem>>, vector<1x64x128xf32>
    %1 = vector.shape_cast %0 : vector<1x64x128xf32> to vector<64x128xf32>
    %c0_2 = arith.constant 0 : index
    %c0_3 = arith.constant 0 : index
    %c0_4 = arith.constant 0 : index
    %2 = vector.load %arg3[%c0_2, %c0_3, %c0_4] : memref<1x128x128xf32, #tpu.memory_space<vmem>>, vector<1x128x128xf32>
    %3 = vector.shape_cast %2 : vector<1x128x128xf32> to vector<128x128xf32>
    %c0_5 = arith.constant 0 : index
    %c0_6 = arith.constant 0 : index
    %c0_7 = arith.constant 0 : index
    %4 = vector.load %arg4[%c0_5, %c0_6, %c0_7] : memref<1x128x128xf32, #tpu.memory_space<vmem>>, vector<1x128x128xf32>
    %5 = vector.shape_cast %4 : vector<1x128x128xf32> to vector<128x128xf32>
    %c0_8 = arith.constant 0 : index
    %c0_9 = arith.constant 0 : index
    %c0_10 = arith.constant 0 : index
    %6 = vector.load %arg5[%c0_8, %c0_9, %c0_10] : memref<1x32x128xf32, #tpu.memory_space<vmem>>, vector<1x32x128xf32>
    %7 = vector.shape_cast %6 : vector<1x32x128xf32> to vector<32x128xf32>
    %c64_i32 = arith.constant 64 : i32
    %8 = arith.muli %arg1, %c64_i32 : i32
    %9 = tpu.iota {dimensions = array<i32: 0>} : vector<64x128xi32>
    %10 = vector.broadcast %8 : i32 to vector<64x128xi32>
    %11 = arith.addi %10, %9 : vector<64x128xi32>
    %12 = tpu.iota {dimensions = array<i32: 1>} : vector<64x128xi32>
    %13 = arith.cmpi sle, %12, %11 : vector<64x128xi32>
    %14 = vector.extract_strided_slice %1 {offsets = [0, 0], sizes = [64, 32], strides = [1, 1]} : vector<64x128xf32> to vector<64x32xf32>
    %15 = vector.extract_strided_slice %1 {offsets = [0, 32], sizes = [64, 32], strides = [1, 1]} : vector<64x128xf32> to vector<64x32xf32>
    %16 = vector.extract_strided_slice %1 {offsets = [0, 64], sizes = [64, 32], strides = [1, 1]} : vector<64x128xf32> to vector<64x32xf32>
    %17 = vector.extract_strided_slice %1 {offsets = [0, 96], sizes = [64, 32], strides = [1, 1]} : vector<64x128xf32> to vector<64x32xf32>
    %18 = tpu.concatenate %14, %15, %16, %17 in 0 : vector<64x32xf32>, vector<64x32xf32>, vector<64x32xf32>, vector<64x32xf32> -> vector<256x32xf32>
    %cst = arith.constant dense<0.000000e+00> : vector<256x128xf32>
    %19 = tpu.matmul %18, %7, %cst {dimension_numbers = #tpu.dot_dimension_numbers<[1], [0], [0], [1], [0, 0, 1, 1], [], []>} : vector<256x32xf32>, vector<32x128xf32>, vector<256x128xf32> -> vector<256x128xf32>
    %cst_11 = arith.constant 0.000000e+00 : f32
    %20 = vector.broadcast %cst_11 : f32 to vector<64x128xf32>
    %21 = vector.extract_strided_slice %3 {offsets = [0, 0], sizes = [128, 32], strides = [1, 1]} : vector<128x128xf32> to vector<128x32xf32>
    %22 = vector.extract_strided_slice %5 {offsets = [0, 0], sizes = [128, 32], strides = [1, 1]} : vector<128x128xf32> to vector<128x32xf32>
    %23 = vector.extract_strided_slice %1 {offsets = [0, 0], sizes = [64, 32], strides = [1, 1]} : vector<64x128xf32> to vector<64x32xf32>
    %cst_12 = arith.constant dense<0.000000e+00> : vector<64x128xf32>
    %24 = tpu.matmul %23, %21, %cst_12 {dimension_numbers = #tpu.dot_dimension_numbers<[1], [1], [0], [0], [0, 0, 1, 0], [], []>} : vector<64x32xf32>, vector<128x32xf32>, vector<64x128xf32> -> vector<64x128xf32>
    %25 = vector.extract_strided_slice %19 {offsets = [0, 0], sizes = [64, 128], strides = [1, 1]} : vector<256x128xf32> to vector<64x128xf32>
    %c1_i32 = arith.constant 1 : i32
    %26 = tpu.dynamic_rotate %25 by %c1_i32 dim 1 {stride = 1 : si32, stride_dimension = 0 : si32} : vector<64x128xf32>, i32 -> vector<64x128xf32>
    %cst_13 = arith.constant 0.000000e+00 : f32
    %27 = vector.broadcast %cst_13 : f32 to vector<64x128xf32>
    %28 = arith.select %13, %26, %27 : vector<64x128xi1>, vector<64x128xf32>
    %29 = arith.addf %24, %28 : vector<64x128xf32>
    %cst_14 = arith.constant dense<0xFF800000> : vector<64xf32>
    %30 = vector.multi_reduction <maximumf>, %29, %cst_14 [1] : vector<64x128xf32> to vector<64xf32>
    %31 = vector.shape_cast %30 : vector<64xf32> to vector<64x1xf32>
    %32 = vector.broadcast %31 : vector<64x1xf32> to vector<64x128xf32>
    %33 = arith.subf %29, %32 : vector<64x128xf32>
    %34 = math.exp %33 : vector<64x128xf32>
    %cst_15 = arith.constant dense<0.000000e+00> : vector<64xf32>
    %35 = vector.multi_reduction <add>, %34, %cst_15 [1] : vector<64x128xf32> to vector<64xf32>
    %36 = vector.shape_cast %35 : vector<64xf32> to vector<64x1xf32>
    %37 = tpu.reciprocal %36 : vector<64x1xf32> -> vector<64x1xf32>
    %38 = vector.broadcast %37 : vector<64x1xf32> to vector<64x128xf32>
    %39 = arith.mulf %34, %38 : vector<64x128xf32>
    %40 = arith.addf %20, %39 : vector<64x128xf32>
    %cst_16 = arith.constant dense<0.000000e+00> : vector<64x32xf32>
    %41 = tpu.matmul %39, %22, %cst_16 {dimension_numbers = #tpu.dot_dimension_numbers<[1], [0], [0], [1], [0, 0, 1, 1], [], []>} : vector<64x128xf32>, vector<128x32xf32>, vector<64x32xf32> -> vector<64x32xf32>
    %42 = vector.extract_strided_slice %3 {offsets = [0, 32], sizes = [128, 32], strides = [1, 1]} : vector<128x128xf32> to vector<128x32xf32>
    %43 = vector.extract_strided_slice %5 {offsets = [0, 32], sizes = [128, 32], strides = [1, 1]} : vector<128x128xf32> to vector<128x32xf32>
    %44 = vector.extract_strided_slice %1 {offsets = [0, 32], sizes = [64, 32], strides = [1, 1]} : vector<64x128xf32> to vector<64x32xf32>
    %cst_17 = arith.constant dense<0.000000e+00> : vector<64x128xf32>
    %45 = tpu.matmul %44, %42, %cst_17 {dimension_numbers = #tpu.dot_dimension_numbers<[1], [1], [0], [0], [0, 0, 1, 0], [], []>} : vector<64x32xf32>, vector<128x32xf32>, vector<64x128xf32> -> vector<64x128xf32>
    %46 = vector.extract_strided_slice %19 {offsets = [64, 0], sizes = [64, 128], strides = [1, 1]} : vector<256x128xf32> to vector<64x128xf32>
    %c1_i32_18 = arith.constant 1 : i32
    %47 = tpu.dynamic_rotate %46 by %c1_i32_18 dim 1 {stride = 1 : si32, stride_dimension = 0 : si32} : vector<64x128xf32>, i32 -> vector<64x128xf32>
    %cst_19 = arith.constant 0.000000e+00 : f32
    %48 = vector.broadcast %cst_19 : f32 to vector<64x128xf32>
    %49 = arith.select %13, %47, %48 : vector<64x128xi1>, vector<64x128xf32>
    %50 = arith.addf %45, %49 : vector<64x128xf32>
    %cst_20 = arith.constant dense<0xFF800000> : vector<64xf32>
    %51 = vector.multi_reduction <maximumf>, %50, %cst_20 [1] : vector<64x128xf32> to vector<64xf32>
    %52 = vector.shape_cast %51 : vector<64xf32> to vector<64x1xf32>
    %53 = vector.broadcast %52 : vector<64x1xf32> to vector<64x128xf32>
    %54 = arith.subf %50, %53 : vector<64x128xf32>
    %55 = math.exp %54 : vector<64x128xf32>
    %cst_21 = arith.constant dense<0.000000e+00> : vector<64xf32>
    %56 = vector.multi_reduction <add>, %55, %cst_21 [1] : vector<64x128xf32> to vector<64xf32>
    %57 = vector.shape_cast %56 : vector<64xf32> to vector<64x1xf32>
    %58 = tpu.reciprocal %57 : vector<64x1xf32> -> vector<64x1xf32>
    %59 = vector.broadcast %58 : vector<64x1xf32> to vector<64x128xf32>
    %60 = arith.mulf %55, %59 : vector<64x128xf32>
    %61 = arith.addf %40, %60 : vector<64x128xf32>
    %cst_22 = arith.constant dense<0.000000e+00> : vector<64x32xf32>
    %62 = tpu.matmul %60, %43, %cst_22 {dimension_numbers = #tpu.dot_dimension_numbers<[1], [0], [0], [1], [0, 0, 1, 1], [], []>} : vector<64x128xf32>, vector<128x32xf32>, vector<64x32xf32> -> vector<64x32xf32>
    %63 = vector.extract_strided_slice %3 {offsets = [0, 64], sizes = [128, 32], strides = [1, 1]} : vector<128x128xf32> to vector<128x32xf32>
    %64 = vector.extract_strided_slice %5 {offsets = [0, 64], sizes = [128, 32], strides = [1, 1]} : vector<128x128xf32> to vector<128x32xf32>
    %65 = vector.extract_strided_slice %1 {offsets = [0, 64], sizes = [64, 32], strides = [1, 1]} : vector<64x128xf32> to vector<64x32xf32>
    %cst_23 = arith.constant dense<0.000000e+00> : vector<64x128xf32>
    %66 = tpu.matmul %65, %63, %cst_23 {dimension_numbers = #tpu.dot_dimension_numbers<[1], [1], [0], [0], [0, 0, 1, 0], [], []>} : vector<64x32xf32>, vector<128x32xf32>, vector<64x128xf32> -> vector<64x128xf32>
    %67 = vector.extract_strided_slice %19 {offsets = [128, 0], sizes = [64, 128], strides = [1, 1]} : vector<256x128xf32> to vector<64x128xf32>
    %c1_i32_24 = arith.constant 1 : i32
    %68 = tpu.dynamic_rotate %67 by %c1_i32_24 dim 1 {stride = 1 : si32, stride_dimension = 0 : si32} : vector<64x128xf32>, i32 -> vector<64x128xf32>
    %cst_25 = arith.constant 0.000000e+00 : f32
    %69 = vector.broadcast %cst_25 : f32 to vector<64x128xf32>
    %70 = arith.select %13, %68, %69 : vector<64x128xi1>, vector<64x128xf32>
    %71 = arith.addf %66, %70 : vector<64x128xf32>
    %cst_26 = arith.constant dense<0xFF800000> : vector<64xf32>
    %72 = vector.multi_reduction <maximumf>, %71, %cst_26 [1] : vector<64x128xf32> to vector<64xf32>
    %73 = vector.shape_cast %72 : vector<64xf32> to vector<64x1xf32>
    %74 = vector.broadcast %73 : vector<64x1xf32> to vector<64x128xf32>
    %75 = arith.subf %71, %74 : vector<64x128xf32>
    %76 = math.exp %75 : vector<64x128xf32>
    %cst_27 = arith.constant dense<0.000000e+00> : vector<64xf32>
    %77 = vector.multi_reduction <add>, %76, %cst_27 [1] : vector<64x128xf32> to vector<64xf32>
    %78 = vector.shape_cast %77 : vector<64xf32> to vector<64x1xf32>
    %79 = tpu.reciprocal %78 : vector<64x1xf32> -> vector<64x1xf32>
    %80 = vector.broadcast %79 : vector<64x1xf32> to vector<64x128xf32>
    %81 = arith.mulf %76, %80 : vector<64x128xf32>
    %82 = arith.addf %61, %81 : vector<64x128xf32>
    %cst_28 = arith.constant dense<0.000000e+00> : vector<64x32xf32>
    %83 = tpu.matmul %81, %64, %cst_28 {dimension_numbers = #tpu.dot_dimension_numbers<[1], [0], [0], [1], [0, 0, 1, 1], [], []>} : vector<64x128xf32>, vector<128x32xf32>, vector<64x32xf32> -> vector<64x32xf32>
    %84 = vector.extract_strided_slice %3 {offsets = [0, 96], sizes = [128, 32], strides = [1, 1]} : vector<128x128xf32> to vector<128x32xf32>
    %85 = vector.extract_strided_slice %5 {offsets = [0, 96], sizes = [128, 32], strides = [1, 1]} : vector<128x128xf32> to vector<128x32xf32>
    %86 = vector.extract_strided_slice %1 {offsets = [0, 96], sizes = [64, 32], strides = [1, 1]} : vector<64x128xf32> to vector<64x32xf32>
    %cst_29 = arith.constant dense<0.000000e+00> : vector<64x128xf32>
    %87 = tpu.matmul %86, %84, %cst_29 {dimension_numbers = #tpu.dot_dimension_numbers<[1], [1], [0], [0], [0, 0, 1, 0], [], []>} : vector<64x32xf32>, vector<128x32xf32>, vector<64x128xf32> -> vector<64x128xf32>
    %88 = vector.extract_strided_slice %19 {offsets = [192, 0], sizes = [64, 128], strides = [1, 1]} : vector<256x128xf32> to vector<64x128xf32>
    %c1_i32_30 = arith.constant 1 : i32
    %89 = tpu.dynamic_rotate %88 by %c1_i32_30 dim 1 {stride = 1 : si32, stride_dimension = 0 : si32} : vector<64x128xf32>, i32 -> vector<64x128xf32>
    %cst_31 = arith.constant 0.000000e+00 : f32
    %90 = vector.broadcast %cst_31 : f32 to vector<64x128xf32>
    %91 = arith.select %13, %89, %90 : vector<64x128xi1>, vector<64x128xf32>
    %92 = arith.addf %87, %91 : vector<64x128xf32>
    %cst_32 = arith.constant dense<0xFF800000> : vector<64xf32>
    %93 = vector.multi_reduction <maximumf>, %92, %cst_32 [1] : vector<64x128xf32> to vector<64xf32>
    %94 = vector.shape_cast %93 : vector<64xf32> to vector<64x1xf32>
    %95 = vector.broadcast %94 : vector<64x1xf32> to vector<64x128xf32>
    %96 = arith.subf %92, %95 : vector<64x128xf32>
    %97 = math.exp %96 : vector<64x128xf32>
    %cst_33 = arith.constant dense<0.000000e+00> : vector<64xf32>
    %98 = vector.multi_reduction <add>, %97, %cst_33 [1] : vector<64x128xf32> to vector<64xf32>
    %99 = vector.shape_cast %98 : vector<64xf32> to vector<64x1xf32>
    %100 = tpu.reciprocal %99 : vector<64x1xf32> -> vector<64x1xf32>
    %101 = vector.broadcast %100 : vector<64x1xf32> to vector<64x128xf32>
    %102 = arith.mulf %97, %101 : vector<64x128xf32>
    %103 = arith.addf %82, %102 : vector<64x128xf32>
    %cst_34 = arith.constant dense<0.000000e+00> : vector<64x32xf32>
    %104 = tpu.matmul %102, %85, %cst_34 {dimension_numbers = #tpu.dot_dimension_numbers<[1], [0], [0], [1], [0, 0, 1, 1], [], []>} : vector<64x128xf32>, vector<128x32xf32>, vector<64x32xf32> -> vector<64x32xf32>
    %105 = tpu.concatenate %41, %62, %83, %104 in 1 : vector<64x32xf32>, vector<64x32xf32>, vector<64x32xf32>, vector<64x32xf32> -> vector<64x128xf32>
    %c0_35 = arith.constant 0 : index
    %c0_36 = arith.constant 0 : index
    %106 = vector.load %arg6[%c0_35, %c0_36] : memref<128x128xf32, #tpu.memory_space<vmem>>, vector<128x128xf32>
    %cst_37 = arith.constant dense<0.000000e+00> : vector<64x128xf32>
    %107 = tpu.matmul %105, %106, %cst_37 {dimension_numbers = #tpu.dot_dimension_numbers<[1], [0], [0], [1], [0, 0, 1, 1], [], []>} : vector<64x128xf32>, vector<128x128xf32>, vector<64x128xf32> -> vector<64x128xf32>
    %c0_38 = arith.constant 0 : index
    %c0_39 = arith.constant 0 : index
    %108 = vector.load %arg7[%c0_38, %c0_39] : memref<1x128xf32, #tpu.memory_space<vmem>>, vector<1x128xf32>
    %109 = vector.broadcast %108 : vector<1x128xf32> to vector<64x128xf32>
    %110 = arith.addf %107, %109 : vector<64x128xf32>
    %c0_40 = arith.constant 0 : index
    %c0_41 = arith.constant 0 : index
    %c0_42 = arith.constant 0 : index
    %111 = vector.load %arg8[%c0_40, %c0_41, %c0_42] : memref<1x64x128xf32, #tpu.memory_space<vmem>>, vector<1x64x128xf32>
    %112 = vector.shape_cast %111 : vector<1x64x128xf32> to vector<64x128xf32>
    %113 = vector.shape_cast %110 : vector<64x128xf32> to vector<1x64x128xf32>
    tpu.vector_store %arg8[%c0_40, %c0_41, %c0_42], %113 {strides = array<i32>} : memref<1x64x128xf32, #tpu.memory_space<vmem>>, vector<1x64x128xf32>,
    %cst_43 = arith.constant 2.500000e-01 : f32
    %114 = vector.broadcast %cst_43 : f32 to vector<64x128xf32>
    %115 = arith.mulf %103, %114 : vector<64x128xf32>
    %c0_44 = arith.constant 0 : index
    %c0_45 = arith.constant 0 : index
    %c0_46 = arith.constant 0 : index
    %116 = vector.load %arg9[%c0_44, %c0_45, %c0_46] : memref<1x64x128xf32, #tpu.memory_space<vmem>>, vector<1x64x128xf32>
    %117 = vector.shape_cast %116 : vector<1x64x128xf32> to vector<64x128xf32>
    %118 = vector.shape_cast %115 : vector<64x128xf32> to vector<1x64x128xf32>
    tpu.vector_store %arg9[%c0_44, %c0_45, %c0_46], %118 {strides = array<i32>} : memref<1x64x128xf32, #tpu.memory_space<vmem>>, vector<1x64x128xf32>,
    return
  }
  func.func @transform_0(%arg0: i32, %arg1: i32) -> (i32, i32, i32) {
    %c0_i32 = arith.constant 0 : i32
    %c0_i32_0 = arith.constant 0 : i32
    return %arg0, %arg1, %c0_i32 : i32, i32, i32
  }
  func.func @transform_1(%arg0: i32, %arg1: i32) -> (i32, i32, i32) {
    %c0_i32 = arith.constant 0 : i32
    %c0_i32_0 = arith.constant 0 : i32
    %c0_i32_1 = arith.constant 0 : i32
    return %arg0, %c0_i32, %c0_i32_0 : i32, i32, i32
  }
  func.func @transform_2(%arg0: i32, %arg1: i32) -> (i32, i32, i32) {
    %c0_i32 = arith.constant 0 : i32
    %c0_i32_0 = arith.constant 0 : i32
    %c0_i32_1 = arith.constant 0 : i32
    return %arg0, %c0_i32, %c0_i32_0 : i32, i32, i32
  }
  func.func @transform_3(%arg0: i32, %arg1: i32) -> (i32, i32, i32) {
    %c0_i32 = arith.constant 0 : i32
    %c0_i32_0 = arith.constant 0 : i32
    %c0_i32_1 = arith.constant 0 : i32
    return %arg1, %c0_i32, %c0_i32_0 : i32, i32, i32
  }
  func.func @transform_4(%arg0: i32, %arg1: i32) -> (i32, i32) {
    %c0_i32 = arith.constant 0 : i32
    %c0_i32_0 = arith.constant 0 : i32
    %c0_i32_1 = arith.constant 0 : i32
    return %c0_i32, %c0_i32_0 : i32, i32
  }
  func.func @transform_5(%arg0: i32, %arg1: i32) -> (i32, i32) {
    %c0_i32 = arith.constant 0 : i32
    %c0_i32_0 = arith.constant 0 : i32
    %c0_i32_1 = arith.constant 0 : i32
    return %c0_i32, %c0_i32_0 : i32, i32
  }
  func.func @transform_6(%arg0: i32, %arg1: i32) -> (i32, i32, i32) {
    %c0_i32 = arith.constant 0 : i32
    %c0_i32_0 = arith.constant 0 : i32
    return %arg0, %arg1, %c0_i32 : i32, i32, i32
  }
  func.func @transform_7(%arg0: i32, %arg1: i32) -> (i32, i32, i32) {
    %c0_i32 = arith.constant 0 : i32
    %c0_i32_0 = arith.constant 0 : i32
    return %arg0, %arg1, %c0_i32 : i32, i32, i32
  }
}

module attributes {stable_mosaic.version = 11 : i64} {
  func.func @kernel(%arg0: i32, %arg1: i32, %arg2: memref<1x64x128xf32, #tpu.memory_space<vmem>>, %arg3: memref<1x128x128xf32, #tpu.memory_space<vmem>>, %arg4: memref<1x128x128xf32, #tpu.memory_space<vmem>>, %arg5: memref<1x32x128xf32, #tpu.memory_space<vmem>>, %arg6: memref<128x128xf32, #tpu.memory_space<vmem>>, %arg7: memref<1x128xf32, #tpu.memory_space<vmem>>, %arg8: memref<1x64x128xf32, #tpu.memory_space<vmem>>, %arg9: memref<1x64x128xf32, #tpu.memory_space<vmem>>) attributes {dimension_semantics = [#tpu.dimension_semantics<parallel>, #tpu.dimension_semantics<parallel>], iteration_bounds = array<i64: 2, 2>, scalar_prefetch = 0 : i64, scratch_operands = 0 : i64, tpu.core_type = #tpu.core_type<tc>, window_params = [{transform_indices = @transform_0, window_bounds = array<i64: 1, 64, 128>}, {transform_indices = @transform_1, window_bounds = array<i64: 1, 128, 128>}, {transform_indices = @transform_2, window_bounds = array<i64: 1, 128, 128>}, {transform_indices = @transform_3, window_bounds = array<i64: 1, 32, 128>}, {pipeline_mode = #tpu.pipeline_mode<synchronous>, transform_indices = @transform_4, window_bounds = array<i64: 128, 128>}, {pipeline_mode = #tpu.pipeline_mode<synchronous>, transform_indices = @transform_5, window_bounds = array<i64: 1, 128>}, {transform_indices = @transform_6, window_bounds = array<i64: 1, 64, 128>}, {transform_indices = @transform_7, window_bounds = array<i64: 1, 64, 128>}]} {
    %c0 = arith.constant 0 : index
    %c0_0 = arith.constant 0 : index
    %c0_1 = arith.constant 0 : index
    %0 = vector.load %arg2[%c0, %c0_0, %c0_1] : memref<1x64x128xf32, #tpu.memory_space<vmem>>, vector<1x64x128xf32>
    %1 = vector.shape_cast %0 : vector<1x64x128xf32> to vector<64x128xf32>
    %c0_2 = arith.constant 0 : index
    %c0_3 = arith.constant 0 : index
    %c0_4 = arith.constant 0 : index
    %2 = vector.load %arg3[%c0_2, %c0_3, %c0_4] : memref<1x128x128xf32, #tpu.memory_space<vmem>>, vector<1x128x128xf32>
    %3 = vector.shape_cast %2 : vector<1x128x128xf32> to vector<128x128xf32>
    %c0_5 = arith.constant 0 : index
    %c0_6 = arith.constant 0 : index
    %c0_7 = arith.constant 0 : index
    %4 = vector.load %arg4[%c0_5, %c0_6, %c0_7] : memref<1x128x128xf32, #tpu.memory_space<vmem>>, vector<1x128x128xf32>
    %5 = vector.shape_cast %4 : vector<1x128x128xf32> to vector<128x128xf32>
    %c0_8 = arith.constant 0 : index
    %c0_9 = arith.constant 0 : index
    %c0_10 = arith.constant 0 : index
    %6 = vector.load %arg5[%c0_8, %c0_9, %c0_10] : memref<1x32x128xf32, #tpu.memory_space<vmem>>, vector<1x32x128xf32>
    %7 = vector.shape_cast %6 : vector<1x32x128xf32> to vector<32x128xf32>
    %c64_i32 = arith.constant 64 : i32
    %8 = arith.muli %arg1, %c64_i32 : i32
    %9 = tpu.iota {dimensions = array<i32: 0>} : vector<64x128xi32>
    %10 = vector.broadcast %8 : i32 to vector<64x128xi32>
    %11 = arith.addi %10, %9 : vector<64x128xi32>
    %12 = tpu.iota {dimensions = array<i32: 1>} : vector<64x128xi32>
    %13 = arith.cmpi sle, %12, %11 : vector<64x128xi32>
    %14 = vector.extract_strided_slice %1 {offsets = [0, 0], sizes = [64, 32], strides = [1, 1]} : vector<64x128xf32> to vector<64x32xf32>
    %15 = vector.extract_strided_slice %1 {offsets = [0, 32], sizes = [64, 32], strides = [1, 1]} : vector<64x128xf32> to vector<64x32xf32>
    %16 = vector.extract_strided_slice %1 {offsets = [0, 64], sizes = [64, 32], strides = [1, 1]} : vector<64x128xf32> to vector<64x32xf32>
    %17 = vector.extract_strided_slice %1 {offsets = [0, 96], sizes = [64, 32], strides = [1, 1]} : vector<64x128xf32> to vector<64x32xf32>
    %18 = tpu.concatenate %14, %15, %16, %17 in 0 : vector<64x32xf32>, vector<64x32xf32>, vector<64x32xf32>, vector<64x32xf32> -> vector<256x32xf32>
    %cst = arith.constant dense<0.000000e+00> : vector<256x128xf32>
    %19 = tpu.matmul %18, %7, %cst {dimension_numbers = #tpu.dot_dimension_numbers<[1], [0], [0], [1], [0, 0, 1, 1], [], []>} : vector<256x32xf32>, vector<32x128xf32>, vector<256x128xf32> -> vector<256x128xf32>
    %cst_11 = arith.constant 0.000000e+00 : f32
    %20 = vector.broadcast %cst_11 : f32 to vector<64x128xf32>
    %21 = vector.extract_strided_slice %3 {offsets = [0, 0], sizes = [128, 32], strides = [1, 1]} : vector<128x128xf32> to vector<128x32xf32>
    %22 = vector.extract_strided_slice %5 {offsets = [0, 0], sizes = [128, 32], strides = [1, 1]} : vector<128x128xf32> to vector<128x32xf32>
    %23 = vector.extract_strided_slice %1 {offsets = [0, 0], sizes = [64, 32], strides = [1, 1]} : vector<64x128xf32> to vector<64x32xf32>
    %cst_12 = arith.constant dense<0.000000e+00> : vector<64x128xf32>
    %24 = tpu.matmul %23, %21, %cst_12 {dimension_numbers = #tpu.dot_dimension_numbers<[1], [1], [0], [0], [0, 0, 1, 0], [], []>} : vector<64x32xf32>, vector<128x32xf32>, vector<64x128xf32> -> vector<64x128xf32>
    %25 = vector.extract_strided_slice %19 {offsets = [0, 0], sizes = [64, 128], strides = [1, 1]} : vector<256x128xf32> to vector<64x128xf32>
    %c1_i32 = arith.constant 1 : i32
    %26 = tpu.dynamic_rotate %25 by %c1_i32 dim 1 {stride = 1 : si32, stride_dimension = 0 : si32} : vector<64x128xf32>, i32 -> vector<64x128xf32>
    %cst_13 = arith.constant 0.000000e+00 : f32
    %27 = vector.broadcast %cst_13 : f32 to vector<64x128xf32>
    %28 = arith.select %13, %26, %27 : vector<64x128xi1>, vector<64x128xf32>
    %29 = arith.addf %24, %28 : vector<64x128xf32>
    %cst_14 = arith.constant dense<0xFF800000> : vector<64xf32>
    %30 = vector.multi_reduction <maximumf>, %29, %cst_14 [1] : vector<64x128xf32> to vector<64xf32>
    %31 = vector.shape_cast %30 : vector<64xf32> to vector<64x1xf32>
    %32 = vector.broadcast %31 : vector<64x1xf32> to vector<64x128xf32>
    %33 = arith.subf %29, %32 : vector<64x128xf32>
    %34 = math.exp %33 : vector<64x128xf32>
    %cst_15 = arith.constant dense<0.000000e+00> : vector<64xf32>
    %35 = vector.multi_reduction <add>, %34, %cst_15 [1] : vector<64x128xf32> to vector<64xf32>
    %36 = vector.shape_cast %35 : vector<64xf32> to vector<64x1xf32>
    %37 = tpu.reciprocal %36 : vector<64x1xf32> -> vector<64x1xf32>
    %38 = vector.broadcast %37 : vector<64x1xf32> to vector<64x128xf32>
    %39 = arith.mulf %34, %38 : vector<64x128xf32>
    %40 = arith.addf %20, %39 : vector<64x128xf32>
    %cst_16 = arith.constant dense<0.000000e+00> : vector<64x32xf32>
    %41 = tpu.matmul %39, %22, %cst_16 {dimension_numbers = #tpu.dot_dimension_numbers<[1], [0], [0], [1], [0, 0, 1, 1], [], []>} : vector<64x128xf32>, vector<128x32xf32>, vector<64x32xf32> -> vector<64x32xf32>
    %42 = vector.extract_strided_slice %3 {offsets = [0, 32], sizes = [128, 32], strides = [1, 1]} : vector<128x128xf32> to vector<128x32xf32>
    %43 = vector.extract_strided_slice %5 {offsets = [0, 32], sizes = [128, 32], strides = [1, 1]} : vector<128x128xf32> to vector<128x32xf32>
    %44 = vector.extract_strided_slice %1 {offsets = [0, 32], sizes = [64, 32], strides = [1, 1]} : vector<64x128xf32> to vector<64x32xf32>
    %cst_17 = arith.constant dense<0.000000e+00> : vector<64x128xf32>
    %45 = tpu.matmul %44, %42, %cst_17 {dimension_numbers = #tpu.dot_dimension_numbers<[1], [1], [0], [0], [0, 0, 1, 0], [], []>} : vector<64x32xf32>, vector<128x32xf32>, vector<64x128xf32> -> vector<64x128xf32>
    %46 = vector.extract_strided_slice %19 {offsets = [64, 0], sizes = [64, 128], strides = [1, 1]} : vector<256x128xf32> to vector<64x128xf32>
    %c1_i32_18 = arith.constant 1 : i32
    %47 = tpu.dynamic_rotate %46 by %c1_i32_18 dim 1 {stride = 1 : si32, stride_dimension = 0 : si32} : vector<64x128xf32>, i32 -> vector<64x128xf32>
    %cst_19 = arith.constant 0.000000e+00 : f32
    %48 = vector.broadcast %cst_19 : f32 to vector<64x128xf32>
    %49 = arith.select %13, %47, %48 : vector<64x128xi1>, vector<64x128xf32>
    %50 = arith.addf %45, %49 : vector<64x128xf32>
    %cst_20 = arith.constant dense<0xFF800000> : vector<64xf32>
    %51 = vector.multi_reduction <maximumf>, %50, %cst_20 [1] : vector<64x128xf32> to vector<64xf32>
    %52 = vector.shape_cast %51 : vector<64xf32> to vector<64x1xf32>
    %53 = vector.broadcast %52 : vector<64x1xf32> to vector<64x128xf32>
    %54 = arith.subf %50, %53 : vector<64x128xf32>
    %55 = math.exp %54 : vector<64x128xf32>
    %cst_21 = arith.constant dense<0.000000e+00> : vector<64xf32>
    %56 = vector.multi_reduction <add>, %55, %cst_21 [1] : vector<64x128xf32> to vector<64xf32>
    %57 = vector.shape_cast %56 : vector<64xf32> to vector<64x1xf32>
    %58 = tpu.reciprocal %57 : vector<64x1xf32> -> vector<64x1xf32>
    %59 = vector.broadcast %58 : vector<64x1xf32> to vector<64x128xf32>
    %60 = arith.mulf %55, %59 : vector<64x128xf32>
    %61 = arith.addf %40, %60 : vector<64x128xf32>
    %cst_22 = arith.constant dense<0.000000e+00> : vector<64x32xf32>
    %62 = tpu.matmul %60, %43, %cst_22 {dimension_numbers = #tpu.dot_dimension_numbers<[1], [0], [0], [1], [0, 0, 1, 1], [], []>} : vector<64x128xf32>, vector<128x32xf32>, vector<64x32xf32> -> vector<64x32xf32>
    %63 = vector.extract_strided_slice %3 {offsets = [0, 64], sizes = [128, 32], strides = [1, 1]} : vector<128x128xf32> to vector<128x32xf32>
    %64 = vector.extract_strided_slice %5 {offsets = [0, 64], sizes = [128, 32], strides = [1, 1]} : vector<128x128xf32> to vector<128x32xf32>
    %65 = vector.extract_strided_slice %1 {offsets = [0, 64], sizes = [64, 32], strides = [1, 1]} : vector<64x128xf32> to vector<64x32xf32>
    %cst_23 = arith.constant dense<0.000000e+00> : vector<64x128xf32>
    %66 = tpu.matmul %65, %63, %cst_23 {dimension_numbers = #tpu.dot_dimension_numbers<[1], [1], [0], [0], [0, 0, 1, 0], [], []>} : vector<64x32xf32>, vector<128x32xf32>, vector<64x128xf32> -> vector<64x128xf32>
    %67 = vector.extract_strided_slice %19 {offsets = [128, 0], sizes = [64, 128], strides = [1, 1]} : vector<256x128xf32> to vector<64x128xf32>
    %c1_i32_24 = arith.constant 1 : i32
    %68 = tpu.dynamic_rotate %67 by %c1_i32_24 dim 1 {stride = 1 : si32, stride_dimension = 0 : si32} : vector<64x128xf32>, i32 -> vector<64x128xf32>
    %cst_25 = arith.constant 0.000000e+00 : f32
    %69 = vector.broadcast %cst_25 : f32 to vector<64x128xf32>
    %70 = arith.select %13, %68, %69 : vector<64x128xi1>, vector<64x128xf32>
    %71 = arith.addf %66, %70 : vector<64x128xf32>
    %cst_26 = arith.constant dense<0xFF800000> : vector<64xf32>
    %72 = vector.multi_reduction <maximumf>, %71, %cst_26 [1] : vector<64x128xf32> to vector<64xf32>
    %73 = vector.shape_cast %72 : vector<64xf32> to vector<64x1xf32>
    %74 = vector.broadcast %73 : vector<64x1xf32> to vector<64x128xf32>
    %75 = arith.subf %71, %74 : vector<64x128xf32>
    %76 = math.exp %75 : vector<64x128xf32>
    %cst_27 = arith.constant dense<0.000000e+00> : vector<64xf32>
    %77 = vector.multi_reduction <add>, %76, %cst_27 [1] : vector<64x128xf32> to vector<64xf32>
    %78 = vector.shape_cast %77 : vector<64xf32> to vector<64x1xf32>
    %79 = tpu.reciprocal %78 : vector<64x1xf32> -> vector<64x1xf32>
    %80 = vector.broadcast %79 : vector<64x1xf32> to vector<64x128xf32>
    %81 = arith.mulf %76, %80 : vector<64x128xf32>
    %82 = arith.addf %61, %81 : vector<64x128xf32>
    %cst_28 = arith.constant dense<0.000000e+00> : vector<64x32xf32>
    %83 = tpu.matmul %81, %64, %cst_28 {dimension_numbers = #tpu.dot_dimension_numbers<[1], [0], [0], [1], [0, 0, 1, 1], [], []>} : vector<64x128xf32>, vector<128x32xf32>, vector<64x32xf32> -> vector<64x32xf32>
    %84 = vector.extract_strided_slice %3 {offsets = [0, 96], sizes = [128, 32], strides = [1, 1]} : vector<128x128xf32> to vector<128x32xf32>
    %85 = vector.extract_strided_slice %5 {offsets = [0, 96], sizes = [128, 32], strides = [1, 1]} : vector<128x128xf32> to vector<128x32xf32>
    %86 = vector.extract_strided_slice %1 {offsets = [0, 96], sizes = [64, 32], strides = [1, 1]} : vector<64x128xf32> to vector<64x32xf32>
    %cst_29 = arith.constant dense<0.000000e+00> : vector<64x128xf32>
    %87 = tpu.matmul %86, %84, %cst_29 {dimension_numbers = #tpu.dot_dimension_numbers<[1], [1], [0], [0], [0, 0, 1, 0], [], []>} : vector<64x32xf32>, vector<128x32xf32>, vector<64x128xf32> -> vector<64x128xf32>
    %88 = vector.extract_strided_slice %19 {offsets = [192, 0], sizes = [64, 128], strides = [1, 1]} : vector<256x128xf32> to vector<64x128xf32>
    %c1_i32_30 = arith.constant 1 : i32
    %89 = tpu.dynamic_rotate %88 by %c1_i32_30 dim 1 {stride = 1 : si32, stride_dimension = 0 : si32} : vector<64x128xf32>, i32 -> vector<64x128xf32>
    %cst_31 = arith.constant 0.000000e+00 : f32
    %90 = vector.broadcast %cst_31 : f32 to vector<64x128xf32>
    %91 = arith.select %13, %89, %90 : vector<64x128xi1>, vector<64x128xf32>
    %92 = arith.addf %87, %91 : vector<64x128xf32>
    %cst_32 = arith.constant dense<0xFF800000> : vector<64xf32>
    %93 = vector.multi_reduction <maximumf>, %92, %cst_32 [1] : vector<64x128xf32> to vector<64xf32>
    %94 = vector.shape_cast %93 : vector<64xf32> to vector<64x1xf32>
    %95 = vector.broadcast %94 : vector<64x1xf32> to vector<64x128xf32>
    %96 = arith.subf %92, %95 : vector<64x128xf32>
    %97 = math.exp %96 : vector<64x128xf32>
    %cst_33 = arith.constant dense<0.000000e+00> : vector<64xf32>
    %98 = vector.multi_reduction <add>, %97, %cst_33 [1] : vector<64x128xf32> to vector<64xf32>
    %99 = vector.shape_cast %98 : vector<64xf32> to vector<64x1xf32>
    %100 = tpu.reciprocal %99 : vector<64x1xf32> -> vector<64x1xf32>
    %101 = vector.broadcast %100 : vector<64x1xf32> to vector<64x128xf32>
    %102 = arith.mulf %97, %101 : vector<64x128xf32>
    %103 = arith.addf %82, %102 : vector<64x128xf32>
    %cst_34 = arith.constant dense<0.000000e+00> : vector<64x32xf32>
    %104 = tpu.matmul %102, %85, %cst_34 {dimension_numbers = #tpu.dot_dimension_numbers<[1], [0], [0], [1], [0, 0, 1, 1], [], []>} : vector<64x128xf32>, vector<128x32xf32>, vector<64x32xf32> -> vector<64x32xf32>
    %105 = tpu.concatenate %41, %62, %83, %104 in 1 : vector<64x32xf32>, vector<64x32xf32>, vector<64x32xf32>, vector<64x32xf32> -> vector<64x128xf32>
    %c0_35 = arith.constant 0 : index
    %c0_36 = arith.constant 0 : index
    %106 = vector.load %arg6[%c0_35, %c0_36] : memref<128x128xf32, #tpu.memory_space<vmem>>, vector<128x128xf32>
    %cst_37 = arith.constant dense<0.000000e+00> : vector<64x128xf32>
    %107 = tpu.matmul %105, %106, %cst_37 {dimension_numbers = #tpu.dot_dimension_numbers<[1], [0], [0], [1], [0, 0, 1, 1], [], []>} : vector<64x128xf32>, vector<128x128xf32>, vector<64x128xf32> -> vector<64x128xf32>
    %c0_38 = arith.constant 0 : index
    %c0_39 = arith.constant 0 : index
    %108 = vector.load %arg7[%c0_38, %c0_39] : memref<1x128xf32, #tpu.memory_space<vmem>>, vector<1x128xf32>
    %109 = vector.broadcast %108 : vector<1x128xf32> to vector<64x128xf32>
    %110 = arith.addf %107, %109 : vector<64x128xf32>
    %c0_40 = arith.constant 0 : index
    %c0_41 = arith.constant 0 : index
    %c0_42 = arith.constant 0 : index
    %111 = vector.load %arg8[%c0_40, %c0_41, %c0_42] : memref<1x64x128xf32, #tpu.memory_space<vmem>>, vector<1x64x128xf32>
    %112 = vector.shape_cast %111 : vector<1x64x128xf32> to vector<64x128xf32>
    %113 = vector.shape_cast %110 : vector<64x128xf32> to vector<1x64x128xf32>
    tpu.vector_store %arg8[%c0_40, %c0_41, %c0_42], %113 {strides = array<i32>} : memref<1x64x128xf32, #tpu.memory_space<vmem>>, vector<1x64x128xf32>,
    %cst_43 = arith.constant 2.500000e-01 : f32
    %114 = vector.broadcast %cst_43 : f32 to vector<64x128xf32>
    %115 = arith.mulf %103, %114 : vector<64x128xf32>
    %c0_44 = arith.constant 0 : index
    %c0_45 = arith.constant 0 : index
    %c0_46 = arith.constant 0 : index
    %116 = vector.load %arg9[%c0_44, %c0_45, %c0_46] : memref<1x64x128xf32, #tpu.memory_space<vmem>>, vector<1x64x128xf32>
    %117 = vector.shape_cast %116 : vector<1x64x128xf32> to vector<64x128xf32>
    %118 = vector.shape_cast %115 : vector<64x128xf32> to vector<1x64x128xf32>
    tpu.vector_store %arg9[%c0_44, %c0_45, %c0_46], %118 {strides = array<i32>} : memref<1x64x128xf32, #tpu.memory_space<vmem>>, vector<1x64x128xf32>,
    return
  }
  func.func @transform_0(%arg0: i32, %arg1: i32) -> (i32, i32, i32) {
    %c0_i32 = arith.constant 0 : i32
    %c0_i32_0 = arith.constant 0 : i32
    return %arg0, %arg1, %c0_i32 : i32, i32, i32
  }
  func.func @transform_1(%arg0: i32, %arg1: i32) -> (i32, i32, i32) {
    %c0_i32 = arith.constant 0 : i32
    %c0_i32_0 = arith.constant 0 : i32
    %c0_i32_1 = arith.constant 0 : i32
    return %arg0, %c0_i32, %c0_i32_0 : i32, i32, i32
  }
  func.func @transform_2(%arg0: i32, %arg1: i32) -> (i32, i32, i32) {
    %c0_i32 = arith.constant 0 : i32
    %c0_i32_0 = arith.constant 0 : i32
    %c0_i32_1 = arith.constant 0 : i32
    return %arg0, %c0_i32, %c0_i32_0 : i32, i32, i32
  }
  func.func @transform_3(%arg0: i32, %arg1: i32) -> (i32, i32, i32) {
    %c0_i32 = arith.constant 0 : i32
    %c0_i32_0 = arith.constant 0 : i32
    %c0_i32_1 = arith.constant 0 : i32
    return %arg1, %c0_i32, %c0_i32_0 : i32, i32, i32
  }
  func.func @transform_4(%arg0: i32, %arg1: i32) -> (i32, i32) {
    %c0_i32 = arith.constant 0 : i32
    %c0_i32_0 = arith.constant 0 : i32
    %c0_i32_1 = arith.constant 0 : i32
    return %c0_i32, %c0_i32_0 : i32, i32
  }
  func.func @transform_5(%arg0: i32, %arg1: i32) -> (i32, i32) {
    %c0_i32 = arith.constant 0 : i32
    %c0_i32_0 = arith.constant 0 : i32
    %c0_i32_1 = arith.constant 0 : i32
    return %c0_i32, %c0_i32_0 : i32, i32
  }
  func.func @transform_6(%arg0: i32, %arg1: i32) -> (i32, i32, i32) {
    %c0_i32 = arith.constant 0 : i32
    %c0_i32_0 = arith.constant 0 : i32
    return %arg0, %arg1, %c0_i32 : i32, i32, i32
  }
  func.func @transform_7(%arg0: i32, %arg1: i32) -> (i32, i32, i32) {
    %c0_i32 = arith.constant 0 : i32
    %c0_i32_0 = arith.constant 0 : i32
    return %arg0, %arg1, %c0_i32 : i32, i32, i32
  }
}

</mosaic_0001>

<bundles_post_ra>
// kernel: tpu_custom_call.1
= control target key start
LH: loop header
LB: loop body
LE: loop exit
PB: predicated region body
PF: predicated region fallthrough
CT: control target
= control target key end

     0   :  { %6 = vsyncpa [#allocation3], 0  ;;  %s130_s0 = inlined_call_operand.hbm [shape: f32[8,128], index: 0, kind: input, shape index: {}]   ;;  %s131_s1 = inlined_call_operand.hbm [shape: f32[8,128], index: 1, kind: output, shape index: {}]  }
   0x1   :  { %7 = vsyncpa [#allocation4], 0  ;;  %s93_s6 = smov [#allocation2]   ;;  %s45_s10 = scalar_lea.hbm %s130_s0, 128 }
   0x2   :  { %s14_s7 = sshll.u32 %s93_s6, 4  ;;  %p46_p0 = scmp.ne.s32.totalorder %s130_s0, %s45_s10  ;;  %s15_s7 = int_to_ptr.vmem [resolvable:$true] %s14_s7 }
   0x3   :  { %p49_p1 = scmp.lt.u32.totalorder %s45_s10, %s130_s0 }
   0x5   :  { %p51_p2 = pnand %p49_p1, %p46_p0 }
   0x7   :  { %54 = shalt.err (!%p51_p2)
}
   0x8   :  { %s55_s15 = scalar_lea.vmem %s15_s7, 128  ;;  %p60_p4 = scmp.lt.s32.totalorder %s15_s7, %s15_s7 }
   0x9   :  { %p56_p3 = scmp.ne.s32.totalorder %s15_s7, %s55_s15  ;;  %p61_p5 = scmp.lt.s32.totalorder %s55_s15, %s55_s15 }
   0xb   :  { %p62_p6 = por %p61_p5, %p60_p4 }
   0xd   :  { %p63_p7 = pnand %p62_p6, %p56_p3 }
   0xf   :  { %66 = shalt.err (!%p63_p7)
}
  0x10   :  { %17 = dma.hbm_to_vmem [thread:$0]  %s130_s0, 128, %s15_s7, [#allocation3]  }
  0x11   :  { %89 = dma.done.wait [#allocation3], 128  }
  0x12   :  { %90 = vsyncadd [#allocation3], 4294967168  ;;  %v21_v0 = vld [vmem:[#allocation2] sm:$0xff]  ;;  %s94_s18 = smov 257   ;;  %s95_s19 = smov [#allocation5]  }
  0x13   :  { %24 = vrot.lane.b32.xlu0 %v21_v0, %s94_s18  ;;  %s33_s20 = sshll.u32 %s95_s19, 4  ;;  %s34_s20 = int_to_ptr.vmem [resolvable:$true] %s33_s20 }
  0x14   :  { %s67_s21 = scalar_lea.vmem %s34_s20, 128  ;;  %p72_p9 = scmp.lt.s32.totalorder %s34_s20, %s34_s20 }
  0x15   :  { %p68_p8 = scmp.ne.s32.totalorder %s34_s20, %s67_s21  ;;  %p73_p10 = scmp.lt.s32.totalorder %s67_s21, %s67_s21 }
  0x17   :  { %p74_p11 = por %p73_p10, %p72_p9 }
  0x19   :  { %p75_p12 = pnand %p74_p11, %p68_p8 }
  0x85   :  { %v25_v1 = vpop.permute.xlu0 %24 }
  0x86   :  { %26 = vst [vmem:[#allocation5] sm:$0xff] %v25_v1 }
  0x87   :  { %78 = shalt.err (!%p75_p12)
}
  0x88   :  { %s79_s0 = scalar_lea.hbm %s131_s1, 128 }
  0x89   :  { %p80_p13 = scmp.ne.s32.totalorder %s131_s1, %s79_s0  ;;  %p83_p0 = scmp.lt.u32.totalorder %s79_s0, %s131_s1 }
  0x8b   :  { %p85_p1 = pnand %p83_p0, %p80_p13 }
  0x8d   :  { %88 = shalt.err (!%p85_p1)
}
  0x8e   :  { %36 = dma.vmem_to_hbm [thread:$0]  %s34_s20, 128, %s131_s1, [#allocation4]  }
  0x8f   :  { %91 = dma.done.wait [#allocation4], 128  }
  0x90   :  { %92 = vsyncadd [#allocation4], 4294967168 }
  0x91   :  { %40 = vsyncpa [#allocation3], 1 }
  0x92   :  { %41 = vsyncpa [#allocation4], 1 }

// kernel: tpu_custom_call.1
= control target key start
LH: loop header
LB: loop body
LE: loop exit
PB: predicated region body
PF: predicated region fallthrough
CT: control target
= control target key end

     0   :  { %s7081_s0 = inlined_call_operand.hbm [shape: f32[2,128,128], index: 0, kind: input, shape index: {}]   ;;  %s7082_s1 = inlined_call_operand.hbm [shape: f32[2,128,128], index: 1, kind: input, shape index: {}]   ;;  %s7083_s2 = inlined_call_operand.hbm [shape: f32[2,128,128], index: 2, kind: input, shape index: {}]   ;;  %s7084_s3 = inlined_call_operand.hbm [shape: f32[2,32,128], index: 3, kind: input, shape index: {}]   ;;  %s7085_s4 = inlined_call_operand.hbm [shape: f32[128,128], index: 4, kind: input, shape index: {}]   ;;  %s7086_s5 = inlined_call_operand.vmem [shape: f32[1,128], index: 5, kind: input, shape index: {}]   ;;  %s7087_s6 = inlined_call_operand.hbm [shape: f32[2,128,128], index: 6, kind: output, shape index: {0}]   ;;  %s7088_s7 = inlined_call_operand.hbm [shape: f32[2,128,128], index: 7, kind: output, shape index: {1}]  }
   0x1   :  { %7147 = sst [smem:[#allocation63_spill]] %s7081_s0 }
   0x2   :  { %7148 = sst [smem:[#allocation64_spill]] %s7082_s1 }
   0x3   :  { %7149 = sst [smem:[#allocation65_spill]] %s7083_s2 }
   0x4   :  { %7150 = sst [smem:[#allocation66_spill]] %s7085_s4 }
   0x5   :  { %7151 = sst [smem:[#allocation67_spill]] %s7086_s5 }
   0x6   :  { %7152 = sst [smem:[#allocation68_spill]] %s7087_s6 }
   0x7   :  { %7153 = sst [smem:[#allocation69_spill]] %s7088_s7 }
   0x8   :  { %13 = vsyncpa [#allocation3], 0 }
   0x9   :  { %15 = vsyncpa [#allocation3 + $0x1], 0 }
   0xa   :  { %16 = vsyncpa [#allocation6], 0 }
   0xb   :  { %17 = vsyncpa [#allocation9], 0 }
   0xc   :  { %19 = vsyncpa [#allocation9 + $0x1], 0 }
   0xd   :  { %20 = vsyncpa [#allocation4], 0 }
   0xe   :  { %22 = vsyncpa [#allocation4 + $0x1], 0 }
   0xf   :  { %23 = vsyncpa [#allocation13], 0 }
  0x10   :  { %25 = vsyncpa [#allocation13 + $0x1], 0  ;;  %s5327_s24 = smov 0   ;;  %s5329_s25 = smov 0  }
  0x11   :  { %s5331_s26 = smov 0   ;;  %s5333_s27 = smov 0  }
  0x12   :  { %s5335_s28 = smov 0   ;;  %s5337_s29 = smov 0  }
  0x13   :  { %s5339_s30 = smov 0   ;;  %s5341_s8 = smov 0  }
  0x14   :  { %s5343_s9 = smov 0   ;;  %s5345_s10 = smov 0  }
  0x15   :  { %s5347_s11 = smov 0   ;;  %s5349_s12 = smov 0  }
  0x16   :  { %s5351_s13 = smov 0   ;;  %s5353_s14 = smov 0  }
  0x17 LB: > { %7154 = sst [smem:[#allocation20_spill]] %s5227_s28  ;;  %s5396_s15 = sadd.s32 4294967295, %s5263_s14   ;;  %s5263_s14 = sphi %s5353_s14, %s31_s14   ;;  %s5259_s13 = sphi %s5351_s13, %s7302_s13   ;;  %s5255_s12 = sphi %s5349_s12, %s7301_s12   ;;  %s5251_s11 = sphi %s5347_s11, %s7300_s11   ;;  %s5247_s10 = sphi %s5345_s10, %s7299_s10   ;;  %s5243_s9 = sphi %s5343_s9, %s7298_s9   ;;  %s5239_s8 = sphi %s5341_s8, %s7297_s8   ;;  %s5235_s30 = sphi %s5339_s30, %s7296_s30   ;;  %s5231_s29 = sphi %s5337_s29, %s7295_s29   ;;  %s5227_s28 = sphi %s5335_s28, %s7294_s28   ;;  %s5223_s27 = sphi %s5333_s27, %s7293_s27   ;;  %s5219_s26 = sphi %s5331_s26, %s7292_s26   ;;  %s5215_s25 = sphi %s5329_s25, %s7291_s25   ;;  %s5211_s24 = sphi %s5327_s24, %s7290_s24  }
  0x18   : > { %7155 = sst [smem:[#allocation21_spill]] %s5247_s10  ;;  %p91_p0 = scmp.ne.s32.totalorder %s5227_s28, %s5223_s27 }
  0x19   : > { %7156 = sst [smem:[#allocation22_spill]] %s5251_s11  ;;  %p7094_p1 = scmp.eq.s32.totalorder %s5396_s15, 0 }
  0x1a   : > { %p3064_p2 = scmp.ge.s32.totalorder %s5263_s14, 1  ;;  %p252_p3 = scmp.lt.s32.totalorder %s5263_s14, 5 }
  0x1b   : > { %s3224_s16 = sshll.u32 %s5251_s11, 11  ;;  %p5405_p4 = por %p91_p0, %p7094_p1 }
  0x1c   : > { %s7159_s1 = sld [smem:[#allocation64_spill]]  ;;  %p5414_p5 = pnand %p3064_p2, %p252_p3 }
  0x1d   : > { %s7157_s17 = scalar_select %p5405_p4, 1, 0 }
  0x1e   : > { %s7160_s21 = scalar_select %p5414_p5, 1, 0 }
  0x1f   : > { %7158 = sst [smem:[#allocation23_spill]] %s7157_s17  ;;  %s5265_s22 = smov [#allocation5]  }
  0x20   : > { %7161 = sst [smem:[#allocation24_spill]] %s7160_s21  ;;  %s267_s23 = sshll.u32 %s5265_s22, 4  ;;  %s5420_s23 = int_to_ptr.vmem [resolvable:$true] %s267_s23 }
  0x21   : > { %p7093_p6 = pneg %p5414_p5  ;;  %s7162_s2 = sld [smem:[#allocation65_spill]] }
  0x22   : > { %s5412_s20 = scalar_lea.hbm %s7159_s1, %s3224_s16  ;;  %s5266_s22 = smov [#allocation10]  }
  0x23   : > { %p5432_p7 = pnand %p7093_p6, %p5405_p4  ;;  %s5436_s6 = sshll.u32 %s5266_s22, 4  ;;  %s297_s6 = int_to_ptr.vmem [resolvable:$true] %s5436_s6 }
  0x24   : > { %s4925_s5 = scalar_lea.hbm %s5412_s20, 2048  ;;  %s4930_s18 = scalar_lea.hbm %s7159_s1, 4096 }
  0x25   : > { %s7163_s28 = scalar_select %p5432_p7, 1, 0 }
  0x26   : > { %p4926_p8 = scmp.ne.s32.totalorder %s5412_s20, %s4925_s5  ;;  %p7104_p9 = pneg %p5432_p7 }
  0x27   : > { %s5425_s19 = scalar_lea.hbm %s7162_s2, %s3224_s16  ;;  %p4931_p12 = scmp.lt.u32.totalorder %s5412_s20, %s7159_s1 }
  0x28   : > { %p4928_p10 = pnand %p7104_p9, %p4926_p8  ;;  %p4932_p13 = scmp.lt.u32.totalorder %s4930_s18, %s4925_s5 }
  0x29   : > { %p4934_p2 = scmp.lt.u32.totalorder %s4925_s5, %s5412_s20 }
  0x2a   : > { %p4929_p11 = pneg %p4928_p10  ;;  %p4933_p0 = por %p4932_p13, %p4931_p12 }
  0x2c   : > { %p4935_p3 = por %p4934_p2, %p4933_p0 }
  0x2e   : > { %p4936_p6 = pnand %p4935_p3, %p4929_p11 }
  0x30   : > { %4939 = shalt.err (!%p4936_p6)
}
  0x31   : > { %s4940_s22 = scalar_lea.vmem %s5420_s23, 2048  ;;  %p4948_p4 = scmp.lt.s32.totalorder %s5420_s23, %s5420_s23 }
  0x32   : > { %p4941_p8 = scmp.ne.s32.totalorder %s5420_s23, %s4940_s22  ;;  %p4949_p5 = scmp.lt.s32.totalorder %s4940_s22, %s4940_s22 }
  0x34   : > { %p4943_p10 = pnand %p4941_p8, %p7104_p9  ;;  %p4950_p12 = por %p4949_p5, %p4948_p4 }
  0x36   : > { %p4944_p1 = pneg %p4943_p10 }
  0x38   : > { %p4951_p13 = pnand %p4950_p12, %p4944_p1 }
  0x3a   : > { %4954 = shalt.err (!%p4951_p13)
}
  0x3b   : > { %s7102_s5 = smov 128   ;;  %s7107_s7 = smov 8  }
  0x3c   : > { %4310 = dma.hbm_to_vmem [thread:$0]  (!%p5432_p7), %s5412_s20, 2048, %s5420_s23, [#allocation6], %s7102_s5, %s7102_s5, %s7107_s7  }
  0x3d   : > { %p7164_p6 = scmp.eq.s32.totalorder %s5396_s15, 0  ;;  %p7165_p11 = scmp.ne.s32.totalorder %s7160_s21, 0 }
  0x3e   : > { %s5269_s16 = smov [#allocation7]   ;;  %s7168_s4 = sld [smem:[#allocation66_spill]] }
  0x3f   : > { %p7166_p0 = pneg %p7165_p11  ;;  %s283_s27 = sshll.u32 %s5269_s16, 4  ;;  %s284_s27 = int_to_ptr.vmem [resolvable:$true] %s283_s27 }
  0x41   : > { %p5473_p4 = pnand %p7166_p0, %p7164_p6 }
  0x43   : > { %p4957_p5 = pneg %p5473_p4 }
  0x44   : > { %s4955_s1 = scalar_lea.hbm %s7168_s4, 2048 }
  0x45   : > { %p4956_p1 = scmp.ne.s32.totalorder %s7168_s4, %s4955_s1  ;;  %p4962_p8 = scmp.lt.u32.totalorder %s4955_s1, %s7168_s4 }
  0x47   : > { %p4958_p2 = pnand %p4957_p5, %p4956_p1 }
  0x49   : > { %p4959_p3 = pneg %p4958_p2 }
  0x4b   : > { %p4964_p10 = pnand %p4962_p8, %p4959_p3 }
  0x4d   : > { %4967 = shalt.err (!%p4964_p10)
}
  0x4e   : > { %s4968_s5 = scalar_lea.vmem %s297_s6, 2048  ;;  %p4976_p0 = scmp.lt.s32.totalorder %s297_s6, %s297_s6 }
  0x4f   : > { %p4969_p12 = scmp.ne.s32.totalorder %s297_s6, %s4968_s5  ;;  %p4977_p9 = scmp.lt.s32.totalorder %s4968_s5, %s4968_s5 }
  0x51   : > { %p4971_p13 = pnand %p4969_p12, %p4957_p5  ;;  %p4978_p11 = por %p4977_p9, %p4976_p0 }
  0x53   : > { %p4972_p6 = pneg %p4971_p13 }
  0x55   : > { %p4979_p7 = pnand %p4978_p11, %p4972_p6 }
  0x57   : > { %4982 = shalt.err (!%p4979_p7)
}
  0x58   : > { %s7169_s10 = smov 128   ;;  %s4983_s1 = scalar_lea.hbm %s5425_s19, 2048 }
  0x59   : > { %4316 = dma.hbm_to_vmem [thread:$0]  (!%p5473_p4), %s7168_s4, 2048, %s297_s6, [#allocation9], %s7169_s10, %s7169_s10, %s7107_s7  }
  0x5a   : > { %p4984_p1 = scmp.ne.s32.totalorder %s5425_s19, %s4983_s1  ;;  %p7170_p9 = scmp.ne.s32.totalorder %s7163_s28, 0 }
  0x5b   : > { %s4988_s18 = scalar_lea.hbm %s7162_s2, 4096  ;;  %p4989_p2 = scmp.lt.u32.totalorder %s5425_s19, %s7162_s2 }
  0x5c   : > { %p7171_p11 = pneg %p7170_p9  ;;  %p4990_p3 = scmp.lt.u32.totalorder %s4988_s18, %s4983_s1 }
  0x5d   : > { %p4992_p10 = scmp.lt.u32.totalorder %s4983_s1, %s5425_s19 }
  0x5e   : > { %p4986_p7 = pnand %p4984_p1, %p7171_p11  ;;  %p4991_p8 = por %p4990_p3, %p4989_p2 }
  0x60   : > { %p4987_p5 = pneg %p4986_p7  ;;  %p4993_p12 = por %p4992_p10, %p4991_p8 }
  0x62   : > { %p4994_p4 = pnand %p4993_p12, %p4987_p5 }
  0x64   : > { %4997 = shalt.err (!%p4994_p4)
}
  0x65   : > { %s4998_s6 = scalar_lea.vmem %s284_s27, 2048  ;;  %p7172_p6 = pmov %p7171_p11 }
  0x66   : > { %p4999_p13 = scmp.ne.s32.totalorder %s284_s27, %s4998_s6  ;;  %p5006_p11 = scmp.lt.s32.totalorder %s284_s27, %s284_s27 }
  0x67   : > { %p5007_p7 = scmp.lt.s32.totalorder %s4998_s6, %s4998_s6 }
  0x68   : > { %p5001_p0 = pnand %p4999_p13, %p7172_p6 }
  0x69   : > { %p5008_p2 = por %p5007_p7, %p5006_p11 }
  0x6a   : > { %p5002_p1 = pneg %p5001_p0 }
  0x6c   : > { %p5009_p3 = pnand %p5008_p2, %p5002_p1 }
  0x6e   : > { %5012 = shalt.err (!%p5009_p3)
}
  0x6f   : > { %4313 = dma.hbm_to_vmem [thread:$0]  (!%p7170_p9), %s5425_s19, 2048, %s284_s27, [#allocation6], %s7169_s10, %s7169_s10, %s7107_s7  }
  0x70   : > { %s3063_s28 = sadd.s32 4294967294, %s5263_s14   ;;  %s40_s23 = sadd.s32 1, %s5255_s12 }
  0x71   : > { %p41_p5 = scmp.ge.s32.totalorder %s40_s23, 2  ;;  %s43_s17 = sadd.s32 1, %s5259_s13 }
  0x72   : > { %s52_s16 = sadd.s32 1, %s5243_s9  ;;  %p59_p8 = scmp.ne.s32.totalorder %s5243_s9, %s5239_s8 }
  0x73   : > { %s7304_s23 = smov (%p41_p5, %s40_s23), 0  ;;  %s7306_s17 = smov (!%p41_p5, %s43_s17), %s5259_s13 }
  0x74   : > { %7173 = sst [smem:[#allocation25_spill]] %s7304_s23  ;;  %s5529_s1 = ssub.s32 %s5255_s12, %s7304_s23 }
  0x75   : > { %p7117_p9 = scmp.eq.s32.totalorder %s5263_s14, 0  ;;  %p45_p10 = scmp.ge.s32.totalorder %s7306_s17, 2 }
  0x76   : > { %p65_p12 = scmp.ne.s32.totalorder %s5239_s8, %s5235_s30  ;;  %s78_s27 = sadd.s32 1, %s5231_s29 }
  0x77   : > { %p5539_p4 = por %p7117_p9, %p59_p8  ;;  %s7308_s17 = smov (%p45_p10, %s7306_s17), 0 }
  0x78   : > { %7175 = sst [smem:[#allocation26_spill]] %s7308_s17  ;;  %p7176_p13 = scmp.eq.s32.totalorder %s5396_s15, 0 }
  0x79   : > { %s47_s11 = ssub.s32 %s5259_s13, %s7308_s17  ;;  %p211_p1 = scmp.eq.s32.totalorder %s5396_s15, 3 }
  0x7a   : > { %p5551_p6 = por %p7176_p13, %p65_p12  ;;  %s49_s18 = sor.u32 %s5529_s1, %s47_s11 }
  0x7b   : > { %p76_p11 = scmp.eq.s32.totalorder %s47_s11, 0  ;;  %p50_p7 = scmp.eq.s32.totalorder %s49_s18, 0 }
  0x7c   : > { %s7177_s5 = scalar_select %p5551_p6, 1, 0 }
  0x7d   : > { %p5563_p2 = por %p211_p1, %p59_p8  ;;  %p217_p3 = scmp.eq.s32.totalorder %s3063_s28, 3 }
  0x7e   : > { %7178 = sst [smem:[#allocation27_spill]] %s7177_s5  ;;  %p7116_p5 = scmp.lt.s32.totalorder %s5263_s14, 4 }
  0x7f   : > { %s7179_s22 = scalar_select %p5563_p2, 1, 0 }
  0x80   : > { %s5568_s20 = scalar_select %p76_p11, %s5231_s29, %s78_s27  }
  0x81   : > { %7180 = sst [smem:[#allocation28_spill]] %s7179_s22  ;;  %s313_s7 = sand.u32 1, %s5243_s9  }
  0x82   : > { %s5571_s6 = scalar_select %p50_p7, %s5243_s9, %s52_s16  }
  0x83   : > { %s3072_s2 = sshll.u32 %s5255_s12, 3  ;;  %p5579_p10 = por %p217_p3, %p65_p12 }
  0x84   : > { %s3071_s11 = sshll.u32 %s313_s7, 6  ;;  %s3073_s18 = sshll.u32 %s5259_s13, 4 }
  0x85   : > { %s7181_s4 = scalar_select %p5579_p10, 1, 0 }
  0x86   : > { %s323_s17 = sadd.s32 %s3073_s18, %s3072_s2  ;;  %s317_s22 = scalar_lea.vmem [#allocation2], %s3071_s11 }
  0x87   : > { %s3074_s23 = sshll.u32 %s323_s17, 7  ;;  %s326_s5 = sshll.u32 %s317_s22, 4  ;;  %s5589_s5 = int_to_ptr.vmem [resolvable:$true] %s326_s5 }
  0x88   : > { %s7182_s0 = sld [smem:[#allocation63_spill]]  ;;  %p5595_p8 = pnand %p7116_p5, %p5539_p4 }
  0x89   : > { %s5599_s2 = scalar_lea.sflag [#allocation3], %s313_s7 }
  0x8a   : > { %p5015_p13 = pneg %p5595_p8 }
  0x8e   : > { %s5587_s16 = scalar_lea.hbm %s7182_s0, %s3074_s23  ;;  %s5018_s19 = scalar_lea.hbm %s7182_s0, 4096 }
  0x8f   : > { %s5013_s17 = scalar_lea.hbm %s5587_s16, 1024  ;;  %p5019_p4 = scmp.lt.u32.totalorder %s5587_s16, %s7182_s0 }
  0x90   : > { %p5014_p12 = scmp.ne.s32.totalorder %s5587_s16, %s5013_s17  ;;  %p5020_p7 = scmp.lt.u32.totalorder %s5018_s19, %s5013_s17 }
  0x91   : > { %p5022_p5 = scmp.lt.u32.totalorder %s5013_s17, %s5587_s16 }
  0x92   : > { %p5016_p1 = pnand %p5015_p13, %p5014_p12  ;;  %p5021_p3 = por %p5020_p7, %p5019_p4 }
  0x94   : > { %p5017_p11 = pneg %p5016_p1  ;;  %p5023_p9 = por %p5022_p5, %p5021_p3 }
  0x96   : > { %p5024_p0 = pnand %p5023_p9, %p5017_p11 }
  0x98   : > { %5027 = shalt.err (!%p5024_p0)
}
  0x99   : > { %s5028_s7 = scalar_lea.vmem %s5589_s5, 1024  ;;  %s5270_s18 = smov [#allocation2]  }
  0x9a   : > { %p5029_p12 = scmp.ne.s32.totalorder %s5589_s5, %s5028_s7  ;;  %s5033_s27 = sshll.u32 %s5270_s18, 4  ;;  %s5034_s27 = int_to_ptr.vmem [resolvable:$false] %s5033_s27 }
  0x9b   : > { %s5035_s21 = scalar_lea.vmem %s5034_s27, 2048  ;;  %p5036_p2 = scmp.lt.s32.totalorder %s5589_s5, %s5034_s27 }
  0x9c   : > { %p5031_p1 = pnand %p5029_p12, %p5015_p13  ;;  %p5037_p4 = scmp.lt.s32.totalorder %s5035_s21, %s5028_s7 }
  0x9e   : > { %p5032_p10 = pneg %p5031_p1  ;;  %p5038_p7 = por %p5037_p4, %p5036_p2 }
  0xa0   : > { %p5039_p5 = pnand %p5038_p7, %p5032_p10 }
  0xa2   : > { %5042 = shalt.err (!%p5039_p5)
}
  0xa3   : > { %s7184_s17 = smov 8   ;;  %s130_s28 = sadd.s32 1, %s5219_s26 }
  0xa4   : > { %4320 = dma.hbm_to_vmem [thread:$0]  (!%p5595_p8), %s5587_s16, 1024, %s5589_s5, %s5599_s2, %s7169_s10, %s7169_s10, %s7184_s17  }
  0xa5   : > { %p137_p9 = scmp.ne.s32.totalorder %s5219_s26, %s5215_s25  ;;  %p7185_p0 = scmp.eq.s32.totalorder %s5529_s1, 0 }
  0xa6   : > { %p7186_p2 = scmp.eq.s32.totalorder %s5263_s14, 0  ;;  %p143_p13 = scmp.ne.s32.totalorder %s5215_s25, %s5211_s24 }
  0xa7   : > { %s5636_s23 = scalar_select %p7185_p0, %s5219_s26, %s130_s28  }
  0xa8   : > { %p139_p10 = por %p137_p9, %p7186_p2  ;;  %s336_s19 = sand.u32 1, %s5263_s14  }
  0xa9   : > { %s338_s22 = sand.u32 1, %s5219_s26   ;;  %p7187_p11 = scmp.eq.s32.totalorder %s5396_s15, 0 }
  0xaa   : > { %s3075_s7 = sshll.u32 %s338_s22, 5  ;;  %s3226_s18 = sshll.u32 %s5255_s12, 9 }
  0xab   : > { %p5646_p3 = por %p143_p13, %p7187_p11  ;;  %s5654_s5 = scalar_lea.hbm %s7084_s3, %s3226_s18 }
  0xac   : > { %s340_s1 = scalar_lea.vmem [#allocation8], %s3075_s7  ;;  %p7189_p8 = scmp.lt.s32.totalorder %s5263_s14, 4 }
  0xad   : > { %s7188_s11 = scalar_select %p5646_p3, 1, 0 }
  0xae   : > { %s347_s24 = sshll.u32 %s340_s1, 4  ;;  %p5658_p12 = pnand %p7189_p8, %p139_p10  ;;  %s5662_s24 = int_to_ptr.vmem [resolvable:$true] %s347_s24 }
  0xaf   : > { %s5664_s2 = scalar_lea.sflag [#allocation9], %s336_s19  ;;  %s5043_s28 = scalar_lea.hbm %s5654_s5, 512 }
  0xb0   : > { %p5044_p1 = scmp.ne.s32.totalorder %s5654_s5, %s5043_s28  ;;  %p5045_p4 = pneg %p5658_p12 }
  0xb1   : > { %s5048_s18 = scalar_lea.hbm %s7084_s3, 1024  ;;  %p5049_p9 = scmp.lt.u32.totalorder %s5654_s5, %s7084_s3 }
  0xb2   : > { %p5046_p7 = pnand %p5045_p4, %p5044_p1  ;;  %p5050_p0 = scmp.lt.u32.totalorder %s5048_s18, %s5043_s28 }
  0xb3   : > { %p5052_p10 = scmp.lt.u32.totalorder %s5043_s28, %s5654_s5 }
  0xb4   : > { %p5047_p5 = pneg %p5046_p7  ;;  %p5051_p2 = por %p5050_p0, %p5049_p9 }
  0xb6   : > { %p5053_p13 = por %p5052_p10, %p5051_p2 }
  0xb8   : > { %p5054_p11 = pnand %p5053_p13, %p5047_p5 }
  0xba   : > { %5057 = shalt.err (!%p5054_p11)
}
  0xbb   : > { %s5058_s19 = scalar_lea.vmem %s5662_s24, 512  ;;  %s5271_s1 = smov [#allocation8]  }
  0xbc   : > { %p5059_p8 = scmp.ne.s32.totalorder %s5662_s24, %s5058_s19  ;;  %s5063_s22 = sshll.u32 %s5271_s1, 4  ;;  %s5064_s22 = int_to_ptr.vmem [resolvable:$false] %s5063_s22 }
  0xbd   : > { %s5065_s7 = scalar_lea.vmem %s5064_s22, 1024  ;;  %p5066_p3 = scmp.lt.s32.totalorder %s5662_s24, %s5064_s22 }
  0xbe   : > { %p5061_p1 = pnand %p5059_p8, %p5045_p4  ;;  %p5067_p9 = scmp.lt.s32.totalorder %s5065_s7, %s5058_s19 }
  0xc0   : > { %p5062_p7 = pneg %p5061_p1  ;;  %p5068_p0 = por %p5067_p9, %p5066_p3 }
  0xc2   : > { %p5069_p2 = pnand %p5068_p0, %p5062_p7 }
  0xc4   : > { %5072 = shalt.err (!%p5069_p2)
}
  0xc5   : > { %4323 = dma.hbm_to_vmem [thread:$0]  (!%p5658_p12), %s5654_s5, 512, %s5662_s24, %s5664_s2, %s7169_s10, %s7169_s10, %s7184_s17  }
  0xc6   : > { %s7191_s28 = sld [smem:[#allocation24_spill]] }
  0xcc   : > { %p7192_p4 = scmp.ne.s32.totalorder %s7191_s28, 0 }
  0xce   : > { %359 = sbr.rel (%p7192_p4) target bundleno = 2925 (0xb6d), region = 44 }
  0xd5   : > { %s5698_s27 = sand.u32 1, %s5239_s8  }
  0xd6   : > { %s5701_s21 = sshll.u32 %s5698_s27, 6  ;;  %s362_s16 = scalar_lea.sflag [#allocation3], %s5698_s27 }
  0xd7   : > { %s5705_s19 = scalar_lea.vmem [#allocation2], %s5701_s21 }
  0xd8   : > { %5186 = dma.done.wait (%p5551_p6), %s362_s16, 1024  }
  0xd9   : > { %5188 = vsyncadd (%p5551_p6), %s362_s16, 4294966272  ;;  %s7194_s10 = sld [smem:[#allocation23_spill]] }
  0xdf   : > { %p7195_p3 = scmp.ne.s32.totalorder %s7194_s10, 0 }
  0xe1   : > { %5190 = dma.done.wait (%p7195_p3), [#allocation6], 4096  }
  0xe2   : > { %5192 = vsyncadd (%p7195_p3), [#allocation6], 4294963200  ;;  %s378_s17 = sand.u32 1, %s5396_s15   ;;  %s380_s5 = sand.u32 1, %s5215_s25  }
  0xe3   : > { %s3080_s24 = sshll.u32 %s380_s5, 5  ;;  %s379_s2 = scalar_lea.sflag [#allocation9], %s378_s17 }
  0xe4   : > { %s5717_s1 = scalar_lea.vmem [#allocation8], %s3080_s24  ;;  %p7196_p12 = scmp.ne.s32.totalorder %s7188_s11, 0 }
  0xe6   : > { %5194 = dma.done.wait (%p7196_p12), %s379_s2, 512  }
  0xe7   : > { %5196 = vsyncadd (%p7196_p12), %s379_s2, 4294966784  ;;  %p7197_p6 = scmp.eq.s32.totalorder %s5396_s15, 0 }
  0xe9   : > { %5198 = dma.done.wait (%p7197_p6), [#allocation9], 2048   ;;  %p7198_p5 = pmov %p7197_p6 }
  0xea   : > { %vm559_vm0 = vcmask 261120   ;;  %v438_v1 = vld [vmem:[#allocation5] sm:$0xff]  ;;  %v439_v2 = vld [vmem:[#allocation5 + $0x8] sm:$0xff]  ;;  %s5272_s11 = smov 96   ;;  %v440_v6 = vld [vmem:[#allocation5 + $0x10] sm:$0xff]  ;;  %s5273_s15 = smov 64  }
  0xeb   : > { %5200 = vsyncadd (%p7198_p5), [#allocation9], 4294965248  ;;  %v5734_v3 = vld [vmem:[%s5705_s19 + $0x8] sm:$0xff]  ;;  %v5736_v4 = vpack.i.bf16 %v439_v2, %v438_v1  ;;  %v5741_v5 = vld [vmem:[%s5705_s19] sm:$0xff]  ;;  %v3939_v8 = vpack.c.bf16 %v439_v2, %v438_v1  ;;  %s5274_s22 = smov 32   ;;  %s5275_s7 = smov 265  }
  0xec   : > { %vm5729_vm1 = vmpackc.low %vm559_vm0, %vm559_vm0  ;;  %513 = vrot.lane.b32.xlu1 %v5734_v3, %s5272_s11  ;;  %v441_v7 = vld [vmem:[#allocation5 + $0x18] sm:$0xff]  ;;  %v444_v10 = vld [vmem:[#allocation5 + $0x30] sm:$0xff]  ;;  %3487 = vmatprep.mubr.msk.f32.mxu0 %vm559_vm0, %v5741_v5  ;;  %s5276_s28 = smov 257   ;;  %s5277_s18 = smov 281   ;;  %vm2673_vm10 = vcmask 523264   ;;  %vm2682_vm11 = vcmask 785408  }
  0xed   : > { %v5743_v9 = vpack.i.bf16 %v441_v7, %v440_v6  ;;  %v3945_v11 = vpack.c.bf16 %v441_v7, %v440_v6  ;;  %3567 = vmatprep.mubr.msk.f32.mxu1 %vm559_vm0, %v5741_v5  ;;  %4466 = vrot.lane.b32.xlu0 %v5736_v4, %s5272_s11  ;;  %v445_v12 = vld [vmem:[#allocation5 + $0x38] sm:$0xff]  ;;  %v442_v13 = vld [vmem:[#allocation5 + $0x20] sm:$0xff]  ;;  %v443_v14 = vld [vmem:[#allocation5 + $0x28] sm:$0xff]  ;;  %s5278_s16 = smov 273   ;;  %s5280_s10 = smov 289  }
  0xee   : > { %3941 = vmatprep.subr.msk.bf16.mxu1 %vm5729_vm1, %v3939_v8  ;;  %v4480_v15 = vpack.i.bf16 %v445_v12, %v444_v10  ;;  %v448_v16 = vld [vmem:[#allocation5 + $0x50] sm:$0xff]  ;;  %v449_v17 = vld [vmem:[#allocation5 + $0x58] sm:$0xff]  ;;  %v5761_v18 = vpack.i.bf16 %v443_v14, %v442_v13  ;;  %v446_v19 = vld [vmem:[#allocation5 + $0x40] sm:$0xff]  ;;  %v3951_v30 = vpack.c.bf16 %v443_v14, %v442_v13  ;;  %v3957_v36 = vpack.c.bf16 %v445_v12, %v444_v10  ;;  %s5281_s17 = smov 313   ;;  %s5282_s5 = smov 305  }
  0xef   : > { %3944 = vmatpush3.bf16.xpose.msk.msra.mxu1 %vm5729_vm1, %v3939_v8  ;;  %v447_v20 = vld [vmem:[#allocation5 + $0x48] sm:$0xff]  ;;  %v470_v21 = vld [vmem:[%s5717_s1] sm:$0xff]  ;;  %v472_v23 = vld [vmem:[%s5717_s1 + $0x10] sm:$0xff]  ;;  %v4490_v24 = vpack.i.bf16 %v449_v17, %v448_v16  ;;  %v3969_v44 = vpack.c.bf16 %v449_v17, %v448_v16  ;;  %s7210_s24 = sld [smem:[#allocation21_spill]]  ;;  %s2849_s0 = scalar_lea.sflag [#allocation13], %s5698_s27 }
  0xf0   : > { %4471 = vrot.lane.b32.xlu1 %v5743_v9, %s5272_s11  ;;  %3947 = vmatprep.subr.msk.bf16.mxu1 %vm5729_vm1, %v3945_v11  ;;  %v471_v22 = vld [vmem:[%s5717_s1 + $0x8] sm:$0xff]  ;;  %v473_v26 = vld [vmem:[%s5717_s1 + $0x18] sm:$0xff]  ;;  %v452_v27 = vld [vmem:[#allocation5 + $0x70] sm:$0xff]  ;;  %v4485_v31 = vpack.i.bf16 %v447_v20, %v446_v19  ;;  %v3963_v41 = vpack.c.bf16 %v447_v20, %v446_v19  ;;  %s6882_s1 = scalar_lea.vmem [#allocation12], %s5701_s21 }
  0xf1   : > { %511 = vrot.lane.b32.xlu0 %v5741_v5, %s5272_s11  ;;  %v3931_v25 = vpack.c.bf16 %v471_v22, %v470_v21  ;;  %v453_v28 = vld [vmem:[#allocation5 + $0x78] sm:$0xff]  ;;  %v3935_v29 = vpack.c.bf16 %v473_v26, %v472_v23  ;;  %v450_v32 = vld [vmem:[#allocation5 + $0x60] sm:$0xff]  ;;  %v451_v33 = vld [vmem:[#allocation5 + $0x68] sm:$0xff] }
  0xf2   : > { %v4500_v34 = vpack.i.bf16 %v453_v28, %v452_v27  ;;  %v4495_v35 = vpack.i.bf16 %v451_v33, %v450_v32  ;;  %v433_v37 = vld [vmem:[%s5705_s19 + $0x18] sm:$0xff]  ;;  %v432_v38 = vld [vmem:[%s5705_s19 + $0x10] sm:$0xff]  ;;  %v435_v39 = vld [vmem:[%s5705_s19 + $0x28] sm:$0xff]  ;;  %v3975_v45 = vpack.c.bf16 %v451_v33, %v450_v32  ;;  %v3981_v46 = vpack.c.bf16 %v453_v28, %v452_v27 }
  0xf3   : > { %3932 = vmatprep.subr.bf16.mxu0 %v3931_v25  ;;  %v434_v40 = vld [vmem:[%s5705_s19 + $0x20] sm:$0xff]  ;;  %v437_v42 = vld [vmem:[%s5705_s19 + $0x38] sm:$0xff]  ;;  %v436_v43 = vld [vmem:[%s5705_s19 + $0x30] sm:$0xff]  ;;  %s5279_s19 = smov 297  }
  0xf4   : > { %4481 = vrot.lane.b32.xlu1 %v4480_v15, %s5272_s11  ;;  %3934 = vmatpush3.bf16.msra.mxu0 %v3931_v25  ;;  %v5847_v47 = vld [vmem:[#allocation7] sm:$0xff]  ;;  %v5849_v48 = vld [vmem:[#allocation7 + $0x8] sm:$0xff] }
  0xf5   : > { %4476 = vrot.lane.b32.xlu0 %v5761_v18, %s5272_s11  ;;  %3936 = vmatprep.subr.bf16.mxu0 %v3935_v29  ;;  %v4505_v49 = vpack.i.bf16 %v5849_v48, %v5847_v47  ;;  %s3084_s2 = sshll.u32 %s7210_s24, 6 }
  0xf7   : > { %3950 = vmatpush3.bf16.xpose.msk.msra.mxu1 %vm5729_vm1, %v3945_v11 }
  0xf8   : > { %4491 = vrot.lane.b32.xlu1 %v4490_v24, %s5272_s11  ;;  %3953 = vmatprep.subr.msk.bf16.mxu1 %vm5729_vm1, %v3951_v30 }
  0xf9   : > { %4486 = vrot.lane.b32.xlu0 %v4485_v31, %s5272_s11  ;;  %3938 = vmatpush3.bf16.msra.mxu0 %v3935_v29 }
  0xfc   : > { %4501 = vrot.lane.b32.xlu1 %v4500_v34, %s5272_s11  ;;  %3488 = vmatmul.mubr.msk.f32.vlgmr.msra.gmra.mrb[0].mxu0 %vm559_vm0, %v5734_v3 }
  0xfd   : > { %4496 = vrot.lane.b32.xlu0 %v4495_v35, %s5272_s11  ;;  %3490 = vmatprep.mubr.msk.f32.mxu0 %vm559_vm0, %v432_v38 }
  0xff   : > { %3956 = vmatpush3.bf16.xpose.msk.msra.mxu1 %vm5729_vm1, %v3951_v30 }
 0x100   : > { %517 = vrot.lane.b32.xlu1 %v433_v37, %s5272_s11  ;;  %3959 = vmatprep.subr.msk.bf16.mxu1 %vm5729_vm1, %v3957_v36 }
 0x101   : > { %515 = vrot.lane.b32.xlu0 %v432_v38, %s5272_s11  ;;  %3491 = vmatmul.mubr.msk.f32.gmra.mrb[2].mxu0 %vm559_vm0, %v433_v37 }
 0x102   : > { %3493 = vmatprep.mubr.msk.f32.mxu0 %vm559_vm0, %v434_v40 }
 0x104   : > { %521 = vrot.lane.b32.xlu1 %v435_v39, %s5272_s11 }
 0x105   : > { %519 = vrot.lane.b32.xlu0 %v434_v40, %s5272_s11  ;;  %3494 = vmatmul.mubr.msk.f32.gmra.mrb[4].mxu0 %vm559_vm0, %v435_v39 }
 0x106   : > { %3496 = vmatprep.mubr.msk.f32.mxu0 %vm559_vm0, %v436_v43 }
 0x107   : > { %3962 = vmatpush3.bf16.xpose.msk.msra.mxu1 %vm5729_vm1, %v3957_v36 }
 0x108   : > { %525 = vrot.lane.b32.xlu1 %v437_v42, %s5272_s11  ;;  %3965 = vmatprep.subr.msk.bf16.mxu1 %vm5729_vm1, %v3963_v41 }
 0x109   : > { %523 = vrot.lane.b32.xlu0 %v436_v43, %s5272_s11  ;;  %3497 = vmatmul.mubr.msk.f32.gmra.mrb[6].mxu0 %vm559_vm0, %v437_v42 }
 0x10c   : > { %527 = vrot.lane.b32.xlu1 %v5741_v5, %s5273_s15 }
 0x10d   : > { %529 = vrot.lane.b32.xlu0 %v5734_v3, %s5273_s15 }
 0x10f   : > { %3968 = vmatpush3.bf16.xpose.msk.msra.mxu1 %vm5729_vm1, %v3963_v41  ;;  %v5936_v41 = vld [vmem:[#allocation7 + $0x18] sm:$0xff] }
 0x110   : > { %3971 = vmatprep.subr.msk.bf16.mxu1 %vm5729_vm1, %v3969_v44  ;;  %531 = vrot.lane.b32.xlu1 %v432_v38, %s5273_s15 }
 0x111   : > { %537 = vrot.lane.b32.xlu0 %v435_v39, %s5273_s15 }
 0x114   : > { %533 = vrot.lane.b32.xlu1 %v433_v37, %s5273_s15 }
 0x115   : > { %541 = vrot.lane.b32.xlu0 %v437_v42, %s5273_s15 }
 0x117   : > { %3974 = vmatpush3.bf16.xpose.msk.msra.mxu1 %vm5729_vm1, %v3969_v44  ;;  %v5945_v44 = vld [vmem:[#allocation7 + $0x20] sm:$0xff] }
 0x118   : > { %3977 = vmatprep.subr.msk.bf16.mxu1 %vm5729_vm1, %v3975_v45  ;;  %535 = vrot.lane.b32.xlu1 %v434_v40, %s5273_s15 }
 0x119   : > { %545 = vrot.lane.b32.xlu0 %v5734_v3, %s5274_s22 }
 0x11c   : > { %539 = vrot.lane.b32.xlu1 %v436_v43, %s5273_s15 }
 0x11d   : > { %551 = vrot.lane.b32.xlu0 %v434_v40, %s5274_s22 }
 0x11f   : > { %3980 = vmatpush3.bf16.xpose.msk.msra.mxu1 %vm5729_vm1, %v3975_v45  ;;  %v5947_v45 = vld [vmem:[#allocation7 + $0x28] sm:$0xff] }
 0x120   : > { %3983 = vmatprep.subr.msk.bf16.mxu1 %vm5729_vm1, %v3981_v46  ;;  %543 = vrot.lane.b32.xlu1 %v5741_v5, %s5274_s22 }
 0x121   : > { %555 = vrot.lane.b32.xlu0 %v436_v43, %s5274_s22 }
 0x124   : > { %547 = vrot.lane.b32.xlu1 %v432_v38, %s5274_s22 }
 0x127   : > { %3986 = vmatpush3.bf16.xpose.msk.msra.mxu1 %vm5729_vm1, %v3981_v46 }
 0x128   : > { %549 = vrot.lane.b32.xlu1 %v433_v37, %s5274_s22 }
 0x12c   : > { %553 = vrot.lane.b32.xlu1 %v435_v39, %s5274_s22 }
 0x12e   : > { %3568 = vmatmul.mubr.msk.f32.vlgmr.msra.gmra.mrb[0].mxu1 %vm559_vm0, %v5734_v3 }
 0x12f   : > { %3570 = vmatprep.mubr.msk.f32.mxu1 %vm559_vm0, %v432_v38  ;;  %v3987_v38 = vpack.c.bf16 %v5849_v48, %v5847_v47 }
 0x130   : > { %557 = vrot.lane.b32.xlu1 %v437_v42, %s5274_s22 }
 0x131   : > { %3988 = vmatprep.subr.bf16.mxu0 %v3987_v38 }
 0x132   : > { %3571 = vmatmul.mubr.msk.f32.gmra.mrb[2].mxu1 %vm559_vm0, %v433_v37  ;;  %3990 = vmatpush3.bf16.msra.mxu0 %v3987_v38 }
 0x133   : > { %3573 = vmatprep.mubr.msk.f32.mxu1 %vm559_vm0, %v434_v40  ;;  %v5934_v40 = vld [vmem:[#allocation7 + $0x10] sm:$0xff] }
 0x134   : > { %4506 = vrot.lane.b32.xlu1 %v4505_v49, %s5272_s11  ;;  %v3995_v49 = vpack.c.bf16 %v5947_v45, %v5945_v44 }
 0x136   : > { %3574 = vmatmul.mubr.msk.f32.gmra.mrb[4].mxu1 %vm559_vm0, %v435_v39 }
 0x137   : > { %3576 = vmatprep.mubr.msk.f32.mxu1 %vm559_vm0, %v436_v43  ;;  %v3991_v43 = vpack.c.bf16 %v5936_v41, %v5934_v40 }
 0x139   : > { %3992 = vmatprep.subr.bf16.mxu0 %v3991_v43 }
 0x13a   : > { %3577 = vmatmul.mubr.msk.f32.gmra.mrb[6].mxu1 %vm559_vm0, %v437_v42  ;;  %3994 = vmatpush3.bf16.msra.mxu0 %v3991_v43 }
 0x13b   : > { %3996 = vmatprep.subr.bf16.mxu0 %v3995_v49 }
 0x13e   : > { %3998 = vmatpush3.bf16.msra.mxu0 %v3995_v49  ;;  %v475_v49 = vlaneseq }
 0x15e   : > { %v5855_v50 = vpop.permute.xlu1 %513 }
 0x15f   : > { %v4467_v51 = vpop.permute.xlu0 %4466 }
 0x160   : > { %v4469_v52 = vunpack.i.h.bf16 %v4467_v51  ;;  %v4468_v53 = vunpack.i.l.bf16 %v4467_v51  ;;  %v5961_v51 = vld [vmem:[#allocation7 + $0x30] sm:$0xff] }
 0x162   : > { %v4472_v54 = vpop.permute.xlu1 %4471  ;;  %v4019_v55 = vpack.c.bf16 %v4469_v52, %v4468_v53  ;;  %v5963_v52 = vld [vmem:[#allocation7 + $0x38] sm:$0xff] }
 0x163   : > { %v4474_v56 = vunpack.i.h.bf16 %v4472_v54  ;;  %v4473_v57 = vunpack.i.l.bf16 %v4472_v54  ;;  %v512_v58 = vpop.permute.xlu0 %511 }
 0x164   : > { %4021 = vmatprep.subr.msk.bf16.mxu1 %vm5729_vm1, %v4019_v55  ;;  %3499 = vmatprep.mubr.msk.f32.mxu0 %vm559_vm0, %v512_v58 }
 0x165   : > { %v4025_v59 = vpack.c.bf16 %v4474_v56, %v4473_v57  ;;  %3655 = vmatprep.mubr.msk.f32.mxu1 %vm559_vm0, %v512_v58  ;;  %3500 = vmatmul.mubr.msk.f32.gmra.mrb[8].mxu0 %vm559_vm0, %v5855_v50  ;;  %v3999_v56 = vpack.c.bf16 %v5963_v52, %v5961_v51  ;;  %v5977_v58 = vld [vmem:[#allocation7 + $0x40] sm:$0xff] }
 0x166   : > { %v4482_v60 = vpop.permute.xlu1 %4481  ;;  %4024 = vmatpush3.bf16.xpose.msk.msra.mxu1 %vm5729_vm1, %v4019_v55 }
 0x167   : > { %v4477_v61 = vpop.permute.xlu0 %4476  ;;  %4027 = vmatprep.subr.msk.bf16.mxu1 %vm5729_vm1, %v4025_v59  ;;  %v4484_v7 = vunpack.i.h.bf16 %v4482_v60  ;;  %v4483_v8 = vunpack.i.l.bf16 %v4482_v60  ;;  %4000 = vmatprep.subr.bf16.mxu0 %v3999_v56 }
 0x168   : > { %v4479_v62 = vunpack.i.h.bf16 %v4477_v61  ;;  %v4478_v63 = vunpack.i.l.bf16 %v4477_v61  ;;  %4002 = vmatpush3.bf16.msra.mxu0 %v3999_v56 }
 0x169   : > { %v4037_v12 = vpack.c.bf16 %v4484_v7, %v4483_v8  ;;  %v6005_v7 = vld [vmem:[#allocation7 + $0x60] sm:$0xff]  ;;  %v6007_v8 = vld [vmem:[#allocation7 + $0x68] sm:$0xff] }
 0x16a   : > { %v4492_v1 = vpop.permute.xlu1 %4491  ;;  %v4031_v3 = vpack.c.bf16 %v4479_v62, %v4478_v63 }
 0x16b   : > { %v4487_v2 = vpop.permute.xlu0 %4486  ;;  %v4494_v21 = vunpack.i.h.bf16 %v4492_v1  ;;  %v4493_v22 = vunpack.i.l.bf16 %v4492_v1  ;;  %v5991_v1 = vld [vmem:[#allocation7 + $0x50] sm:$0xff] }
 0x16c   : > { %v4489_v15 = vunpack.i.h.bf16 %v4487_v2  ;;  %v4488_v16 = vunpack.i.l.bf16 %v4487_v2  ;;  %v5993_v2 = vld [vmem:[#allocation7 + $0x58] sm:$0xff] }
 0x16d   : > { %v4049_v23 = vpack.c.bf16 %v4494_v21, %v4493_v22 }
 0x16e   : > { %v4502_v5 = vpop.permute.xlu1 %4501  ;;  %4030 = vmatpush3.bf16.xpose.msk.msra.mxu1 %vm5729_vm1, %v4025_v59  ;;  %v4043_v20 = vpack.c.bf16 %v4489_v15, %v4488_v16  ;;  %v5979_v59 = vld [vmem:[#allocation7 + $0x48] sm:$0xff] }
 0x16f   : > { %4033 = vmatprep.subr.msk.bf16.mxu1 %vm5729_vm1, %v4031_v3  ;;  %v4497_v6 = vpop.permute.xlu0 %4496  ;;  %v4504_v27 = vunpack.i.h.bf16 %v4502_v5  ;;  %v4503_v28 = vunpack.i.l.bf16 %v4502_v5  ;;  %v4003_v63 = vpack.c.bf16 %v5979_v59, %v5977_v58 }
 0x170   : > { %v4499_v24 = vunpack.i.h.bf16 %v4497_v6  ;;  %v4498_v25 = vunpack.i.l.bf16 %v4497_v6  ;;  %v4007_v6 = vpack.c.bf16 %v5993_v2, %v5991_v1 }
 0x171   : > { %v4061_v29 = vpack.c.bf16 %v4504_v27, %v4503_v28  ;;  %4004 = vmatprep.subr.bf16.mxu0 %v4003_v63 }
 0x172   : > { %v518_v10 = vpop.permute.xlu1 %517  ;;  %v4055_v26 = vpack.c.bf16 %v4499_v24, %v4498_v25  ;;  %4006 = vmatpush3.bf16.msra.mxu0 %v4003_v63 }
 0x173   : > { %v516_v11 = vpop.permute.xlu0 %515  ;;  %4008 = vmatprep.subr.bf16.mxu0 %v4007_v6 }
 0x174   : > { %3502 = vmatprep.mubr.msk.f32.mxu0 %vm559_vm0, %v516_v11 }
 0x175   : > { %3503 = vmatmul.mubr.msk.f32.gmra.mrb[10].mxu0 %vm559_vm0, %v518_v10 }
 0x176   : > { %v522_v13 = vpop.permute.xlu1 %521  ;;  %4036 = vmatpush3.bf16.xpose.msk.msra.mxu1 %vm5729_vm1, %v4031_v3  ;;  %4010 = vmatpush3.bf16.msra.mxu0 %v4007_v6 }
 0x177   : > { %4039 = vmatprep.subr.msk.bf16.mxu1 %vm5729_vm1, %v4037_v12  ;;  %v520_v14 = vpop.permute.xlu0 %519 }
 0x178   : > { %3505 = vmatprep.mubr.msk.f32.mxu0 %vm559_vm0, %v520_v14 }
 0x179   : > { %3506 = vmatmul.mubr.msk.f32.gmra.mrb[12].mxu0 %vm559_vm0, %v522_v13 }
 0x17a   : > { %v526_v17 = vpop.permute.xlu1 %525 }
 0x17b   : > { %v524_v19 = vpop.permute.xlu0 %523 }
 0x17c   : > { %3508 = vmatprep.mubr.msk.f32.mxu0 %vm559_vm0, %v524_v19 }
 0x17d   : > { %3509 = vmatmul.mubr.msk.f32.gmra.mrb[14].mxu0 %vm559_vm0, %v526_v17 }
 0x17e   : > { %4042 = vmatpush3.bf16.xpose.msk.msra.mxu1 %vm5729_vm1, %v4037_v12  ;;  %v5907_v30 = vpop.permute.xlu1 %527  ;;  %v6017_v12 = vld [vmem:[#allocation7 + $0x70] sm:$0xff] }
 0x17f   : > { %4045 = vmatprep.subr.msk.bf16.mxu1 %vm5729_vm1, %v4043_v20  ;;  %v5909_v31 = vpop.permute.xlu0 %529  ;;  %3511 = vmatprep.mubr.msk.f32.mxu0 %vm559_vm0, %v5907_v30 }
 0x181   : > { %3512 = vmatmul.mubr.msk.f32.gmra.mrb[16].mxu0 %vm559_vm0, %v5909_v31 }
 0x182   : > { %v5915_v32 = vpop.permute.xlu1 %531 }
 0x183   : > { %3514 = vmatprep.mubr.msk.f32.mxu0 %vm559_vm0, %v5915_v32  ;;  %v5932_v39 = vpop.permute.xlu0 %537 }
 0x186   : > { %4048 = vmatpush3.bf16.xpose.msk.msra.mxu1 %vm5729_vm1, %v4043_v20  ;;  %v5919_v33 = vpop.permute.xlu1 %533 }
 0x187   : > { %4051 = vmatprep.subr.msk.bf16.mxu1 %vm5729_vm1, %v4049_v23  ;;  %3515 = vmatmul.mubr.msk.f32.gmra.mrb[18].mxu0 %vm559_vm0, %v5919_v33  ;;  %v5952_v48 = vpop.permute.xlu0 %541 }
 0x188   : > { %7202 = vst [vmem:[#allocation30_spill] sm:$0xff] %v5952_v48 }
 0x18a   : > { %v5923_v34 = vpop.permute.xlu1 %535 }
 0x18b   : > { %3517 = vmatprep.mubr.msk.f32.mxu0 %vm559_vm0, %v5923_v34  ;;  %v5968_v55 = vpop.permute.xlu0 %545 }
 0x18c   : > { %3518 = vmatmul.mubr.msk.f32.gmra.mrb[20].mxu0 %vm559_vm0, %v5932_v39  ;;  %7204 = vst [vmem:[#allocation32_spill] sm:$0xff] %v5968_v55 }
 0x18e   : > { %4054 = vmatpush3.bf16.xpose.msk.msra.mxu1 %vm5729_vm1, %v4049_v23  ;;  %v5927_v35 = vpop.permute.xlu1 %539 }
 0x18f   : > { %4057 = vmatprep.subr.msk.bf16.mxu1 %vm5729_vm1, %v4055_v26  ;;  %3520 = vmatprep.mubr.msk.f32.mxu0 %vm559_vm0, %v5927_v35  ;;  %v5984_v62 = vpop.permute.xlu0 %551 }
 0x190   : > { %3521 = vmatmul.mubr.msk.f32.gmra.mrb[22].mxu0 %vm559_vm0, %v5952_v48  ;;  %7206 = vst [vmem:[#allocation34_spill] sm:$0xff] %v5984_v62 }
 0x192   : > { %v5939_v42 = vpop.permute.xlu1 %543 }
 0x193   : > { %7201 = vst [vmem:[#allocation29_spill] sm:$0xff] %v5939_v42  ;;  %3523 = vmatprep.mubr.msk.f32.mxu0 %vm559_vm0, %v5939_v42  ;;  %v5999_v5 = vpop.permute.xlu0 %555 }
 0x194   : > { %3524 = vmatmul.mubr.msk.f32.gmra.mrb[24].mxu0 %vm559_vm0, %v5968_v55  ;;  %7208 = vst [vmem:[#allocation36_spill] sm:$0xff] %v5999_v5 }
 0x196   : > { %4060 = vmatpush3.bf16.xpose.msk.msra.mxu1 %vm5729_vm1, %v4055_v26 }
 0x197   : > { %4063 = vmatprep.subr.msk.bf16.mxu1 %vm5729_vm1, %v4061_v29 }
 0x19b   : > { %v7259_v0 = vld [vmem:[#allocation36_spill] sm:$0xff] }
 0x19e   : > { %4066 = vmatpush3.bf16.xpose.msk.msra.mxu1 %vm5729_vm1, %v4061_v29 }
 0x1a5   : > { %3656 = vmatmul.mubr.msk.f32.vlgmr.msra.gmra.mrb[8].mxu1 %vm559_vm0, %v5855_v50  ;;  %v5957_v50 = vpop.permute.xlu1 %547 }
 0x1a6   : > { %3658 = vmatprep.mubr.msk.f32.mxu1 %vm559_vm0, %v516_v11  ;;  %7203 = vst [vmem:[#allocation31_spill] sm:$0xff] %v5957_v50  ;;  %3526 = vmatprep.mubr.msk.f32.mxu0 %vm559_vm0, %v5957_v50  ;;  %v4011_v11 = vpack.c.bf16 %v6007_v8, %v6005_v7 }
 0x1a8   : > { %4012 = vmatprep.subr.bf16.mxu0 %v4011_v11 }
 0x1a9   : > { %3659 = vmatmul.mubr.msk.f32.gmra.mrb[10].mxu1 %vm559_vm0, %v518_v10  ;;  %v5973_v57 = vpop.permute.xlu1 %549  ;;  %4014 = vmatpush3.bf16.msra.mxu0 %v4011_v11 }
 0x1aa   : > { %3661 = vmatprep.mubr.msk.f32.mxu1 %vm559_vm0, %v520_v14  ;;  %7205 = vst [vmem:[#allocation33_spill] sm:$0xff] %v5973_v57  ;;  %3527 = vmatmul.mubr.msk.f32.gmra.mrb[26].mxu0 %vm559_vm0, %v5973_v57 }
 0x1ab   : > { %3529 = vmatprep.mubr.msk.f32.mxu0 %vm559_vm0, %v5984_v62 }
 0x1ad   : > { %3662 = vmatmul.mubr.msk.f32.gmra.mrb[12].mxu1 %vm559_vm0, %v522_v13  ;;  %v5995_v3 = vpop.permute.xlu1 %553  ;;  %v6019_v13 = vld [vmem:[#allocation7 + $0x78] sm:$0xff] }
 0x1ae   : > { %3664 = vmatprep.mubr.msk.f32.mxu1 %vm559_vm0, %v524_v19  ;;  %7207 = vst [vmem:[#allocation35_spill] sm:$0xff] %v5995_v3  ;;  %3530 = vmatmul.mubr.msk.f32.gmra.mrb[28].mxu0 %vm559_vm0, %v5995_v3  ;;  %v4015_v14 = vpack.c.bf16 %v6019_v13, %v6017_v12 }
 0x1af   : > { %3532 = vmatprep.mubr.msk.f32.mxu0 %vm559_vm0, %v5999_v5 }
 0x1b0   : > { %4016 = vmatprep.subr.bf16.mxu0 %v4015_v14 }
 0x1b1   : > { %3665 = vmatmul.mubr.msk.f32.gmra.mrb[14].mxu1 %vm559_vm0, %v526_v17  ;;  %v6011_v10 = vpop.permute.xlu1 %557  ;;  %4018 = vmatpush3.bf16.msra.mxu0 %v4015_v14 }
 0x1b2   : > { %7209 = vst [vmem:[#allocation37_spill] sm:$0xff] %v6011_v10  ;;  %3533 = vmatmul.mubr.msk.f32.gmra.mrb[30].mxu0 %vm559_vm0, %v6011_v10 }
 0x1b5   : > { %v4507_v15 = vpop.permute.xlu1 %4506 }
 0x1b6   : > { %v4509_v16 = vunpack.i.h.bf16 %v4507_v15  ;;  %v4508_v17 = vunpack.i.l.bf16 %v4507_v15 }
 0x1b8   : > { %v6023_v19 = vpack.c.bf16 %v4509_v16, %v4508_v17 }
 0x1ba   : > { %4068 = vmatprep.subr.bf16.mxu0 %v6023_v19 }
 0x1cf   : > { %v3489_v36 = vpop.f32.mrb[0].mxu0 }
 0x1d0   : > { %v690_v37 = vpop.f32.mrb[1].mxu0  ;;  %855 = vrot.lane.b32.xlu1 %v3489_v36, %s5275_s7 }
 0x1d1   : > { %851 = vrot.lane.b32.xlu0 %v690_v37, %s5276_s28 }
 0x1d4   : > { %v3492_v46 = vpop.f32.mrb[2].mxu0 }
 0x1d5   : > { %863 = vrot.lane.b32.xlu1 %v3492_v46, %s5277_s18  ;;  %v700_v47 = vpop.f32.mrb[3].mxu0 }
 0x1d6   : > { %859 = vrot.lane.b32.xlu0 %v700_v47, %s5278_s16 }
 0x1d8   : > { %v3495_v53 = vpop.f32.mrb[4].mxu0 }
 0x1d9   : > { %871 = vrot.lane.b32.xlu1 %v3495_v53, %s5279_s19  ;;  %v710_v54 = vpop.f32.mrb[5].mxu0  ;;  %v476_v53 = vshrl.u32 %v475_v49, 7 }
 0x1da   : > { %867 = vrot.lane.b32.xlu0 %v710_v54, %s5280_s10  ;;  %v484_v54 = vstv %s3084_s2  ;;  %s2882_s2 = sshll.u32 %s6882_s1, 4  ;;  %s6960_s2 = int_to_ptr.vmem [resolvable:$true] %s2882_s2 }
 0x1db   : > { %v477_v56 = vadd.s32 8, %v476_v53  ;;  %v482_v5 = vadd.s32 48, %v476_v53  ;;  %v483_v62 = vadd.s32 56, %v476_v53 }
 0x1dc   : > { %v3498_v60 = vpop.f32.mrb[6].mxu0 }
 0x1dd   : > { %879 = vrot.lane.b32.xlu1 %v3498_v60, %s5281_s17  ;;  %v720_v61 = vpop.f32.mrb[7].mxu0  ;;  %v6046_v60 = vand.u32 127, %v475_v49  ;;  %v6050_v63 = vadd.s32 %v484_v54, %v477_v56 }
 0x1de   : > { %875 = vrot.lane.b32.xlu0 %v720_v61, %s5282_s5  ;;  %v6048_v61 = vadd.s32 %v484_v54, %v476_v53 }
 0x1df   : > { %vm496_vm3 = vcmp.le.s32.totalorder %v6046_v60, %v6050_v63 }
 0x1e0   : > { %7211 = vst [vmem:[#allocation38_spill] sm:$0xff] %v6048_v61  ;;  %vm495_vm2 = vcmp.le.s32.totalorder %v6046_v60, %v6048_v61 }
 0x201   : > { %v3569_v20 = vpop.f32.mrb[0].mxu1 }
 0x202   : > { %v1003_v21 = vpop.f32.mrb[1].mxu1 }
 0x205   : > { %v6026_v22 = vpop.f32.mrb[2].mxu1 }
 0x206   : > { %v6028_v23 = vpop.f32.mrb[3].mxu1 }
 0x209   : > { %v6030_v24 = vpop.f32.mrb[4].mxu1 }
 0x20a   : > { %v6032_v25 = vpop.f32.mrb[5].mxu1 }
 0x20d   : > { %v6034_v26 = vpop.f32.mrb[6].mxu1 }
 0x20e   : > { %v6036_v27 = vpop.f32.mrb[7].mxu1 }
 0x238   : > { %v3501_v28 = vpop.f32.mrb[8].mxu0 }
 0x239   : > { %1233 = vrot.lane.b32.xlu1 %v3501_v28, %s5275_s7  ;;  %v730_v29 = vpop.f32.mrb[9].mxu0 }
 0x23a   : > { %1229 = vrot.lane.b32.xlu0 %v730_v29, %s5276_s28 }
 0x242   : > { %v856_v14 = vpop.permute.xlu1 %855 }
 0x243   : > { %v852_v6 = vpop.permute.xlu0 %851  ;;  %v882_v16 = vsel %vm496_vm3, %v856_v14, 0.0  ;;  %v480_v14 = vadd.s32 32, %v476_v53 }
 0x244   : > { %v881_v11 = vsel %vm495_vm2, %v852_v6, 0.0  ;;  %v6065_v17 = vadd.f32 %v3569_v20, %v882_v16  ;;  %v4510_v20 = vpack.i.bf16 %v5936_v41, %v5934_v40  ;;  %v478_v41 = vadd.s32 16, %v476_v53 }
 0x245   : > { %v6059_v15 = vadd.f32 %v1003_v21, %v881_v11  ;;  %v4515_v21 = vpack.i.bf16 %v5947_v45, %v5945_v44  ;;  %v479_v45 = vadd.s32 24, %v476_v53  ;;  %v6105_v10 = vadd.s32 %v484_v54, %v480_v14 }
 0x246   : > { %v6119_v14 = vadd.s32 %v484_v54, %v482_v5 }
 0x247   : > { %v6097_v11 = vadd.s32 %v484_v54, %v479_v45  ;;  %7214 = vst [vmem:[#allocation41_spill] sm:$0xff] %v6105_v10  ;;  %vm499_vm6 = vcmp.le.s32.totalorder %v6046_v60, %v6105_v10 }
 0x248   : > { %v3504_v36 = vpop.f32.mrb[10].mxu0  ;;  %v860_v16 = vpop.permute.xlu0 %859  ;;  %7216 = vst [vmem:[#allocation43_spill] sm:$0xff] %v6119_v14  ;;  %vm501_vm8 = vcmp.le.s32.totalorder %v6046_v60, %v6119_v14 }
 0x249   : > { %1241 = vrot.lane.b32.xlu0 %v3504_v36, %s5277_s18  ;;  %v740_v37 = vpop.f32.mrb[11].mxu0  ;;  %7212 = vst [vmem:[#allocation39_spill] sm:$0xff] %v6097_v11  ;;  %vm498_vm4 = vcmp.le.s32.totalorder %v6046_v60, %v6097_v11 }
 0x24a   : > { %1237 = vrot.lane.b32.xlu1 %v740_v37, %s5278_s16 }
 0x24c   : > { %v3507_v38 = vpop.f32.mrb[12].mxu0  ;;  %v868_v57 = vpop.permute.xlu0 %867 }
 0x24d   : > { %1249 = vrot.lane.b32.xlu0 %v3507_v38, %s5279_s19  ;;  %v750_v43 = vpop.f32.mrb[13].mxu0 }
 0x24e   : > { %1245 = vrot.lane.b32.xlu1 %v750_v43, %s5280_s10 }
 0x250   : > { %v3510_v46 = vpop.f32.mrb[14].mxu0 }
 0x251   : > { %1257 = vrot.lane.b32.xlu0 %v3510_v46, %s5281_s17  ;;  %v760_v47 = vpop.f32.mrb[15].mxu0 }
 0x254   : > { %v6091_v56 = vpop.f32.mrb[16].mxu0 }
 0x255   : > { %v6093_v44 = vpop.f32.mrb[17].mxu0 }
 0x25a   : > { %v6095_v6 = vpop.f32.mrb[18].mxu0 }
 0x25b   : > { %v6099_v40 = vpop.f32.mrb[19].mxu0 }
 0x25f   : > { %v6134_v5 = vpop.f32.mrb[20].mxu0 }
 0x270   : > { %1042 = vmax.xlane.f32.xlu0 %v6059_v15 }
 0x272   : > { %1044 = vmax.xlane.f32.xlu1 %v6065_v17 }
 0x278   : > { %v6068_v28 = vpop.f32.mrb[8].mxu1 }
 0x279   : > { %v6070_v29 = vpop.f32.mrb[9].mxu1 }
 0x27c   : > { %v6072_v36 = vpop.f32.mrb[10].mxu1 }
 0x27d   : > { %v6074_v37 = vpop.f32.mrb[11].mxu1 }
 0x280   : > { %v6078_v38 = vpop.f32.mrb[12].mxu1 }
 0x281   : > { %v6080_v43 = vpop.f32.mrb[13].mxu1 }
 0x283   : > { %4516 = vrot.lane.b32.xlu1 %v4515_v21, %s5272_s11  ;;  %v864_v21 = vpop.permute.xlu1 %863 }
 0x284   : > { %v6085_v46 = vpop.f32.mrb[14].mxu1  ;;  %v884_v45 = vsel %vm498_vm4, %v864_v21, 0.0  ;;  %v6123_v21 = vadd.s32 %v484_v54, %v483_v62 }
 0x285   : > { %v6087_v49 = vpop.f32.mrb[15].mxu1 }
 0x286   : > { %4511 = vrot.lane.b32.xlu0 %v4510_v20, %s5272_s11  ;;  %v481_v20 = vadd.s32 40, %v476_v53  ;;  %7217 = vst [vmem:[#allocation44_spill] sm:$0xff] %v6123_v21  ;;  %vm502_vm9 = vcmp.le.s32.totalorder %v6046_v60, %v6123_v21 }
 0x287   : > { %1253 = vrot.lane.b32.xlu1 %v760_v47, %s5282_s5  ;;  %v6103_v47 = vadd.s32 %v484_v54, %v478_v41  ;;  %v872_v50 = vpop.permute.xlu1 %871  ;;  %v6117_v41 = vadd.f32 %v6026_v22, %v884_v45  ;;  %v876_v22 = vpop.permute.xlu0 %875 }
 0x288   : > { %v6110_v3 = vadd.s32 %v484_v54, %v481_v20  ;;  %v885_v20 = vsel %vm499_vm6, %v868_v57, 0.0  ;;  %v6139_v54 = vpop.f32.mrb[21].mxu0  ;;  %v887_v55 = vsel %vm501_vm8, %v876_v22, 0.0 }
 0x289   : > { %7213 = vst [vmem:[#allocation40_spill] sm:$0xff] %v6103_v47  ;;  %vm497_vm5 = vcmp.le.s32.totalorder %v6046_v60, %v6103_v47  ;;  %v6147_v45 = vadd.f32 %v6032_v25, %v885_v20  ;;  %v6156_v42 = vpop.f32.mrb[22].mxu0  ;;  %v6165_v25 = vadd.f32 %v6036_v27, %v887_v55 }
 0x28a   : > { %7215 = vst [vmem:[#allocation42_spill] sm:$0xff] %v6110_v3  ;;  %vm500_vm7 = vcmp.le.s32.totalorder %v6046_v60, %v6110_v3  ;;  %v883_v53 = vsel %vm497_vm5, %v860_v16, 0.0 }
 0x28b   : > { %v886_v62 = vsel %vm500_vm7, %v872_v50, 0.0  ;;  %v880_v16 = vpop.permute.xlu1 %879  ;;  %v6144_v57 = vadd.f32 %v6028_v23, %v883_v53  ;;  %v6161_v23 = vpop.f32.mrb[23].mxu0 }
 0x28c   : > { %v6154_v50 = vadd.f32 %v6030_v24, %v886_v62  ;;  %v888_v48 = vsel %vm502_vm9, %v880_v16, 0.0  ;;  %v6171_v62 = vpop.f32.mrb[24].mxu0 }
 0x28d   : > { %v6169_v24 = vadd.f32 %v6034_v26, %v888_v48  ;;  %7218 = vst [vmem:[#allocation45_spill] sm:$0xff] %v6171_v62  ;;  %v6188_v26 = vpop.f32.mrb[25].mxu0 }
 0x28e   : > { %7219 = vst [vmem:[#allocation46_spill] sm:$0xff] %v6188_v26  ;;  %v6190_v16 = vpop.f32.mrb[26].mxu0 }
 0x28f   : > { %7220 = vst [vmem:[#allocation47_spill] sm:$0xff] %v6190_v16 }
 0x2a5   : > { %1048 = vmax.xlane.f32.xlu0 %v6117_v41 }
 0x2a9   : > { %1046 = vmax.xlane.f32.xlu0 %v6144_v57 }
 0x2ab   : > { %1050 = vmax.xlane.f32.xlu1 %v6147_v45  ;;  %v1234_v20 = vpop.permute.xlu1 %1233 }
 0x2ac   : > { %v1230_v53 = vpop.permute.xlu0 %1229  ;;  %v1260_v55 = vsel %vm496_vm3, %v1234_v20, 0.0 }
 0x2ad   : > { %1052 = vmax.xlane.f32.xlu0 %v6154_v50  ;;  %v1259_v22 = vsel %vm495_vm2, %v1230_v53, 0.0  ;;  %v6186_v48 = vadd.f32 %v6068_v28, %v1260_v55  ;;  %v6193_v53 = vpop.f32.mrb[27].mxu0 }
 0x2ae   : > { %v6182_v27 = vadd.f32 %v6070_v29, %v1259_v22  ;;  %7221 = vst [vmem:[#allocation48_spill] sm:$0xff] %v6193_v53  ;;  %v6195_v62 = vpop.f32.mrb[28].mxu0 }
 0x2af   : > { %1054 = vmax.xlane.f32.xlu1 %v6165_v25  ;;  %7222 = vst [vmem:[#allocation49_spill] sm:$0xff] %v6195_v62  ;;  %v6197_v20 = vpop.f32.mrb[29].mxu0 }
 0x2b0   : > { %7223 = vst [vmem:[#allocation50_spill] sm:$0xff] %v6197_v20  ;;  %v6202_v28 = vpop.f32.mrb[30].mxu0 }
 0x2b1   : > { %1056 = vmax.xlane.f32.xlu0 %v6169_v24  ;;  %7224 = vst [vmem:[#allocation51_spill] sm:$0xff] %v6202_v28  ;;  %v6207_v16 = vpop.f32.mrb[31].mxu0 }
 0x2b2   : > { %7225 = vst [vmem:[#allocation52_spill] sm:$0xff] %v6207_v16 }
 0x2b3   : > { %1436 = vmax.xlane.f32.xlu1 %v6182_v27 }
 0x2b5   : > { %1438 = vmax.xlane.f32.xlu0 %v6186_v48 }
 0x2bb   : > { %v1242_v61 = vpop.permute.xlu0 %1241 }
 0x2bc   : > { %v1262_v29 = vsel %vm498_vm4, %v1242_v61, 0.0  ;;  %v1238_v22 = vpop.permute.xlu1 %1237 }
 0x2bd   : > { %v6205_v55 = vadd.f32 %v6072_v36, %v1262_v29  ;;  %v1261_v53 = vsel %vm497_vm5, %v1238_v22, 0.0 }
 0x2be   : > { %v6217_v26 = vadd.f32 %v6074_v37, %v1261_v53 }
 0x2bf   : > { %v1250_v62 = vpop.permute.xlu0 %1249  ;;  %1442 = vmax.xlane.f32.xlu0 %v6205_v55 }
 0x2c0   : > { %v1246_v20 = vpop.permute.xlu1 %1245  ;;  %v1264_v36 = vsel %vm500_vm7, %v1250_v62, 0.0 }
 0x2c1   : > { %v1263_v61 = vsel %vm499_vm6, %v1246_v20, 0.0  ;;  %v6228_v16 = vadd.f32 %v6078_v38, %v1264_v36 }
 0x2c2   : > { %v6223_v29 = vadd.f32 %v6080_v43, %v1263_v61 }
 0x2c3   : > { %1440 = vmax.xlane.f32.xlu0 %v6217_v26  ;;  %v1258_v22 = vpop.permute.xlu0 %1257 }
 0x2c4   : > { %1444 = vmax.xlane.f32.xlu1 %v6223_v29  ;;  %v1266_v37 = vsel %vm502_vm9, %v1258_v22, 0.0 }
 0x2c5   : > { %v6235_v53 = vadd.f32 %v6085_v46, %v1266_v37 }
 0x2c7   : > { %1446 = vmax.xlane.f32.xlu0 %v6228_v16 }
 0x2cb   : > { %1450 = vmax.xlane.f32.xlu0 %v6235_v53 }
 0x2fd   : > { %v1043_v43 = vpop.xlane.xlu0 %1042 }
 0x2fe   : > { %v1058_v62 = vsub.f32 %v6059_v15, %v1043_v43 }
 0x2ff   : > { %v1045_v20 = vpop.xlane.xlu1 %1044 }
 0x300   : > { %v1066_v61 = vmul.f32 1.442695, %v1058_v62  ;;  %v1059_v28 = vsub.f32 %v6065_v17, %v1045_v20 }
 0x302   : > { %4765 = vpow2.f32 %v1066_v61  ;;  %v1068_v38 = vmul.f32 1.442695, %v1059_v28  ;;  %v6255_v28 = vpop.permute.xlu0 %4511 }
 0x303   : > { %v6240_v36 = vpop.permute.xlu1 %4516 }
 0x304   : > { %4767 = vpow2.f32 %v1068_v38 }
 0x307   : > { %v1254_v22 = vpop.permute.xlu1 %1253 }
 0x308   : > { %v1265_v46 = vsel %vm501_vm8, %v1254_v22, 0.0 }
 0x309   : > { %v6246_v37 = vadd.f32 %v6087_v49, %v1265_v46 }
 0x30b   : > { %1448 = vmax.xlane.f32.xlu1 %v6246_v37 }
 0x30c   : > { %v6249_v15 = vpop.eup %4765 }
 0x30d   : > { %1082 = vadd.xlane.f32.xlu0 %v6249_v15 }
 0x30e   : > { %v6252_v17 = vpop.eup %4767 }
 0x30f   : > { %1084 = vadd.xlane.f32.xlu1 %v6252_v17 }
 0x332   : > { %v1049_v43 = vpop.xlane.xlu0 %1048 }
 0x333   : > { %v1061_v62 = vsub.f32 %v6117_v41, %v1049_v43 }
 0x335   : > { %v1072_v20 = vmul.f32 1.442695, %v1061_v62 }
 0x336   : > { %v1047_v61 = vpop.xlane.xlu0 %1046 }
 0x337   : > { %4769 = vpow2.f32 %v1072_v20  ;;  %v1060_v49 = vsub.f32 %v6144_v57, %v1047_v61 }
 0x338   : > { %v1051_v38 = vpop.xlane.xlu1 %1050 }
 0x339   : > { %v1070_v22 = vmul.f32 1.442695, %v1060_v49  ;;  %v1062_v46 = vsub.f32 %v6147_v45, %v1051_v38 }
 0x33a   : > { %v1053_v21 = vpop.xlane.xlu0 %1052 }
 0x33b   : > { %4771 = vpow2.f32 %v1070_v22  ;;  %v1074_v14 = vmul.f32 1.442695, %v1062_v46  ;;  %v1063_v10 = vsub.f32 %v6154_v50, %v1053_v21  ;;  %v4520_v21 = vpack.i.bf16 %v5963_v52, %v5961_v51 }
 0x33c   : > { %v1055_v3 = vpop.xlane.xlu1 %1054  ;;  %v6294_v50 = vpack.i.bf16 %v5993_v2, %v5991_v1  ;;  %v6306_v51 = vpack.i.bf16 %v6019_v13, %v6017_v12 }
 0x33d   : > { %v1076_v47 = vmul.f32 1.442695, %v1063_v10  ;;  %v1064_v11 = vsub.f32 %v6165_v25, %v1055_v3  ;;  %4773 = vpow2.f32 %v1074_v14  ;;  %v6283_v14 = vpack.i.bf16 %v5979_v59, %v5977_v58 }
 0x33e   : > { %v1057_v41 = vpop.xlane.xlu0 %1056  ;;  %v6300_v58 = vpack.i.bf16 %v6007_v8, %v6005_v7 }
 0x33f   : > { %4775 = vpow2.f32 %v1076_v47  ;;  %v1078_v43 = vmul.f32 1.442695, %v1064_v11  ;;  %v1065_v62 = vsub.f32 %v6169_v24, %v1057_v41 }
 0x340   : > { %v1437_v59 = vpop.xlane.xlu1 %1436 }
 0x341   : > { %v6263_v57 = vpop.eup %4769  ;;  %v1080_v20 = vmul.f32 1.442695, %v1065_v62  ;;  %4777 = vpow2.f32 %v1078_v43  ;;  %v1452_v1 = vsub.f32 %v6182_v27, %v1437_v59  ;;  %v4893_v43 = vld [vmem:[#allocation5 + $0x30] sm:$0xff]  ;;  %v4894_v62 = vld [vmem:[#allocation5 + $0x38] sm:$0xff] }
 0x342   : > { %1088 = vadd.xlane.f32.xlu1 %v6263_v57 }
 0x343   : > { %4779 = vpow2.f32 %v1080_v20  ;;  %v1460_v8 = vmul.f32 1.442695, %v1452_v1  ;;  %v6329_v20 = vpack.i.bf16 %v4894_v62, %v4893_v43 }
 0x345   : > { %v6266_v45 = vpop.eup %4771 }
 0x346   : > { %1086 = vadd.xlane.f32.xlu0 %v6266_v45 }
 0x347   : > { %v6269_v10 = vpop.eup %4773 }
 0x349   : > { %v6271_v3 = vpop.eup %4775 }
 0x34a   : > { %1092 = vadd.xlane.f32.xlu1 %v6271_v3  ;;  %1090 = vadd.xlane.f32.xlu0 %v6269_v10 }
 0x34b   : > { %v6275_v11 = vpop.eup %4777 }
 0x34d   : > { %v6277_v47 = vpop.eup %4779 }
 0x34e   : > { %1096 = vadd.xlane.f32.xlu0 %v6277_v47  ;;  %1094 = vadd.xlane.f32.xlu1 %v6275_v11 }
 0x351   : > { %v1445_v27 = vpop.xlane.xlu1 %1444 }
 0x35f   : > { %4526 = vrot.lane.b32.xlu1 %v6283_v14, %s5272_s11 }
 0x363   : > { %4551 = vrot.lane.b32.xlu1 %v5743_v9, %s5273_s15  ;;  %v1439_v9 = vpop.xlane.xlu0 %1438 }
 0x364   : > { %4521 = vrot.lane.b32.xlu0 %v4520_v21, %s5272_s11  ;;  %v1453_v52 = vsub.f32 %v6186_v48, %v1439_v9 }
 0x366   : > { %v1462_v2 = vmul.f32 1.442695, %v1453_v52 }
 0x367   : > { %v1443_v7 = vpop.xlane.xlu0 %1442 }
 0x368   : > { %4531 = vrot.lane.b32.xlu0 %v6294_v50, %s5272_s11  ;;  %4781 = vpow2.f32 %v1462_v2 }
 0x369   : > { %4783 = vpow2.f32 %v1460_v8 }
 0x36b   : > { %v1441_v12 = vpop.xlane.xlu0 %1440 }
 0x36c   : > { %4536 = vrot.lane.b32.xlu0 %v6300_v58, %s5272_s11  ;;  %v1454_v13 = vsub.f32 %v6217_v26, %v1441_v12  ;;  %v4514_v12 = vunpack.i.h.bf16 %v6255_v28 }
 0x36f   : > { %v1447_v25 = vpop.xlane.xlu0 %1446 }
 0x370   : > { %4541 = vrot.lane.b32.xlu0 %v6306_v51, %s5272_s11  ;;  %v1457_v48 = vsub.f32 %v6228_v16, %v1447_v25 }
 0x372   : > { %v6317_v24 = vpop.eup %4781  ;;  %v1470_v49 = vmul.f32 1.442695, %v1457_v48  ;;  %v4519_v48 = vunpack.i.h.bf16 %v6240_v36 }
 0x373   : > { %v6321_v61 = vpop.eup %4783  ;;  %v1451_v38 = vpop.xlane.xlu0 %1450 }
 0x374   : > { %4546 = vrot.lane.b32.xlu0 %v5736_v4, %s5273_s15  ;;  %v1464_v4 = vmul.f32 1.442695, %v1454_v13  ;;  %v1459_v26 = vsub.f32 %v6235_v53, %v1451_v38  ;;  %v4513_v13 = vunpack.i.l.bf16 %v6255_v28  ;;  %v4896_v38 = vld [vmem:[#allocation5 + $0x58] sm:$0xff] }
 0x376   : > { %4785 = vpow2.f32 %v1464_v4  ;;  %v1474_v46 = vmul.f32 1.442695, %v1459_v26 }
 0x377   : > { %4787 = vpow2.f32 %v1470_v49 }
 0x378   : > { %4556 = vrot.lane.b32.xlu0 %v5761_v18, %s5273_s15  ;;  %v1456_v18 = vsub.f32 %v6223_v29, %v1445_v27  ;;  %v4518_v27 = vunpack.i.l.bf16 %v6240_v36 }
 0x37a   : > { %v1468_v22 = vmul.f32 1.442695, %v1456_v18  ;;  %v1455_v18 = vsub.f32 %v6205_v55, %v1443_v7  ;;  %v4075_v28 = vpack.c.bf16 %v4519_v48, %v4518_v27  ;;  %v4898_v55 = vld [vmem:[#allocation5 + $0x48] sm:$0xff] }
 0x37c   : > { %4789 = vpow2.f32 %v1468_v22  ;;  %v1466_v49 = vmul.f32 1.442695, %v1455_v18 }
 0x37d   : > { %4791 = vpow2.f32 %v1474_v46  ;;  %v4899_v46 = vld [vmem:[#allocation5 + $0x60] sm:$0xff] }
 0x380   : > { %v6326_v41 = vpop.eup %4785 }
 0x381   : > { %v6332_v21 = vpop.eup %4787 }
 0x386   : > { %v6337_v59 = vpop.eup %4789 }
 0x387   : > { %1478 = vadd.xlane.f32.xlu1 %v6317_v24  ;;  %v6340_v1 = vpop.eup %4791 }
 0x38b   : > { %1476 = vadd.xlane.f32.xlu1 %v6321_v61 }
 0x397   : > { %1480 = vadd.xlane.f32.xlu0 %v6326_v41 }
 0x398   : > { %v1449_v16 = vpop.xlane.xlu1 %1448 }
 0x399   : > { %v1458_v29 = vsub.f32 %v6246_v37, %v1449_v16  ;;  %v4900_v16 = vld [vmem:[#allocation5 + $0x68] sm:$0xff] }
 0x39a   : > { %v1083_v9 = vpop.xlane.xlu0 %1082  ;;  %v6377_v43 = vpack.i.bf16 %v4900_v16, %v4899_v46 }
 0x39b   : > { %v1472_v52 = vmul.f32 1.442695, %v1458_v29  ;;  %4793 = vrcp.f32 %v1083_v9  ;;  %1486 = vadd.xlane.f32.xlu0 %v6332_v21 }
 0x39c   : > { %4561 = vrot.lane.b32.xlu1 %v6329_v20, %s5273_s15  ;;  %v1085_v53 = vpop.xlane.xlu1 %1084 }
 0x39d   : > { %4795 = vpow2.f32 %v1472_v52 }
 0x39e   : > { %4797 = vrcp.f32 %v1085_v53 }
 0x39f   : > { %1484 = vadd.xlane.f32.xlu0 %v6337_v59  ;;  %4799 = vpow2.f32 %v1466_v49 }
 0x3a3   : > { %1490 = vadd.xlane.f32.xlu0 %v6340_v1 }
 0x3a5   : > { %v4794_v37 = vpop.eup %4793 }
 0x3a6   : > { %v6344_v2 = vmul.f32 %v4794_v37, %v6249_v15  ;;  %v4071_v15 = vpack.c.bf16 %v4514_v12, %v4513_v13 }
 0x3a7   : > { %v6346_v8 = vpop.eup %4795 }
 0x3a8   : > { %v4798_v25 = vpop.eup %4797  ;;  %3611 = vmatprep.mubr.f32.mxu0 %v6344_v2  ;;  %1488 = vadd.xlane.f32.xlu0 %v6346_v8 }
 0x3a9   : > { %v6353_v4 = vmul.f32 %v4798_v25, %v6252_v17  ;;  %v4895_v17 = vld [vmem:[#allocation5 + $0x50] sm:$0xff]  ;;  %v6364_v36 = vpop.eup %4799 }
 0x3aa   : > { %v6360_v22 = vpack.i.bf16 %v4896_v38, %v4895_v17 }
 0x3ab   : > { %3612 = vmatmul.mubr.f32.vlgmr.msra.gmra.mrb[32].mxu0 %v6353_v4 }
 0x3ac   : > { %4070 = vmatpush3.bf16.msra.mxu0 %v6023_v19  ;;  %v4897_v19 = vld [vmem:[#allocation5 + $0x40] sm:$0xff] }
 0x3ad   : > { %4072 = vmatprep.subr.bf16.mxu0 %v4071_v15  ;;  %v6373_v7 = vpack.i.bf16 %v4898_v55, %v4897_v19 }
 0x3b0   : > { %4074 = vmatpush3.bf16.msra.mxu0 %v4071_v15 }
 0x3b1   : > { %4076 = vmatprep.subr.bf16.mxu0 %v4075_v28 }
 0x3b4   : > { %4078 = vmatpush3.bf16.msra.mxu0 %v4075_v28 }
 0x3be   : > { %4571 = vrot.lane.b32.xlu0 %v6360_v22, %s5273_s15 }
 0x3c0   : > { %1482 = vadd.xlane.f32.xlu1 %v6364_v36 }
 0x3c2   : > { %1695 = vrot.lane.b32.xlu0 %v6099_v40, %s5278_s16 }
 0x3c6   : > { %1703 = vrot.lane.b32.xlu0 %v6139_v54, %s5280_s10  ;;  %v4901_v54 = vld [vmem:[#allocation5 + $0x70] sm:$0xff] }
 0x3ca   : > { %1711 = vrot.lane.b32.xlu0 %v6161_v23, %s5282_s5  ;;  %v4902_v23 = vld [vmem:[#allocation5 + $0x78] sm:$0xff] }
 0x3cb   : > { %v6381_v62 = vpack.i.bf16 %v4902_v23, %v4901_v54 }
 0x3cf   : > { %v1089_v26 = vpop.xlane.xlu1 %1088 }
 0x3d0   : > { %4801 = vrcp.f32 %v1089_v26 }
 0x3d1   : > { %4566 = vrot.lane.b32.xlu1 %v6373_v7, %s5273_s15 }
 0x3d3   : > { %v1087_v40 = vpop.xlane.xlu0 %1086 }
 0x3d4   : > { %4803 = vrcp.f32 %v1087_v40 }
 0x3d5   : > { %4576 = vrot.lane.b32.xlu1 %v6377_v43, %s5273_s15 }
 0x3d7   : > { %v1091_v29 = vpop.xlane.xlu0 %1090  ;;  %v1093_v9 = vpop.xlane.xlu1 %1092 }
 0x3d8   : > { %4805 = vrcp.f32 %v1091_v29 }
 0x3d9   : > { %4807 = vrcp.f32 %v1093_v9  ;;  %4581 = vrot.lane.b32.xlu1 %v6381_v62, %s5273_s15 }
 0x3da   : > { %v4802_v37 = vpop.eup %4801 }
 0x3db   : > { %v1097_v52 = vpop.xlane.xlu0 %1096  ;;  %v1095_v53 = vpop.xlane.xlu1 %1094  ;;  %v6391_v18 = vmul.f32 %v4802_v37, %v6263_v57 }
 0x3dc   : > { %4809 = vrcp.f32 %v1097_v52 }
 0x3dd   : > { %4811 = vrcp.f32 %v1095_v53  ;;  %1687 = vrot.lane.b32.xlu1 %v6093_v44, %s5276_s28 }
 0x3de   : > { %v4804_v12 = vpop.eup %4803 }
 0x3df   : > { %v4522_v13 = vpop.permute.xlu0 %4521  ;;  %v4527_v25 = vpop.permute.xlu1 %4526  ;;  %v6388_v48 = vmul.f32 %v4804_v12, %v6266_v45 }
 0x3e0   : > { %v4524_v27 = vunpack.i.h.bf16 %v4522_v13  ;;  %v4523_v15 = vunpack.i.l.bf16 %v4522_v13  ;;  %v4529_v28 = vunpack.i.h.bf16 %v4527_v25  ;;  %v4528_v49 = vunpack.i.l.bf16 %v4527_v25 }
 0x3e1   : > { %3614 = vmatprep.mubr.f32.mxu0 %v6388_v48  ;;  %1691 = vrot.lane.b32.xlu1 %v6091_v56, %s5275_s7 }
 0x3e2   : > { %v4806_v17 = vpop.eup %4805  ;;  %3615 = vmatmul.mubr.f32.gmra.mrb[34].mxu0 %v6391_v18  ;;  %v4079_v44 = vpack.c.bf16 %v4524_v27, %v4523_v15  ;;  %v4083_v26 = vpack.c.bf16 %v4529_v28, %v4528_v49 }
 0x3e3   : > { %v4808_v38 = vpop.eup %4807  ;;  %v6398_v45 = vmul.f32 %v4806_v17, %v6269_v10  ;;  %v4532_v19 = vpop.permute.xlu0 %4531 }
 0x3e4   : > { %4080 = vmatprep.subr.bf16.mxu0 %v4079_v44  ;;  %v6401_v57 = vmul.f32 %v4808_v38, %v6271_v3  ;;  %v4534_v55 = vunpack.i.h.bf16 %v4532_v19  ;;  %v4533_v46 = vunpack.i.l.bf16 %v4532_v19 }
 0x3e5   : > { %3617 = vmatprep.mubr.f32.mxu0 %v6398_v45  ;;  %4082 = vmatpush3.bf16.msra.mxu0 %v4079_v44 }
 0x3e6   : > { %v4810_v56 = vpop.eup %4809  ;;  %1699 = vrot.lane.b32.xlu1 %v6095_v6, %s5277_s18  ;;  %3618 = vmatmul.mubr.f32.gmra.mrb[36].mxu0 %v6401_v57  ;;  %v4087_v3 = vpack.c.bf16 %v4534_v55, %v4533_v46 }
 0x3e7   : > { %v4812_v16 = vpop.eup %4811  ;;  %4084 = vmatprep.subr.bf16.mxu0 %v4083_v26  ;;  %v6408_v10 = vmul.f32 %v4810_v56, %v6277_v47  ;;  %v4537_v40 = vpop.permute.xlu0 %4536 }
 0x3e8   : > { %v6411_v54 = vmul.f32 %v4812_v16, %v6275_v11  ;;  %v4539_v23 = vunpack.i.h.bf16 %v4537_v40  ;;  %v4538_v29 = vunpack.i.l.bf16 %v4537_v40 }
 0x3e9   : > { %4086 = vmatpush3.bf16.msra.mxu0 %v4083_v26 }
 0x3ea   : > { %3620 = vmatprep.mubr.f32.mxu0 %v6411_v54  ;;  %1707 = vrot.lane.b32.xlu1 %v6134_v5, %s5279_s19  ;;  %v4091_v6 = vpack.c.bf16 %v4539_v23, %v4538_v29  ;;  %v4552_v5 = vpop.permute.xlu1 %4551 }
 0x3eb   : > { %3621 = vmatmul.mubr.f32.gmra.mrb[38].mxu0 %v6408_v10  ;;  %4088 = vmatprep.subr.bf16.mxu0 %v4087_v3  ;;  %v4542_v9 = vpop.permute.xlu0 %4541  ;;  %v4554_v49 = vunpack.i.h.bf16 %v4552_v5  ;;  %v4553_v17 = vunpack.i.l.bf16 %v4552_v5 }
 0x3ec   : > { %v4544_v47 = vunpack.i.h.bf16 %v4542_v9  ;;  %v4543_v52 = vunpack.i.l.bf16 %v4542_v9 }
 0x3ed   : > { %4090 = vmatpush3.bf16.msra.mxu0 %v4087_v3  ;;  %v4105_v55 = vpack.c.bf16 %v4554_v49, %v4553_v17 }
 0x3ee   : > { %1715 = vrot.lane.b32.xlu1 %v6156_v42, %s5281_s17  ;;  %4092 = vmatprep.subr.bf16.mxu0 %v4091_v6  ;;  %v4095_v11 = vpack.c.bf16 %v4544_v47, %v4543_v52 }
 0x3ef   : > { %v4547_v53 = vpop.permute.xlu0 %4546 }
 0x3f0   : > { %v4549_v37 = vunpack.i.h.bf16 %v4547_v53  ;;  %v4548_v12 = vunpack.i.l.bf16 %v4547_v53 }
 0x3f1   : > { %4094 = vmatpush3.bf16.msra.mxu0 %v4091_v6 }
 0x3f2   : > { %v4099_v13 = vpack.c.bf16 %v4549_v37, %v4548_v12  ;;  %4096 = vmatprep.subr.bf16.mxu0 %v4095_v11 }
 0x3f3   : > { %v4557_v15 = vpop.permute.xlu0 %4556 }
 0x3f4   : > { %v4559_v26 = vunpack.i.h.bf16 %v4557_v15  ;;  %v4558_v46 = vunpack.i.l.bf16 %v4557_v15 }
 0x3f5   : > { %4098 = vmatpush3.bf16.msra.mxu0 %v4095_v11 }
 0x3f6   : > { %4101 = vmatprep.subr.msk.bf16.mxu0 %vm5729_vm1, %v4099_v13 }
 0x414   : > { %v1479_v25 = vpop.xlane.xlu1 %1478 }
 0x415   : > { %4813 = vrcp.f32 %v1479_v25 }
 0x418   : > { %v1477_v27 = vpop.xlane.xlu1 %1476 }
 0x419   : > { %4815 = vrcp.f32 %v1477_v27 }
 0x41c   : > { %v4562_v16 = vpop.permute.xlu1 %4561 }
 0x41d   : > { %v4564_v40 = vunpack.i.h.bf16 %v4562_v16  ;;  %v4563_v3 = vunpack.i.l.bf16 %v4562_v16 }
 0x41f   : > { %v4814_v28 = vpop.eup %4813  ;;  %v4117_v23 = vpack.c.bf16 %v4564_v40, %v4563_v3 }
 0x420   : > { %v6425_v19 = vmul.f32 %v4814_v28, %v6317_v24 }
 0x423   : > { %v4816_v42 = vpop.eup %4815 }
 0x424   : > { %v1481_v44 = vpop.xlane.xlu0 %1480  ;;  %v6422_v38 = vmul.f32 %v4816_v42, %v6321_v61  ;;  %v4111_v61 = vpack.c.bf16 %v4559_v26, %v4558_v46 }
 0x425   : > { %4817 = vrcp.f32 %v1481_v44 }
 0x426   : > { %3699 = vmatprep.mubr.f32.mxu0 %v6422_v38 }
 0x427   : > { %3700 = vmatmul.mubr.f32.vlgmr.msra.gmra.mrb[40].mxu0 %v6425_v19 }
 0x428   : > { %4104 = vmatpush3.bf16.xpose.msk.msra.mxu0 %vm5729_vm1, %v4099_v13  ;;  %v1487_v29 = vpop.xlane.xlu0 %1486 }
 0x429   : > { %4107 = vmatprep.subr.msk.bf16.mxu0 %vm5729_vm1, %v4105_v55 }
 0x42c   : > { %v1485_v6 = vpop.xlane.xlu0 %1484 }
 0x42d   : > { %4819 = vrcp.f32 %v1485_v6 }
 0x42f   : > { %v4818_v56 = vpop.eup %4817 }
 0x430   : > { %4110 = vmatpush3.bf16.xpose.msk.msra.mxu0 %vm5729_vm1, %v4105_v55  ;;  %v6436_v24 = vmul.f32 %v4818_v56, %v6326_v41  ;;  %v1491_v41 = vpop.xlane.xlu0 %1490 }
 0x431   : > { %4113 = vmatprep.subr.msk.bf16.mxu0 %vm5729_vm1, %v4111_v61 }
 0x432   : > { %3702 = vmatprep.mubr.f32.mxu0 %v6436_v24 }
 0x435   : > { %v1489_v9 = vpop.xlane.xlu0 %1488 }
 0x437   : > { %v4820_v27 = vpop.eup %4819 }
 0x438   : > { %4116 = vmatpush3.bf16.xpose.msk.msra.mxu0 %vm5729_vm1, %v4111_v61  ;;  %v6457_v55 = vmul.f32 %v4820_v27, %v6337_v59 }
 0x439   : > { %4119 = vmatprep.subr.msk.bf16.mxu0 %vm5729_vm1, %v4117_v23  ;;  %v4572_v52 = vpop.permute.xlu0 %4571 }
 0x43a   : > { %v4574_v11 = vunpack.i.h.bf16 %v4572_v52  ;;  %v4573_v53 = vunpack.i.l.bf16 %v4572_v52 }
 0x43c   : > { %v4129_v5 = vpack.c.bf16 %v4574_v11, %v4573_v53  ;;  %v7228_v11 = vld [vmem:[#allocation30_spill] sm:$0xff] }
 0x440   : > { %4122 = vmatpush3.bf16.xpose.msk.msra.mxu0 %vm5729_vm1, %v4117_v23  ;;  %v4905_v23 = vld [vmem:[#allocation7 + $0x10] sm:$0xff] }
 0x44d   : > { %v1483_v47 = vpop.xlane.xlu1 %1482 }
 0x44e   : > { %4821 = vrcp.f32 %v1483_v47 }
 0x44f   : > { %4823 = vrcp.f32 %v1487_v29  ;;  %v4906_v29 = vld [vmem:[#allocation7 + $0x18] sm:$0xff] }
 0x450   : > { %4825 = vrcp.f32 %v1489_v9  ;;  %v6495_v6 = vpack.i.bf16 %v4906_v29, %v4905_v23  ;;  %v4910_v9 = vld [vmem:[#allocation7 + $0x38] sm:$0xff] }
 0x451   : > { %v4567_v37 = vpop.permute.xlu1 %4566  ;;  %4827 = vrcp.f32 %v1491_v41 }
 0x452   : > { %v4569_v12 = vunpack.i.h.bf16 %v4567_v37  ;;  %v4568_v13 = vunpack.i.l.bf16 %v4567_v37  ;;  %4591 = vrot.lane.b32.xlu0 %v6495_v6, %s5273_s15 }
 0x454   : > { %v4123_v25 = vpack.c.bf16 %v4569_v12, %v4568_v13 }
 0x455   : > { %v4577_v28 = vpop.permute.xlu1 %4576 }
 0x456   : > { %4125 = vmatprep.subr.msk.bf16.mxu0 %vm5729_vm1, %v4123_v25  ;;  %v4579_v42 = vunpack.i.h.bf16 %v4577_v28  ;;  %v4578_v49 = vunpack.i.l.bf16 %v4577_v28 }
 0x457   : > { %4128 = vmatpush3.bf16.xpose.msk.msra.mxu0 %vm5729_vm1, %v4123_v25 }
 0x458   : > { %v4822_v15 = vpop.eup %4821  ;;  %4131 = vmatprep.subr.msk.bf16.mxu0 %vm5729_vm1, %v4129_v5  ;;  %v4135_v46 = vpack.c.bf16 %v4579_v42, %v4578_v49 }
 0x459   : > { %v6454_v17 = vmul.f32 %v4822_v15, %v6364_v36  ;;  %v4824_v44 = vpop.eup %4823  ;;  %v4582_v36 = vpop.permute.xlu1 %4581 }
 0x45a   : > { %v4826_v26 = vpop.eup %4825  ;;  %v6462_v56 = vmul.f32 %v4824_v44, %v6332_v21  ;;  %v4584_v59 = vunpack.i.h.bf16 %v4582_v36  ;;  %v4583_v40 = vunpack.i.l.bf16 %v4582_v36 }
 0x45b   : > { %3703 = vmatmul.mubr.f32.gmra.mrb[42].mxu0 %v6454_v17  ;;  %v4828_v61 = vpop.eup %4827  ;;  %v6465_v16 = vmul.f32 %v4826_v26, %v6346_v8 }
 0x45c   : > { %3705 = vmatprep.mubr.f32.mxu0 %v6457_v55  ;;  %v6472_v3 = vmul.f32 %v4828_v61, %v6340_v1  ;;  %v4141_v21 = vpack.c.bf16 %v4584_v59, %v4583_v40  ;;  %v4904_v1 = vld [vmem:[#allocation7 + $0x8] sm:$0xff] }
 0x45d   : > { %v6539_v13 = vpop.permute.xlu1 %1687 }
 0x45f   : > { %3706 = vmatmul.mubr.f32.gmra.mrb[44].mxu0 %v6462_v56 }
 0x460   : > { %4134 = vmatpush3.bf16.xpose.msk.msra.mxu0 %vm5729_vm1, %v4129_v5  ;;  %3708 = vmatprep.mubr.f32.mxu0 %v6465_v16  ;;  %v6545_v5 = vpop.permute.xlu0 %1695 }
 0x461   : > { %4137 = vmatprep.subr.msk.bf16.mxu0 %vm5729_vm1, %v4135_v46 }
 0x463   : > { %3709 = vmatmul.mubr.f32.gmra.mrb[46].mxu0 %v6472_v3 }
 0x464   : > { %3743 = vmatprep.mubr.msk.f32.mxu0 %vm559_vm0, %v5907_v30  ;;  %v4903_v30 = vld [vmem:[#allocation7] sm:$0xff]  ;;  %v6553_v15 = vpop.permute.xlu0 %1703 }
 0x465   : > { %v6493_v8 = vpack.i.bf16 %v4904_v1, %v4903_v30 }
 0x467   : > { %4586 = vrot.lane.b32.xlu1 %v6493_v8, %s5273_s15 }
 0x468   : > { %4140 = vmatpush3.bf16.xpose.msk.msra.mxu0 %vm5729_vm1, %v4135_v46  ;;  %v6559_v49 = vpop.permute.xlu0 %1711 }
 0x469   : > { %4143 = vmatprep.subr.msk.bf16.mxu0 %vm5729_vm1, %v4141_v21 }
 0x470   : > { %4146 = vmatpush3.bf16.xpose.msk.msra.mxu0 %vm5729_vm1, %v4141_v21 }
 0x477   : > { %3744 = vmatmul.mubr.msk.f32.vlgmr.msra.gmra.mrb[48].mxu0 %vm559_vm0, %v5909_v31  ;;  %v4907_v31 = vld [vmem:[#allocation7 + $0x20] sm:$0xff] }
 0x478   : > { %3746 = vmatprep.mubr.msk.f32.mxu0 %vm559_vm0, %v5915_v32  ;;  %v4908_v32 = vld [vmem:[#allocation7 + $0x28] sm:$0xff] }
 0x47b   : > { %3747 = vmatmul.mubr.msk.f32.gmra.mrb[50].mxu0 %vm559_vm0, %v5919_v33  ;;  %v6503_v33 = vpack.i.bf16 %v4908_v32, %v4907_v31 }
 0x47c   : > { %3749 = vmatprep.mubr.msk.f32.mxu0 %vm559_vm0, %v5923_v34  ;;  %v4909_v34 = vld [vmem:[#allocation7 + $0x30] sm:$0xff] }
 0x47d   : > { %v6505_v47 = vpack.i.bf16 %v4910_v9, %v4909_v34  ;;  %4596 = vrot.lane.b32.xlu1 %v6503_v33, %s5273_s15 }
 0x47e   : > { %v6497_v41 = vpop.f32.mrb[32].mxu0 }
 0x47f   : > { %7226 = vst [vmem:[#allocation53_spill] sm:$0xff] %v6497_v41  ;;  %v6507_v52 = vpop.f32.mrb[33].mxu0  ;;  %3750 = vmatmul.mubr.msk.f32.gmra.mrb[52].mxu0 %vm559_vm0, %v5932_v39  ;;  %4601 = vrot.lane.b32.xlu0 %v6505_v47, %s5273_s15 }
 0x480   : > { %7227 = vst [vmem:[#allocation54_spill] sm:$0xff] %v6507_v52  ;;  %3752 = vmatprep.mubr.msk.f32.mxu0 %vm559_vm0, %v5927_v35 }
 0x481   : > { %4606 = vrot.lane.b32.xlu1 %v6283_v14, %s5273_s15 }
 0x483   : > { %3753 = vmatmul.mubr.msk.f32.gmra.mrb[54].mxu0 %vm559_vm0, %v7228_v11  ;;  %4611 = vrot.lane.b32.xlu0 %v6294_v50, %s5273_s15  ;;  %v6541_v50 = vpop.permute.xlu1 %1691 }
 0x485   : > { %4616 = vrot.lane.b32.xlu1 %v6300_v58, %s5273_s15 }
 0x487   : > { %v6543_v58 = vpop.permute.xlu1 %1699 }
 0x489   : > { %4621 = vrot.lane.b32.xlu1 %v6306_v51, %s5273_s15 }
 0x48b   : > { %v6547_v51 = vpop.permute.xlu1 %1707 }
 0x48f   : > { %v6557_v42 = vpop.permute.xlu1 %1715 }
 0x4b5   : > { %v6527_v35 = vpop.f32.mrb[34].mxu0 }
 0x4b6   : > { %7229 = vst [vmem:[#allocation30_spill] sm:$0xff] %v6527_v35  ;;  %v6529_v39 = vpop.f32.mrb[35].mxu0 }
 0x4b7   : > { %7230 = vst [vmem:[#allocation55_spill] sm:$0xff] %v6529_v39 }
 0x4b9   : > { %v6531_v53 = vpop.f32.mrb[36].mxu0 }
 0x4ba   : > { %7231 = vst [vmem:[#allocation56_spill] sm:$0xff] %v6531_v53  ;;  %v6533_v37 = vpop.f32.mrb[37].mxu0 }
 0x4bb   : > { %7232 = vst [vmem:[#allocation57_spill] sm:$0xff] %v6533_v37 }
 0x4be   : > { %v6535_v12 = vpop.f32.mrb[38].mxu0 }
 0x4bf   : > { %7233 = vst [vmem:[#allocation58_spill] sm:$0xff] %v6535_v12  ;;  %v6537_v14 = vpop.f32.mrb[39].mxu0 }
 0x4c0   : > { %7234 = vst [vmem:[#allocation59_spill] sm:$0xff] %v6537_v14 }
 0x4c4   : > { %v4592_v36 = vpop.permute.xlu0 %4591 }
 0x4c5   : > { %v4594_v59 = vunpack.i.h.bf16 %v4592_v36  ;;  %v4593_v40 = vunpack.i.l.bf16 %v4592_v36 }
 0x4c7   : > { %v4151_v23 = vpack.c.bf16 %v4594_v59, %v4593_v40 }
 0x4d9   : > { %v4587_v44 = vpop.permute.xlu1 %4586 }
 0x4da   : > { %v4589_v26 = vunpack.i.h.bf16 %v4587_v44  ;;  %v4588_v46 = vunpack.i.l.bf16 %v4587_v44 }
 0x4dc   : > { %v4147_v61 = vpack.c.bf16 %v4589_v26, %v4588_v46 }
 0x4de   : > { %4148 = vmatprep.subr.bf16.mxu1 %v4147_v61 }
 0x4df   : > { %4150 = vmatpush3.bf16.msra.mxu1 %v4147_v61 }
 0x4e0   : > { %4152 = vmatprep.subr.bf16.mxu1 %v4151_v23 }
 0x4e3   : > { %4154 = vmatpush3.bf16.msra.mxu1 %v4151_v23 }
 0x4ef   : > { %v4597_v21 = vpop.permute.xlu1 %4596 }
 0x4f0   : > { %v4599_v30 = vunpack.i.h.bf16 %v4597_v21  ;;  %v4598_v1 = vunpack.i.l.bf16 %v4597_v21 }
 0x4f1   : > { %v4602_v31 = vpop.permute.xlu0 %4601 }
 0x4f2   : > { %v4155_v29 = vpack.c.bf16 %v4599_v30, %v4598_v1  ;;  %v4604_v32 = vunpack.i.h.bf16 %v4602_v31  ;;  %v4603_v34 = vunpack.i.l.bf16 %v4602_v31 }
 0x4f3   : > { %v4607_v11 = vpop.permute.xlu1 %4606 }
 0x4f4   : > { %4156 = vmatprep.subr.bf16.mxu1 %v4155_v29  ;;  %v4159_v9 = vpack.c.bf16 %v4604_v32, %v4603_v34  ;;  %v4609_v26 = vunpack.i.h.bf16 %v4607_v11  ;;  %v4608_v46 = vunpack.i.l.bf16 %v4607_v11 }
 0x4f5   : > { %v4612_v44 = vpop.permute.xlu0 %4611  ;;  %4158 = vmatpush3.bf16.msra.mxu1 %v4155_v29 }
 0x4f6   : > { %4160 = vmatprep.subr.bf16.mxu1 %v4159_v9  ;;  %v4614_v36 = vunpack.i.h.bf16 %v4612_v44  ;;  %v4613_v28 = vunpack.i.l.bf16 %v4612_v44  ;;  %v4163_v61 = vpack.c.bf16 %v4609_v26, %v4608_v46  ;;  %v1719_v46 = vsel %vm497_vm5, %v6545_v5, 0.0  ;;  %v4911_v5 = vld [vmem:[#allocation5 + $0x10] sm:$0xff] }
 0x4f7   : > { %v4617_v12 = vpop.permute.xlu1 %4616 }
 0x4f8   : > { %v4167_v59 = vpack.c.bf16 %v4614_v36, %v4613_v28  ;;  %v4619_v40 = vunpack.i.h.bf16 %v4617_v12  ;;  %v4618_v21 = vunpack.i.l.bf16 %v4617_v12  ;;  %v1718_v36 = vsel %vm496_vm3, %v6541_v50, 0.0 }
 0x4f9   : > { %4162 = vmatpush3.bf16.msra.mxu1 %v4159_v9 }
 0x4fa   : > { %v6549_v25 = vpop.f32.mrb[40].mxu0  ;;  %4164 = vmatprep.subr.bf16.mxu1 %v4163_v61  ;;  %v4171_v1 = vpack.c.bf16 %v4619_v40, %v4618_v21  ;;  %v1717_v40 = vsel %vm495_vm2, %v6539_v13, 0.0 }
 0x4fb   : > { %v6551_v27 = vpop.f32.mrb[41].mxu0  ;;  %v4622_v30 = vpop.permute.xlu1 %4621 }
 0x4fc   : > { %v4624_v23 = vunpack.i.h.bf16 %v4622_v30  ;;  %v4623_v31 = vunpack.i.l.bf16 %v4622_v30 }
 0x4fd   : > { %4166 = vmatpush3.bf16.msra.mxu1 %v4163_v61 }
 0x4fe   : > { %4168 = vmatprep.subr.bf16.mxu1 %v4167_v59  ;;  %v4175_v29 = vpack.c.bf16 %v4624_v23, %v4623_v31  ;;  %v1720_v31 = vsel %vm498_vm4, %v6543_v58, 0.0  ;;  %v1721_v58 = vsel %vm499_vm6, %v6553_v15, 0.0  ;;  %v1723_v15 = vsel %vm501_vm8, %v6559_v49, 0.0 }
 0x501   : > { %4170 = vmatpush3.bf16.msra.mxu1 %v4167_v59 }
 0x502   : > { %4172 = vmatprep.subr.bf16.mxu1 %v4171_v1 }
 0x505   : > { %4174 = vmatpush3.bf16.msra.mxu1 %v4171_v1 }
 0x506   : > { %4176 = vmatprep.subr.bf16.mxu1 %v4175_v29 }
 0x509   : > { %4178 = vmatpush3.bf16.msra.mxu1 %v4175_v29 }
 0x52e   : > { %v6561_v32 = vpop.f32.mrb[42].mxu0 }
 0x52f   : > { %v6563_v34 = vpop.f32.mrb[43].mxu0 }
 0x532   : > { %v6567_v12 = vpop.f32.mrb[44].mxu0 }
 0x533   : > { %v6569_v9 = vpop.f32.mrb[45].mxu0 }
 0x534   : > { %7235 = vst [vmem:[#allocation60_spill] sm:$0xff] %v6569_v9 }
 0x536   : > { %v6573_v44 = vpop.f32.mrb[46].mxu0 }
 0x537   : > { %7236 = vst [vmem:[#allocation61_spill] sm:$0xff] %v6573_v44  ;;  %v6575_v26 = vpop.f32.mrb[47].mxu0 }
 0x538   : > { %7237 = vst [vmem:[#allocation62_spill] sm:$0xff] %v6575_v26 }
 0x54a   : > { %v3745_v61 = vpop.f32.mrb[48].mxu0 }
 0x54b   : > { %v1861_v21 = vadd.f32 %v3745_v61, %v1718_v36  ;;  %v1855_v30 = vpop.f32.mrb[49].mxu0  ;;  %v1722_v36 = vsel %vm500_vm7, %v6547_v51, 0.0 }
 0x54c   : > { %v1856_v1 = vadd.f32 %v1855_v30, %v1717_v40 }
 0x54d   : > { %1896 = vmax.xlane.f32.xlu1 %v1861_v21 }
 0x54e   : > { %v3748_v29 = vpop.f32.mrb[50].mxu0  ;;  %1894 = vmax.xlane.f32.xlu0 %v1856_v1 }
 0x54f   : > { %v1871_v11 = vadd.f32 %v3748_v29, %v1720_v31  ;;  %v1865_v28 = vpop.f32.mrb[51].mxu0  ;;  %v4912_v31 = vld [vmem:[#allocation5 + $0x18] sm:$0xff] }
 0x550   : > { %v1866_v14 = vadd.f32 %v1865_v28, %v1719_v46  ;;  %v4630_v29 = vpack.i.bf16 %v4912_v31, %v4911_v5  ;;  %v4913_v28 = vld [vmem:[#allocation5] sm:$0xff]  ;;  %v4914_v46 = vld [vmem:[#allocation5 + $0x8] sm:$0xff] }
 0x551   : > { %v4625_v52 = vpack.i.bf16 %v4914_v46, %v4913_v28 }
 0x552   : > { %v3751_v61 = vpop.f32.mrb[52].mxu0 }
 0x553   : > { %v1881_v30 = vadd.f32 %v3751_v61, %v1722_v36  ;;  %v1875_v53 = vpop.f32.mrb[53].mxu0  ;;  %v1724_v61 = vsel %vm502_vm9, %v6557_v42, 0.0  ;;  %v4915_v42 = vld [vmem:[#allocation5 + $0x20] sm:$0xff] }
 0x554   : > { %v1876_v37 = vadd.f32 %v1875_v53, %v1721_v58  ;;  %v4917_v36 = vld [vmem:[#allocation7 + $0x40] sm:$0xff] }
 0x556   : > { %v3754_v35 = vpop.f32.mrb[54].mxu0 }
 0x557   : > { %v1885_v39 = vpop.f32.mrb[55].mxu0  ;;  %v1891_v58 = vadd.f32 %v3754_v35, %v1724_v61 }
 0x558   : > { %v1886_v53 = vadd.f32 %v1885_v39, %v1723_v15 }
 0x55e   : > { %4631 = vrot.lane.b32.xlu1 %v4630_v29, %s5274_s22 }
 0x564   : > { %4626 = vrot.lane.b32.xlu0 %v4625_v52, %s5274_s22 }
 0x582   : > { %1902 = vmax.xlane.f32.xlu1 %v1876_v37 }
 0x583   : > { %1900 = vmax.xlane.f32.xlu0 %v1871_v11 }
 0x586   : > { %1906 = vmax.xlane.f32.xlu1 %v1886_v53 }
 0x587   : > { %1898 = vmax.xlane.f32.xlu0 %v1866_v14 }
 0x58b   : > { %1904 = vmax.xlane.f32.xlu0 %v1881_v30 }
 0x58f   : > { %1908 = vmax.xlane.f32.xlu0 %v1891_v58 }
 0x597   : > { %4641 = vrot.lane.b32.xlu1 %v6329_v20, %s5274_s22 }
 0x5da   : > { %v1897_v52 = vpop.xlane.xlu1 %1896 }
 0x5db   : > { %v1911_v5 = vsub.f32 %v1861_v21, %v1897_v52  ;;  %v1895_v31 = vpop.xlane.xlu0 %1894  ;;  %v4916_v21 = vld [vmem:[#allocation5 + $0x28] sm:$0xff] }
 0x5dc   : > { %v1910_v29 = vsub.f32 %v1856_v1, %v1895_v31  ;;  %v4635_v1 = vpack.i.bf16 %v4916_v21, %v4915_v42 }
 0x5dd   : > { %v1920_v49 = vmul.f32 1.442695, %v1911_v5 }
 0x5de   : > { %v1918_v28 = vmul.f32 1.442695, %v1910_v29  ;;  %v6629_v5 = vpop.permute.xlu1 %4631 }
 0x5df   : > { %4829 = vpow2.f32 %v1920_v49  ;;  %v4627_v39 = vpop.permute.xlu0 %4626 }
 0x5e0   : > { %4831 = vpow2.f32 %v1918_v28  ;;  %v4629_v46 = vunpack.i.h.bf16 %v4627_v39  ;;  %v4628_v15 = vunpack.i.l.bf16 %v4627_v39 }
 0x5e2   : > { %v6615_v41 = vpack.c.bf16 %v4629_v46, %v4628_v15 }
 0x5e4   : > { %4181 = vmatprep.subr.msk.bf16.mxu1 %vm5729_vm1, %v6615_v41 }
 0x5e9   : > { %v6620_v35 = vpop.eup %4829 }
 0x5ea   : > { %v6622_v20 = vpop.eup %4831  ;;  %1936 = vadd.xlane.f32.xlu0 %v6620_v35 }
 0x5eb   : > { %1934 = vadd.xlane.f32.xlu1 %v6622_v20 }
 0x5fc   : > { %4646 = vrot.lane.b32.xlu1 %v6373_v7, %s5274_s22 }
 0x600   : > { %4636 = vrot.lane.b32.xlu0 %v4635_v1, %s5274_s22 }
 0x60f   : > { %v1903_v28 = vpop.xlane.xlu1 %1902 }
 0x610   : > { %v1901_v61 = vpop.xlane.xlu0 %1900  ;;  %v1914_v15 = vsub.f32 %v1876_v37, %v1903_v28 }
 0x611   : > { %v1913_v52 = vsub.f32 %v1871_v11, %v1901_v61 }
 0x612   : > { %v1926_v9 = vmul.f32 1.442695, %v1914_v15 }
 0x613   : > { %v1924_v31 = vmul.f32 1.442695, %v1913_v52  ;;  %v1907_v21 = vpop.xlane.xlu1 %1906  ;;  %v7247_v52 = vld [vmem:[#allocation47_spill] sm:$0xff] }
 0x614   : > { %v1899_v29 = vpop.xlane.xlu0 %1898  ;;  %v1916_v11 = vsub.f32 %v1886_v53, %v1907_v21  ;;  %v7245_v53 = vld [vmem:[#allocation46_spill] sm:$0xff]  ;;  %v4633_v21 = vunpack.i.l.bf16 %v6629_v5 }
 0x615   : > { %4833 = vpow2.f32 %v1924_v31  ;;  %v1912_v49 = vsub.f32 %v1866_v14, %v1899_v29  ;;  %v7248_v31 = vld [vmem:[#allocation49_spill] sm:$0xff]  ;;  %v7251_v29 = vld [vmem:[#allocation50_spill] sm:$0xff] }
 0x616   : > { %v1930_v37 = vmul.f32 1.442695, %v1916_v11 }
 0x617   : > { %v1922_v39 = vmul.f32 1.442695, %v1912_v49  ;;  %v7252_v49 = vld [vmem:[#allocation52_spill] sm:$0xff]  ;;  %v4642_v28 = vpop.permute.xlu1 %4641 }
 0x618   : > { %v1905_v46 = vpop.xlane.xlu0 %1904 }
 0x619   : > { %4835 = vpow2.f32 %v1922_v39  ;;  %v1915_v26 = vsub.f32 %v1881_v30, %v1905_v46 }
 0x61b   : > { %v1928_v7 = vmul.f32 1.442695, %v1915_v26 }
 0x61c   : > { %v1909_v44 = vpop.xlane.xlu0 %1908 }
 0x61d   : > { %4837 = vpow2.f32 %v1928_v7  ;;  %v1917_v42 = vsub.f32 %v1891_v58, %v1909_v44  ;;  %v7246_v58 = vld [vmem:[#allocation45_spill] sm:$0xff] }
 0x61e   : > { %4839 = vpow2.f32 %v1926_v9 }
 0x61f   : > { %v6631_v1 = vpop.eup %4833  ;;  %v1932_v61 = vmul.f32 1.442695, %v1917_v42  ;;  %v1509_v42 = vadd.f32 %v6425_v19, %v6353_v4 }
 0x620   : > { %1940 = vadd.xlane.f32.xlu1 %v6631_v1 }
 0x621   : > { %4841 = vpow2.f32 %v1932_v61  ;;  %v1508_v61 = vadd.f32 %v6422_v38, %v6344_v2  ;;  %v4644_v38 = vunpack.i.h.bf16 %v4642_v28 }
 0x622   : > { %4843 = vpow2.f32 %v1930_v37 }
 0x623   : > { %v6634_v14 = vpop.eup %4835 }
 0x624   : > { %1938 = vadd.xlane.f32.xlu0 %v6634_v14 }
 0x627   : > { %v6637_v30 = vpop.eup %4837 }
 0x628   : > { %1944 = vadd.xlane.f32.xlu0 %v6637_v30  ;;  %v6640_v44 = vpop.eup %4839 }
 0x62b   : > { %v6643_v26 = vpop.eup %4841 }
 0x62c   : > { %1942 = vadd.xlane.f32.xlu0 %v6640_v44  ;;  %v6648_v9 = vpop.eup %4843 }
 0x630   : > { %1948 = vadd.xlane.f32.xlu0 %v6643_v26 }
 0x631   : > { %4656 = vrot.lane.b32.xlu1 %v6377_v43, %s5274_s22  ;;  %v7249_v43 = vld [vmem:[#allocation51_spill] sm:$0xff] }
 0x634   : > { %1946 = vadd.xlane.f32.xlu0 %v6648_v9 }
 0x635   : > { %4661 = vrot.lane.b32.xlu1 %v6381_v62, %s5274_s22  ;;  %v7250_v62 = vld [vmem:[#allocation48_spill] sm:$0xff] }
 0x639   : > { %2129 = vrot.lane.b32.xlu1 %v7245_v53, %s5276_s28 }
 0x63d   : > { %2133 = vrot.lane.b32.xlu1 %v7246_v58, %s5275_s7 }
 0x641   : > { %2141 = vrot.lane.b32.xlu1 %v7247_v52, %s5277_s18 }
 0x645   : > { %2149 = vrot.lane.b32.xlu1 %v7248_v31, %s5279_s19 }
 0x649   : > { %2157 = vrot.lane.b32.xlu1 %v7249_v43, %s5281_s17 }
 0x64a   : > { %4651 = vrot.lane.b32.xlu0 %v6360_v22, %s5274_s22  ;;  %v4634_v22 = vunpack.i.h.bf16 %v6629_v5 }
 0x64c   : > { %v4185_v52 = vpack.c.bf16 %v4634_v22, %v4633_v21  ;;  %v1510_v21 = vadd.f32 %v6436_v24, %v6388_v48 }
 0x64d   : > { %4666 = vrot.lane.b32.xlu1 %v6493_v8, %s5274_s22 }
 0x64e   : > { %2137 = vrot.lane.b32.xlu0 %v7250_v62, %s5278_s16 }
 0x652   : > { %2145 = vrot.lane.b32.xlu0 %v7251_v29, %s5280_s10  ;;  %s7278_s10 = sld [smem:[#allocation69_spill]] }
 0x656   : > { %2153 = vrot.lane.b32.xlu0 %v7252_v49, %s5282_s5 }
 0x658   : > { %s7279_s17 = smov %s7278_s10 }
 0x65a   : > { %4671 = vrot.lane.b32.xlu0 %v6495_v6, %s5274_s22 }
 0x677   : > { %v1937_v39 = vpop.xlane.xlu0 %1936 }
 0x678   : > { %4845 = vrcp.f32 %v1937_v39  ;;  %v1935_v46 = vpop.xlane.xlu1 %1934 }
 0x679   : > { %4847 = vrcp.f32 %v1935_v46  ;;  %v1511_v46 = vadd.f32 %v6454_v17, %v6391_v18  ;;  %v1513_v18 = vadd.f32 %v6462_v56, %v6401_v57 }
 0x67b   : > { %v4637_v31 = vpop.permute.xlu0 %4636 }
 0x67c   : > { %v4639_v4 = vunpack.i.h.bf16 %v4637_v31  ;;  %v4638_v19 = vunpack.i.l.bf16 %v4637_v31  ;;  %v4647_v5 = vpop.permute.xlu1 %4646 }
 0x67d   : > { %v4648_v43 = vunpack.i.l.bf16 %v4647_v5 }
 0x67e   : > { %v4191_v2 = vpack.c.bf16 %v4639_v4, %v4638_v19 }
 0x682   : > { %v4846_v15 = vpop.eup %4845 }
 0x683   : > { %v4848_v7 = vpop.eup %4847  ;;  %v1959_v11 = vmul.f32 %v4846_v15, %v6620_v35  ;;  %v4643_v35 = vunpack.i.l.bf16 %v4642_v28 }
 0x684   : > { %v1958_v37 = vmul.f32 %v4848_v7, %v6622_v20 }
 0x685   : > { %v6679_v53 = vadd.f32 %v1959_v11, %v1509_v42  ;;  %v4197_v20 = vpack.c.bf16 %v4644_v38, %v4643_v35 }
 0x686   : > { %v6681_v58 = vadd.f32 %v1958_v37, %v1508_v61  ;;  %3787 = vmatprep.mubr.f32.mxu1 %v1958_v37 }
 0x687   : > { %3788 = vmatmul.mubr.f32.vlgmr.msra.gmra.mrb[16].mxu1 %v1959_v11 }
 0x688   : > { %4184 = vmatpush3.bf16.xpose.msk.msra.mxu1 %vm5729_vm1, %v6615_v41  ;;  %v4649_v41 = vunpack.i.h.bf16 %v4647_v5 }
 0x689   : > { %4187 = vmatprep.subr.msk.bf16.mxu1 %vm5729_vm1, %v4185_v52 }
 0x68a   : > { %v4203_v62 = vpack.c.bf16 %v4649_v41, %v4648_v43  ;;  %v1515_v41 = vadd.f32 %v6472_v3, %v6408_v10  ;;  %v1514_v10 = vadd.f32 %v6465_v16, %v6411_v54  ;;  %v7254_v54 = vld [vmem:[#allocation32_spill] sm:$0xff]  ;;  %v7255_v16 = vld [vmem:[#allocation31_spill] sm:$0xff] }
 0x690   : > { %4190 = vmatpush3.bf16.xpose.msk.msra.mxu1 %vm5729_vm1, %v4185_v52 }
 0x691   : > { %4193 = vmatprep.subr.msk.bf16.mxu1 %vm5729_vm1, %v4191_v2 }
 0x698   : > { %4196 = vmatpush3.bf16.xpose.msk.msra.mxu1 %vm5729_vm1, %v4191_v2 }
 0x699   : > { %4199 = vmatprep.subr.msk.bf16.mxu1 %vm5729_vm1, %v4197_v20 }
 0x6a0   : > { %4202 = vmatpush3.bf16.xpose.msk.msra.mxu1 %vm5729_vm1, %v4197_v20 }
 0x6a1   : > { %4205 = vmatprep.subr.msk.bf16.mxu1 %vm5729_vm1, %v4203_v62 }
 0x6a8   : > { %4208 = vmatpush3.bf16.xpose.msk.msra.mxu1 %vm5729_vm1, %v4203_v62 }
 0x6ad   : > { %v1941_v29 = vpop.xlane.xlu1 %1940 }
 0x6ae   : > { %4849 = vrcp.f32 %v1941_v29 }
 0x6b1   : > { %v1939_v49 = vpop.xlane.xlu0 %1938  ;;  %v4657_v31 = vpop.permute.xlu1 %4656 }
 0x6b2   : > { %4851 = vrcp.f32 %v1939_v49  ;;  %v4659_v24 = vunpack.i.h.bf16 %v4657_v31  ;;  %v4658_v19 = vunpack.i.l.bf16 %v4657_v31 }
 0x6b4   : > { %v4215_v56 = vpack.c.bf16 %v4659_v24, %v4658_v19 }
 0x6b5   : > { %v1945_v28 = vpop.xlane.xlu0 %1944 }
 0x6b6   : > { %4853 = vrcp.f32 %v1945_v28  ;;  %v7253_v28 = vld [vmem:[#allocation29_spill] sm:$0xff] }
 0x6b8   : > { %v4850_v39 = vpop.eup %4849 }
 0x6b9   : > { %v1943_v15 = vpop.xlane.xlu0 %1942  ;;  %v1961_v7 = vmul.f32 %v4850_v39, %v6631_v1  ;;  %v7257_v39 = vld [vmem:[#allocation34_spill] sm:$0xff] }
 0x6ba   : > { %4855 = vrcp.f32 %v1943_v15  ;;  %v7260_v15 = vld [vmem:[#allocation37_spill] sm:$0xff] }
 0x6bb   : > { %v6705_v42 = vadd.f32 %v1961_v7, %v1511_v46  ;;  %v7258_v46 = vld [vmem:[#allocation35_spill] sm:$0xff] }
 0x6bc   : > { %v4852_v22 = vpop.eup %4851 }
 0x6bd   : > { %v1949_v11 = vpop.xlane.xlu0 %1948  ;;  %v1960_v61 = vmul.f32 %v4852_v22, %v6634_v14  ;;  %v1512_v14 = vadd.f32 %v6457_v55, %v6398_v45  ;;  %v4662_v45 = vpop.permute.xlu1 %4661 }
 0x6be   : > { %4857 = vrcp.f32 %v1949_v11  ;;  %v4664_v62 = vunpack.i.h.bf16 %v4662_v45  ;;  %v4663_v29 = vunpack.i.l.bf16 %v4662_v45 }
 0x6bf   : > { %v6710_v37 = vadd.f32 %v1960_v61, %v1510_v21  ;;  %3790 = vmatprep.mubr.f32.mxu1 %v1960_v61 }
 0x6c0   : > { %v4854_v52 = vpop.eup %4853  ;;  %3791 = vmatmul.mubr.f32.gmra.mrb[18].mxu1 %v1961_v7  ;;  %v4221_v49 = vpack.c.bf16 %v4664_v62, %v4663_v29 }
 0x6c1   : > { %v1947_v17 = vpop.xlane.xlu0 %1946  ;;  %v1963_v1 = vmul.f32 %v4854_v52, %v6637_v30  ;;  %v2130_v8 = vpop.permute.xlu1 %2129 }
 0x6c2   : > { %4859 = vrcp.f32 %v1947_v17 }
 0x6c3   : > { %v6715_v4 = vadd.f32 %v1963_v1, %v1513_v18 }
 0x6c4   : > { %v4856_v48 = vpop.eup %4855 }
 0x6c5   : > { %v4652_v2 = vpop.permute.xlu0 %4651  ;;  %v1962_v38 = vmul.f32 %v4856_v48, %v6640_v44  ;;  %v2134_v22 = vpop.permute.xlu1 %2133 }
 0x6c6   : > { %v4654_v35 = vunpack.i.h.bf16 %v4652_v2  ;;  %v4653_v20 = vunpack.i.l.bf16 %v4652_v2  ;;  %v2160_v29 = vsel %vm496_vm3, %v2134_v22, 0.0 }
 0x6c7   : > { %v6720_v5 = vadd.f32 %v1962_v38, %v1512_v14  ;;  %3793 = vmatprep.mubr.f32.mxu1 %v1962_v38 }
 0x6c8   : > { %v4858_v57 = vpop.eup %4857  ;;  %v4209_v30 = vpack.c.bf16 %v4654_v35, %v4653_v20  ;;  %3794 = vmatmul.mubr.f32.gmra.mrb[20].mxu1 %v1963_v1 }
 0x6c9   : > { %v1965_v43 = vmul.f32 %v4858_v57, %v6643_v26  ;;  %v2142_v61 = vpop.permute.xlu1 %2141  ;;  %v2138_v24 = vpop.permute.xlu0 %2137 }
 0x6ca   : > { %4211 = vmatprep.subr.msk.bf16.mxu1 %vm5729_vm1, %v4209_v30  ;;  %v2161_v63 = vsel %vm497_vm5, %v2138_v24, 0.0 }
 0x6cb   : > { %4214 = vmatpush3.bf16.xpose.msk.msra.mxu1 %vm5729_vm1, %v4209_v30  ;;  %v6729_v55 = vadd.f32 %v1965_v43, %v1515_v41 }
 0x6cc   : > { %v4860_v44 = vpop.eup %4859  ;;  %4217 = vmatprep.subr.msk.bf16.mxu1 %vm5729_vm1, %v4215_v56 }
 0x6cd   : > { %v1964_v3 = vmul.f32 %v4860_v44, %v6648_v9  ;;  %v7256_v9 = vld [vmem:[#allocation33_spill] sm:$0xff]  ;;  %v2150_v52 = vpop.permute.xlu1 %2149  ;;  %v2146_v6 = vpop.permute.xlu0 %2145 }
 0x6ce   : > { %v2164_v59 = vsel %vm500_vm7, %v2150_v52, 0.0  ;;  %v2163_v23 = vsel %vm499_vm6, %v2146_v6, 0.0 }
 0x6cf   : > { %v6736_v26 = vadd.f32 %v1964_v3, %v1514_v10  ;;  %3796 = vmatprep.mubr.f32.mxu1 %v1964_v3  ;;  %v2159_v3 = vsel %vm495_vm2, %v2130_v8, 0.0 }
 0x6d0   : > { %3797 = vmatmul.mubr.f32.gmra.mrb[22].mxu1 %v1965_v43 }
 0x6d1   : > { %3831 = vmatprep.mubr.msk.f32.mxu1 %vm559_vm0, %v7253_v28  ;;  %v2158_v18 = vpop.permute.xlu1 %2157  ;;  %v2154_v19 = vpop.permute.xlu0 %2153 }
 0x6d2   : > { %v2165_v40 = vsel %vm501_vm8, %v2154_v19, 0.0 }
 0x6d3   : > { %4220 = vmatpush3.bf16.xpose.msk.msra.mxu1 %vm5729_vm1, %v4215_v56 }
 0x6d4   : > { %4223 = vmatprep.subr.msk.bf16.mxu1 %vm5729_vm1, %v4221_v49 }
 0x6d5   : > { %v4667_v17 = vpop.permute.xlu1 %4666  ;;  %v4672_v14 = vpop.permute.xlu0 %4671 }
 0x6d6   : > { %v4669_v1 = vunpack.i.h.bf16 %v4667_v17  ;;  %v4668_v31 = vunpack.i.l.bf16 %v4667_v17  ;;  %v4674_v2 = vunpack.i.h.bf16 %v4672_v14  ;;  %v4673_v38 = vunpack.i.l.bf16 %v4672_v14 }
 0x6d8   : > { %v4227_v48 = vpack.c.bf16 %v4669_v1, %v4668_v31  ;;  %v4231_v35 = vpack.c.bf16 %v4674_v2, %v4673_v38  ;;  %v2166_v1 = vsel %vm502_vm9, %v2158_v18, 0.0  ;;  %v4918_v18 = vld [vmem:[#allocation7 + $0x48] sm:$0xff] }
 0x6d9   : > { %v4685_v31 = vpack.i.bf16 %v4918_v18, %v4917_v36 }
 0x6da   : > { %4228 = vmatprep.subr.bf16.mxu0 %v4227_v48 }
 0x6db   : > { %4226 = vmatpush3.bf16.xpose.msk.msra.mxu1 %vm5729_vm1, %v4221_v49  ;;  %4230 = vmatpush3.bf16.msra.mxu0 %v4227_v48  ;;  %v4920_v48 = vld [vmem:[#allocation7 + $0x58] sm:$0xff] }
 0x6dc   : > { %4232 = vmatprep.subr.bf16.mxu0 %v4231_v35 }
 0x6df   : > { %4234 = vmatpush3.bf16.msra.mxu0 %v4231_v35 }
 0x6e2   : > { %3832 = vmatmul.mubr.msk.f32.vlgmr.msra.gmra.mrb[24].mxu1 %vm559_vm0, %v7254_v54 }
 0x6e3   : > { %3834 = vmatprep.mubr.msk.f32.mxu1 %vm559_vm0, %v7255_v16  ;;  %v2162_v16 = vsel %vm498_vm4, %v2142_v61, 0.0 }
 0x6e6   : > { %3835 = vmatmul.mubr.msk.f32.gmra.mrb[26].mxu1 %vm559_vm0, %v7256_v9 }
 0x6e7   : > { %3837 = vmatprep.mubr.msk.f32.mxu1 %vm559_vm0, %v7257_v39 }
 0x6ea   : > { %3838 = vmatmul.mubr.msk.f32.gmra.mrb[28].mxu1 %vm559_vm0, %v7258_v46 }
 0x6eb   : > { %3840 = vmatprep.mubr.msk.f32.mxu1 %vm559_vm0, %v7259_v0 }
 0x6ee   : > { %3841 = vmatmul.mubr.msk.f32.gmra.mrb[30].mxu1 %vm559_vm0, %v7260_v15 }
 0x75a   : > { %v6764_v7 = vpop.f32.mrb[16].mxu1 }
 0x75b   : > { %v6766_v21 = vpop.f32.mrb[17].mxu1 }
 0x75c   : > { %v4710_v11 = vpack.i.bf16 %v6764_v7, %v6766_v21 }
 0x793   : > { %v6770_v20 = vpop.f32.mrb[18].mxu1 }
 0x794   : > { %v6772_v57 = vpop.f32.mrb[19].mxu1 }
 0x795   : > { %v4720_v56 = vpack.i.bf16 %v6770_v20, %v6772_v57 }
 0x79b   : > { %v6776_v30 = vpop.f32.mrb[20].mxu1 }
 0x79c   : > { %v6778_v41 = vpop.f32.mrb[21].mxu1 }
 0x79d   : > { %v4730_v43 = vpack.i.bf16 %v6776_v30, %v6778_v41 }
 0x7a3   : > { %v6782_v45 = vpop.f32.mrb[22].mxu1 }
 0x7a4   : > { %v6784_v44 = vpop.f32.mrb[23].mxu1 }
 0x7a5   : > { %v4755_v62 = vpack.i.bf16 %v6782_v45, %v6784_v44 }
 0x7b5   : > { %v3833_v10 = vpop.f32.mrb[24].mxu1 }
 0x7b6   : > { %v2303_v49 = vadd.f32 %v3833_v10, %v2160_v29  ;;  %v2297_v28 = vpop.f32.mrb[25].mxu1 }
 0x7b7   : > { %v2298_v54 = vadd.f32 %v2297_v28, %v2159_v3 }
 0x7b8   : > { %2338 = vmax.xlane.f32.xlu1 %v2303_v49 }
 0x7b9   : > { %v3836_v9 = vpop.f32.mrb[26].mxu1  ;;  %2336 = vmax.xlane.f32.xlu0 %v2298_v54 }
 0x7ba   : > { %v2313_v39 = vadd.f32 %v3836_v9, %v2162_v16  ;;  %v2307_v46 = vpop.f32.mrb[27].mxu1 }
 0x7bb   : > { %v2308_v0 = vadd.f32 %v2307_v46, %v2161_v63 }
 0x7bd   : > { %v3839_v15 = vpop.f32.mrb[28].mxu1  ;;  %2342 = vmax.xlane.f32.xlu0 %v2313_v39 }
 0x7be   : > { %v2323_v8 = vadd.f32 %v3839_v15, %v2164_v59  ;;  %v2317_v22 = vpop.f32.mrb[29].mxu1 }
 0x7bf   : > { %v6806_v61 = vadd.f32 %v2317_v22, %v2163_v23 }
 0x7c1   : > { %v3842_v17 = vpop.f32.mrb[30].mxu1  ;;  %2340 = vmax.xlane.f32.xlu0 %v2308_v0 }
 0x7c2   : > { %v2327_v50 = vpop.f32.mrb[31].mxu1  ;;  %v2333_v13 = vadd.f32 %v3842_v17, %v2166_v1 }
 0x7c3   : > { %v6819_v52 = vadd.f32 %v2327_v50, %v2165_v40 }
 0x7c5   : > { %2346 = vmax.xlane.f32.xlu0 %v2323_v8 }
 0x7c9   : > { %4676 = vrot.lane.b32.xlu1 %v6503_v33, %s5274_s22  ;;  %2350 = vmax.xlane.f32.xlu0 %v2333_v13  ;;  %v4919_v33 = vld [vmem:[#allocation7 + $0x50] sm:$0xff] }
 0x7ca   : > { %v4690_v24 = vpack.i.bf16 %v4920_v48, %v4919_v33 }
 0x7df   : > { %4681 = vrot.lane.b32.xlu0 %v6505_v47, %s5274_s22 }
 0x7ed   : > { %2344 = vmax.xlane.f32.xlu1 %v6806_v61 }
 0x7f1   : > { %2348 = vmax.xlane.f32.xlu1 %v6819_v52 }
 0x802   : > { %4686 = vrot.lane.b32.xlu1 %v4685_v31, %s5274_s22 }
 0x806   : > { %4691 = vrot.lane.b32.xlu1 %v4690_v24, %s5274_s22 }
 0x845   : > { %v2339_v47 = vpop.xlane.xlu1 %2338 }
 0x846   : > { %v2353_v6 = vsub.f32 %v2303_v49, %v2339_v47  ;;  %v2337_v14 = vpop.xlane.xlu0 %2336 }
 0x847   : > { %v2352_v2 = vsub.f32 %v2298_v54, %v2337_v14 }
 0x848   : > { %v2362_v60 = vmul.f32 1.442695, %v2353_v6 }
 0x849   : > { %v2360_v51 = vmul.f32 1.442695, %v2352_v2  ;;  %v4677_v19 = vpop.permute.xlu1 %4676 }
 0x84a   : > { %4861 = vpow2.f32 %v2362_v60  ;;  %v4679_v38 = vunpack.i.h.bf16 %v4677_v19  ;;  %v4678_v35 = vunpack.i.l.bf16 %v4677_v19  ;;  %v2343_v29 = vpop.xlane.xlu0 %2342 }
 0x84b   : > { %4863 = vpow2.f32 %v2360_v51  ;;  %v2355_v10 = vsub.f32 %v2313_v39, %v2343_v29 }
 0x84c   : > { %v4235_v3 = vpack.c.bf16 %v4679_v38, %v4678_v35 }
 0x84d   : > { %v2366_v28 = vmul.f32 1.442695, %v2355_v10  ;;  %v4922_v10 = vld [vmem:[#allocation7 + $0x78] sm:$0xff] }
 0x84e   : > { %4236 = vmatprep.subr.bf16.mxu0 %v4235_v3  ;;  %v2341_v16 = vpop.xlane.xlu0 %2340 }
 0x84f   : > { %4865 = vpow2.f32 %v2366_v28  ;;  %v2354_v9 = vsub.f32 %v2308_v0, %v2341_v16  ;;  %4238 = vmatpush3.bf16.msra.mxu0 %v4235_v3  ;;  %v7261_v28 = vpack.i.bf16 %v6549_v25, %v6551_v27  ;;  %v4923_v16 = vld [vmem:[#allocation7 + $0x60] sm:$0xff]  ;;  %v7263_v25 = vld [vmem:[#allocation60_spill] sm:$0xff] }
 0x850   : > { %v7264_v27 = vpack.i.bf16 %v6567_v12, %v7263_v25 }
 0x851   : > { %v2364_v63 = vmul.f32 1.442695, %v2354_v9  ;;  %v4924_v9 = vld [vmem:[#allocation7 + $0x68] sm:$0xff] }
 0x852   : > { %v2347_v49 = vpop.xlane.xlu0 %2346 }
 0x853   : > { %4867 = vpow2.f32 %v2364_v63  ;;  %v2357_v54 = vsub.f32 %v2323_v8, %v2347_v49  ;;  %v4695_v63 = vpack.i.bf16 %v4924_v9, %v4923_v16  ;;  %v7262_v49 = vpack.i.bf16 %v6561_v32, %v6563_v34  ;;  %v2696_v9 = vld [vmem:[#allocation10 + $0x28] sm:$0xff] }
 0x854   : > { %v6824_v46 = vpop.eup %4861 }
 0x855   : > { %v6826_v59 = vpop.eup %4863  ;;  %v2370_v15 = vmul.f32 1.442695, %v2357_v54  ;;  %2378 = vadd.xlane.f32.xlu0 %v6824_v46 }
 0x856   : > { %2376 = vadd.xlane.f32.xlu1 %v6826_v59  ;;  %v2351_v39 = vpop.xlane.xlu0 %2350 }
 0x857   : > { %4869 = vpow2.f32 %v2370_v15  ;;  %v2359_v23 = vsub.f32 %v2333_v13, %v2351_v39 }
 0x859   : > { %v6830_v22 = vpop.eup %4865  ;;  %v2374_v0 = vmul.f32 1.442695, %v2359_v23 }
 0x85a   : > { %2382 = vadd.xlane.f32.xlu0 %v6830_v22  ;;  %v4682_v17 = vpop.permute.xlu0 %4681 }
 0x85b   : > { %4871 = vpow2.f32 %v2374_v0  ;;  %v4684_v8 = vunpack.i.h.bf16 %v4682_v17  ;;  %v4683_v50 = vunpack.i.l.bf16 %v4682_v17 }
 0x85d   : > { %v6833_v1 = vpop.eup %4867  ;;  %v4239_v40 = vpack.c.bf16 %v4684_v8, %v4683_v50 }
 0x85e   : > { %2380 = vadd.xlane.f32.xlu0 %v6833_v1 }
 0x85f   : > { %4240 = vmatprep.subr.bf16.mxu0 %v4239_v40 }
 0x860   : > { %4242 = vmatpush3.bf16.msra.mxu0 %v4239_v40 }
 0x861   : > { %v6836_v36 = vpop.eup %4869 }
 0x862   : > { %2386 = vadd.xlane.f32.xlu0 %v6836_v36 }
 0x865   : > { %v6839_v13 = vpop.eup %4871 }
 0x866   : > { %2390 = vadd.xlane.f32.xlu0 %v6839_v13 }
 0x87a   : > { %v2345_v18 = vpop.xlane.xlu1 %2344 }
 0x87b   : > { %v2356_v31 = vsub.f32 %v6806_v61, %v2345_v18 }
 0x87d   : > { %v2368_v33 = vmul.f32 1.442695, %v2356_v31 }
 0x87e   : > { %v2349_v48 = vpop.xlane.xlu1 %2348 }
 0x87f   : > { %4873 = vpow2.f32 %v2368_v33  ;;  %v2358_v24 = vsub.f32 %v6819_v52, %v2349_v48  ;;  %v4921_v52 = vld [vmem:[#allocation7 + $0x70] sm:$0xff] }
 0x880   : > { %v4700_v3 = vpack.i.bf16 %v4922_v10, %v4921_v52  ;;  %v2693_v10 = vld [vmem:[#allocation10 + $0x10] sm:$0xff] }
 0x881   : > { %v2372_v47 = vmul.f32 1.442695, %v2358_v24 }
 0x882   : > { %v4687_v6 = vpop.permute.xlu1 %4686 }
 0x883   : > { %4875 = vpow2.f32 %v2372_v47  ;;  %v4689_v14 = vunpack.i.h.bf16 %v4687_v6  ;;  %v4688_v2 = vunpack.i.l.bf16 %v4687_v6 }
 0x885   : > { %v4243_v60 = vpack.c.bf16 %v4689_v14, %v4688_v2 }
 0x886   : > { %v4692_v51 = vpop.permute.xlu1 %4691 }
 0x887   : > { %v4694_v19 = vunpack.i.h.bf16 %v4692_v51  ;;  %v4693_v38 = vunpack.i.l.bf16 %v4692_v51  ;;  %4244 = vmatprep.subr.bf16.mxu0 %v4243_v60 }
 0x888   : > { %4246 = vmatpush3.bf16.msra.mxu0 %v4243_v60 }
 0x889   : > { %v6844_v35 = vpop.eup %4873  ;;  %v4247_v29 = vpack.c.bf16 %v4694_v19, %v4693_v38 }
 0x88a   : > { %2384 = vadd.xlane.f32.xlu1 %v6844_v35 }
 0x88b   : > { %4248 = vmatprep.subr.bf16.mxu0 %v4247_v29 }
 0x88c   : > { %4250 = vmatpush3.bf16.msra.mxu0 %v4247_v29 }
 0x88d   : > { %v6847_v61 = vpop.eup %4875 }
 0x88e   : > { %2388 = vadd.xlane.f32.xlu0 %v6847_v61 }
 0x89b   : > { %4701 = vrot.lane.b32.xlu1 %v4700_v3, %s5274_s22 }
 0x89f   : > { %4706 = vrot.lane.b32.xlu1 %v7261_v28, %s5274_s22  ;;  %v2694_v28 = vld [vmem:[#allocation10 + $0x18] sm:$0xff] }
 0x8a0   : > { %v4263_v16 = vpack.c.bf16 %v2694_v28, %v2693_v10 }
 0x8a3   : > { %4711 = vrot.lane.b32.xlu1 %v4710_v11, %s5273_s15 }
 0x8a4   : > { %4696 = vrot.lane.b32.xlu0 %v4695_v63, %s5274_s22  ;;  %v2697_v63 = vld [vmem:[#allocation10 + $0x30] sm:$0xff] }
 0x8a7   : > { %4716 = vrot.lane.b32.xlu1 %v7262_v49, %s5274_s22  ;;  %v2698_v49 = vld [vmem:[#allocation10 + $0x38] sm:$0xff] }
 0x8a8   : > { %4721 = vrot.lane.b32.xlu0 %v4720_v56, %s5273_s15  ;;  %v4271_v25 = vpack.c.bf16 %v2698_v49, %v2697_v63 }
 0x8ab   : > { %4731 = vrot.lane.b32.xlu1 %v4730_v43, %s5273_s15 }
 0x8ac   : > { %4726 = vrot.lane.b32.xlu0 %v7264_v27, %s5274_s22  ;;  %v2699_v27 = vld [vmem:[#allocation10 + $0x40] sm:$0xff] }
 0x8e2   : > { %v2379_v7 = vpop.xlane.xlu0 %2378 }
 0x8e3   : > { %4877 = vrcp.f32 %v2379_v7  ;;  %v2377_v21 = vpop.xlane.xlu1 %2376  ;;  %v2700_v7 = vld [vmem:[#allocation10 + $0x48] sm:$0xff] }
 0x8e4   : > { %4879 = vrcp.f32 %v2377_v21  ;;  %v4275_v21 = vpack.c.bf16 %v2700_v7, %v2699_v27 }
 0x8e7   : > { %v2383_v32 = vpop.xlane.xlu0 %2382 }
 0x8e8   : > { %4881 = vrcp.f32 %v2383_v32  ;;  %v2701_v32 = vld [vmem:[#allocation10 + $0x50] sm:$0xff] }
 0x8eb   : > { %v2381_v34 = vpop.xlane.xlu0 %2380 }
 0x8ec   : > { %4883 = vrcp.f32 %v2381_v34  ;;  %v2702_v34 = vld [vmem:[#allocation10 + $0x58] sm:$0xff] }
 0x8ed   : > { %v4878_v11 = vpop.eup %4877 }
 0x8ee   : > { %v4880_v20 = vpop.eup %4879  ;;  %v2401_v57 = vmul.f32 %v4878_v11, %v6824_v46  ;;  %v4279_v11 = vpack.c.bf16 %v2702_v34, %v2701_v32 }
 0x8ef   : > { %v2387_v56 = vpop.xlane.xlu0 %2386  ;;  %v2400_v30 = vmul.f32 %v4880_v20, %v6826_v59  ;;  %v2703_v20 = vld [vmem:[#allocation10 + $0x60] sm:$0xff] }
 0x8f0   : > { %v2409_v41 = vadd.f32 %v2401_v57, %v6679_v53  ;;  %4885 = vrcp.f32 %v2387_v56 }
 0x8f1   : > { %v2408_v12 = vadd.f32 %v2400_v30, %v6681_v58  ;;  %3875 = vmatprep.mubr.f32.mxu0 %v2400_v30  ;;  %v2705_v30 = vld [vmem:[#allocation10 + $0x70] sm:$0xff] }
 0x8f2   : > { %v4882_v43 = vpop.eup %4881  ;;  %v2828_v54 = vmul.f32 0.25, %v2409_v41  ;;  %v2706_v41 = vld [vmem:[#allocation10 + $0x78] sm:$0xff] }
 0x8f3   : > { %v2827_v15 = vmul.f32 0.25, %v2408_v12  ;;  %v2391_v39 = vpop.xlane.xlu0 %2390  ;;  %v2403_v23 = vmul.f32 %v4882_v43, %v6830_v22  ;;  %v4287_v12 = vpack.c.bf16 %v2706_v41, %v2705_v30  ;;  %v7273_v30 = vld [vmem:[#allocation56_spill] sm:$0xff] }
 0x8f4   : > { %2836 = vst [vmem:[%s6882_s1 + $0x8] sm:$0xff] %v2828_v54  ;;  %4887 = vrcp.f32 %v2391_v39 }
 0x8f5   : > { %2835 = vst [vmem:[%s6882_s1] sm:$0xff] %v2827_v15  ;;  %v2411_v53 = vadd.f32 %v2403_v23, %v6705_v42 }
 0x8f6   : > { %v4884_v58 = vpop.eup %4883 }
 0x8f7   : > { %v2402_v46 = vmul.f32 %v4884_v58, %v6833_v1  ;;  %v2830_v59 = vmul.f32 0.25, %v2411_v53 }
 0x8f9   : > { %v2410_v0 = vadd.f32 %v2402_v46, %v6710_v37  ;;  %2838 = vst [vmem:[%s6882_s1 + $0x18] sm:$0xff] %v2830_v59 }
 0x8fa   : > { %v4886_v22 = vpop.eup %4885 }
 0x8fb   : > { %v2829_v17 = vmul.f32 0.25, %v2410_v0  ;;  %v2405_v8 = vmul.f32 %v4886_v22, %v6836_v36  ;;  %v7265_v0 = vld [vmem:[#allocation61_spill] sm:$0xff]  ;;  %v7266_v22 = vld [vmem:[#allocation62_spill] sm:$0xff] }
 0x8fd   : > { %2837 = vst [vmem:[%s6882_s1 + $0x10] sm:$0xff] %v2829_v17  ;;  %v2413_v50 = vadd.f32 %v2405_v8, %v6715_v4  ;;  %v7267_v17 = vpack.i.bf16 %v7265_v0, %v7266_v22 }
 0x8fe   : > { %v4888_v40 = vpop.eup %4887 }
 0x8ff   : > { %v2832_v18 = vmul.f32 0.25, %v2413_v50  ;;  %v2407_v31 = vmul.f32 %v4888_v40, %v6839_v13 }
 0x901   : > { %2840 = vst [vmem:[%s6882_s1 + $0x28] sm:$0xff] %v2832_v18  ;;  %v2415_v42 = vadd.f32 %v2407_v31, %v6729_v55 }
 0x903   : > { %v2834_v33 = vmul.f32 0.25, %v2415_v42 }
 0x905   : > { %2842 = vst [vmem:[%s6882_s1 + $0x38] sm:$0xff] %v2834_v33 }
 0x917   : > { %v2385_v1 = vpop.xlane.xlu1 %2384 }
 0x918   : > { %4889 = vrcp.f32 %v2385_v1 }
 0x91b   : > { %v2389_v37 = vpop.xlane.xlu0 %2388  ;;  %v4702_v48 = vpop.permute.xlu1 %4701 }
 0x91c   : > { %4891 = vrcp.f32 %v2389_v37  ;;  %v4704_v24 = vunpack.i.h.bf16 %v4702_v48  ;;  %v4703_v47 = vunpack.i.l.bf16 %v4702_v48 }
 0x91e   : > { %v4255_v2 = vpack.c.bf16 %v4704_v24, %v4703_v47 }
 0x91f   : > { %v4697_v36 = vpop.permute.xlu0 %4696  ;;  %v4707_v18 = vpop.permute.xlu1 %4706 }
 0x920   : > { %v4699_v6 = vunpack.i.h.bf16 %v4697_v36  ;;  %v4698_v4 = vunpack.i.l.bf16 %v4697_v36  ;;  %v4709_v37 = vunpack.i.h.bf16 %v4707_v18  ;;  %v4708_v48 = vunpack.i.l.bf16 %v4707_v18 }
 0x922   : > { %v4890_v14 = vpop.eup %4889  ;;  %v4251_v13 = vpack.c.bf16 %v4699_v6, %v4698_v4 }
 0x923   : > { %v2404_v60 = vmul.f32 %v4890_v14, %v6844_v35  ;;  %v2691_v35 = vld [vmem:[#allocation10] sm:$0xff]  ;;  %v4722_v33 = vpop.permute.xlu0 %4721 }
 0x924   : > { %4252 = vmatprep.subr.bf16.mxu0 %v4251_v13  ;;  %v7268_v14 = vld [vmem:[#allocation53_spill] sm:$0xff]  ;;  %v4724_v10 = vunpack.i.h.bf16 %v4722_v33 }
 0x925   : > { %4254 = vmatpush3.bf16.msra.mxu0 %v4251_v13  ;;  %v2412_v55 = vadd.f32 %v2404_v60, %v6720_v5  ;;  %v2692_v5 = vld [vmem:[#allocation10 + $0x8] sm:$0xff]  ;;  %v2666_v45 = vsel %vm559_vm0, %v7268_v14, %v4709_v37 }
 0x926   : > { %v4892_v51 = vpop.eup %4891  ;;  %4256 = vmatprep.subr.bf16.mxu0 %v4255_v2  ;;  %v4259_v3 = vpack.c.bf16 %v2692_v5, %v2691_v35  ;;  %v7271_v35 = vld [vmem:[#allocation30_spill] sm:$0xff] }
 0x927   : > { %v2831_v19 = vmul.f32 0.25, %v2412_v55  ;;  %v2406_v38 = vmul.f32 %v4892_v51, %v6847_v61  ;;  %v2695_v61 = vld [vmem:[#allocation10 + $0x20] sm:$0xff]  ;;  %v4727_v55 = vpop.permute.xlu0 %4726 }
 0x929   : > { %4258 = vmatpush3.bf16.msra.mxu0 %v4255_v2  ;;  %2839 = vst [vmem:[%s6882_s1 + $0x20] sm:$0xff] %v2831_v19  ;;  %v2414_v29 = vadd.f32 %v2406_v38, %v6736_v26  ;;  %v4267_v26 = vpack.c.bf16 %v2696_v9, %v2695_v61  ;;  %v7269_v2 = vld [vmem:[#allocation54_spill] sm:$0xff]  ;;  %v4728_v61 = vunpack.i.l.bf16 %v4727_v55 }
 0x92a   : > { %4260 = vmatprep.subr.bf16.mxu0 %v4259_v3  ;;  %v2665_v13 = vsel %vm559_vm0, %v7269_v2, %v4708_v48 }
 0x92b   : > { %v2833_v52 = vmul.f32 0.25, %v2414_v29  ;;  %v7270_v29 = vld [vmem:[#allocation55_spill] sm:$0xff] }
 0x92c   : > { %3876 = vmatmul.mubr.f32.vlgmr.msra.gmra.mrb[56].mxu0 %v2401_v57  ;;  %v2704_v57 = vld [vmem:[#allocation10 + $0x68] sm:$0xff] }
 0x92d   : > { %3878 = vmatprep.mubr.f32.mxu0 %v2402_v46  ;;  %2841 = vst [vmem:[%s6882_s1 + $0x30] sm:$0xff] %v2833_v52  ;;  %4262 = vmatpush3.bf16.msra.mxu0 %v4259_v3  ;;  %v4283_v56 = vpack.c.bf16 %v2704_v57, %v2703_v20  ;;  %v4723_v3 = vunpack.i.l.bf16 %v4722_v33  ;;  %v7272_v57 = vld [vmem:[#allocation57_spill] sm:$0xff] }
 0x92e   : > { %4264 = vmatprep.subr.bf16.mxu0 %v4263_v16 }
 0x930   : > { %3879 = vmatmul.mubr.f32.gmra.mrb[58].mxu0 %v2403_v23 }
 0x931   : > { %3881 = vmatprep.mubr.f32.mxu0 %v2404_v60  ;;  %4266 = vmatpush3.bf16.msra.mxu0 %v4263_v16  ;;  %v4729_v16 = vunpack.i.h.bf16 %v4727_v55 }
 0x932   : > { %4268 = vmatprep.subr.bf16.mxu0 %v4267_v26 }
 0x933   : > { %v2670_v41 = vsel %vm559_vm0, %v7273_v30, %v4729_v16 }
 0x934   : > { %3882 = vmatmul.mubr.f32.gmra.mrb[60].mxu0 %v2405_v8 }
 0x935   : > { %3884 = vmatprep.mubr.f32.mxu0 %v2406_v38  ;;  %4270 = vmatpush3.bf16.msra.mxu0 %v4267_v26 }
 0x936   : > { %4272 = vmatprep.subr.bf16.mxu0 %v4271_v25 }
 0x938   : > { %3885 = vmatmul.mubr.f32.gmra.mrb[62].mxu0 %v2407_v31  ;;  %v4712_v31 = vpop.permute.xlu1 %4711 }
 0x939   : > { %4274 = vmatpush3.bf16.msra.mxu0 %v4271_v25  ;;  %v4714_v24 = vunpack.i.h.bf16 %v4712_v31  ;;  %v4713_v47 = vunpack.i.l.bf16 %v4712_v31 }
 0x93a   : > { %4276 = vmatprep.subr.bf16.mxu0 %v4275_v21 }
 0x93b   : > { %v2675_v60 = vsel %vm2673_vm10, %v2666_v45, %v4714_v24  ;;  %v2674_v51 = vsel %vm2673_vm10, %v2665_v13, %v4713_v47 }
 0x93c   : > { %v4717_v42 = vpop.permute.xlu1 %4716 }
 0x93d   : > { %4278 = vmatpush3.bf16.msra.mxu0 %v4275_v21  ;;  %v4719_v36 = vunpack.i.h.bf16 %v4717_v42  ;;  %v4718_v6 = vunpack.i.l.bf16 %v4717_v42 }
 0x93e   : > { %4280 = vmatprep.subr.bf16.mxu0 %v4279_v11 }
 0x93f   : > { %v2667_v52 = vsel %vm559_vm0, %v7270_v29, %v4718_v6  ;;  %v2668_v5 = vsel %vm559_vm0, %v7271_v35, %v4719_v36 }
 0x940   : > { %v4732_v1 = vpop.permute.xlu1 %4731  ;;  %v2676_v25 = vsel %vm2673_vm10, %v2667_v52, %v4723_v3  ;;  %v2677_v27 = vsel %vm2673_vm10, %v2668_v5, %v4724_v10 }
 0x941   : > { %4282 = vmatpush3.bf16.msra.mxu0 %v4279_v11  ;;  %v4734_v63 = vunpack.i.h.bf16 %v4732_v1  ;;  %v4733_v49 = vunpack.i.l.bf16 %v4732_v1 }
 0x942   : > { %4284 = vmatprep.subr.bf16.mxu0 %v4283_v56 }
 0x945   : > { %4286 = vmatpush3.bf16.msra.mxu0 %v4283_v56  ;;  %v2669_v56 = vsel %vm559_vm0, %v7272_v57, %v4728_v61 }
 0x946   : > { %4288 = vmatprep.subr.bf16.mxu0 %v4287_v12 }
 0x949   : > { %4290 = vmatpush3.bf16.msra.mxu0 %v4287_v12 }
 0x9ff   : > { %v3877_v43 = vpop.f32.mrb[56].mxu0 }
 0xa00   : > { %v2530_v54 = vpop.f32.mrb[57].mxu0 }
 0xa01   : > { %v4735_v15 = vpack.i.bf16 %v3877_v43, %v2530_v54  ;;  %v2678_v54 = vsel %vm2673_vm10, %v2669_v56, %v4733_v49 }
 0xa03   : > { %4736 = vrot.lane.b32.xlu1 %v4735_v15, %s5272_s11  ;;  %v3880_v39 = vpop.f32.mrb[58].mxu0  ;;  %v2679_v15 = vsel %vm2673_vm10, %v2670_v41, %v4734_v63 }
 0xa04   : > { %v2540_v23 = vpop.f32.mrb[59].mxu0 }
 0xa05   : > { %v4740_v53 = vpack.i.bf16 %v3880_v39, %v2540_v23 }
 0xa07   : > { %4741 = vrot.lane.b32.xlu1 %v4740_v53, %s5272_s11  ;;  %v3883_v58 = vpop.f32.mrb[60].mxu0 }
 0xa08   : > { %v2550_v46 = vpop.f32.mrb[61].mxu0 }
 0xa09   : > { %v4750_v59 = vpack.i.bf16 %v3883_v58, %v2550_v46 }
 0xa0b   : > { %4746 = vrot.lane.b32.xlu1 %v7267_v17, %s5274_s22  ;;  %4751 = vrot.lane.b32.xlu0 %v4750_v59, %s5272_s11  ;;  %v3886_v8 = vpop.f32.mrb[62].mxu0  ;;  %v7275_v17 = vld [vmem:[#allocation59_spill] sm:$0xff]  ;;  %s3216_s22 = sshll.u32 %s7210_s24, 3  ;;  %s5073_s24 = scalar_lea.vmem %s6960_s2, 1024 }
 0xa0c   : > { %v2560_v50 = vpop.f32.mrb[63].mxu0  ;;  %p5074_p10 = scmp.ne.s32.totalorder %s6960_s2, %s5073_s24 }
 0xa0d   : > { %v4760_v40 = vpack.i.bf16 %v3886_v8, %v2560_v50  ;;  %v7276_v50 = vld [vmem:[#allocation58_spill] sm:$0xff] }
 0xa0f   : > { %4756 = vrot.lane.b32.xlu0 %v4755_v62, %s5273_s15  ;;  %4761 = vrot.lane.b32.xlu1 %v4760_v40, %s5272_s11  ;;  %s7274_s11 = sld [smem:[#allocation22_spill]]  ;;  %s7277_s15 = sld [smem:[#allocation28_spill]] }
 0xa15   : > { %s3217_s7 = sshll.u32 %s7274_s11, 4  ;;  %p7280_p13 = scmp.ne.s32.totalorder %s7277_s15, 0 }
 0xa16   : > { %s6949_s28 = sadd.s32 %s3217_s7, %s3216_s22  ;;  %s5283_s11 = smov [#allocation12]  }
 0xa17   : > { %s3218_s18 = sshll.u32 %s6949_s28, 7  ;;  %p5075_p11 = pnand %p5074_p10, %p7280_p13 }
 0xa18   : > { %s6957_s5 = scalar_lea.hbm %s7278_s10, %s3218_s18  ;;  %s5077_s22 = sshll.u32 %s5283_s11, 4  ;;  %s5078_s22 = int_to_ptr.vmem [resolvable:$false] %s5077_s22 }
 0xa19   : > { %p5076_p8 = pneg %p5075_p11  ;;  %s5079_s7 = scalar_lea.vmem %s5078_s22, 2048 }
 0xa1a   : > { %p5080_p1 = scmp.lt.s32.totalorder %s6960_s2, %s5078_s22  ;;  %p5081_p7 = scmp.lt.s32.totalorder %s5079_s7, %s5073_s24 }
 0xa1c   : > { %p5082_p9 = por %p5081_p7, %p5080_p1 }
 0xa1e   : > { %p5083_p0 = pnand %p5082_p9, %p5076_p8 }
 0xa75   : > { %v4737_v4 = vpop.permute.xlu1 %4736 }
 0xa76   : > { %v4739_v44 = vunpack.i.h.bf16 %v4737_v4  ;;  %v4738_v62 = vunpack.i.l.bf16 %v4737_v4 }
 0xa78   : > { %v2683_v19 = vsel %vm2682_vm11, %v2674_v51, %v4738_v62  ;;  %v2684_v38 = vsel %vm2682_vm11, %v2675_v60, %v4739_v44 }
 0xa79   : > { %3919 = vmatprep.mubr.f32.mxu0 %v2683_v19  ;;  %v4742_v28 = vpop.permute.xlu1 %4741 }
 0xa7a   : > { %v4744_v9 = vunpack.i.h.bf16 %v4742_v28  ;;  %v4743_v26 = vunpack.i.l.bf16 %v4742_v28  ;;  %3920 = vmatmul.mubr.f32.vlgmr.msra.gmra.mrb[64].mxu0 %v2684_v38 }
 0xa7c   : > { %v2685_v7 = vsel %vm2682_vm11, %v2676_v25, %v4743_v26  ;;  %v2686_v21 = vsel %vm2682_vm11, %v2677_v27, %v4744_v9 }
 0xa7d   : > { %v4747_v32 = vpop.permute.xlu1 %4746  ;;  %3922 = vmatprep.mubr.f32.mxu0 %v2685_v7  ;;  %v4752_v34 = vpop.permute.xlu0 %4751 }
 0xa7e   : > { %v4754_v11 = vunpack.i.h.bf16 %v4752_v34  ;;  %v4753_v20 = vunpack.i.l.bf16 %v4752_v34  ;;  %3923 = vmatmul.mubr.f32.gmra.mrb[66].mxu0 %v2686_v21  ;;  %v4749_v12 = vunpack.i.h.bf16 %v4747_v32  ;;  %v4748_v43 = vunpack.i.l.bf16 %v4747_v32 }
 0xa80   : > { %v2687_v39 = vsel %vm2682_vm11, %v2678_v54, %v4753_v20  ;;  %v2688_v23 = vsel %vm2682_vm11, %v2679_v15, %v4754_v11  ;;  %v2671_v8 = vsel %vm559_vm0, %v7275_v17, %v4748_v43  ;;  %v2672_v40 = vsel %vm559_vm0, %v7276_v50, %v4749_v12 }
 0xa81   : > { %v4757_v53 = vpop.permute.xlu0 %4756  ;;  %3925 = vmatprep.mubr.f32.mxu0 %v2687_v39  ;;  %v4762_v58 = vpop.permute.xlu1 %4761 }
 0xa82   : > { %v4759_v46 = vunpack.i.h.bf16 %v4757_v53  ;;  %v4758_v59 = vunpack.i.l.bf16 %v4757_v53  ;;  %v4764_v0 = vunpack.i.h.bf16 %v4762_v58  ;;  %v4763_v22 = vunpack.i.l.bf16 %v4762_v58  ;;  %3926 = vmatmul.mubr.f32.gmra.mrb[68].mxu0 %v2688_v23 }
 0xa84   : > { %v2680_v18 = vsel %vm2673_vm10, %v2671_v8, %v4758_v59  ;;  %v2681_v31 = vsel %vm2673_vm10, %v2672_v40, %v4759_v46 }
 0xa85   : > { %v2689_v42 = vsel %vm2682_vm11, %v2680_v18, %v4763_v22  ;;  %v2690_v33 = vsel %vm2682_vm11, %v2681_v31, %v4764_v0 }
 0xa86   : > { %3928 = vmatprep.mubr.f32.mxu0 %v2689_v42 }
 0xa87   : > { %3929 = vmatmul.mubr.f32.gmra.mrb[70].mxu0 %v2690_v33 }
 0xa88   : > { %5086 = shalt.err (!%p5083_p0)
}
 0xa89   : > { %s5087_s1 = scalar_lea.hbm %s6957_s5, 1024  ;;  %s5091_s10 = scalar_lea.hbm %s7279_s17, 4096 }
 0xa8a   : > { %p5088_p2 = scmp.ne.s32.totalorder %s6957_s5, %s5087_s1  ;;  %p5092_p12 = scmp.lt.u32.totalorder %s6957_s5, %s7279_s17 }
 0xa8b   : > { %p5093_p6 = scmp.lt.u32.totalorder %s5091_s10, %s5087_s1  ;;  %p5095_p10 = scmp.lt.u32.totalorder %s5087_s1, %s6957_s5 }
 0xa8c   : > { %p5089_p4 = pnand %p5088_p2, %p7280_p13 }
 0xa8d   : > { %p5094_p5 = por %p5093_p6, %p5092_p12 }
 0xa8e   : > { %p5090_p3 = pneg %p5089_p4 }
 0xa8f   : > { %p5096_p11 = por %p5095_p10, %p5094_p5 }
 0xa91   : > { %p5097_p8 = pnand %p5096_p11, %p5090_p3 }
 0xa93   : > { %5100 = shalt.err (!%p5097_p8)
}
 0xa94   : > { %s7146_s24 = smov 128   ;;  %s5285_s7 = smov 8  }
 0xa95   : > { %4304 = dma.vmem_to_hbm [thread:$0]  (%p7280_p13), %s6960_s2, 1024, %s6957_s5, %s2849_s0, %s7146_s24, %s7146_s24, %s5285_s7  }
 0xa96   : > { %s7281_s10 = sld [smem:[#allocation67_spill]]  ;;  %s419_s1 = scalar_lea.vmem [#allocation11], %s5701_s21 }
 0xa97   : > { %s2864_s0 = sshll.u32 %s419_s1, 4  ;;  %s7282_s2 = sld [smem:[#allocation68_spill]]  ;;  %s6993_s0 = int_to_ptr.vmem [resolvable:$true] %s2864_s0 }
 0xa98   : > { %s2844_s22 = scalar_lea.sflag [#allocation4], %s5698_s27  ;;  %s5101_s16 = scalar_lea.vmem %s6993_s0, 1024 }
 0xa99   : > { %p5102_p1 = scmp.ne.s32.totalorder %s6993_s0, %s5101_s16  ;;  %s5286_s19 = smov [#allocation11]  }
 0xa9b   : > { %p5103_p7 = pnand %p5102_p1, %p7280_p13 }
 0xa9c   : > { %v3213_v1 = vld [vmem:[%s7281_s10] ss:$0 sm:$0xff]  ;;  %s5105_s10 = sshll.u32 %s5286_s19, 4  ;;  %s5106_s10 = int_to_ptr.vmem [resolvable:$false] %s5105_s10 }
 0xa9d   : > { %s7000_s11 = scalar_lea.hbm %s7282_s2, %s3218_s18  ;;  %p5104_p9 = pneg %p5103_p7 }
 0xa9e   : > { %s5107_s24 = scalar_lea.vmem %s5106_s10, 2048  ;;  %p5108_p0 = scmp.lt.s32.totalorder %s6993_s0, %s5106_s10 }
 0xa9f   : > { %p5109_p2 = scmp.lt.s32.totalorder %s5107_s24, %s5101_s16 }
 0xaa1   : > { %p5110_p4 = por %p5109_p2, %p5108_p0 }
 0xaa3   : > { %p5111_p3 = pnand %p5110_p4, %p5104_p9 }
 0xb4d   : > { %v3921_v37 = vpop.f32.mrb[64].mxu0 }
 0xb4e   : > { %v2786_v48 = vadd.f32 %v3921_v37, %v3213_v1  ;;  %v2780_v24 = vpop.f32.mrb[65].mxu0 }
 0xb4f   : > { %v2781_v47 = vadd.f32 %v3213_v1, %v2780_v24 }
 0xb50   : > { %2820 = vst [vmem:[%s419_s1 + $0x8] sm:$0xff] %v2786_v48 }
 0xb51   : > { %2819 = vst [vmem:[%s419_s1] sm:$0xff] %v2781_v47  ;;  %v3924_v36 = vpop.f32.mrb[66].mxu0 }
 0xb52   : > { %v2796_v6 = vadd.f32 %v3924_v36, %v3213_v1  ;;  %v2790_v4 = vpop.f32.mrb[67].mxu0 }
 0xb53   : > { %v2791_v14 = vadd.f32 %v3213_v1, %v2790_v4 }
 0xb54   : > { %2822 = vst [vmem:[%s419_s1 + $0x18] sm:$0xff] %v2796_v6 }
 0xb55   : > { %2821 = vst [vmem:[%s419_s1 + $0x10] sm:$0xff] %v2791_v14  ;;  %v3927_v45 = vpop.f32.mrb[68].mxu0 }
 0xb56   : > { %v2806_v44 = vadd.f32 %v3927_v45, %v3213_v1  ;;  %v2800_v62 = vpop.f32.mrb[69].mxu0 }
 0xb57   : > { %v2801_v2 = vadd.f32 %v3213_v1, %v2800_v62 }
 0xb58   : > { %2824 = vst [vmem:[%s419_s1 + $0x28] sm:$0xff] %v2806_v44 }
 0xb59   : > { %2823 = vst [vmem:[%s419_s1 + $0x20] sm:$0xff] %v2801_v2 }
 0xb5a   : > { %v3930_v13 = vpop.f32.mrb[70].mxu0 }
 0xb5b   : > { %v2816_v60 = vadd.f32 %v3930_v13, %v3213_v1  ;;  %v2810_v55 = vpop.f32.mrb[71].mxu0 }
 0xb5c   : > { %v2811_v51 = vadd.f32 %v3213_v1, %v2810_v55 }
 0xb5d   : > { %2826 = vst [vmem:[%s419_s1 + $0x38] sm:$0xff] %v2816_v60 }
 0xb5e   : > { %2825 = vst [vmem:[%s419_s1 + $0x30] sm:$0xff] %v2811_v51 }
 0xb5f   : > { %5114 = shalt.err (!%p5111_p3)
}
 0xb60   : > { %s5115_s28 = scalar_lea.hbm %s7000_s11, 1024  ;;  %s5119_s21 = scalar_lea.hbm %s7282_s2, 4096 }
 0xb61   : > { %p5116_p12 = scmp.ne.s32.totalorder %s7000_s11, %s5115_s28  ;;  %p5120_p10 = scmp.lt.u32.totalorder %s7000_s11, %s7282_s2 }
 0xb62   : > { %p5121_p11 = scmp.lt.u32.totalorder %s5119_s21, %s5115_s28  ;;  %p5123_p1 = scmp.lt.u32.totalorder %s5115_s28, %s7000_s11 }
 0xb63   : > { %p5117_p6 = pnand %p5116_p12, %p7280_p13 }
 0xb64   : > { %p5122_p8 = por %p5121_p11, %p5120_p10 }
 0xb65   : > { %p5118_p5 = pneg %p5117_p6 }
 0xb66   : > { %p5124_p7 = por %p5123_p1, %p5122_p8 }
 0xb68   : > { %p5125_p9 = pnand %p5124_p7, %p5118_p5 }
 0xb6a   : > { %5128 = shalt.err (!%p5125_p9)
}
 0xb6b   : > { %s7283_s24 = smov 128  }
 0xb6c   : > { %4303 = dma.vmem_to_hbm [thread:$0]  (%p7280_p13), %s6993_s0, 1024, %s7000_s11, %s2844_s22, %s7283_s24, %s7283_s24, %s5285_s7  }
 0xb6d PF: > { %p4334_p0 = scmp.ge.s32.totalorder %s5263_s14, 2  ;;  %s2897_s16 = sand.u32 1, %s5235_s30  }
 0xb6e   : > { %p7284_p2 = scmp.ne.s32.totalorder %s7181_s4, 0  ;;  %s2898_s10 = scalar_lea.sflag [#allocation4], %s2897_s16 }
 0xb70   : > { %p4325_p4 = pnand %p4334_p0, %p7284_p2 }
 0xb72   : > { %5202 = dma.done.wait (!%p4325_p4), %s2898_s10, 1024  }
 0xb73   : > { %5204 = vsyncadd (!%p4325_p4), %s2898_s10, 4294966272  ;;  %s2907_s15 = scalar_lea.sflag [#allocation13], %s2897_s16 }
 0xb74   : > { %5206 = dma.done.wait (!%p4325_p4), %s2907_s15, 1024  }
 0xb75   : > { %5208 = vsyncadd (!%p4325_p4), %s2907_s15, 4294966272  ;;  %s31_s14 = sadd.s32 1, %s5263_s14   ;;  %s7286_s7 = sld [smem:[#allocation20_spill]] }
 0xb76   : > { %p7034_p3 = scmp.ge.s32.totalorder %s31_s14, 6   ;;  %s7287_s4 = sld [smem:[#allocation25_spill]] }
 0xb77   : > { %s7288_s0 = sld [smem:[#allocation26_spill]]  ;;  %s7290_s24 = smov %s5215_s25 }
 0xb78   : > { %s7291_s25 = smov %s5219_s26  ;;  %s7292_s26 = smov %s5636_s23 }
 0xb79   : > { %s7294_s28 = smov %s5231_s29  ;;  %s7295_s29 = smov %s5568_s20 }
 0xb7a   : > { %s7296_s30 = smov %s5239_s8  ;;  %s7297_s8 = smov %s5243_s9 }
 0xb7b   : > { %s7293_s27 = smov %s7286_s7  ;;  %s7298_s9 = smov %s5571_s6 }
 0xb7c   : > { %s7299_s10 = smov %s5255_s12  ;;  %s7300_s11 = smov %s5259_s13 }
 0xb7d   : > { %s7301_s12 = smov %s7287_s4  ;;  %s7302_s13 = smov %s7288_s0 }
 0xb7e   :  { %30 = sbr.rel (!%p7034_p3) target bundleno = 23 (0x17), region = 133 }
 0xb85   :  { %2912 = vsyncpa [#allocation3], 1 }
 0xb86   :  { %2914 = vsyncpa [#allocation3 + $0x1], 1 }
 0xb87   :  { %2915 = vsyncpa [#allocation6], 1 }
 0xb88   :  { %2916 = vsyncpa [#allocation9], 1 }
 0xb89   :  { %2918 = vsyncpa [#allocation9 + $0x1], 1 }
 0xb8a   :  { %2919 = vsyncpa [#allocation4], 1 }
 0xb8b   :  { %2921 = vsyncpa [#allocation4 + $0x1], 1 }
 0xb8c   :  { %2922 = vsyncpa [#allocation13], 1 }
 0xb8d   :  { %2924 = vsyncpa [#allocation13 + $0x1], 1 }

// kernel: tpu_custom_call.1
= control target key start
LH: loop header
LB: loop body
LE: loop exit
PB: predicated region body
PF: predicated region fallthrough
CT: control target
= control target key end

     0   :  { %s7228_s0 = inlined_call_operand.hbm [shape: f32[2,128,128], index: 0, kind: input, shape index: {}]   ;;  %s7229_s1 = inlined_call_operand.hbm [shape: f32[2,128,128], index: 1, kind: input, shape index: {}]   ;;  %s7230_s2 = inlined_call_operand.hbm [shape: f32[2,128,128], index: 2, kind: input, shape index: {}]   ;;  %s7231_s3 = inlined_call_operand.hbm [shape: f32[2,32,128], index: 3, kind: input, shape index: {}]   ;;  %s7232_s4 = inlined_call_operand.hbm [shape: f32[128,128], index: 4, kind: input, shape index: {}]   ;;  %s7233_s5 = inlined_call_operand.vmem [shape: f32[1,128], index: 5, kind: input, shape index: {}]   ;;  %s7234_s6 = inlined_call_operand.hbm [shape: f32[2,128,128], index: 6, kind: output, shape index: {0}]   ;;  %s7235_s7 = inlined_call_operand.hbm [shape: f32[2,128,128], index: 7, kind: output, shape index: {1}]  }
   0x1   :  { %7295 = sst [smem:[#allocation69_spill]] %s7229_s1 }
   0x2   :  { %7296 = sst [smem:[#allocation70_spill]] %s7231_s3 }
   0x3   :  { %7297 = sst [smem:[#allocation71_spill]] %s7232_s4 }
   0x4   :  { %7298 = sst [smem:[#allocation72_spill]] %s7233_s5 }
   0x5   :  { %7299 = sst [smem:[#allocation73_spill]] %s7234_s6 }
   0x6   :  { %7300 = sst [smem:[#allocation74_spill]] %s7235_s7 }
   0x7   :  { %13 = vsyncpa [#allocation3], 0 }
   0x8   :  { %15 = vsyncpa [#allocation3 + $0x1], 0 }
   0x9   :  { %16 = vsyncpa [#allocation6], 0 }
   0xa   :  { %18 = vsyncpa [#allocation6 + $0x1], 0 }
   0xb   :  { %19 = vsyncpa [#allocation9], 0 }
   0xc   :  { %21 = vsyncpa [#allocation9 + $0x1], 0 }
   0xd   :  { %22 = vsyncpa [#allocation4], 0 }
   0xe   :  { %24 = vsyncpa [#allocation4 + $0x1], 0 }
   0xf   :  { %25 = vsyncpa [#allocation13], 0 }
  0x10   :  { %27 = vsyncpa [#allocation13 + $0x1], 0  ;;  %s5381_s24 = smov 0   ;;  %s5383_s25 = smov 0  }
  0x11   :  { %s5385_s26 = smov 0   ;;  %s5387_s27 = smov 0  }
  0x12   :  { %s5389_s28 = smov 0   ;;  %s5391_s29 = smov 0  }
  0x13   :  { %s5393_s30 = smov 0   ;;  %s5395_s8 = smov 0  }
  0x14   :  { %s5397_s9 = smov 0   ;;  %s5399_s10 = smov 0  }
  0x15   :  { %s5401_s11 = smov 0   ;;  %s5403_s12 = smov 0  }
  0x16   :  { %s5405_s13 = smov 0   ;;  %s5407_s14 = smov 0  }
  0x17 LB: > { %7301 = sst [smem:[#allocation20_spill]] %s5265_s24  ;;  %s5452_s15 = sadd.s32 4294967295, %s5317_s14   ;;  %s5317_s14 = sphi %s5407_s14, %s33_s14   ;;  %s5313_s13 = sphi %s5405_s13, %s7463_s13   ;;  %s5309_s12 = sphi %s5403_s12, %s7462_s12   ;;  %s5305_s11 = sphi %s5401_s11, %s7461_s11   ;;  %s5301_s10 = sphi %s5399_s10, %s7460_s10   ;;  %s5297_s9 = sphi %s5397_s9, %s7459_s9   ;;  %s5293_s8 = sphi %s5395_s8, %s7458_s8   ;;  %s5289_s30 = sphi %s5393_s30, %s7457_s30   ;;  %s5285_s29 = sphi %s5391_s29, %s7456_s29   ;;  %s5281_s28 = sphi %s5389_s28, %s7455_s28   ;;  %s5277_s27 = sphi %s5387_s27, %s7448_s27   ;;  %s5273_s26 = sphi %s5385_s26, %s7454_s26   ;;  %s5269_s25 = sphi %s5383_s25, %s7453_s25   ;;  %s5265_s24 = sphi %s5381_s24, %s7447_s24  }
  0x18   : > { %7302 = sst [smem:[#allocation21_spill]] %s5269_s25  ;;  %p3116_p0 = scmp.ge.s32.totalorder %s5317_s14, 1 }
  0x19   : > { %7303 = sst [smem:[#allocation22_spill]] %s5281_s28  ;;  %p7238_p1 = scmp.eq.s32.totalorder %s5452_s15, 0 }
  0x1a   : > { %7304 = sst [smem:[#allocation23_spill]] %s5289_s30  ;;  %p254_p3 = scmp.lt.s32.totalorder %s5317_s14, 5 }
  0x1b   : > { %7305 = sst [smem:[#allocation24_spill]] %s5293_s8  ;;  %s5319_s17 = smov [#allocation10]  }
  0x1c   : > { %7306 = sst [smem:[#allocation25_spill]] %s5301_s10  ;;  %p5458_p4 = pnand %p3116_p0, %p254_p3 }
  0x1d   : > { %7307 = sst [smem:[#allocation26_spill]] %s5305_s11  ;;  %s266_s18 = sshll.u32 %s5319_s17, 4  ;;  %s267_s18 = int_to_ptr.vmem [resolvable:$true] %s266_s18 }
  0x1e   : > { %7308 = sst [smem:[#allocation27_spill]] %s5452_s15  ;;  %p4363_p5 = pneg %p5458_p4 }
  0x1f   : > { %s7309_s16 = scalar_select %p5458_p4, 1, 0 }
  0x20   : > { %p5466_p6 = pnand %p4363_p5, %p7238_p1  ;;  %s7312_s4 = sld [smem:[#allocation71_spill]] }
  0x21   : > { %7310 = sst [smem:[#allocation28_spill]] %s7309_s16 }
  0x22   : > { %p4981_p8 = pneg %p5466_p6 }
  0x26   : > { %s4979_s22 = scalar_lea.hbm %s7312_s4, 2048 }
  0x27   : > { %p4980_p7 = scmp.ne.s32.totalorder %s7312_s4, %s4979_s22  ;;  %p4986_p11 = scmp.lt.u32.totalorder %s4979_s22, %s7312_s4 }
  0x29   : > { %p4982_p9 = pnand %p4981_p8, %p4980_p7 }
  0x2b   : > { %p4983_p10 = pneg %p4982_p9 }
  0x2d   : > { %p4988_p12 = pnand %p4986_p11, %p4983_p10 }
  0x2f   : > { %4991 = shalt.err (!%p4988_p12)
}
  0x30   : > { %s4992_s7 = scalar_lea.vmem %s267_s18, 2048  ;;  %p5000_p5 = scmp.lt.s32.totalorder %s267_s18, %s267_s18 }
  0x31   : > { %p4993_p13 = scmp.ne.s32.totalorder %s267_s18, %s4992_s7  ;;  %p5001_p2 = scmp.lt.s32.totalorder %s4992_s7, %s4992_s7 }
  0x33   : > { %p4995_p0 = pnand %p4993_p13, %p4981_p8  ;;  %p5002_p1 = por %p5001_p2, %p5000_p5 }
  0x35   : > { %p4996_p3 = pneg %p4995_p0 }
  0x37   : > { %p5003_p4 = pnand %p5002_p1, %p4996_p3 }
  0x39   : > { %5006 = shalt.err (!%p5003_p4)
}
  0x3a   : > { %s7242_s6 = smov 128   ;;  %s7244_s5 = smov 8  }
  0x3b   : > { %4366 = dma.hbm_to_vmem [thread:$0]  (!%p5466_p6), %s7312_s4, 2048, %s267_s18, [#allocation9], %s7242_s6, %s7242_s6, %s7244_s5  }
  0x3c   : > { %p7247_p1 = scmp.eq.s32.totalorder %s5317_s14, 0  ;;  %p87_p2 = scmp.ne.s32.totalorder %s5285_s29, %s5281_s28 }
  0x3d   : > { %p93_p4 = scmp.ne.s32.totalorder %s5281_s28, %s5277_s27  ;;  %p7246_p7 = scmp.lt.s32.totalorder %s5317_s14, 4 }
  0x3e   : > { %p89_p8 = por %p87_p2, %p7247_p1  ;;  %s7248_s23 = sand.u32 1, %s5317_s14  }
  0x3f   : > { %p7313_p9 = scmp.eq.s32.totalorder %s5452_s15, 0  ;;  %s308_s17 = sand.u32 1, %s5285_s29  }
  0x40   : > { %s7241_s11 = sshll.u32 %s5313_s13, 11  ;;  %s5508_s10 = sshll.u32 %s308_s17, 7 }
  0x41   : > { %p5502_p10 = por %p93_p4, %p7313_p9  ;;  %s7316_s1 = sld [smem:[#allocation69_spill]] }
  0x42   : > { %p5519_p6 = pnand %p7246_p7, %p89_p8  ;;  %s310_s17 = scalar_lea.vmem [#allocation5], %s5508_s10 }
  0x43   : > { %s7314_s19 = scalar_select %p5502_p10, 1, 0 }
  0x44   : > { %s317_s22 = sshll.u32 %s310_s17, 4  ;;  %s5528_s18 = scalar_lea.sflag [#allocation6], %s7248_s23  ;;  %s5524_s22 = int_to_ptr.vmem [resolvable:$true] %s317_s22 }
  0x45   : > { %7315 = sst [smem:[#allocation29_spill]] %s7314_s19  ;;  %p5009_p12 = pneg %p5519_p6 }
  0x47   : > { %s5515_s20 = scalar_lea.hbm %s7316_s1, %s7241_s11  ;;  %s5012_s6 = scalar_lea.hbm %s7316_s1, 4096 }
  0x48   : > { %s5007_s7 = scalar_lea.hbm %s5515_s20, 2048  ;;  %p5013_p3 = scmp.lt.u32.totalorder %s5515_s20, %s7316_s1 }
  0x49   : > { %p5008_p11 = scmp.ne.s32.totalorder %s5515_s20, %s5007_s7  ;;  %p5014_p5 = scmp.lt.u32.totalorder %s5012_s6, %s5007_s7 }
  0x4a   : > { %p5016_p4 = scmp.lt.u32.totalorder %s5007_s7, %s5515_s20 }
  0x4b   : > { %p5010_p13 = pnand %p5009_p12, %p5008_p11  ;;  %p5015_p2 = por %p5014_p5, %p5013_p3 }
  0x4d   : > { %p5011_p0 = pneg %p5010_p13  ;;  %p5017_p8 = por %p5016_p4, %p5015_p2 }
  0x4f   : > { %p5018_p9 = pnand %p5017_p8, %p5011_p0 }
  0x51   : > { %5021 = shalt.err (!%p5018_p9)
}
  0x52   : > { %s5022_s17 = scalar_lea.vmem %s5524_s22, 2048  ;;  %s5322_s11 = smov [#allocation5]  }
  0x53   : > { %p5023_p11 = scmp.ne.s32.totalorder %s5524_s22, %s5022_s17  ;;  %s5027_s21 = sshll.u32 %s5322_s11, 4  ;;  %s5028_s21 = int_to_ptr.vmem [resolvable:$false] %s5027_s21 }
  0x54   : > { %s5029_s4 = scalar_lea.vmem %s5028_s21, 4096  ;;  %p5030_p1 = scmp.lt.s32.totalorder %s5524_s22, %s5028_s21 }
  0x55   : > { %p5025_p13 = pnand %p5023_p11, %p5009_p12  ;;  %p5031_p3 = scmp.lt.s32.totalorder %s5029_s4, %s5022_s17 }
  0x57   : > { %p5026_p7 = pneg %p5025_p13  ;;  %p5032_p5 = por %p5031_p3, %p5030_p1 }
  0x59   : > { %p5033_p2 = pnand %p5032_p5, %p5026_p7 }
  0x5b   : > { %5036 = shalt.err (!%p5033_p2)
}
  0x5c   : > { %s7318_s6 = smov 8   ;;  %s7319_s5 = smov 128  }
  0x5d   : > { %4373 = dma.hbm_to_vmem [thread:$0]  (!%p5519_p6), %s5515_s20, 2048, %s5524_s22, %s5528_s18, %s7319_s5, %s7319_s5, %s7318_s6  }
  0x5e   : > { %s7320_s7 = sshll.u32 %s5313_s13, 11  ;;  %s331_s4 = scalar_lea.vmem [#allocation7], %s5508_s10 }
  0x5f   : > { %s5564_s21 = scalar_lea.hbm %s7230_s2, %s7320_s7  ;;  %s338_s23 = sshll.u32 %s331_s4, 4  ;;  %s5567_s23 = int_to_ptr.vmem [resolvable:$true] %s338_s23 }
  0x60   : > { %s3115_s1 = sadd.s32 4294967294, %s5317_s14   ;;  %s42_s19 = sadd.s32 1, %s5309_s12 }
  0x61   : > { %p43_p1 = scmp.ge.s32.totalorder %s42_s19, 2  ;;  %s54_s22 = sadd.s32 1, %s5297_s9 }
  0x62   : > { %p61_p7 = scmp.ne.s32.totalorder %s5297_s9, %s5293_s8  ;;  %p67_p0 = scmp.ne.s32.totalorder %s5293_s8, %s5289_s30 }
  0x63   : > { %s7465_s19 = smov (%p43_p1, %s42_s19), 0  ;;  %s7322_s20 = sadd.s32 1, %s5313_s13 }
  0x64   : > { %7321 = sst [smem:[#allocation30_spill]] %s7465_s19  ;;  %s7467_s20 = smov (!%p43_p1, %s7322_s20), %s5313_s13 }
  0x65   : > { %s5583_s10 = ssub.s32 %s5309_s12, %s7465_s19  ;;  %p7323_p4 = scmp.eq.s32.totalorder %s5317_s14, 0 }
  0x66   : > { %p47_p9 = scmp.ge.s32.totalorder %s7467_s20, 2  ;;  %p7325_p11 = scmp.eq.s32.totalorder %s5452_s15, 0 }
  0x67   : > { %p5587_p8 = por %p7323_p4, %p61_p7  ;;  %p7328_p5 = scmp.eq.s32.totalorder %s5452_s15, 3 }
  0x68   : > { %p5596_p13 = por %p7325_p11, %p67_p0  ;;  %s7469_s20 = smov (%p47_p9, %s7467_s20), 0 }
  0x69   : > { %p5603_p2 = por %p7328_p5, %p61_p7  ;;  %7331 = sst [smem:[#allocation33_spill]] %s7469_s20 }
  0x6a   : > { %s7326_s17 = scalar_select %p5596_p13, 1, 0 }
  0x6b   : > { %s7329_s11 = scalar_select %p5603_p2, 1, 0 }
  0x6c   : > { %7327 = sst [smem:[#allocation31_spill]] %s7326_s17  ;;  %p219_p1 = scmp.eq.s32.totalorder %s3115_s1, 3 }
  0x6d   : > { %7330 = sst [smem:[#allocation32_spill]] %s7329_s11  ;;  %s283_s4 = sand.u32 1, %s5297_s9  }
  0x6e   : > { %s49_s19 = ssub.s32 %s5313_s13, %s7469_s20  ;;  %p5616_p3 = por %p219_p1, %p67_p0 }
  0x6f   : > { %s51_s28 = sor.u32 %s5583_s10, %s49_s19  ;;  %p78_p4 = scmp.eq.s32.totalorder %s49_s19, 0 }
  0x70   : > { %p52_p11 = scmp.eq.s32.totalorder %s51_s28, 0  ;;  %s7334_s11 = sadd.s32 1, %s5285_s29 }
  0x71   : > { %s7332_s17 = scalar_select %p5616_p3, 1, 0 }
  0x72   : > { %s5623_s16 = scalar_select %p78_p4, %s5285_s29, %s7334_s11  }
  0x73   : > { %7333 = sst [smem:[#allocation34_spill]] %s7332_s17  ;;  %s3119_s1 = sshll.u32 %s283_s4, 6 }
  0x74   : > { %s5626_s3 = scalar_select %p52_p11, %s5297_s9, %s54_s22  }
  0x75   : > { %s3120_s20 = sshll.u32 %s5309_s12, 3  ;;  %s3121_s15 = sshll.u32 %s5313_s13, 4 }
  0x76   : > { %s293_s19 = sadd.s32 %s3121_s15, %s3120_s20  ;;  %s287_s24 = scalar_lea.vmem [#allocation2], %s3119_s1 }
  0x77   : > { %s296_s28 = sshll.u32 %s287_s24, 4  ;;  %s3122_s30 = sshll.u32 %s293_s19, 7  ;;  %s5632_s28 = int_to_ptr.vmem [resolvable:$true] %s296_s28 }
  0x78   : > { %s5637_s17 = scalar_lea.hbm %s7228_s0, %s3122_s30  ;;  %p7335_p7 = scmp.lt.s32.totalorder %s5317_s14, 4 }
  0x79   : > { %s5037_s11 = scalar_lea.hbm %s5564_s21, 2048  ;;  %s5042_s20 = scalar_lea.hbm %s7230_s2, 4096 }
  0x7a   : > { %p5643_p0 = pnand %p7335_p7, %p5587_p8  ;;  %p5038_p9 = scmp.ne.s32.totalorder %s5564_s21, %s5037_s11 }
  0x7b   : > { %p5043_p4 = scmp.lt.u32.totalorder %s5564_s21, %s7230_s2  ;;  %p5044_p11 = scmp.lt.u32.totalorder %s5042_s20, %s5037_s11 }
  0x7c   : > { %p5040_p5 = pnand %p5038_p9, %p5009_p12  ;;  %p5046_p8 = scmp.lt.u32.totalorder %s5037_s11, %s5564_s21 }
  0x7d   : > { %p5045_p3 = por %p5044_p11, %p5043_p4 }
  0x7e   : > { %p5041_p1 = pneg %p5040_p5 }
  0x7f   : > { %p5047_p7 = por %p5046_p8, %p5045_p3 }
  0x81   : > { %p5048_p2 = pnand %p5047_p7, %p5041_p1 }
  0x83   : > { %5051 = shalt.err (!%p5048_p2)
}
  0x84   : > { %s5052_s30 = scalar_lea.vmem %s5567_s23, 2048  ;;  %s5323_s8 = smov [#allocation7]  }
  0x85   : > { %p5053_p9 = scmp.ne.s32.totalorder %s5567_s23, %s5052_s30  ;;  %s5057_s7 = sshll.u32 %s5323_s8, 4  ;;  %s5058_s7 = int_to_ptr.vmem [resolvable:$false] %s5057_s7 }
  0x86   : > { %s5059_s19 = scalar_lea.vmem %s5058_s7, 4096  ;;  %p5060_p13 = scmp.lt.s32.totalorder %s5567_s23, %s5058_s7 }
  0x87   : > { %p5055_p5 = pnand %p5053_p9, %p5009_p12  ;;  %p5061_p4 = scmp.lt.s32.totalorder %s5059_s19, %s5052_s30 }
  0x89   : > { %p5056_p10 = pneg %p5055_p5  ;;  %p5062_p11 = por %p5061_p4, %p5060_p13 }
  0x8b   : > { %p5063_p3 = pnand %p5062_p11, %p5056_p10 }
  0x8d   : > { %5066 = shalt.err (!%p5063_p3)
}
  0x8e   : > { %4376 = dma.hbm_to_vmem [thread:$0]  (!%p5519_p6), %s5564_s21, 2048, %s5567_s23, %s5528_s18, %s7319_s5, %s7319_s5, %s7318_s6  }
  0x8f   : > { %s5676_s11 = scalar_lea.sflag [#allocation3], %s283_s4  ;;  %s5067_s24 = scalar_lea.hbm %s5637_s17, 1024 }
  0x90   : > { %p5068_p10 = scmp.ne.s32.totalorder %s5637_s17, %s5067_s24  ;;  %p5069_p12 = pneg %p5643_p0 }
  0x91   : > { %s5072_s20 = scalar_lea.hbm %s7228_s0, 4096  ;;  %p5073_p1 = scmp.lt.u32.totalorder %s5637_s17, %s7228_s0 }
  0x92   : > { %p5070_p13 = pnand %p5069_p12, %p5068_p10  ;;  %p5074_p6 = scmp.lt.u32.totalorder %s5072_s20, %s5067_s24 }
  0x93   : > { %p5076_p7 = scmp.lt.u32.totalorder %s5067_s24, %s5637_s17 }
  0x94   : > { %p5071_p2 = pneg %p5070_p13  ;;  %p5075_p8 = por %p5074_p6, %p5073_p1 }
  0x96   : > { %p5077_p9 = por %p5076_p7, %p5075_p8 }
  0x98   : > { %p5078_p5 = pnand %p5077_p9, %p5071_p2 }
  0x9a   : > { %5081 = shalt.err (!%p5078_p5)
}
  0x9b   : > { %s5082_s23 = scalar_lea.vmem %s5632_s28, 1024  ;;  %s5324_s18 = smov [#allocation2]  }
  0x9c   : > { %p5083_p4 = scmp.ne.s32.totalorder %s5632_s28, %s5082_s23  ;;  %s5087_s21 = sshll.u32 %s5324_s18, 4  ;;  %s5088_s21 = int_to_ptr.vmem [resolvable:$false] %s5087_s21 }
  0x9d   : > { %s5089_s4 = scalar_lea.vmem %s5088_s21, 2048  ;;  %p5090_p10 = scmp.lt.s32.totalorder %s5632_s28, %s5088_s21 }
  0x9e   : > { %p5085_p11 = pnand %p5083_p4, %p5069_p12  ;;  %p5091_p13 = scmp.lt.s32.totalorder %s5089_s4, %s5082_s23 }
  0xa0   : > { %p5086_p3 = pneg %p5085_p11  ;;  %p5092_p1 = por %p5091_p13, %p5090_p10 }
  0xa2   : > { %p5093_p6 = pnand %p5092_p1, %p5086_p3 }
  0xa4   : > { %5096 = shalt.err (!%p5093_p6)
}
  0xa5   : > { %s7337_s30 = sld [smem:[#allocation21_spill]]  ;;  %s7338_s8 = sld [smem:[#allocation20_spill]] }
  0xa6   : > { %s7339_s7 = sld [smem:[#allocation27_spill]]  ;;  %s132_s22 = sadd.s32 1, %s5273_s26 }
  0xa7   : > { %4370 = dma.hbm_to_vmem [thread:$0]  (!%p5643_p0), %s5637_s17, 1024, %s5632_s28, %s5676_s11, %s7319_s5, %s7319_s5, %s7318_s6  }
  0xa8   : > { %p7340_p12 = scmp.eq.s32.totalorder %s5583_s10, 0  ;;  %s350_s24 = sand.u32 1, %s5273_s26  }
  0xa9   : > { %s3282_s27 = sshll.u32 %s5309_s12, 9  ;;  %p7341_p7 = scmp.eq.s32.totalorder %s5317_s14, 0 }
  0xaa   : > { %s5711_s19 = scalar_select %p7340_p12, %s5273_s26, %s132_s22  }
  0xab   : > { %p139_p2 = scmp.ne.s32.totalorder %s5273_s26, %s7337_s30  ;;  %p145_p8 = scmp.ne.s32.totalorder %s7337_s30, %s7338_s8 }
  0xac   : > { %p7342_p5 = scmp.eq.s32.totalorder %s7339_s7, 0  ;;  %s3129_s20 = sshll.u32 %s350_s24, 5 }
  0xad   : > { %p141_p9 = por %p139_p2, %p7341_p7  ;;  %s7344_s23 = sld [smem:[#allocation70_spill]] }
  0xae   : > { %p5723_p4 = por %p145_p8, %p7342_p5  ;;  %p7345_p0 = scmp.lt.s32.totalorder %s5317_s14, 4 }
  0xaf   : > { %s352_s28 = scalar_lea.vmem [#allocation8], %s3129_s20  ;;  %s7347_s18 = sand.u32 1, %s5317_s14  }
  0xb0   : > { %p5734_p11 = pnand %p7345_p0, %p141_p9  ;;  %s359_s11 = sshll.u32 %s352_s28, 4  ;;  %s5738_s11 = int_to_ptr.vmem [resolvable:$true] %s359_s11 }
  0xb1   : > { %s5742_s21 = scalar_lea.sflag [#allocation9], %s7347_s18 }
  0xb2   : > { %p5099_p10 = pneg %p5734_p11 }
  0xb3   : > { %s5730_s17 = scalar_lea.hbm %s7344_s23, %s3282_s27  ;;  %s5102_s7 = scalar_lea.hbm %s7344_s23, 1024 }
  0xb4   : > { %s5097_s4 = scalar_lea.hbm %s5730_s17, 512  ;;  %p5103_p6 = scmp.lt.u32.totalorder %s5730_s17, %s7344_s23 }
  0xb5   : > { %p5098_p3 = scmp.ne.s32.totalorder %s5730_s17, %s5097_s4  ;;  %p5104_p12 = scmp.lt.u32.totalorder %s5102_s7, %s5097_s4 }
  0xb6   : > { %p5106_p8 = scmp.lt.u32.totalorder %s5097_s4, %s5730_s17 }
  0xb7   : > { %p5100_p13 = pnand %p5099_p10, %p5098_p3  ;;  %p5105_p2 = por %p5104_p12, %p5103_p6 }
  0xb9   : > { %p5101_p1 = pneg %p5100_p13  ;;  %p5107_p7 = por %p5106_p8, %p5105_p2 }
  0xbb   : > { %p5108_p9 = pnand %p5107_p7, %p5101_p1 }
  0xbd   : > { %5111 = shalt.err (!%p5108_p9)
}
  0xbe   : > { %s5112_s27 = scalar_lea.vmem %s5738_s11, 512  ;;  %s5325_s20 = smov [#allocation8]  }
  0xbf   : > { %p5113_p5 = scmp.ne.s32.totalorder %s5738_s11, %s5112_s27  ;;  %s5117_s1 = sshll.u32 %s5325_s20, 4  ;;  %s5118_s1 = int_to_ptr.vmem [resolvable:$false] %s5117_s1 }
  0xc0   : > { %s5119_s25 = scalar_lea.vmem %s5118_s1, 1024  ;;  %p5120_p13 = scmp.lt.s32.totalorder %s5738_s11, %s5118_s1 }
  0xc1   : > { %p5115_p0 = pnand %p5113_p5, %p5099_p10  ;;  %p5121_p6 = scmp.lt.s32.totalorder %s5119_s25, %s5112_s27 }
  0xc3   : > { %p5116_p3 = pneg %p5115_p0  ;;  %p5122_p12 = por %p5121_p6, %p5120_p13 }
  0xc5   : > { %p5123_p2 = pnand %p5122_p12, %p5116_p3 }
  0xc7   : > { %5126 = shalt.err (!%p5123_p2)
}
  0xc8   : > { %4379 = dma.hbm_to_vmem [thread:$0]  (!%p5734_p11), %s5730_s17, 512, %s5738_s11, %s5742_s21, %s7319_s5, %s7319_s5, %s7318_s6  }
  0xc9   : > { %s7348_s28 = sld [smem:[#allocation28_spill]] }
  0xcf   : > { %p7349_p10 = scmp.ne.s32.totalorder %s7348_s28, 0 }
  0xd1   : > { %371 = sbr.rel (%p7349_p10) target bundleno = 2940 (0xb7c), region = 44 }
  0xd8   : > { %s7350_s18 = sld [smem:[#allocation24_spill]]  ;;  %s7351_s4 = sld [smem:[#allocation31_spill]] }
  0xde   : > { %s5776_s30 = sand.u32 1, %s7350_s18   ;;  %p7352_p1 = scmp.ne.s32.totalorder %s7351_s4, 0 }
  0xdf   : > { %s5779_s8 = sshll.u32 %s5776_s30, 6  ;;  %s374_s10 = scalar_lea.sflag [#allocation3], %s5776_s30 }
  0xe0   : > { %s5783_s7 = scalar_lea.vmem [#allocation2], %s5779_s8 }
  0xe1   : > { %5240 = dma.done.wait (%p7352_p1), %s374_s10, 1024  }
  0xe2   : > { %5242 = vsyncadd (%p7352_p1), %s374_s10, 4294966272  ;;  %s7353_s6 = sld [smem:[#allocation27_spill]]  ;;  %s7355_s17 = sld [smem:[#allocation29_spill]] }
  0xe3   : > { %s7354_s5 = sld [smem:[#allocation22_spill]] }
  0xe8   : > { %s382_s11 = sand.u32 1, %s7353_s6   ;;  %p7356_p11 = scmp.ne.s32.totalorder %s7355_s17, 0 }
  0xe9   : > { %s384_s21 = sand.u32 1, %s7354_s5   ;;  %s383_s24 = scalar_lea.sflag [#allocation6], %s382_s11 }
  0xea   : > { %s3134_s22 = sshll.u32 %s384_s21, 7 }
  0xeb   : > { %s5791_s27 = scalar_lea.vmem [#allocation5], %s3134_s22 }
  0xec   : > { %5244 = dma.done.wait (%p7356_p11), %s383_s24, 4096  }
  0xed   : > { %5246 = vsyncadd (%p7356_p11), %s383_s24, 4294963200  ;;  %s7357_s20 = sld [smem:[#allocation21_spill]]  ;;  %s5798_s28 = scalar_lea.vmem [#allocation7], %s3134_s22 }
  0xee   : > { %s401_s18 = scalar_lea.sflag [#allocation9], %s382_s11 }
  0xf3   : > { %s402_s1 = sand.u32 1, %s7357_s20  }
  0xf4   : > { %s3136_s25 = sshll.u32 %s402_s1, 5 }
  0xf5   : > { %s5800_s4 = scalar_lea.vmem [#allocation8], %s3136_s25 }
  0xf6   : > { %5248 = dma.done.wait (%p5723_p4), %s401_s18, 512  }
  0xf7   : > { %5250 = vsyncadd (%p5723_p4), %s401_s18, 4294966784  ;;  %p7358_p8 = scmp.eq.s32.totalorder %s7353_s6, 0 }
  0xf9   : > { %5252 = dma.done.wait (%p7358_p8), [#allocation9], 2048   ;;  %p7359_p7 = pmov %p7358_p8 }
  0xfa   : > { %vm591_vm0 = vcmask 261120   ;;  %v470_v1 = vld [vmem:[%s5791_s27] sm:$0xff]  ;;  %v471_v2 = vld [vmem:[%s5791_s27 + $0x8] sm:$0xff]  ;;  %s5326_s15 = smov 96   ;;  %v472_v6 = vld [vmem:[%s5791_s27 + $0x10] sm:$0xff]  ;;  %s5327_s10 = smov 64  }
  0xfb   : > { %5254 = vsyncadd (%p7359_p7), [#allocation9], 4294965248  ;;  %v5819_v3 = vld [vmem:[%s5783_s7 + $0x8] sm:$0xff]  ;;  %v5821_v4 = vpack.i.bf16 %v471_v2, %v470_v1  ;;  %v5826_v5 = vld [vmem:[%s5783_s7] sm:$0xff]  ;;  %v3995_v8 = vpack.c.bf16 %v471_v2, %v470_v1  ;;  %s5329_s6 = smov 265   ;;  %s5330_s5 = smov 257  }
  0xfc   : > { %vm5812_vm1 = vmpackc.low %vm591_vm0, %vm591_vm0  ;;  %545 = vrot.lane.b32.xlu1 %v5819_v3, %s5326_s15  ;;  %v473_v7 = vld [vmem:[%s5791_s27 + $0x18] sm:$0xff]  ;;  %v476_v10 = vld [vmem:[%s5791_s27 + $0x30] sm:$0xff]  ;;  %3543 = vmatprep.mubr.msk.f32.mxu0 %vm591_vm0, %v5826_v5  ;;  %s5331_s17 = smov 281   ;;  %s5332_s11 = smov 273   ;;  %vm2705_vm10 = vcmask 523264   ;;  %vm2714_vm11 = vcmask 785408  }
  0xfd   : > { %v5830_v9 = vpack.i.bf16 %v473_v7, %v472_v6  ;;  %v4001_v11 = vpack.c.bf16 %v473_v7, %v472_v6  ;;  %3623 = vmatprep.mubr.msk.f32.mxu1 %vm591_vm0, %v5826_v5  ;;  %4520 = vrot.lane.b32.xlu0 %v5821_v4, %s5326_s15  ;;  %v477_v12 = vld [vmem:[%s5791_s27 + $0x38] sm:$0xff]  ;;  %v474_v13 = vld [vmem:[%s5791_s27 + $0x20] sm:$0xff]  ;;  %v475_v14 = vld [vmem:[%s5791_s27 + $0x28] sm:$0xff]  ;;  %s5333_s21 = smov 297   ;;  %s5334_s22 = smov 289  }
  0xfe   : > { %3997 = vmatprep.subr.msk.bf16.mxu1 %vm5812_vm1, %v3995_v8  ;;  %v4534_v15 = vpack.i.bf16 %v477_v12, %v476_v10  ;;  %v480_v16 = vld [vmem:[%s5791_s27 + $0x50] sm:$0xff]  ;;  %v481_v17 = vld [vmem:[%s5791_s27 + $0x58] sm:$0xff]  ;;  %v5854_v18 = vpack.i.bf16 %v475_v14, %v474_v13  ;;  %v478_v19 = vld [vmem:[%s5791_s27 + $0x40] sm:$0xff]  ;;  %v4007_v30 = vpack.c.bf16 %v475_v14, %v474_v13  ;;  %v4013_v36 = vpack.c.bf16 %v477_v12, %v476_v10  ;;  %s5335_s24 = smov 313   ;;  %s5336_s20 = smov 305  }
  0xff   : > { %4000 = vmatpush3.bf16.xpose.msk.msra.mxu1 %vm5812_vm1, %v3995_v8  ;;  %v479_v20 = vld [vmem:[%s5791_s27 + $0x48] sm:$0xff]  ;;  %v502_v21 = vld [vmem:[%s5800_s4] sm:$0xff]  ;;  %v504_v23 = vld [vmem:[%s5800_s4 + $0x10] sm:$0xff]  ;;  %v4544_v24 = vpack.i.bf16 %v481_v17, %v480_v16  ;;  %v4025_v44 = vpack.c.bf16 %v481_v17, %v480_v16  ;;  %s7371_s1 = sld [smem:[#allocation25_spill]]  ;;  %s7438_s18 = sld [smem:[#allocation32_spill]] }
 0x100   : > { %4525 = vrot.lane.b32.xlu1 %v5830_v9, %s5326_s15  ;;  %4003 = vmatprep.subr.msk.bf16.mxu1 %vm5812_vm1, %v4001_v11  ;;  %v503_v22 = vld [vmem:[%s5800_s4 + $0x8] sm:$0xff]  ;;  %v505_v26 = vld [vmem:[%s5800_s4 + $0x18] sm:$0xff]  ;;  %v484_v27 = vld [vmem:[%s5791_s27 + $0x70] sm:$0xff]  ;;  %v4539_v31 = vpack.i.bf16 %v479_v20, %v478_v19  ;;  %v4019_v41 = vpack.c.bf16 %v479_v20, %v478_v19 }
 0x101   : > { %543 = vrot.lane.b32.xlu0 %v5826_v5, %s5326_s15  ;;  %v3987_v25 = vpack.c.bf16 %v503_v22, %v502_v21  ;;  %v485_v28 = vld [vmem:[%s5791_s27 + $0x78] sm:$0xff]  ;;  %v3991_v29 = vpack.c.bf16 %v505_v26, %v504_v23  ;;  %v482_v32 = vld [vmem:[%s5791_s27 + $0x60] sm:$0xff]  ;;  %v483_v33 = vld [vmem:[%s5791_s27 + $0x68] sm:$0xff] }
 0x102   : > { %v4554_v34 = vpack.i.bf16 %v485_v28, %v484_v27  ;;  %v4549_v35 = vpack.i.bf16 %v483_v33, %v482_v32  ;;  %v465_v37 = vld [vmem:[%s5783_s7 + $0x18] sm:$0xff]  ;;  %v464_v38 = vld [vmem:[%s5783_s7 + $0x10] sm:$0xff]  ;;  %v467_v39 = vld [vmem:[%s5783_s7 + $0x28] sm:$0xff]  ;;  %v4031_v45 = vpack.c.bf16 %v483_v33, %v482_v32  ;;  %v4037_v46 = vpack.c.bf16 %v485_v28, %v484_v27 }
 0x103   : > { %3988 = vmatprep.subr.bf16.mxu0 %v3987_v25  ;;  %v466_v40 = vld [vmem:[%s5783_s7 + $0x20] sm:$0xff]  ;;  %v469_v42 = vld [vmem:[%s5783_s7 + $0x38] sm:$0xff]  ;;  %v468_v43 = vld [vmem:[%s5783_s7 + $0x30] sm:$0xff]  ;;  %s5328_s7 = smov 32  }
 0x104   : > { %4535 = vrot.lane.b32.xlu1 %v4534_v15, %s5326_s15  ;;  %3990 = vmatpush3.bf16.msra.mxu0 %v3987_v25  ;;  %v5947_v47 = vld [vmem:[%s5798_s28] sm:$0xff]  ;;  %v5950_v48 = vld [vmem:[%s5798_s28 + $0x8] sm:$0xff] }
 0x105   : > { %4530 = vrot.lane.b32.xlu0 %v5854_v18, %s5326_s15  ;;  %3992 = vmatprep.subr.bf16.mxu0 %v3991_v29  ;;  %v4559_v49 = vpack.i.bf16 %v5950_v48, %v5947_v47  ;;  %s3140_s25 = sshll.u32 %s7371_s1, 6  ;;  %s3272_s4 = sshll.u32 %s7371_s1, 3 }
 0x106   : > { %p7440_p9 = scmp.ne.s32.totalorder %s7438_s18, 0 }
 0x107   : > { %4006 = vmatpush3.bf16.xpose.msk.msra.mxu1 %vm5812_vm1, %v4001_v11 }
 0x108   : > { %4545 = vrot.lane.b32.xlu1 %v4544_v24, %s5326_s15  ;;  %4009 = vmatprep.subr.msk.bf16.mxu1 %vm5812_vm1, %v4007_v30 }
 0x109   : > { %4540 = vrot.lane.b32.xlu0 %v4539_v31, %s5326_s15  ;;  %3994 = vmatpush3.bf16.msra.mxu0 %v3991_v29 }
 0x10c   : > { %4555 = vrot.lane.b32.xlu1 %v4554_v34, %s5326_s15  ;;  %3544 = vmatmul.mubr.msk.f32.vlgmr.msra.gmra.mrb[0].mxu0 %vm591_vm0, %v5819_v3 }
 0x10d   : > { %4550 = vrot.lane.b32.xlu0 %v4549_v35, %s5326_s15  ;;  %3546 = vmatprep.mubr.msk.f32.mxu0 %vm591_vm0, %v464_v38 }
 0x10f   : > { %4012 = vmatpush3.bf16.xpose.msk.msra.mxu1 %vm5812_vm1, %v4007_v30 }
 0x110   : > { %549 = vrot.lane.b32.xlu1 %v465_v37, %s5326_s15  ;;  %4015 = vmatprep.subr.msk.bf16.mxu1 %vm5812_vm1, %v4013_v36 }
 0x111   : > { %547 = vrot.lane.b32.xlu0 %v464_v38, %s5326_s15  ;;  %3547 = vmatmul.mubr.msk.f32.gmra.mrb[2].mxu0 %vm591_vm0, %v465_v37 }
 0x112   : > { %3549 = vmatprep.mubr.msk.f32.mxu0 %vm591_vm0, %v466_v40 }
 0x114   : > { %553 = vrot.lane.b32.xlu1 %v467_v39, %s5326_s15 }
 0x115   : > { %551 = vrot.lane.b32.xlu0 %v466_v40, %s5326_s15  ;;  %3550 = vmatmul.mubr.msk.f32.gmra.mrb[4].mxu0 %vm591_vm0, %v467_v39 }
 0x116   : > { %3552 = vmatprep.mubr.msk.f32.mxu0 %vm591_vm0, %v468_v43 }
 0x117   : > { %4018 = vmatpush3.bf16.xpose.msk.msra.mxu1 %vm5812_vm1, %v4013_v36 }
 0x118   : > { %557 = vrot.lane.b32.xlu1 %v469_v42, %s5326_s15  ;;  %4021 = vmatprep.subr.msk.bf16.mxu1 %vm5812_vm1, %v4019_v41 }
 0x119   : > { %555 = vrot.lane.b32.xlu0 %v468_v43, %s5326_s15  ;;  %3553 = vmatmul.mubr.msk.f32.gmra.mrb[6].mxu0 %vm591_vm0, %v469_v42 }
 0x11c   : > { %559 = vrot.lane.b32.xlu1 %v5826_v5, %s5327_s10 }
 0x11d   : > { %561 = vrot.lane.b32.xlu0 %v5819_v3, %s5327_s10 }
 0x11f   : > { %4024 = vmatpush3.bf16.xpose.msk.msra.mxu1 %vm5812_vm1, %v4019_v41  ;;  %v6039_v41 = vld [vmem:[%s5798_s28 + $0x18] sm:$0xff] }
 0x120   : > { %4027 = vmatprep.subr.msk.bf16.mxu1 %vm5812_vm1, %v4025_v44  ;;  %563 = vrot.lane.b32.xlu1 %v464_v38, %s5327_s10 }
 0x121   : > { %569 = vrot.lane.b32.xlu0 %v467_v39, %s5327_s10 }
 0x124   : > { %565 = vrot.lane.b32.xlu1 %v465_v37, %s5327_s10 }
 0x125   : > { %573 = vrot.lane.b32.xlu0 %v469_v42, %s5327_s10 }
 0x127   : > { %4030 = vmatpush3.bf16.xpose.msk.msra.mxu1 %vm5812_vm1, %v4025_v44  ;;  %v6049_v44 = vld [vmem:[%s5798_s28 + $0x20] sm:$0xff] }
 0x128   : > { %4033 = vmatprep.subr.msk.bf16.mxu1 %vm5812_vm1, %v4031_v45  ;;  %567 = vrot.lane.b32.xlu1 %v466_v40, %s5327_s10 }
 0x129   : > { %577 = vrot.lane.b32.xlu0 %v5819_v3, %s5328_s7 }
 0x12c   : > { %571 = vrot.lane.b32.xlu1 %v468_v43, %s5327_s10 }
 0x12d   : > { %583 = vrot.lane.b32.xlu0 %v466_v40, %s5328_s7 }
 0x12f   : > { %4036 = vmatpush3.bf16.xpose.msk.msra.mxu1 %vm5812_vm1, %v4031_v45  ;;  %v6052_v45 = vld [vmem:[%s5798_s28 + $0x28] sm:$0xff] }
 0x130   : > { %4039 = vmatprep.subr.msk.bf16.mxu1 %vm5812_vm1, %v4037_v46  ;;  %575 = vrot.lane.b32.xlu1 %v5826_v5, %s5328_s7 }
 0x131   : > { %587 = vrot.lane.b32.xlu0 %v468_v43, %s5328_s7 }
 0x134   : > { %579 = vrot.lane.b32.xlu1 %v464_v38, %s5328_s7 }
 0x137   : > { %4042 = vmatpush3.bf16.xpose.msk.msra.mxu1 %vm5812_vm1, %v4037_v46 }
 0x138   : > { %581 = vrot.lane.b32.xlu1 %v465_v37, %s5328_s7 }
 0x13c   : > { %585 = vrot.lane.b32.xlu1 %v467_v39, %s5328_s7 }
 0x13e   : > { %3624 = vmatmul.mubr.msk.f32.vlgmr.msra.gmra.mrb[0].mxu1 %vm591_vm0, %v5819_v3 }
 0x13f   : > { %3626 = vmatprep.mubr.msk.f32.mxu1 %vm591_vm0, %v464_v38  ;;  %v4043_v38 = vpack.c.bf16 %v5950_v48, %v5947_v47 }
 0x140   : > { %589 = vrot.lane.b32.xlu1 %v469_v42, %s5328_s7 }
 0x141   : > { %4044 = vmatprep.subr.bf16.mxu0 %v4043_v38 }
 0x142   : > { %3627 = vmatmul.mubr.msk.f32.gmra.mrb[2].mxu1 %vm591_vm0, %v465_v37  ;;  %4046 = vmatpush3.bf16.msra.mxu0 %v4043_v38 }
 0x143   : > { %3629 = vmatprep.mubr.msk.f32.mxu1 %vm591_vm0, %v466_v40  ;;  %v6036_v40 = vld [vmem:[%s5798_s28 + $0x10] sm:$0xff] }
 0x144   : > { %4560 = vrot.lane.b32.xlu1 %v4559_v49, %s5326_s15  ;;  %v4051_v49 = vpack.c.bf16 %v6052_v45, %v6049_v44 }
 0x146   : > { %3630 = vmatmul.mubr.msk.f32.gmra.mrb[4].mxu1 %vm591_vm0, %v467_v39 }
 0x147   : > { %3632 = vmatprep.mubr.msk.f32.mxu1 %vm591_vm0, %v468_v43  ;;  %v4047_v43 = vpack.c.bf16 %v6039_v41, %v6036_v40 }
 0x149   : > { %4048 = vmatprep.subr.bf16.mxu0 %v4047_v43 }
 0x14a   : > { %3633 = vmatmul.mubr.msk.f32.gmra.mrb[6].mxu1 %vm591_vm0, %v469_v42  ;;  %4050 = vmatpush3.bf16.msra.mxu0 %v4047_v43 }
 0x14b   : > { %4052 = vmatprep.subr.bf16.mxu0 %v4051_v49 }
 0x14e   : > { %4054 = vmatpush3.bf16.msra.mxu0 %v4051_v49  ;;  %v507_v49 = vlaneseq }
 0x16e   : > { %v5956_v50 = vpop.permute.xlu1 %545 }
 0x16f   : > { %v4521_v51 = vpop.permute.xlu0 %4520 }
 0x170   : > { %v4523_v52 = vunpack.i.h.bf16 %v4521_v51  ;;  %v4522_v53 = vunpack.i.l.bf16 %v4521_v51  ;;  %v6067_v51 = vld [vmem:[%s5798_s28 + $0x30] sm:$0xff] }
 0x172   : > { %v4526_v54 = vpop.permute.xlu1 %4525  ;;  %v4075_v55 = vpack.c.bf16 %v4523_v52, %v4522_v53  ;;  %v6070_v52 = vld [vmem:[%s5798_s28 + $0x38] sm:$0xff] }
 0x173   : > { %v4528_v56 = vunpack.i.h.bf16 %v4526_v54  ;;  %v4527_v57 = vunpack.i.l.bf16 %v4526_v54  ;;  %v544_v58 = vpop.permute.xlu0 %543 }
 0x174   : > { %4077 = vmatprep.subr.msk.bf16.mxu1 %vm5812_vm1, %v4075_v55  ;;  %3555 = vmatprep.mubr.msk.f32.mxu0 %vm591_vm0, %v544_v58 }
 0x175   : > { %v4081_v59 = vpack.c.bf16 %v4528_v56, %v4527_v57  ;;  %3711 = vmatprep.mubr.msk.f32.mxu1 %vm591_vm0, %v544_v58  ;;  %3556 = vmatmul.mubr.msk.f32.gmra.mrb[8].mxu0 %vm591_vm0, %v5956_v50  ;;  %v4055_v56 = vpack.c.bf16 %v6070_v52, %v6067_v51  ;;  %v6085_v58 = vld [vmem:[%s5798_s28 + $0x40] sm:$0xff] }
 0x176   : > { %v4536_v60 = vpop.permute.xlu1 %4535  ;;  %4080 = vmatpush3.bf16.xpose.msk.msra.mxu1 %vm5812_vm1, %v4075_v55 }
 0x177   : > { %v4531_v61 = vpop.permute.xlu0 %4530  ;;  %4083 = vmatprep.subr.msk.bf16.mxu1 %vm5812_vm1, %v4081_v59  ;;  %v4538_v7 = vunpack.i.h.bf16 %v4536_v60  ;;  %v4537_v8 = vunpack.i.l.bf16 %v4536_v60  ;;  %4056 = vmatprep.subr.bf16.mxu0 %v4055_v56 }
 0x178   : > { %v4533_v62 = vunpack.i.h.bf16 %v4531_v61  ;;  %v4532_v63 = vunpack.i.l.bf16 %v4531_v61  ;;  %4058 = vmatpush3.bf16.msra.mxu0 %v4055_v56 }
 0x179   : > { %v4093_v12 = vpack.c.bf16 %v4538_v7, %v4537_v8  ;;  %v6117_v7 = vld [vmem:[%s5798_s28 + $0x60] sm:$0xff]  ;;  %v6120_v8 = vld [vmem:[%s5798_s28 + $0x68] sm:$0xff] }
 0x17a   : > { %v4546_v1 = vpop.permute.xlu1 %4545  ;;  %v4087_v3 = vpack.c.bf16 %v4533_v62, %v4532_v63 }
 0x17b   : > { %v4541_v2 = vpop.permute.xlu0 %4540  ;;  %v4548_v21 = vunpack.i.h.bf16 %v4546_v1  ;;  %v4547_v22 = vunpack.i.l.bf16 %v4546_v1  ;;  %v6101_v1 = vld [vmem:[%s5798_s28 + $0x50] sm:$0xff] }
 0x17c   : > { %v4543_v15 = vunpack.i.h.bf16 %v4541_v2  ;;  %v4542_v16 = vunpack.i.l.bf16 %v4541_v2  ;;  %v6104_v2 = vld [vmem:[%s5798_s28 + $0x58] sm:$0xff] }
 0x17d   : > { %v4105_v23 = vpack.c.bf16 %v4548_v21, %v4547_v22 }
 0x17e   : > { %v4556_v5 = vpop.permute.xlu1 %4555  ;;  %4086 = vmatpush3.bf16.xpose.msk.msra.mxu1 %vm5812_vm1, %v4081_v59  ;;  %v4099_v20 = vpack.c.bf16 %v4543_v15, %v4542_v16  ;;  %v6088_v59 = vld [vmem:[%s5798_s28 + $0x48] sm:$0xff] }
 0x17f   : > { %4089 = vmatprep.subr.msk.bf16.mxu1 %vm5812_vm1, %v4087_v3  ;;  %v4551_v6 = vpop.permute.xlu0 %4550  ;;  %v4558_v27 = vunpack.i.h.bf16 %v4556_v5  ;;  %v4557_v28 = vunpack.i.l.bf16 %v4556_v5  ;;  %v4059_v63 = vpack.c.bf16 %v6088_v59, %v6085_v58 }
 0x180   : > { %v4553_v24 = vunpack.i.h.bf16 %v4551_v6  ;;  %v4552_v25 = vunpack.i.l.bf16 %v4551_v6  ;;  %v4063_v6 = vpack.c.bf16 %v6104_v2, %v6101_v1 }
 0x181   : > { %v4117_v29 = vpack.c.bf16 %v4558_v27, %v4557_v28  ;;  %4060 = vmatprep.subr.bf16.mxu0 %v4059_v63 }
 0x182   : > { %v550_v10 = vpop.permute.xlu1 %549  ;;  %v4111_v26 = vpack.c.bf16 %v4553_v24, %v4552_v25  ;;  %4062 = vmatpush3.bf16.msra.mxu0 %v4059_v63 }
 0x183   : > { %v548_v11 = vpop.permute.xlu0 %547  ;;  %4064 = vmatprep.subr.bf16.mxu0 %v4063_v6 }
 0x184   : > { %3558 = vmatprep.mubr.msk.f32.mxu0 %vm591_vm0, %v548_v11 }
 0x185   : > { %3559 = vmatmul.mubr.msk.f32.gmra.mrb[10].mxu0 %vm591_vm0, %v550_v10 }
 0x186   : > { %v554_v13 = vpop.permute.xlu1 %553  ;;  %4092 = vmatpush3.bf16.xpose.msk.msra.mxu1 %vm5812_vm1, %v4087_v3  ;;  %4066 = vmatpush3.bf16.msra.mxu0 %v4063_v6 }
 0x187   : > { %4095 = vmatprep.subr.msk.bf16.mxu1 %vm5812_vm1, %v4093_v12  ;;  %v552_v14 = vpop.permute.xlu0 %551 }
 0x188   : > { %3561 = vmatprep.mubr.msk.f32.mxu0 %vm591_vm0, %v552_v14 }
 0x189   : > { %3562 = vmatmul.mubr.msk.f32.gmra.mrb[12].mxu0 %vm591_vm0, %v554_v13 }
 0x18a   : > { %v558_v17 = vpop.permute.xlu1 %557 }
 0x18b   : > { %v556_v19 = vpop.permute.xlu0 %555 }
 0x18c   : > { %3564 = vmatprep.mubr.msk.f32.mxu0 %vm591_vm0, %v556_v19 }
 0x18d   : > { %3565 = vmatmul.mubr.msk.f32.gmra.mrb[14].mxu0 %vm591_vm0, %v558_v17 }
 0x18e   : > { %4098 = vmatpush3.bf16.xpose.msk.msra.mxu1 %vm5812_vm1, %v4093_v12  ;;  %v6008_v30 = vpop.permute.xlu1 %559  ;;  %v6131_v12 = vld [vmem:[%s5798_s28 + $0x70] sm:$0xff] }
 0x18f   : > { %4101 = vmatprep.subr.msk.bf16.mxu1 %vm5812_vm1, %v4099_v20  ;;  %v6010_v31 = vpop.permute.xlu0 %561  ;;  %3567 = vmatprep.mubr.msk.f32.mxu0 %vm591_vm0, %v6008_v30 }
 0x191   : > { %3568 = vmatmul.mubr.msk.f32.gmra.mrb[16].mxu0 %vm591_vm0, %v6010_v31 }
 0x192   : > { %v6016_v32 = vpop.permute.xlu1 %563 }
 0x193   : > { %3570 = vmatprep.mubr.msk.f32.mxu0 %vm591_vm0, %v6016_v32  ;;  %v6033_v39 = vpop.permute.xlu0 %569 }
 0x196   : > { %4104 = vmatpush3.bf16.xpose.msk.msra.mxu1 %vm5812_vm1, %v4099_v20  ;;  %v6020_v33 = vpop.permute.xlu1 %565 }
 0x197   : > { %4107 = vmatprep.subr.msk.bf16.mxu1 %vm5812_vm1, %v4105_v23  ;;  %3571 = vmatmul.mubr.msk.f32.gmra.mrb[18].mxu0 %vm591_vm0, %v6020_v33  ;;  %v6057_v48 = vpop.permute.xlu0 %573 }
 0x198   : > { %7363 = vst [vmem:[#allocation36_spill] sm:$0xff] %v6057_v48 }
 0x19a   : > { %v6024_v34 = vpop.permute.xlu1 %567 }
 0x19b   : > { %3573 = vmatprep.mubr.msk.f32.mxu0 %vm591_vm0, %v6024_v34  ;;  %v6075_v55 = vpop.permute.xlu0 %577 }
 0x19c   : > { %3574 = vmatmul.mubr.msk.f32.gmra.mrb[20].mxu0 %vm591_vm0, %v6033_v39  ;;  %7365 = vst [vmem:[#allocation38_spill] sm:$0xff] %v6075_v55 }
 0x19e   : > { %4110 = vmatpush3.bf16.xpose.msk.msra.mxu1 %vm5812_vm1, %v4105_v23  ;;  %v6028_v35 = vpop.permute.xlu1 %571 }
 0x19f   : > { %4113 = vmatprep.subr.msk.bf16.mxu1 %vm5812_vm1, %v4111_v26  ;;  %3576 = vmatprep.mubr.msk.f32.mxu0 %vm591_vm0, %v6028_v35  ;;  %v6093_v62 = vpop.permute.xlu0 %583 }
 0x1a0   : > { %3577 = vmatmul.mubr.msk.f32.gmra.mrb[22].mxu0 %vm591_vm0, %v6057_v48  ;;  %7367 = vst [vmem:[#allocation40_spill] sm:$0xff] %v6093_v62 }
 0x1a2   : > { %v6042_v42 = vpop.permute.xlu1 %575 }
 0x1a3   : > { %7362 = vst [vmem:[#allocation35_spill] sm:$0xff] %v6042_v42  ;;  %3579 = vmatprep.mubr.msk.f32.mxu0 %vm591_vm0, %v6042_v42  ;;  %v6110_v5 = vpop.permute.xlu0 %587 }
 0x1a4   : > { %3580 = vmatmul.mubr.msk.f32.gmra.mrb[24].mxu0 %vm591_vm0, %v6075_v55  ;;  %7369 = vst [vmem:[#allocation42_spill] sm:$0xff] %v6110_v5 }
 0x1a6   : > { %4116 = vmatpush3.bf16.xpose.msk.msra.mxu1 %vm5812_vm1, %v4111_v26 }
 0x1a7   : > { %4119 = vmatprep.subr.msk.bf16.mxu1 %vm5812_vm1, %v4117_v29 }
 0x1ab   : > { %v7420_v0 = vld [vmem:[#allocation42_spill] sm:$0xff] }
 0x1ae   : > { %4122 = vmatpush3.bf16.xpose.msk.msra.mxu1 %vm5812_vm1, %v4117_v29 }
 0x1b5   : > { %3712 = vmatmul.mubr.msk.f32.vlgmr.msra.gmra.mrb[8].mxu1 %vm591_vm0, %v5956_v50  ;;  %v6062_v50 = vpop.permute.xlu1 %579 }
 0x1b6   : > { %3714 = vmatprep.mubr.msk.f32.mxu1 %vm591_vm0, %v548_v11  ;;  %7364 = vst [vmem:[#allocation37_spill] sm:$0xff] %v6062_v50  ;;  %3582 = vmatprep.mubr.msk.f32.mxu0 %vm591_vm0, %v6062_v50  ;;  %v4067_v11 = vpack.c.bf16 %v6120_v8, %v6117_v7 }
 0x1b8   : > { %4068 = vmatprep.subr.bf16.mxu0 %v4067_v11 }
 0x1b9   : > { %3715 = vmatmul.mubr.msk.f32.gmra.mrb[10].mxu1 %vm591_vm0, %v550_v10  ;;  %v6080_v57 = vpop.permute.xlu1 %581  ;;  %4070 = vmatpush3.bf16.msra.mxu0 %v4067_v11 }
 0x1ba   : > { %3717 = vmatprep.mubr.msk.f32.mxu1 %vm591_vm0, %v552_v14  ;;  %7366 = vst [vmem:[#allocation39_spill] sm:$0xff] %v6080_v57  ;;  %3583 = vmatmul.mubr.msk.f32.gmra.mrb[26].mxu0 %vm591_vm0, %v6080_v57 }
 0x1bb   : > { %3585 = vmatprep.mubr.msk.f32.mxu0 %vm591_vm0, %v6093_v62 }
 0x1bd   : > { %3718 = vmatmul.mubr.msk.f32.gmra.mrb[12].mxu1 %vm591_vm0, %v554_v13  ;;  %v6106_v3 = vpop.permute.xlu1 %585  ;;  %v6134_v13 = vld [vmem:[%s5798_s28 + $0x78] sm:$0xff] }
 0x1be   : > { %3720 = vmatprep.mubr.msk.f32.mxu1 %vm591_vm0, %v556_v19  ;;  %7368 = vst [vmem:[#allocation41_spill] sm:$0xff] %v6106_v3  ;;  %3586 = vmatmul.mubr.msk.f32.gmra.mrb[28].mxu0 %vm591_vm0, %v6106_v3  ;;  %v4071_v14 = vpack.c.bf16 %v6134_v13, %v6131_v12 }
 0x1bf   : > { %3588 = vmatprep.mubr.msk.f32.mxu0 %vm591_vm0, %v6110_v5 }
 0x1c0   : > { %4072 = vmatprep.subr.bf16.mxu0 %v4071_v14 }
 0x1c1   : > { %3721 = vmatmul.mubr.msk.f32.gmra.mrb[14].mxu1 %vm591_vm0, %v558_v17  ;;  %v6124_v10 = vpop.permute.xlu1 %589  ;;  %4074 = vmatpush3.bf16.msra.mxu0 %v4071_v14 }
 0x1c2   : > { %7370 = vst [vmem:[#allocation43_spill] sm:$0xff] %v6124_v10  ;;  %3589 = vmatmul.mubr.msk.f32.gmra.mrb[30].mxu0 %vm591_vm0, %v6124_v10 }
 0x1c5   : > { %v4561_v15 = vpop.permute.xlu1 %4560 }
 0x1c6   : > { %v4563_v16 = vunpack.i.h.bf16 %v4561_v15  ;;  %v4562_v17 = vunpack.i.l.bf16 %v4561_v15 }
 0x1c8   : > { %v6138_v19 = vpack.c.bf16 %v4563_v16, %v4562_v17 }
 0x1ca   : > { %4124 = vmatprep.subr.bf16.mxu0 %v6138_v19 }
 0x1df   : > { %v3545_v36 = vpop.f32.mrb[0].mxu0 }
 0x1e0   : > { %v722_v37 = vpop.f32.mrb[1].mxu0  ;;  %887 = vrot.lane.b32.xlu1 %v3545_v36, %s5329_s6 }
 0x1e1   : > { %883 = vrot.lane.b32.xlu0 %v722_v37, %s5330_s5 }
 0x1e4   : > { %v3548_v46 = vpop.f32.mrb[2].mxu0 }
 0x1e5   : > { %895 = vrot.lane.b32.xlu1 %v3548_v46, %s5331_s17  ;;  %v732_v47 = vpop.f32.mrb[3].mxu0 }
 0x1e6   : > { %891 = vrot.lane.b32.xlu0 %v732_v47, %s5332_s11 }
 0x1e8   : > { %v3551_v53 = vpop.f32.mrb[4].mxu0 }
 0x1e9   : > { %903 = vrot.lane.b32.xlu1 %v3551_v53, %s5333_s21  ;;  %v742_v54 = vpop.f32.mrb[5].mxu0  ;;  %v508_v53 = vshrl.u32 %v507_v49, 7 }
 0x1ea   : > { %899 = vrot.lane.b32.xlu0 %v742_v54, %s5334_s22  ;;  %v516_v54 = vstv %s3140_s25 }
 0x1eb   : > { %v509_v56 = vadd.s32 8, %v508_v53  ;;  %v514_v5 = vadd.s32 48, %v508_v53  ;;  %v515_v62 = vadd.s32 56, %v508_v53 }
 0x1ec   : > { %v3554_v60 = vpop.f32.mrb[6].mxu0 }
 0x1ed   : > { %911 = vrot.lane.b32.xlu1 %v3554_v60, %s5335_s24  ;;  %v752_v61 = vpop.f32.mrb[7].mxu0  ;;  %v6161_v60 = vand.u32 127, %v507_v49  ;;  %v6165_v63 = vadd.s32 %v516_v54, %v509_v56 }
 0x1ee   : > { %907 = vrot.lane.b32.xlu0 %v752_v61, %s5336_s20  ;;  %v6163_v61 = vadd.s32 %v516_v54, %v508_v53 }
 0x1ef   : > { %vm528_vm3 = vcmp.le.s32.totalorder %v6161_v60, %v6165_v63 }
 0x1f0   : > { %7372 = vst [vmem:[#allocation44_spill] sm:$0xff] %v6163_v61  ;;  %vm527_vm2 = vcmp.le.s32.totalorder %v6161_v60, %v6163_v61 }
 0x211   : > { %v3625_v20 = vpop.f32.mrb[0].mxu1 }
 0x212   : > { %v1035_v21 = vpop.f32.mrb[1].mxu1 }
 0x215   : > { %v6141_v22 = vpop.f32.mrb[2].mxu1 }
 0x216   : > { %v6143_v23 = vpop.f32.mrb[3].mxu1 }
 0x219   : > { %v6145_v24 = vpop.f32.mrb[4].mxu1 }
 0x21a   : > { %v6147_v25 = vpop.f32.mrb[5].mxu1 }
 0x21d   : > { %v6149_v26 = vpop.f32.mrb[6].mxu1 }
 0x21e   : > { %v6151_v27 = vpop.f32.mrb[7].mxu1 }
 0x248   : > { %v3557_v28 = vpop.f32.mrb[8].mxu0 }
 0x249   : > { %1265 = vrot.lane.b32.xlu1 %v3557_v28, %s5329_s6  ;;  %v762_v29 = vpop.f32.mrb[9].mxu0 }
 0x24a   : > { %1261 = vrot.lane.b32.xlu0 %v762_v29, %s5330_s5 }
 0x252   : > { %v888_v14 = vpop.permute.xlu1 %887 }
 0x253   : > { %v884_v6 = vpop.permute.xlu0 %883  ;;  %v914_v16 = vsel %vm528_vm3, %v888_v14, 0.0  ;;  %v512_v14 = vadd.s32 32, %v508_v53 }
 0x254   : > { %v913_v11 = vsel %vm527_vm2, %v884_v6, 0.0  ;;  %v6180_v17 = vadd.f32 %v3625_v20, %v914_v16  ;;  %v4564_v20 = vpack.i.bf16 %v6039_v41, %v6036_v40  ;;  %v510_v41 = vadd.s32 16, %v508_v53 }
 0x255   : > { %v6174_v15 = vadd.f32 %v1035_v21, %v913_v11  ;;  %v4569_v21 = vpack.i.bf16 %v6052_v45, %v6049_v44  ;;  %v511_v45 = vadd.s32 24, %v508_v53  ;;  %v6220_v10 = vadd.s32 %v516_v54, %v512_v14 }
 0x256   : > { %v6234_v14 = vadd.s32 %v516_v54, %v514_v5 }
 0x257   : > { %v6212_v11 = vadd.s32 %v516_v54, %v511_v45  ;;  %7375 = vst [vmem:[#allocation47_spill] sm:$0xff] %v6220_v10  ;;  %vm531_vm6 = vcmp.le.s32.totalorder %v6161_v60, %v6220_v10 }
 0x258   : > { %v3560_v36 = vpop.f32.mrb[10].mxu0  ;;  %v892_v16 = vpop.permute.xlu0 %891  ;;  %7377 = vst [vmem:[#allocation49_spill] sm:$0xff] %v6234_v14  ;;  %vm533_vm8 = vcmp.le.s32.totalorder %v6161_v60, %v6234_v14 }
 0x259   : > { %1273 = vrot.lane.b32.xlu0 %v3560_v36, %s5331_s17  ;;  %v772_v37 = vpop.f32.mrb[11].mxu0  ;;  %7373 = vst [vmem:[#allocation45_spill] sm:$0xff] %v6212_v11  ;;  %vm530_vm4 = vcmp.le.s32.totalorder %v6161_v60, %v6212_v11 }
 0x25a   : > { %1269 = vrot.lane.b32.xlu1 %v772_v37, %s5332_s11 }
 0x25c   : > { %v3563_v38 = vpop.f32.mrb[12].mxu0  ;;  %v900_v57 = vpop.permute.xlu0 %899 }
 0x25d   : > { %1281 = vrot.lane.b32.xlu0 %v3563_v38, %s5333_s21  ;;  %v782_v43 = vpop.f32.mrb[13].mxu0 }
 0x25e   : > { %1277 = vrot.lane.b32.xlu1 %v782_v43, %s5334_s22 }
 0x260   : > { %v3566_v46 = vpop.f32.mrb[14].mxu0 }
 0x261   : > { %1289 = vrot.lane.b32.xlu0 %v3566_v46, %s5335_s24  ;;  %v792_v47 = vpop.f32.mrb[15].mxu0 }
 0x264   : > { %v6206_v56 = vpop.f32.mrb[16].mxu0 }
 0x265   : > { %v6208_v44 = vpop.f32.mrb[17].mxu0 }
 0x26a   : > { %v6210_v6 = vpop.f32.mrb[18].mxu0 }
 0x26b   : > { %v6214_v40 = vpop.f32.mrb[19].mxu0 }
 0x26f   : > { %v6249_v5 = vpop.f32.mrb[20].mxu0 }
 0x280   : > { %1074 = vmax.xlane.f32.xlu0 %v6174_v15 }
 0x282   : > { %1076 = vmax.xlane.f32.xlu1 %v6180_v17 }
 0x288   : > { %v6183_v28 = vpop.f32.mrb[8].mxu1 }
 0x289   : > { %v6185_v29 = vpop.f32.mrb[9].mxu1 }
 0x28c   : > { %v6187_v36 = vpop.f32.mrb[10].mxu1 }
 0x28d   : > { %v6189_v37 = vpop.f32.mrb[11].mxu1 }
 0x290   : > { %v6193_v38 = vpop.f32.mrb[12].mxu1 }
 0x291   : > { %v6195_v43 = vpop.f32.mrb[13].mxu1 }
 0x293   : > { %4570 = vrot.lane.b32.xlu1 %v4569_v21, %s5326_s15  ;;  %v896_v21 = vpop.permute.xlu1 %895 }
 0x294   : > { %v6200_v46 = vpop.f32.mrb[14].mxu1  ;;  %v916_v45 = vsel %vm530_vm4, %v896_v21, 0.0  ;;  %v6238_v21 = vadd.s32 %v516_v54, %v515_v62 }
 0x295   : > { %v6202_v49 = vpop.f32.mrb[15].mxu1 }
 0x296   : > { %4565 = vrot.lane.b32.xlu0 %v4564_v20, %s5326_s15  ;;  %v513_v20 = vadd.s32 40, %v508_v53  ;;  %7378 = vst [vmem:[#allocation50_spill] sm:$0xff] %v6238_v21  ;;  %vm534_vm9 = vcmp.le.s32.totalorder %v6161_v60, %v6238_v21 }
 0x297   : > { %1285 = vrot.lane.b32.xlu1 %v792_v47, %s5336_s20  ;;  %v6218_v47 = vadd.s32 %v516_v54, %v510_v41  ;;  %v904_v50 = vpop.permute.xlu1 %903  ;;  %v6232_v41 = vadd.f32 %v6141_v22, %v916_v45  ;;  %v908_v22 = vpop.permute.xlu0 %907 }
 0x298   : > { %v6225_v3 = vadd.s32 %v516_v54, %v513_v20  ;;  %v917_v20 = vsel %vm531_vm6, %v900_v57, 0.0  ;;  %v6254_v54 = vpop.f32.mrb[21].mxu0  ;;  %v919_v55 = vsel %vm533_vm8, %v908_v22, 0.0 }
 0x299   : > { %7374 = vst [vmem:[#allocation46_spill] sm:$0xff] %v6218_v47  ;;  %vm529_vm5 = vcmp.le.s32.totalorder %v6161_v60, %v6218_v47  ;;  %v6262_v45 = vadd.f32 %v6147_v25, %v917_v20  ;;  %v6271_v42 = vpop.f32.mrb[22].mxu0  ;;  %v6280_v25 = vadd.f32 %v6151_v27, %v919_v55 }
 0x29a   : > { %7376 = vst [vmem:[#allocation48_spill] sm:$0xff] %v6225_v3  ;;  %vm532_vm7 = vcmp.le.s32.totalorder %v6161_v60, %v6225_v3  ;;  %v915_v53 = vsel %vm529_vm5, %v892_v16, 0.0 }
 0x29b   : > { %v918_v62 = vsel %vm532_vm7, %v904_v50, 0.0  ;;  %v912_v16 = vpop.permute.xlu1 %911  ;;  %v6259_v57 = vadd.f32 %v6143_v23, %v915_v53  ;;  %v6276_v23 = vpop.f32.mrb[23].mxu0 }
 0x29c   : > { %v6269_v50 = vadd.f32 %v6145_v24, %v918_v62  ;;  %v920_v48 = vsel %vm534_vm9, %v912_v16, 0.0  ;;  %v6286_v62 = vpop.f32.mrb[24].mxu0 }
 0x29d   : > { %v6284_v24 = vadd.f32 %v6149_v26, %v920_v48  ;;  %7379 = vst [vmem:[#allocation51_spill] sm:$0xff] %v6286_v62  ;;  %v6303_v26 = vpop.f32.mrb[25].mxu0 }
 0x29e   : > { %7380 = vst [vmem:[#allocation52_spill] sm:$0xff] %v6303_v26  ;;  %v6305_v16 = vpop.f32.mrb[26].mxu0 }
 0x29f   : > { %7381 = vst [vmem:[#allocation53_spill] sm:$0xff] %v6305_v16 }
 0x2b5   : > { %1080 = vmax.xlane.f32.xlu0 %v6232_v41 }
 0x2b9   : > { %1078 = vmax.xlane.f32.xlu0 %v6259_v57 }
 0x2bb   : > { %1082 = vmax.xlane.f32.xlu1 %v6262_v45  ;;  %v1266_v20 = vpop.permute.xlu1 %1265 }
 0x2bc   : > { %v1262_v53 = vpop.permute.xlu0 %1261  ;;  %v1292_v55 = vsel %vm528_vm3, %v1266_v20, 0.0 }
 0x2bd   : > { %1084 = vmax.xlane.f32.xlu0 %v6269_v50  ;;  %v1291_v22 = vsel %vm527_vm2, %v1262_v53, 0.0  ;;  %v6301_v48 = vadd.f32 %v6183_v28, %v1292_v55  ;;  %v6308_v53 = vpop.f32.mrb[27].mxu0 }
 0x2be   : > { %v6297_v27 = vadd.f32 %v6185_v29, %v1291_v22  ;;  %7382 = vst [vmem:[#allocation54_spill] sm:$0xff] %v6308_v53  ;;  %v6310_v62 = vpop.f32.mrb[28].mxu0 }
 0x2bf   : > { %1086 = vmax.xlane.f32.xlu1 %v6280_v25  ;;  %7383 = vst [vmem:[#allocation55_spill] sm:$0xff] %v6310_v62  ;;  %v6312_v20 = vpop.f32.mrb[29].mxu0 }
 0x2c0   : > { %7384 = vst [vmem:[#allocation56_spill] sm:$0xff] %v6312_v20  ;;  %v6317_v28 = vpop.f32.mrb[30].mxu0 }
 0x2c1   : > { %1088 = vmax.xlane.f32.xlu0 %v6284_v24  ;;  %7385 = vst [vmem:[#allocation57_spill] sm:$0xff] %v6317_v28  ;;  %v6322_v16 = vpop.f32.mrb[31].mxu0 }
 0x2c2   : > { %7386 = vst [vmem:[#allocation58_spill] sm:$0xff] %v6322_v16 }
 0x2c3   : > { %1468 = vmax.xlane.f32.xlu1 %v6297_v27 }
 0x2c5   : > { %1470 = vmax.xlane.f32.xlu0 %v6301_v48 }
 0x2cb   : > { %v1274_v61 = vpop.permute.xlu0 %1273 }
 0x2cc   : > { %v1294_v29 = vsel %vm530_vm4, %v1274_v61, 0.0  ;;  %v1270_v22 = vpop.permute.xlu1 %1269 }
 0x2cd   : > { %v6320_v55 = vadd.f32 %v6187_v36, %v1294_v29  ;;  %v1293_v53 = vsel %vm529_vm5, %v1270_v22, 0.0 }
 0x2ce   : > { %v6332_v26 = vadd.f32 %v6189_v37, %v1293_v53 }
 0x2cf   : > { %v1282_v62 = vpop.permute.xlu0 %1281  ;;  %1474 = vmax.xlane.f32.xlu0 %v6320_v55 }
 0x2d0   : > { %v1278_v20 = vpop.permute.xlu1 %1277  ;;  %v1296_v36 = vsel %vm532_vm7, %v1282_v62, 0.0 }
 0x2d1   : > { %v1295_v61 = vsel %vm531_vm6, %v1278_v20, 0.0  ;;  %v6343_v16 = vadd.f32 %v6193_v38, %v1296_v36 }
 0x2d2   : > { %v6338_v29 = vadd.f32 %v6195_v43, %v1295_v61 }
 0x2d3   : > { %1472 = vmax.xlane.f32.xlu0 %v6332_v26  ;;  %v1290_v22 = vpop.permute.xlu0 %1289 }
 0x2d4   : > { %1476 = vmax.xlane.f32.xlu1 %v6338_v29  ;;  %v1298_v37 = vsel %vm534_vm9, %v1290_v22, 0.0 }
 0x2d5   : > { %v6350_v53 = vadd.f32 %v6200_v46, %v1298_v37 }
 0x2d7   : > { %1478 = vmax.xlane.f32.xlu0 %v6343_v16 }
 0x2db   : > { %1482 = vmax.xlane.f32.xlu0 %v6350_v53 }
 0x30d   : > { %v1075_v43 = vpop.xlane.xlu0 %1074 }
 0x30e   : > { %v1090_v62 = vsub.f32 %v6174_v15, %v1075_v43 }
 0x30f   : > { %v1077_v20 = vpop.xlane.xlu1 %1076 }
 0x310   : > { %v1098_v61 = vmul.f32 1.442695, %v1090_v62  ;;  %v1091_v28 = vsub.f32 %v6180_v17, %v1077_v20 }
 0x312   : > { %4819 = vpow2.f32 %v1098_v61  ;;  %v1100_v38 = vmul.f32 1.442695, %v1091_v28  ;;  %v6370_v28 = vpop.permute.xlu0 %4565 }
 0x313   : > { %v6355_v36 = vpop.permute.xlu1 %4570 }
 0x314   : > { %4821 = vpow2.f32 %v1100_v38 }
 0x317   : > { %v1286_v22 = vpop.permute.xlu1 %1285 }
 0x318   : > { %v1297_v46 = vsel %vm533_vm8, %v1286_v22, 0.0 }
 0x319   : > { %v6361_v37 = vadd.f32 %v6202_v49, %v1297_v46 }
 0x31b   : > { %1480 = vmax.xlane.f32.xlu1 %v6361_v37 }
 0x31c   : > { %v6364_v15 = vpop.eup %4819 }
 0x31d   : > { %1114 = vadd.xlane.f32.xlu0 %v6364_v15 }
 0x31e   : > { %v6367_v17 = vpop.eup %4821 }
 0x31f   : > { %1116 = vadd.xlane.f32.xlu1 %v6367_v17 }
 0x342   : > { %v1081_v43 = vpop.xlane.xlu0 %1080 }
 0x343   : > { %v1093_v62 = vsub.f32 %v6232_v41, %v1081_v43 }
 0x345   : > { %v1104_v20 = vmul.f32 1.442695, %v1093_v62 }
 0x346   : > { %v1079_v61 = vpop.xlane.xlu0 %1078 }
 0x347   : > { %4823 = vpow2.f32 %v1104_v20  ;;  %v1092_v49 = vsub.f32 %v6259_v57, %v1079_v61 }
 0x348   : > { %v1083_v38 = vpop.xlane.xlu1 %1082 }
 0x349   : > { %v1102_v22 = vmul.f32 1.442695, %v1092_v49  ;;  %v1094_v46 = vsub.f32 %v6262_v45, %v1083_v38 }
 0x34a   : > { %v1085_v21 = vpop.xlane.xlu0 %1084 }
 0x34b   : > { %4825 = vpow2.f32 %v1102_v22  ;;  %v1106_v14 = vmul.f32 1.442695, %v1094_v46  ;;  %v1095_v10 = vsub.f32 %v6269_v50, %v1085_v21  ;;  %v4574_v21 = vpack.i.bf16 %v6070_v52, %v6067_v51 }
 0x34c   : > { %v1087_v3 = vpop.xlane.xlu1 %1086  ;;  %v6409_v50 = vpack.i.bf16 %v6104_v2, %v6101_v1  ;;  %v6421_v51 = vpack.i.bf16 %v6134_v13, %v6131_v12 }
 0x34d   : > { %v1108_v47 = vmul.f32 1.442695, %v1095_v10  ;;  %v1096_v11 = vsub.f32 %v6280_v25, %v1087_v3  ;;  %4827 = vpow2.f32 %v1106_v14  ;;  %v6398_v14 = vpack.i.bf16 %v6088_v59, %v6085_v58 }
 0x34e   : > { %v1089_v41 = vpop.xlane.xlu0 %1088  ;;  %v6415_v58 = vpack.i.bf16 %v6120_v8, %v6117_v7 }
 0x34f   : > { %4829 = vpow2.f32 %v1108_v47  ;;  %v1110_v43 = vmul.f32 1.442695, %v1096_v11  ;;  %v1097_v62 = vsub.f32 %v6284_v24, %v1089_v41 }
 0x350   : > { %v1469_v59 = vpop.xlane.xlu1 %1468 }
 0x351   : > { %v6378_v57 = vpop.eup %4823  ;;  %v1112_v20 = vmul.f32 1.442695, %v1097_v62  ;;  %4831 = vpow2.f32 %v1110_v43  ;;  %v1484_v1 = vsub.f32 %v6297_v27, %v1469_v59  ;;  %v4947_v43 = vld [vmem:[%s5791_s27 + $0x30] sm:$0xff]  ;;  %v4948_v62 = vld [vmem:[%s5791_s27 + $0x38] sm:$0xff] }
 0x352   : > { %1120 = vadd.xlane.f32.xlu1 %v6378_v57 }
 0x353   : > { %4833 = vpow2.f32 %v1112_v20  ;;  %v1492_v8 = vmul.f32 1.442695, %v1484_v1  ;;  %v6446_v20 = vpack.i.bf16 %v4948_v62, %v4947_v43 }
 0x355   : > { %v6381_v45 = vpop.eup %4825 }
 0x356   : > { %1118 = vadd.xlane.f32.xlu0 %v6381_v45 }
 0x357   : > { %v6384_v10 = vpop.eup %4827 }
 0x359   : > { %v6386_v3 = vpop.eup %4829 }
 0x35a   : > { %1124 = vadd.xlane.f32.xlu1 %v6386_v3  ;;  %1122 = vadd.xlane.f32.xlu0 %v6384_v10 }
 0x35b   : > { %v6390_v11 = vpop.eup %4831 }
 0x35d   : > { %v6392_v47 = vpop.eup %4833 }
 0x35e   : > { %1128 = vadd.xlane.f32.xlu0 %v6392_v47  ;;  %1126 = vadd.xlane.f32.xlu1 %v6390_v11 }
 0x361   : > { %v1477_v27 = vpop.xlane.xlu1 %1476 }
 0x36f   : > { %4580 = vrot.lane.b32.xlu1 %v6398_v14, %s5326_s15 }
 0x373   : > { %4605 = vrot.lane.b32.xlu1 %v5830_v9, %s5327_s10  ;;  %v1471_v9 = vpop.xlane.xlu0 %1470 }
 0x374   : > { %4575 = vrot.lane.b32.xlu0 %v4574_v21, %s5326_s15  ;;  %v1485_v52 = vsub.f32 %v6301_v48, %v1471_v9 }
 0x376   : > { %v1494_v2 = vmul.f32 1.442695, %v1485_v52 }
 0x377   : > { %v1475_v7 = vpop.xlane.xlu0 %1474 }
 0x378   : > { %4585 = vrot.lane.b32.xlu0 %v6409_v50, %s5326_s15  ;;  %4835 = vpow2.f32 %v1494_v2 }
 0x379   : > { %4837 = vpow2.f32 %v1492_v8 }
 0x37b   : > { %v1473_v12 = vpop.xlane.xlu0 %1472 }
 0x37c   : > { %4590 = vrot.lane.b32.xlu0 %v6415_v58, %s5326_s15  ;;  %v1486_v13 = vsub.f32 %v6332_v26, %v1473_v12  ;;  %v4568_v12 = vunpack.i.h.bf16 %v6370_v28 }
 0x37f   : > { %v1479_v25 = vpop.xlane.xlu0 %1478 }
 0x380   : > { %4595 = vrot.lane.b32.xlu0 %v6421_v51, %s5326_s15  ;;  %v1489_v48 = vsub.f32 %v6343_v16, %v1479_v25 }
 0x382   : > { %v6432_v24 = vpop.eup %4835  ;;  %v1502_v49 = vmul.f32 1.442695, %v1489_v48  ;;  %v4573_v48 = vunpack.i.h.bf16 %v6355_v36 }
 0x383   : > { %v6436_v61 = vpop.eup %4837  ;;  %v1483_v26 = vpop.xlane.xlu0 %1482 }
 0x384   : > { %4600 = vrot.lane.b32.xlu0 %v5821_v4, %s5327_s10  ;;  %v1496_v4 = vmul.f32 1.442695, %v1486_v13  ;;  %v1491_v22 = vsub.f32 %v6350_v53, %v1483_v26  ;;  %v4567_v13 = vunpack.i.l.bf16 %v6370_v28  ;;  %v1487_v28 = vsub.f32 %v6320_v55, %v1475_v7  ;;  %v4951_v55 = vld [vmem:[%s5791_s27 + $0x40] sm:$0xff]  ;;  %v4952_v7 = vld [vmem:[%s5791_s27 + $0x48] sm:$0xff] }
 0x386   : > { %4839 = vpow2.f32 %v1496_v4  ;;  %v1506_v46 = vmul.f32 1.442695, %v1491_v22 }
 0x387   : > { %4841 = vpow2.f32 %v1502_v49  ;;  %v1498_v49 = vmul.f32 1.442695, %v1487_v28 }
 0x388   : > { %4610 = vrot.lane.b32.xlu0 %v5854_v18, %s5327_s10  ;;  %v1488_v18 = vsub.f32 %v6338_v29, %v1477_v27  ;;  %v4127_v27 = vpack.c.bf16 %v4568_v12, %v4567_v13 }
 0x38a   : > { %v1500_v38 = vmul.f32 1.442695, %v1488_v18 }
 0x38c   : > { %4843 = vpow2.f32 %v1500_v38  ;;  %v6494_v38 = vpack.i.bf16 %v4952_v7, %v4951_v55 }
 0x38d   : > { %4845 = vpow2.f32 %v1506_v46  ;;  %v4953_v46 = vld [vmem:[%s5791_s27 + $0x60] sm:$0xff] }
 0x390   : > { %v6441_v41 = vpop.eup %4839 }
 0x391   : > { %v6449_v21 = vpop.eup %4841 }
 0x396   : > { %v6454_v59 = vpop.eup %4843 }
 0x397   : > { %1510 = vadd.xlane.f32.xlu1 %v6432_v24  ;;  %v6457_v1 = vpop.eup %4845 }
 0x39b   : > { %1508 = vadd.xlane.f32.xlu1 %v6436_v61 }
 0x3a7   : > { %1512 = vadd.xlane.f32.xlu0 %v6441_v41 }
 0x3a8   : > { %v1481_v16 = vpop.xlane.xlu1 %1480 }
 0x3a9   : > { %v1490_v29 = vsub.f32 %v6361_v37, %v1481_v16  ;;  %v4954_v16 = vld [vmem:[%s5791_s27 + $0x68] sm:$0xff] }
 0x3aa   : > { %v1115_v9 = vpop.xlane.xlu0 %1114  ;;  %v6500_v43 = vpack.i.bf16 %v4954_v16, %v4953_v46 }
 0x3ab   : > { %v1504_v52 = vmul.f32 1.442695, %v1490_v29  ;;  %4847 = vrcp.f32 %v1115_v9  ;;  %1518 = vadd.xlane.f32.xlu0 %v6449_v21 }
 0x3ac   : > { %4615 = vrot.lane.b32.xlu1 %v6446_v20, %s5327_s10  ;;  %v1117_v53 = vpop.xlane.xlu1 %1116 }
 0x3ad   : > { %4849 = vpow2.f32 %v1504_v52 }
 0x3ae   : > { %4851 = vrcp.f32 %v1117_v53 }
 0x3af   : > { %1516 = vadd.xlane.f32.xlu0 %v6454_v59  ;;  %4853 = vpow2.f32 %v1498_v49 }
 0x3b3   : > { %1522 = vadd.xlane.f32.xlu0 %v6457_v1 }
 0x3b5   : > { %v4848_v37 = vpop.eup %4847 }
 0x3b6   : > { %v6461_v2 = vmul.f32 %v4848_v37, %v6364_v15  ;;  %v4572_v15 = vunpack.i.l.bf16 %v6355_v36  ;;  %v4950_v36 = vld [vmem:[%s5791_s27 + $0x58] sm:$0xff] }
 0x3b7   : > { %v6463_v8 = vpop.eup %4849 }
 0x3b8   : > { %v4852_v25 = vpop.eup %4851  ;;  %3667 = vmatprep.mubr.f32.mxu0 %v6461_v2  ;;  %1520 = vadd.xlane.f32.xlu0 %v6463_v8  ;;  %v4131_v18 = vpack.c.bf16 %v4573_v48, %v4572_v15 }
 0x3b9   : > { %v6470_v4 = vmul.f32 %v4852_v25, %v6367_v17  ;;  %v4949_v17 = vld [vmem:[%s5791_s27 + $0x50] sm:$0xff] }
 0x3ba   : > { %v6479_v26 = vpack.i.bf16 %v4950_v36, %v4949_v17 }
 0x3bb   : > { %3668 = vmatmul.mubr.f32.vlgmr.msra.gmra.mrb[32].mxu0 %v6470_v4 }
 0x3bc   : > { %4126 = vmatpush3.bf16.msra.mxu0 %v6138_v19  ;;  %v6483_v19 = vpop.eup %4853 }
 0x3bd   : > { %4128 = vmatprep.subr.bf16.mxu0 %v4127_v27 }
 0x3c0   : > { %4130 = vmatpush3.bf16.msra.mxu0 %v4127_v27 }
 0x3c1   : > { %4132 = vmatprep.subr.bf16.mxu0 %v4131_v18 }
 0x3c4   : > { %4134 = vmatpush3.bf16.msra.mxu0 %v4131_v18 }
 0x3ce   : > { %4625 = vrot.lane.b32.xlu0 %v6479_v26, %s5327_s10 }
 0x3d0   : > { %1514 = vadd.xlane.f32.xlu1 %v6483_v19 }
 0x3d2   : > { %1727 = vrot.lane.b32.xlu0 %v6214_v40, %s5332_s11 }
 0x3d6   : > { %1735 = vrot.lane.b32.xlu0 %v6254_v54, %s5334_s22  ;;  %v4955_v54 = vld [vmem:[%s5791_s27 + $0x70] sm:$0xff] }
 0x3da   : > { %1743 = vrot.lane.b32.xlu0 %v6276_v23, %s5336_s20  ;;  %v4956_v23 = vld [vmem:[%s5791_s27 + $0x78] sm:$0xff] }
 0x3db   : > { %v6506_v62 = vpack.i.bf16 %v4956_v23, %v4955_v54 }
 0x3df   : > { %v1121_v22 = vpop.xlane.xlu1 %1120 }
 0x3e0   : > { %4855 = vrcp.f32 %v1121_v22 }
 0x3e1   : > { %4620 = vrot.lane.b32.xlu1 %v6494_v38, %s5327_s10 }
 0x3e3   : > { %v1119_v40 = vpop.xlane.xlu0 %1118 }
 0x3e4   : > { %4857 = vrcp.f32 %v1119_v40 }
 0x3e5   : > { %4630 = vrot.lane.b32.xlu1 %v6500_v43, %s5327_s10 }
 0x3e7   : > { %v1123_v29 = vpop.xlane.xlu0 %1122  ;;  %v1125_v9 = vpop.xlane.xlu1 %1124 }
 0x3e8   : > { %4859 = vrcp.f32 %v1123_v29 }
 0x3e9   : > { %4861 = vrcp.f32 %v1125_v9  ;;  %4635 = vrot.lane.b32.xlu1 %v6506_v62, %s5327_s10 }
 0x3ea   : > { %v4856_v37 = vpop.eup %4855 }
 0x3eb   : > { %v1129_v52 = vpop.xlane.xlu0 %1128  ;;  %v1127_v53 = vpop.xlane.xlu1 %1126  ;;  %v6516_v28 = vmul.f32 %v4856_v37, %v6378_v57 }
 0x3ec   : > { %4863 = vrcp.f32 %v1129_v52 }
 0x3ed   : > { %4865 = vrcp.f32 %v1127_v53  ;;  %1719 = vrot.lane.b32.xlu1 %v6208_v44, %s5330_s5 }
 0x3ee   : > { %v4858_v12 = vpop.eup %4857 }
 0x3ef   : > { %v4576_v13 = vpop.permute.xlu0 %4575  ;;  %v4581_v25 = vpop.permute.xlu1 %4580  ;;  %v6513_v48 = vmul.f32 %v4858_v12, %v6381_v45 }
 0x3f0   : > { %v4578_v15 = vunpack.i.h.bf16 %v4576_v13  ;;  %v4577_v27 = vunpack.i.l.bf16 %v4576_v13  ;;  %v4583_v18 = vunpack.i.h.bf16 %v4581_v25  ;;  %v4582_v49 = vunpack.i.l.bf16 %v4581_v25 }
 0x3f1   : > { %3670 = vmatprep.mubr.f32.mxu0 %v6513_v48  ;;  %1723 = vrot.lane.b32.xlu1 %v6206_v56, %s5329_s6 }
 0x3f2   : > { %v4860_v17 = vpop.eup %4859  ;;  %3671 = vmatmul.mubr.f32.gmra.mrb[34].mxu0 %v6516_v28  ;;  %v4135_v44 = vpack.c.bf16 %v4578_v15, %v4577_v27  ;;  %v4139_v22 = vpack.c.bf16 %v4583_v18, %v4582_v49 }
 0x3f3   : > { %v4862_v36 = vpop.eup %4861  ;;  %v6523_v45 = vmul.f32 %v4860_v17, %v6384_v10  ;;  %v4586_v55 = vpop.permute.xlu0 %4585 }
 0x3f4   : > { %4136 = vmatprep.subr.bf16.mxu0 %v4135_v44  ;;  %v6526_v57 = vmul.f32 %v4862_v36, %v6386_v3  ;;  %v4588_v7 = vunpack.i.h.bf16 %v4586_v55  ;;  %v4587_v46 = vunpack.i.l.bf16 %v4586_v55 }
 0x3f5   : > { %3673 = vmatprep.mubr.f32.mxu0 %v6523_v45  ;;  %4138 = vmatpush3.bf16.msra.mxu0 %v4135_v44 }
 0x3f6   : > { %v4864_v56 = vpop.eup %4863  ;;  %1731 = vrot.lane.b32.xlu1 %v6210_v6, %s5331_s17  ;;  %3674 = vmatmul.mubr.f32.gmra.mrb[36].mxu0 %v6526_v57  ;;  %v4143_v3 = vpack.c.bf16 %v4588_v7, %v4587_v46 }
 0x3f7   : > { %v4866_v16 = vpop.eup %4865  ;;  %4140 = vmatprep.subr.bf16.mxu0 %v4139_v22  ;;  %v6533_v10 = vmul.f32 %v4864_v56, %v6392_v47  ;;  %v4591_v40 = vpop.permute.xlu0 %4590 }
 0x3f8   : > { %v6536_v54 = vmul.f32 %v4866_v16, %v6390_v11  ;;  %v4593_v23 = vunpack.i.h.bf16 %v4591_v40  ;;  %v4592_v29 = vunpack.i.l.bf16 %v4591_v40 }
 0x3f9   : > { %4142 = vmatpush3.bf16.msra.mxu0 %v4139_v22 }
 0x3fa   : > { %3676 = vmatprep.mubr.f32.mxu0 %v6536_v54  ;;  %1739 = vrot.lane.b32.xlu1 %v6249_v5, %s5333_s21  ;;  %v4147_v6 = vpack.c.bf16 %v4593_v23, %v4592_v29  ;;  %v4606_v5 = vpop.permute.xlu1 %4605 }
 0x3fb   : > { %3677 = vmatmul.mubr.f32.gmra.mrb[38].mxu0 %v6533_v10  ;;  %4144 = vmatprep.subr.bf16.mxu0 %v4143_v3  ;;  %v4596_v9 = vpop.permute.xlu0 %4595  ;;  %v4608_v49 = vunpack.i.h.bf16 %v4606_v5  ;;  %v4607_v17 = vunpack.i.l.bf16 %v4606_v5 }
 0x3fc   : > { %v4598_v47 = vunpack.i.h.bf16 %v4596_v9  ;;  %v4597_v52 = vunpack.i.l.bf16 %v4596_v9 }
 0x3fd   : > { %4146 = vmatpush3.bf16.msra.mxu0 %v4143_v3  ;;  %v4161_v7 = vpack.c.bf16 %v4608_v49, %v4607_v17 }
 0x3fe   : > { %1747 = vrot.lane.b32.xlu1 %v6271_v42, %s5335_s24  ;;  %4148 = vmatprep.subr.bf16.mxu0 %v4147_v6  ;;  %v4151_v11 = vpack.c.bf16 %v4598_v47, %v4597_v52 }
 0x3ff   : > { %v4601_v53 = vpop.permute.xlu0 %4600 }
 0x400   : > { %v4603_v37 = vunpack.i.h.bf16 %v4601_v53  ;;  %v4602_v12 = vunpack.i.l.bf16 %v4601_v53 }
 0x401   : > { %4150 = vmatpush3.bf16.msra.mxu0 %v4147_v6 }
 0x402   : > { %v4155_v13 = vpack.c.bf16 %v4603_v37, %v4602_v12  ;;  %4152 = vmatprep.subr.bf16.mxu0 %v4151_v11 }
 0x403   : > { %v4611_v27 = vpop.permute.xlu0 %4610 }
 0x404   : > { %v4613_v22 = vunpack.i.h.bf16 %v4611_v27  ;;  %v4612_v46 = vunpack.i.l.bf16 %v4611_v27 }
 0x405   : > { %4154 = vmatpush3.bf16.msra.mxu0 %v4151_v11 }
 0x406   : > { %4157 = vmatprep.subr.msk.bf16.mxu0 %vm5812_vm1, %v4155_v13 }
 0x424   : > { %v1511_v25 = vpop.xlane.xlu1 %1510 }
 0x425   : > { %4867 = vrcp.f32 %v1511_v25 }
 0x428   : > { %v1509_v15 = vpop.xlane.xlu1 %1508 }
 0x429   : > { %4869 = vrcp.f32 %v1509_v15 }
 0x42c   : > { %v4616_v16 = vpop.permute.xlu1 %4615 }
 0x42d   : > { %v4618_v40 = vunpack.i.h.bf16 %v4616_v16  ;;  %v4617_v3 = vunpack.i.l.bf16 %v4616_v16 }
 0x42f   : > { %v4868_v18 = vpop.eup %4867  ;;  %v4173_v23 = vpack.c.bf16 %v4618_v40, %v4617_v3 }
 0x430   : > { %v6550_v55 = vmul.f32 %v4868_v18, %v6432_v24 }
 0x433   : > { %v4870_v42 = vpop.eup %4869 }
 0x434   : > { %v1513_v44 = vpop.xlane.xlu0 %1512  ;;  %v6547_v36 = vmul.f32 %v4870_v42, %v6436_v61  ;;  %v4167_v61 = vpack.c.bf16 %v4613_v22, %v4612_v46 }
 0x435   : > { %4871 = vrcp.f32 %v1513_v44 }
 0x436   : > { %3755 = vmatprep.mubr.f32.mxu0 %v6547_v36 }
 0x437   : > { %3756 = vmatmul.mubr.f32.vlgmr.msra.gmra.mrb[40].mxu0 %v6550_v55 }
 0x438   : > { %4160 = vmatpush3.bf16.xpose.msk.msra.mxu0 %vm5812_vm1, %v4155_v13  ;;  %v1519_v29 = vpop.xlane.xlu0 %1518 }
 0x439   : > { %4163 = vmatprep.subr.msk.bf16.mxu0 %vm5812_vm1, %v4161_v7 }
 0x43c   : > { %v1517_v6 = vpop.xlane.xlu0 %1516 }
 0x43d   : > { %4873 = vrcp.f32 %v1517_v6 }
 0x43f   : > { %v4872_v56 = vpop.eup %4871 }
 0x440   : > { %4166 = vmatpush3.bf16.xpose.msk.msra.mxu0 %vm5812_vm1, %v4161_v7  ;;  %v6561_v24 = vmul.f32 %v4872_v56, %v6441_v41  ;;  %v1523_v41 = vpop.xlane.xlu0 %1522 }
 0x441   : > { %4169 = vmatprep.subr.msk.bf16.mxu0 %vm5812_vm1, %v4167_v61 }
 0x442   : > { %3758 = vmatprep.mubr.f32.mxu0 %v6561_v24 }
 0x445   : > { %v1521_v9 = vpop.xlane.xlu0 %1520 }
 0x447   : > { %v4874_v15 = vpop.eup %4873 }
 0x448   : > { %4172 = vmatpush3.bf16.xpose.msk.msra.mxu0 %vm5812_vm1, %v4167_v61  ;;  %v6582_v7 = vmul.f32 %v4874_v15, %v6454_v59 }
 0x449   : > { %4175 = vmatprep.subr.msk.bf16.mxu0 %vm5812_vm1, %v4173_v23  ;;  %v4626_v52 = vpop.permute.xlu0 %4625 }
 0x44a   : > { %v4628_v11 = vunpack.i.h.bf16 %v4626_v52  ;;  %v4627_v53 = vunpack.i.l.bf16 %v4626_v52 }
 0x44c   : > { %v4185_v5 = vpack.c.bf16 %v4628_v11, %v4627_v53  ;;  %v7389_v11 = vld [vmem:[#allocation36_spill] sm:$0xff] }
 0x450   : > { %4178 = vmatpush3.bf16.xpose.msk.msra.mxu0 %vm5812_vm1, %v4173_v23  ;;  %v4959_v23 = vld [vmem:[%s5798_s28 + $0x10] sm:$0xff] }
 0x45d   : > { %v1515_v47 = vpop.xlane.xlu1 %1514 }
 0x45e   : > { %4875 = vrcp.f32 %v1515_v47 }
 0x45f   : > { %4877 = vrcp.f32 %v1519_v29  ;;  %v4960_v29 = vld [vmem:[%s5798_s28 + $0x18] sm:$0xff] }
 0x460   : > { %4879 = vrcp.f32 %v1521_v9  ;;  %v6624_v6 = vpack.i.bf16 %v4960_v29, %v4959_v23  ;;  %v4964_v9 = vld [vmem:[%s5798_s28 + $0x38] sm:$0xff] }
 0x461   : > { %v4621_v37 = vpop.permute.xlu1 %4620  ;;  %4881 = vrcp.f32 %v1523_v41 }
 0x462   : > { %v4623_v12 = vunpack.i.h.bf16 %v4621_v37  ;;  %v4622_v13 = vunpack.i.l.bf16 %v4621_v37  ;;  %4645 = vrot.lane.b32.xlu0 %v6624_v6, %s5327_s10 }
 0x464   : > { %v4179_v25 = vpack.c.bf16 %v4623_v12, %v4622_v13 }
 0x465   : > { %v4631_v18 = vpop.permute.xlu1 %4630 }
 0x466   : > { %4181 = vmatprep.subr.msk.bf16.mxu0 %vm5812_vm1, %v4179_v25  ;;  %v4633_v42 = vunpack.i.h.bf16 %v4631_v18  ;;  %v4632_v49 = vunpack.i.l.bf16 %v4631_v18 }
 0x467   : > { %4184 = vmatpush3.bf16.xpose.msk.msra.mxu0 %vm5812_vm1, %v4179_v25 }
 0x468   : > { %v4876_v27 = vpop.eup %4875  ;;  %4187 = vmatprep.subr.msk.bf16.mxu0 %vm5812_vm1, %v4185_v5  ;;  %v4191_v46 = vpack.c.bf16 %v4633_v42, %v4632_v49 }
 0x469   : > { %v6579_v17 = vmul.f32 %v4876_v27, %v6483_v19  ;;  %v4878_v44 = vpop.eup %4877  ;;  %v4636_v19 = vpop.permute.xlu1 %4635 }
 0x46a   : > { %v4880_v22 = vpop.eup %4879  ;;  %v6587_v56 = vmul.f32 %v4878_v44, %v6449_v21  ;;  %v4638_v59 = vunpack.i.h.bf16 %v4636_v19  ;;  %v4637_v40 = vunpack.i.l.bf16 %v4636_v19 }
 0x46b   : > { %3759 = vmatmul.mubr.f32.gmra.mrb[42].mxu0 %v6579_v17  ;;  %v4882_v61 = vpop.eup %4881  ;;  %v6590_v16 = vmul.f32 %v4880_v22, %v6463_v8 }
 0x46c   : > { %3761 = vmatprep.mubr.f32.mxu0 %v6582_v7  ;;  %v6597_v21 = vmul.f32 %v4882_v61, %v6457_v1  ;;  %v4197_v8 = vpack.c.bf16 %v4638_v59, %v4637_v40  ;;  %v4958_v1 = vld [vmem:[%s5798_s28 + $0x8] sm:$0xff] }
 0x46d   : > { %v6672_v13 = vpop.permute.xlu1 %1719 }
 0x46f   : > { %3762 = vmatmul.mubr.f32.gmra.mrb[44].mxu0 %v6587_v56 }
 0x470   : > { %4190 = vmatpush3.bf16.xpose.msk.msra.mxu0 %vm5812_vm1, %v4185_v5  ;;  %3764 = vmatprep.mubr.f32.mxu0 %v6590_v16  ;;  %v6678_v5 = vpop.permute.xlu0 %1727 }
 0x471   : > { %4193 = vmatprep.subr.msk.bf16.mxu0 %vm5812_vm1, %v4191_v46 }
 0x473   : > { %3765 = vmatmul.mubr.f32.gmra.mrb[46].mxu0 %v6597_v21 }
 0x474   : > { %3799 = vmatprep.mubr.msk.f32.mxu0 %vm591_vm0, %v6008_v30  ;;  %v4957_v30 = vld [vmem:[%s5798_s28] sm:$0xff]  ;;  %v6686_v27 = vpop.permute.xlu0 %1735 }
 0x475   : > { %v6620_v3 = vpack.i.bf16 %v4958_v1, %v4957_v30 }
 0x477   : > { %4640 = vrot.lane.b32.xlu1 %v6620_v3, %s5327_s10 }
 0x478   : > { %4196 = vmatpush3.bf16.xpose.msk.msra.mxu0 %vm5812_vm1, %v4191_v46  ;;  %v6692_v49 = vpop.permute.xlu0 %1743 }
 0x479   : > { %4199 = vmatprep.subr.msk.bf16.mxu0 %vm5812_vm1, %v4197_v8 }
 0x480   : > { %4202 = vmatpush3.bf16.xpose.msk.msra.mxu0 %vm5812_vm1, %v4197_v8 }
 0x487   : > { %3800 = vmatmul.mubr.msk.f32.vlgmr.msra.gmra.mrb[48].mxu0 %vm591_vm0, %v6010_v31 }
 0x488   : > { %3802 = vmatprep.mubr.msk.f32.mxu0 %vm591_vm0, %v6016_v32  ;;  %v4961_v32 = vld [vmem:[%s5798_s28 + $0x20] sm:$0xff] }
 0x48b   : > { %3803 = vmatmul.mubr.msk.f32.gmra.mrb[50].mxu0 %vm591_vm0, %v6020_v33  ;;  %v4962_v33 = vld [vmem:[%s5798_s28 + $0x28] sm:$0xff] }
 0x48c   : > { %3805 = vmatprep.mubr.msk.f32.mxu0 %vm591_vm0, %v6024_v34  ;;  %v6634_v41 = vpack.i.bf16 %v4962_v33, %v4961_v32  ;;  %v4963_v34 = vld [vmem:[%s5798_s28 + $0x30] sm:$0xff] }
 0x48d   : > { %v6638_v47 = vpack.i.bf16 %v4964_v9, %v4963_v34 }
 0x48e   : > { %v6626_v31 = vpop.f32.mrb[32].mxu0  ;;  %4650 = vrot.lane.b32.xlu1 %v6634_v41, %s5327_s10 }
 0x48f   : > { %7387 = vst [vmem:[#allocation59_spill] sm:$0xff] %v6626_v31  ;;  %v6640_v52 = vpop.f32.mrb[33].mxu0  ;;  %3806 = vmatmul.mubr.msk.f32.gmra.mrb[52].mxu0 %vm591_vm0, %v6033_v39  ;;  %4655 = vrot.lane.b32.xlu0 %v6638_v47, %s5327_s10 }
 0x490   : > { %7388 = vst [vmem:[#allocation60_spill] sm:$0xff] %v6640_v52  ;;  %3808 = vmatprep.mubr.msk.f32.mxu0 %vm591_vm0, %v6028_v35 }
 0x492   : > { %4660 = vrot.lane.b32.xlu1 %v6398_v14, %s5327_s10 }
 0x493   : > { %3809 = vmatmul.mubr.msk.f32.gmra.mrb[54].mxu0 %vm591_vm0, %v7389_v11  ;;  %4665 = vrot.lane.b32.xlu0 %v6409_v50, %s5327_s10  ;;  %v6674_v50 = vpop.permute.xlu1 %1723 }
 0x496   : > { %4670 = vrot.lane.b32.xlu1 %v6415_v58, %s5327_s10 }
 0x497   : > { %v6676_v58 = vpop.permute.xlu1 %1731 }
 0x49a   : > { %4675 = vrot.lane.b32.xlu1 %v6421_v51, %s5327_s10 }
 0x49b   : > { %v6680_v51 = vpop.permute.xlu1 %1739 }
 0x49f   : > { %v6690_v42 = vpop.permute.xlu1 %1747 }
 0x4c5   : > { %v6660_v35 = vpop.f32.mrb[34].mxu0 }
 0x4c6   : > { %7390 = vst [vmem:[#allocation36_spill] sm:$0xff] %v6660_v35  ;;  %v6662_v39 = vpop.f32.mrb[35].mxu0 }
 0x4c7   : > { %7391 = vst [vmem:[#allocation61_spill] sm:$0xff] %v6662_v39 }
 0x4c9   : > { %v6664_v53 = vpop.f32.mrb[36].mxu0 }
 0x4ca   : > { %7392 = vst [vmem:[#allocation62_spill] sm:$0xff] %v6664_v53  ;;  %v6666_v37 = vpop.f32.mrb[37].mxu0 }
 0x4cb   : > { %7393 = vst [vmem:[#allocation63_spill] sm:$0xff] %v6666_v37 }
 0x4ce   : > { %v6668_v12 = vpop.f32.mrb[38].mxu0 }
 0x4cf   : > { %7394 = vst [vmem:[#allocation64_spill] sm:$0xff] %v6668_v12  ;;  %v6670_v14 = vpop.f32.mrb[39].mxu0 }
 0x4d0   : > { %7395 = vst [vmem:[#allocation65_spill] sm:$0xff] %v6670_v14 }
 0x4d4   : > { %v4646_v19 = vpop.permute.xlu0 %4645 }
 0x4d5   : > { %v4648_v59 = vunpack.i.h.bf16 %v4646_v19  ;;  %v4647_v40 = vunpack.i.l.bf16 %v4646_v19 }
 0x4d7   : > { %v4207_v23 = vpack.c.bf16 %v4648_v59, %v4647_v40 }
 0x4e9   : > { %v4641_v44 = vpop.permute.xlu1 %4640 }
 0x4ea   : > { %v4643_v22 = vunpack.i.h.bf16 %v4641_v44  ;;  %v4642_v46 = vunpack.i.l.bf16 %v4641_v44 }
 0x4ec   : > { %v4203_v61 = vpack.c.bf16 %v4643_v22, %v4642_v46 }
 0x4ee   : > { %4204 = vmatprep.subr.bf16.mxu1 %v4203_v61 }
 0x4ef   : > { %4206 = vmatpush3.bf16.msra.mxu1 %v4203_v61 }
 0x4f0   : > { %4208 = vmatprep.subr.bf16.mxu1 %v4207_v23 }
 0x4f3   : > { %4210 = vmatpush3.bf16.msra.mxu1 %v4207_v23 }
 0x500   : > { %v4651_v8 = vpop.permute.xlu1 %4650 }
 0x501   : > { %v4653_v30 = vunpack.i.h.bf16 %v4651_v8  ;;  %v4652_v1 = vunpack.i.l.bf16 %v4651_v8  ;;  %v4656_v32 = vpop.permute.xlu0 %4655 }
 0x502   : > { %v4658_v33 = vunpack.i.h.bf16 %v4656_v32  ;;  %v4657_v34 = vunpack.i.l.bf16 %v4656_v32 }
 0x503   : > { %v4211_v29 = vpack.c.bf16 %v4653_v30, %v4652_v1 }
 0x504   : > { %v4215_v9 = vpack.c.bf16 %v4658_v33, %v4657_v34  ;;  %v4661_v11 = vpop.permute.xlu1 %4660 }
 0x505   : > { %4212 = vmatprep.subr.bf16.mxu1 %v4211_v29  ;;  %v4666_v44 = vpop.permute.xlu0 %4665  ;;  %v4663_v22 = vunpack.i.h.bf16 %v4661_v11  ;;  %v4662_v46 = vunpack.i.l.bf16 %v4661_v11 }
 0x506   : > { %4214 = vmatpush3.bf16.msra.mxu1 %v4211_v29  ;;  %v4668_v19 = vunpack.i.h.bf16 %v4666_v44  ;;  %v4667_v18 = vunpack.i.l.bf16 %v4666_v44 }
 0x507   : > { %4216 = vmatprep.subr.bf16.mxu1 %v4215_v9  ;;  %v4219_v61 = vpack.c.bf16 %v4663_v22, %v4662_v46  ;;  %v1751_v46 = vsel %vm529_vm5, %v6678_v5, 0.0 }
 0x508   : > { %v4671_v12 = vpop.permute.xlu1 %4670  ;;  %v4223_v59 = vpack.c.bf16 %v4668_v19, %v4667_v18  ;;  %v1750_v19 = vsel %vm528_vm3, %v6674_v50, 0.0  ;;  %v1753_v18 = vsel %vm531_vm6, %v6686_v27, 0.0  ;;  %v1755_v27 = vsel %vm533_vm8, %v6692_v49, 0.0 }
 0x509   : > { %v4673_v40 = vunpack.i.h.bf16 %v4671_v12  ;;  %v4672_v8 = vunpack.i.l.bf16 %v4671_v12 }
 0x50a   : > { %v6682_v25 = vpop.f32.mrb[40].mxu0  ;;  %4218 = vmatpush3.bf16.msra.mxu1 %v4215_v9 }
 0x50b   : > { %v6684_v15 = vpop.f32.mrb[41].mxu0  ;;  %4220 = vmatprep.subr.bf16.mxu1 %v4219_v61  ;;  %v4227_v1 = vpack.c.bf16 %v4673_v40, %v4672_v8  ;;  %v1749_v40 = vsel %vm527_vm2, %v6672_v13, 0.0 }
 0x50c   : > { %v4676_v30 = vpop.permute.xlu1 %4675 }
 0x50d   : > { %v4678_v23 = vunpack.i.h.bf16 %v4676_v30  ;;  %v4677_v32 = vunpack.i.l.bf16 %v4676_v30 }
 0x50e   : > { %4222 = vmatpush3.bf16.msra.mxu1 %v4219_v61 }
 0x50f   : > { %4224 = vmatprep.subr.bf16.mxu1 %v4223_v59  ;;  %v4231_v29 = vpack.c.bf16 %v4678_v23, %v4677_v32  ;;  %v1752_v32 = vsel %vm530_vm4, %v6676_v58, 0.0 }
 0x512   : > { %4226 = vmatpush3.bf16.msra.mxu1 %v4223_v59 }
 0x513   : > { %4228 = vmatprep.subr.bf16.mxu1 %v4227_v1 }
 0x516   : > { %4230 = vmatpush3.bf16.msra.mxu1 %v4227_v1 }
 0x517   : > { %4232 = vmatprep.subr.bf16.mxu1 %v4231_v29 }
 0x51a   : > { %4234 = vmatpush3.bf16.msra.mxu1 %v4231_v29 }
 0x53e   : > { %v6694_v33 = vpop.f32.mrb[42].mxu0 }
 0x53f   : > { %v6696_v34 = vpop.f32.mrb[43].mxu0 }
 0x542   : > { %v6700_v12 = vpop.f32.mrb[44].mxu0 }
 0x543   : > { %v6702_v9 = vpop.f32.mrb[45].mxu0 }
 0x544   : > { %7396 = vst [vmem:[#allocation66_spill] sm:$0xff] %v6702_v9 }
 0x546   : > { %v6706_v44 = vpop.f32.mrb[46].mxu0 }
 0x547   : > { %7397 = vst [vmem:[#allocation67_spill] sm:$0xff] %v6706_v44  ;;  %v6708_v22 = vpop.f32.mrb[47].mxu0 }
 0x548   : > { %7398 = vst [vmem:[#allocation68_spill] sm:$0xff] %v6708_v22 }
 0x55a   : > { %v3801_v61 = vpop.f32.mrb[48].mxu0 }
 0x55b   : > { %v1893_v8 = vadd.f32 %v3801_v61, %v1750_v19  ;;  %v1887_v30 = vpop.f32.mrb[49].mxu0 }
 0x55c   : > { %v1888_v1 = vadd.f32 %v1887_v30, %v1749_v40  ;;  %v1754_v30 = vsel %vm532_vm7, %v6680_v51, 0.0 }
 0x55d   : > { %1928 = vmax.xlane.f32.xlu1 %v1893_v8 }
 0x55e   : > { %v3804_v29 = vpop.f32.mrb[50].mxu0  ;;  %1926 = vmax.xlane.f32.xlu0 %v1888_v1 }
 0x55f   : > { %v1903_v13 = vadd.f32 %v3804_v29, %v1752_v32  ;;  %v1897_v19 = vpop.f32.mrb[51].mxu0  ;;  %v4965_v32 = vld [vmem:[%s5791_s27 + $0x10] sm:$0xff]  ;;  %v4966_v29 = vld [vmem:[%s5791_s27 + $0x18] sm:$0xff] }
 0x560   : > { %v1898_v61 = vadd.f32 %v1897_v19, %v1751_v46  ;;  %v4684_v39 = vpack.i.bf16 %v4966_v29, %v4965_v32  ;;  %v4967_v46 = vld [vmem:[%s5791_s27] sm:$0xff]  ;;  %v4968_v19 = vld [vmem:[%s5791_s27 + $0x8] sm:$0xff] }
 0x561   : > { %v4679_v52 = vpack.i.bf16 %v4968_v19, %v4967_v46 }
 0x562   : > { %v3807_v11 = vpop.f32.mrb[52].mxu0 }
 0x563   : > { %v1913_v14 = vadd.f32 %v3807_v11, %v1754_v30  ;;  %v1907_v53 = vpop.f32.mrb[53].mxu0 }
 0x564   : > { %v1908_v37 = vadd.f32 %v1907_v53, %v1753_v18  ;;  %v4971_v18 = vld [vmem:[%s5798_s28 + $0x40] sm:$0xff] }
 0x566   : > { %v3810_v5 = vpop.f32.mrb[54].mxu0 }
 0x567   : > { %v1917_v35 = vpop.f32.mrb[55].mxu0 }
 0x568   : > { %v1918_v53 = vadd.f32 %v1917_v35, %v1755_v27 }
 0x56e   : > { %4685 = vrot.lane.b32.xlu1 %v4684_v39, %s5328_s7  ;;  %v1756_v39 = vsel %vm534_vm9, %v6690_v42, 0.0 }
 0x56f   : > { %v1923_v11 = vadd.f32 %v3810_v5, %v1756_v39 }
 0x574   : > { %4680 = vrot.lane.b32.xlu0 %v4679_v52, %s5328_s7 }
 0x592   : > { %1934 = vmax.xlane.f32.xlu1 %v1908_v37 }
 0x593   : > { %1932 = vmax.xlane.f32.xlu0 %v1903_v13 }
 0x596   : > { %1938 = vmax.xlane.f32.xlu1 %v1918_v53 }
 0x597   : > { %1930 = vmax.xlane.f32.xlu0 %v1898_v61 }
 0x59b   : > { %1936 = vmax.xlane.f32.xlu0 %v1913_v14 }
 0x59f   : > { %1940 = vmax.xlane.f32.xlu0 %v1923_v11 }
 0x5a7   : > { %4695 = vrot.lane.b32.xlu1 %v6446_v20, %s5328_s7 }
 0x5ea   : > { %v1929_v52 = vpop.xlane.xlu1 %1928 }
 0x5eb   : > { %v1943_v30 = vsub.f32 %v1893_v8, %v1929_v52  ;;  %v1927_v32 = vpop.xlane.xlu0 %1926  ;;  %v4969_v8 = vld [vmem:[%s5791_s27 + $0x20] sm:$0xff] }
 0x5ec   : > { %v1942_v49 = vsub.f32 %v1888_v1, %v1927_v32  ;;  %v4970_v1 = vld [vmem:[%s5791_s27 + $0x28] sm:$0xff]  ;;  %s7029_s27 = scalar_lea.vmem [#allocation12], %s5779_s8 }
 0x5ed   : > { %v1952_v35 = vmul.f32 1.442695, %v1943_v30  ;;  %v4689_v5 = vpack.i.bf16 %v4970_v1, %v4969_v8 }
 0x5ee   : > { %v1950_v29 = vmul.f32 1.442695, %v1942_v49  ;;  %v6768_v30 = vpop.permute.xlu1 %4685 }
 0x5ef   : > { %4883 = vpow2.f32 %v1952_v35  ;;  %v4681_v46 = vpop.permute.xlu0 %4680 }
 0x5f0   : > { %4885 = vpow2.f32 %v1950_v29  ;;  %v4683_v19 = vunpack.i.h.bf16 %v4681_v46  ;;  %v4682_v27 = vunpack.i.l.bf16 %v4681_v46 }
 0x5f2   : > { %v6752_v31 = vpack.c.bf16 %v4683_v19, %v4682_v27 }
 0x5f4   : > { %4237 = vmatprep.subr.msk.bf16.mxu1 %vm5812_vm1, %v6752_v31 }
 0x5f9   : > { %v6757_v20 = vpop.eup %4883 }
 0x5fa   : > { %v6759_v42 = vpop.eup %4885  ;;  %1968 = vadd.xlane.f32.xlu0 %v6757_v20 }
 0x5fb   : > { %1966 = vadd.xlane.f32.xlu1 %v6759_v42 }
 0x60c   : > { %4700 = vrot.lane.b32.xlu1 %v6494_v38, %s5328_s7 }
 0x610   : > { %4690 = vrot.lane.b32.xlu0 %v4689_v5, %s5328_s7 }
 0x61f   : > { %v1935_v29 = vpop.xlane.xlu1 %1934 }
 0x620   : > { %v1933_v39 = vpop.xlane.xlu0 %1932  ;;  %v1946_v27 = vsub.f32 %v1908_v37, %v1935_v29 }
 0x621   : > { %v1945_v52 = vsub.f32 %v1903_v13, %v1933_v39 }
 0x622   : > { %v1958_v9 = vmul.f32 1.442695, %v1946_v27 }
 0x623   : > { %v1956_v32 = vmul.f32 1.442695, %v1945_v52  ;;  %v1939_v1 = vpop.xlane.xlu1 %1938  ;;  %v7408_v52 = vld [vmem:[#allocation53_spill] sm:$0xff] }
 0x624   : > { %v1931_v49 = vpop.xlane.xlu0 %1930  ;;  %v1948_v13 = vsub.f32 %v1918_v53, %v1939_v1  ;;  %v7406_v53 = vld [vmem:[#allocation52_spill] sm:$0xff]  ;;  %v4687_v1 = vunpack.i.l.bf16 %v6768_v30 }
 0x625   : > { %4887 = vpow2.f32 %v1956_v32  ;;  %v1944_v35 = vsub.f32 %v1898_v61, %v1931_v49  ;;  %v7409_v32 = vld [vmem:[#allocation55_spill] sm:$0xff]  ;;  %v7412_v49 = vld [vmem:[#allocation56_spill] sm:$0xff] }
 0x626   : > { %v1962_v37 = vmul.f32 1.442695, %v1948_v13 }
 0x627   : > { %v1954_v46 = vmul.f32 1.442695, %v1944_v35  ;;  %v7413_v35 = vld [vmem:[#allocation58_spill] sm:$0xff]  ;;  %v4696_v29 = vpop.permute.xlu1 %4695 }
 0x628   : > { %v1937_v19 = vpop.xlane.xlu0 %1936 }
 0x629   : > { %4889 = vpow2.f32 %v1954_v46  ;;  %v1947_v22 = vsub.f32 %v1913_v14, %v1937_v19 }
 0x62b   : > { %v1960_v38 = vmul.f32 1.442695, %v1947_v22 }
 0x62c   : > { %v1941_v44 = vpop.xlane.xlu0 %1940 }
 0x62d   : > { %4891 = vpow2.f32 %v1960_v38  ;;  %v1949_v8 = vsub.f32 %v1923_v11, %v1941_v44  ;;  %v7407_v11 = vld [vmem:[#allocation51_spill] sm:$0xff] }
 0x62e   : > { %4893 = vpow2.f32 %v1958_v9 }
 0x62f   : > { %v6770_v5 = vpop.eup %4887  ;;  %v1964_v39 = vmul.f32 1.442695, %v1949_v8  ;;  %v1541_v8 = vadd.f32 %v6550_v55, %v6470_v4 }
 0x630   : > { %1972 = vadd.xlane.f32.xlu1 %v6770_v5 }
 0x631   : > { %4895 = vpow2.f32 %v1964_v39  ;;  %v1540_v39 = vadd.f32 %v6547_v36, %v6461_v2  ;;  %v4698_v36 = vunpack.i.h.bf16 %v4696_v29 }
 0x632   : > { %4897 = vpow2.f32 %v1962_v37 }
 0x633   : > { %v6773_v61 = vpop.eup %4889 }
 0x634   : > { %1970 = vadd.xlane.f32.xlu0 %v6773_v61 }
 0x637   : > { %v6776_v14 = vpop.eup %4891 }
 0x638   : > { %1976 = vadd.xlane.f32.xlu0 %v6776_v14  ;;  %v6779_v44 = vpop.eup %4893 }
 0x63b   : > { %v6782_v22 = vpop.eup %4895 }
 0x63c   : > { %1974 = vadd.xlane.f32.xlu0 %v6779_v44  ;;  %v6787_v9 = vpop.eup %4897 }
 0x640   : > { %1980 = vadd.xlane.f32.xlu0 %v6782_v22 }
 0x641   : > { %4710 = vrot.lane.b32.xlu1 %v6500_v43, %s5328_s7  ;;  %v7410_v43 = vld [vmem:[#allocation57_spill] sm:$0xff] }
 0x644   : > { %1978 = vadd.xlane.f32.xlu0 %v6787_v9 }
 0x645   : > { %4715 = vrot.lane.b32.xlu1 %v6506_v62, %s5328_s7  ;;  %v7411_v62 = vld [vmem:[#allocation54_spill] sm:$0xff] }
 0x649   : > { %2161 = vrot.lane.b32.xlu1 %v7406_v53, %s5330_s5 }
 0x64d   : > { %2165 = vrot.lane.b32.xlu1 %v7407_v11, %s5329_s6 }
 0x651   : > { %2173 = vrot.lane.b32.xlu1 %v7408_v52, %s5331_s17  ;;  %s7439_s17 = sld [smem:[#allocation74_spill]] }
 0x655   : > { %2181 = vrot.lane.b32.xlu1 %v7409_v32, %s5333_s21  ;;  %s2914_s21 = sshll.u32 %s7029_s27, 4  ;;  %s7107_s21 = int_to_ptr.vmem [resolvable:$true] %s2914_s21 }
 0x659   : > { %2189 = vrot.lane.b32.xlu1 %v7410_v43, %s5335_s24  ;;  %s5127_s24 = scalar_lea.vmem %s7107_s21, 1024 }
 0x65a   : > { %4705 = vrot.lane.b32.xlu0 %v6479_v26, %s5328_s7  ;;  %v4688_v26 = vunpack.i.h.bf16 %v6768_v30  ;;  %p5128_p4 = scmp.ne.s32.totalorder %s7107_s21, %s5127_s24 }
 0x65c   : > { %v4241_v52 = vpack.c.bf16 %v4688_v26, %v4687_v1  ;;  %v1542_v1 = vadd.f32 %v6561_v24, %v6513_v48  ;;  %p5129_p5 = pnand %p5128_p4, %p7440_p9 }
 0x65d   : > { %4720 = vrot.lane.b32.xlu1 %v6620_v3, %s5328_s7 }
 0x65e   : > { %2169 = vrot.lane.b32.xlu0 %v7411_v62, %s5332_s11  ;;  %p5130_p0 = pneg %p5129_p5 }
 0x662   : > { %2177 = vrot.lane.b32.xlu0 %v7412_v49, %s5334_s22  ;;  %s2881_s22 = scalar_lea.sflag [#allocation13], %s5776_s30 }
 0x666   : > { %2185 = vrot.lane.b32.xlu0 %v7413_v35, %s5336_s20  ;;  %s5337_s20 = smov [#allocation12]  }
 0x667   : > { %s5131_s1 = sshll.u32 %s5337_s20, 4  ;;  %s5132_s1 = int_to_ptr.vmem [resolvable:$false] %s5131_s1 }
 0x668   : > { %s5133_s25 = scalar_lea.vmem %s5132_s1, 2048  ;;  %p5134_p3 = scmp.lt.s32.totalorder %s7107_s21, %s5132_s1 }
 0x669   : > { %p5135_p13 = scmp.lt.s32.totalorder %s5133_s25, %s5127_s24 }
 0x66a   : > { %4725 = vrot.lane.b32.xlu0 %v6624_v6, %s5328_s7 }
 0x66b   : > { %p5136_p6 = por %p5135_p13, %p5134_p3 }
 0x66d   : > { %p5137_p12 = pnand %p5136_p6, %p5130_p0 }
 0x687   : > { %v1969_v46 = vpop.xlane.xlu0 %1968 }
 0x688   : > { %4899 = vrcp.f32 %v1969_v46  ;;  %v1967_v19 = vpop.xlane.xlu1 %1966 }
 0x689   : > { %4901 = vrcp.f32 %v1967_v19  ;;  %v1543_v19 = vadd.f32 %v6579_v17, %v6516_v28  ;;  %v1545_v28 = vadd.f32 %v6587_v56, %v6526_v57 }
 0x68b   : > { %v4691_v32 = vpop.permute.xlu0 %4690 }
 0x68c   : > { %v4693_v4 = vunpack.i.h.bf16 %v4691_v32  ;;  %v4692_v55 = vunpack.i.l.bf16 %v4691_v32  ;;  %v4701_v30 = vpop.permute.xlu1 %4700 }
 0x68d   : > { %v4702_v43 = vunpack.i.l.bf16 %v4701_v30 }
 0x68e   : > { %v4247_v2 = vpack.c.bf16 %v4693_v4, %v4692_v55 }
 0x692   : > { %v4900_v27 = vpop.eup %4899 }
 0x693   : > { %v4902_v38 = vpop.eup %4901  ;;  %v1991_v13 = vmul.f32 %v4900_v27, %v6757_v20  ;;  %v4697_v20 = vunpack.i.l.bf16 %v4696_v29 }
 0x694   : > { %v1990_v37 = vmul.f32 %v4902_v38, %v6759_v42 }
 0x695   : > { %v6818_v53 = vadd.f32 %v1991_v13, %v1541_v8  ;;  %v4253_v42 = vpack.c.bf16 %v4698_v36, %v4697_v20 }
 0x696   : > { %v6820_v11 = vadd.f32 %v1990_v37, %v1540_v39  ;;  %3843 = vmatprep.mubr.f32.mxu1 %v1990_v37 }
 0x697   : > { %3844 = vmatmul.mubr.f32.vlgmr.msra.gmra.mrb[16].mxu1 %v1991_v13 }
 0x698   : > { %4240 = vmatpush3.bf16.xpose.msk.msra.mxu1 %vm5812_vm1, %v6752_v31  ;;  %v4703_v31 = vunpack.i.h.bf16 %v4701_v30 }
 0x699   : > { %4243 = vmatprep.subr.msk.bf16.mxu1 %vm5812_vm1, %v4241_v52 }
 0x69a   : > { %v4259_v62 = vpack.c.bf16 %v4703_v31, %v4702_v43  ;;  %v1547_v31 = vadd.f32 %v6597_v21, %v6533_v10  ;;  %v1546_v10 = vadd.f32 %v6590_v16, %v6536_v54  ;;  %v7415_v54 = vld [vmem:[#allocation38_spill] sm:$0xff]  ;;  %v7416_v16 = vld [vmem:[#allocation37_spill] sm:$0xff] }
 0x6a0   : > { %4246 = vmatpush3.bf16.xpose.msk.msra.mxu1 %vm5812_vm1, %v4241_v52 }
 0x6a1   : > { %4249 = vmatprep.subr.msk.bf16.mxu1 %vm5812_vm1, %v4247_v2 }
 0x6a8   : > { %4252 = vmatpush3.bf16.xpose.msk.msra.mxu1 %vm5812_vm1, %v4247_v2 }
 0x6a9   : > { %4255 = vmatprep.subr.msk.bf16.mxu1 %vm5812_vm1, %v4253_v42 }
 0x6b0   : > { %4258 = vmatpush3.bf16.xpose.msk.msra.mxu1 %vm5812_vm1, %v4253_v42 }
 0x6b1   : > { %4261 = vmatprep.subr.msk.bf16.mxu1 %vm5812_vm1, %v4259_v62 }
 0x6b8   : > { %4264 = vmatpush3.bf16.xpose.msk.msra.mxu1 %vm5812_vm1, %v4259_v62 }
 0x6bd   : > { %v1973_v49 = vpop.xlane.xlu1 %1972 }
 0x6be   : > { %4903 = vrcp.f32 %v1973_v49 }
 0x6c1   : > { %v1971_v35 = vpop.xlane.xlu0 %1970  ;;  %v4711_v32 = vpop.permute.xlu1 %4710 }
 0x6c2   : > { %4905 = vrcp.f32 %v1971_v35  ;;  %v4713_v24 = vunpack.i.h.bf16 %v4711_v32  ;;  %v4712_v55 = vunpack.i.l.bf16 %v4711_v32 }
 0x6c4   : > { %v4271_v56 = vpack.c.bf16 %v4713_v24, %v4712_v55 }
 0x6c5   : > { %v1977_v29 = vpop.xlane.xlu0 %1976 }
 0x6c6   : > { %4907 = vrcp.f32 %v1977_v29  ;;  %v7414_v29 = vld [vmem:[#allocation35_spill] sm:$0xff] }
 0x6c8   : > { %v4904_v46 = vpop.eup %4903 }
 0x6c9   : > { %v1975_v27 = vpop.xlane.xlu0 %1974  ;;  %v1993_v38 = vmul.f32 %v4904_v46, %v6770_v5  ;;  %v7418_v46 = vld [vmem:[#allocation40_spill] sm:$0xff] }
 0x6ca   : > { %4909 = vrcp.f32 %v1975_v27  ;;  %v7421_v27 = vld [vmem:[#allocation43_spill] sm:$0xff] }
 0x6cb   : > { %v6844_v8 = vadd.f32 %v1993_v38, %v1543_v19  ;;  %v7419_v19 = vld [vmem:[#allocation41_spill] sm:$0xff] }
 0x6cc   : > { %v4906_v26 = vpop.eup %4905 }
 0x6cd   : > { %v1981_v13 = vpop.xlane.xlu0 %1980  ;;  %v1992_v39 = vmul.f32 %v4906_v26, %v6773_v61  ;;  %v1544_v61 = vadd.f32 %v6582_v7, %v6523_v45  ;;  %v4716_v45 = vpop.permute.xlu1 %4715 }
 0x6ce   : > { %4911 = vrcp.f32 %v1981_v13  ;;  %v4718_v62 = vunpack.i.h.bf16 %v4716_v45  ;;  %v4717_v49 = vunpack.i.l.bf16 %v4716_v45 }
 0x6cf   : > { %v6849_v37 = vadd.f32 %v1992_v39, %v1542_v1  ;;  %3846 = vmatprep.mubr.f32.mxu1 %v1992_v39 }
 0x6d0   : > { %v4908_v52 = vpop.eup %4907  ;;  %3847 = vmatmul.mubr.f32.gmra.mrb[18].mxu1 %v1993_v38  ;;  %v4277_v35 = vpack.c.bf16 %v4718_v62, %v4717_v49 }
 0x6d1   : > { %v1979_v17 = vpop.xlane.xlu0 %1978  ;;  %v1995_v5 = vmul.f32 %v4908_v52, %v6776_v14  ;;  %v2162_v3 = vpop.permute.xlu1 %2161 }
 0x6d2   : > { %4913 = vrcp.f32 %v1979_v17 }
 0x6d3   : > { %v6854_v4 = vadd.f32 %v1995_v5, %v1545_v28 }
 0x6d4   : > { %v4910_v48 = vpop.eup %4909 }
 0x6d5   : > { %v4706_v2 = vpop.permute.xlu0 %4705  ;;  %v1994_v36 = vmul.f32 %v4910_v48, %v6779_v44  ;;  %v2166_v26 = vpop.permute.xlu1 %2165 }
 0x6d6   : > { %v4708_v20 = vunpack.i.h.bf16 %v4706_v2  ;;  %v4707_v42 = vunpack.i.l.bf16 %v4706_v2  ;;  %v2192_v49 = vsel %vm528_vm3, %v2166_v26, 0.0 }
 0x6d7   : > { %v6859_v30 = vadd.f32 %v1994_v36, %v1544_v61  ;;  %3849 = vmatprep.mubr.f32.mxu1 %v1994_v36 }
 0x6d8   : > { %v4912_v57 = vpop.eup %4911  ;;  %v4265_v14 = vpack.c.bf16 %v4708_v20, %v4707_v42  ;;  %3850 = vmatmul.mubr.f32.gmra.mrb[20].mxu1 %v1995_v5 }
 0x6d9   : > { %v1997_v43 = vmul.f32 %v4912_v57, %v6782_v22  ;;  %v2174_v39 = vpop.permute.xlu1 %2173  ;;  %v2170_v24 = vpop.permute.xlu0 %2169 }
 0x6da   : > { %4267 = vmatprep.subr.msk.bf16.mxu1 %vm5812_vm1, %v4265_v14  ;;  %v2193_v63 = vsel %vm529_vm5, %v2170_v24, 0.0 }
 0x6db   : > { %4270 = vmatpush3.bf16.xpose.msk.msra.mxu1 %vm5812_vm1, %v4265_v14  ;;  %v6868_v7 = vadd.f32 %v1997_v43, %v1547_v31 }
 0x6dc   : > { %v4914_v44 = vpop.eup %4913  ;;  %4273 = vmatprep.subr.msk.bf16.mxu1 %vm5812_vm1, %v4271_v56 }
 0x6dd   : > { %v1996_v21 = vmul.f32 %v4914_v44, %v6787_v9  ;;  %v7417_v9 = vld [vmem:[#allocation39_spill] sm:$0xff]  ;;  %v2182_v52 = vpop.permute.xlu1 %2181  ;;  %v2178_v6 = vpop.permute.xlu0 %2177 }
 0x6de   : > { %v2196_v59 = vsel %vm532_vm7, %v2182_v52, 0.0  ;;  %v2195_v23 = vsel %vm531_vm6, %v2178_v6, 0.0 }
 0x6df   : > { %v6875_v22 = vadd.f32 %v1996_v21, %v1546_v10  ;;  %3852 = vmatprep.mubr.f32.mxu1 %v1996_v21  ;;  %v2191_v21 = vsel %vm527_vm2, %v2162_v3, 0.0 }
 0x6e0   : > { %3853 = vmatmul.mubr.f32.gmra.mrb[22].mxu1 %v1997_v43 }
 0x6e1   : > { %3887 = vmatprep.mubr.msk.f32.mxu1 %vm591_vm0, %v7414_v29  ;;  %v2190_v28 = vpop.permute.xlu1 %2189  ;;  %v2186_v55 = vpop.permute.xlu0 %2185 }
 0x6e2   : > { %v2198_v40 = vsel %vm534_vm9, %v2190_v28, 0.0  ;;  %v2197_v58 = vsel %vm533_vm8, %v2186_v55, 0.0  ;;  %v4972_v28 = vld [vmem:[%s5798_s28 + $0x48] sm:$0xff] }
 0x6e3   : > { %4276 = vmatpush3.bf16.xpose.msk.msra.mxu1 %vm5812_vm1, %v4271_v56 }
 0x6e4   : > { %4279 = vmatprep.subr.msk.bf16.mxu1 %vm5812_vm1, %v4277_v35 }
 0x6e5   : > { %v4721_v17 = vpop.permute.xlu1 %4720  ;;  %v4726_v61 = vpop.permute.xlu0 %4725 }
 0x6e6   : > { %v4723_v5 = vunpack.i.h.bf16 %v4721_v17  ;;  %v4722_v32 = vunpack.i.l.bf16 %v4721_v17  ;;  %v4728_v2 = vunpack.i.h.bf16 %v4726_v61  ;;  %v4727_v36 = vunpack.i.l.bf16 %v4726_v61 }
 0x6e8   : > { %v4283_v48 = vpack.c.bf16 %v4723_v5, %v4722_v32  ;;  %v4287_v20 = vpack.c.bf16 %v4728_v2, %v4727_v36  ;;  %v4739_v32 = vpack.i.bf16 %v4972_v28, %v4971_v18 }
 0x6ea   : > { %4284 = vmatprep.subr.bf16.mxu0 %v4283_v48 }
 0x6eb   : > { %4282 = vmatpush3.bf16.xpose.msk.msra.mxu1 %vm5812_vm1, %v4277_v35  ;;  %4286 = vmatpush3.bf16.msra.mxu0 %v4283_v48  ;;  %v4974_v48 = vld [vmem:[%s5798_s28 + $0x58] sm:$0xff] }
 0x6ec   : > { %4288 = vmatprep.subr.bf16.mxu0 %v4287_v20 }
 0x6ef   : > { %4290 = vmatpush3.bf16.msra.mxu0 %v4287_v20 }
 0x6f2   : > { %3888 = vmatmul.mubr.msk.f32.vlgmr.msra.gmra.mrb[24].mxu1 %vm591_vm0, %v7415_v54 }
 0x6f3   : > { %3890 = vmatprep.mubr.msk.f32.mxu1 %vm591_vm0, %v7416_v16  ;;  %v2194_v16 = vsel %vm530_vm4, %v2174_v39, 0.0 }
 0x6f6   : > { %3891 = vmatmul.mubr.msk.f32.gmra.mrb[26].mxu1 %vm591_vm0, %v7417_v9 }
 0x6f7   : > { %3893 = vmatprep.mubr.msk.f32.mxu1 %vm591_vm0, %v7418_v46 }
 0x6fa   : > { %3894 = vmatmul.mubr.msk.f32.gmra.mrb[28].mxu1 %vm591_vm0, %v7419_v19 }
 0x6fb   : > { %3896 = vmatprep.mubr.msk.f32.mxu1 %vm591_vm0, %v7420_v0 }
 0x6fe   : > { %3897 = vmatmul.mubr.msk.f32.gmra.mrb[30].mxu1 %vm591_vm0, %v7421_v27 }
 0x76a   : > { %v6903_v38 = vpop.f32.mrb[16].mxu1 }
 0x76b   : > { %v6905_v1 = vpop.f32.mrb[17].mxu1 }
 0x76c   : > { %v4764_v13 = vpack.i.bf16 %v6903_v38, %v6905_v1 }
 0x7a3   : > { %v6909_v42 = vpop.f32.mrb[18].mxu1 }
 0x7a4   : > { %v6911_v57 = vpop.f32.mrb[19].mxu1 }
 0x7a5   : > { %v4774_v56 = vpack.i.bf16 %v6909_v42, %v6911_v57 }
 0x7ab   : > { %v6915_v14 = vpop.f32.mrb[20].mxu1 }
 0x7ac   : > { %v6917_v31 = vpop.f32.mrb[21].mxu1 }
 0x7ad   : > { %v4784_v43 = vpack.i.bf16 %v6915_v14, %v6917_v31 }
 0x7b3   : > { %v6921_v45 = vpop.f32.mrb[22].mxu1 }
 0x7b4   : > { %v6923_v44 = vpop.f32.mrb[23].mxu1 }
 0x7b5   : > { %v4809_v62 = vpack.i.bf16 %v6921_v45, %v6923_v44 }
 0x7c5   : > { %v3889_v10 = vpop.f32.mrb[24].mxu1 }
 0x7c6   : > { %v2335_v35 = vadd.f32 %v3889_v10, %v2192_v49  ;;  %v2329_v29 = vpop.f32.mrb[25].mxu1 }
 0x7c7   : > { %v2330_v54 = vadd.f32 %v2329_v29, %v2191_v21 }
 0x7c8   : > { %2370 = vmax.xlane.f32.xlu1 %v2335_v35 }
 0x7c9   : > { %v3892_v9 = vpop.f32.mrb[26].mxu1  ;;  %2368 = vmax.xlane.f32.xlu0 %v2330_v54 }
 0x7ca   : > { %v2345_v46 = vadd.f32 %v3892_v9, %v2194_v16  ;;  %v2339_v19 = vpop.f32.mrb[27].mxu1 }
 0x7cb   : > { %v2340_v0 = vadd.f32 %v2339_v19, %v2193_v63 }
 0x7cd   : > { %v3895_v27 = vpop.f32.mrb[28].mxu1  ;;  %2374 = vmax.xlane.f32.xlu0 %v2345_v46 }
 0x7ce   : > { %v2355_v3 = vadd.f32 %v3895_v27, %v2196_v59  ;;  %v2349_v26 = vpop.f32.mrb[29].mxu1 }
 0x7cf   : > { %v6945_v39 = vadd.f32 %v2349_v26, %v2195_v23 }
 0x7d1   : > { %v3898_v50 = vpop.f32.mrb[30].mxu1  ;;  %2372 = vmax.xlane.f32.xlu0 %v2340_v0 }
 0x7d2   : > { %v2359_v17 = vpop.f32.mrb[31].mxu1  ;;  %v2365_v52 = vadd.f32 %v3898_v50, %v2198_v40 }
 0x7d3   : > { %v6958_v5 = vadd.f32 %v2359_v17, %v2197_v58 }
 0x7d5   : > { %2378 = vmax.xlane.f32.xlu0 %v2355_v3 }
 0x7d9   : > { %4730 = vrot.lane.b32.xlu1 %v6634_v41, %s5328_s7  ;;  %2382 = vmax.xlane.f32.xlu0 %v2365_v52  ;;  %v4973_v41 = vld [vmem:[%s5798_s28 + $0x50] sm:$0xff] }
 0x7da   : > { %v4744_v24 = vpack.i.bf16 %v4974_v48, %v4973_v41 }
 0x7ef   : > { %4735 = vrot.lane.b32.xlu0 %v6638_v47, %s5328_s7 }
 0x7fd   : > { %2376 = vmax.xlane.f32.xlu1 %v6945_v39 }
 0x801   : > { %2380 = vmax.xlane.f32.xlu1 %v6958_v5 }
 0x812   : > { %4740 = vrot.lane.b32.xlu1 %v4739_v32, %s5328_s7 }
 0x816   : > { %4745 = vrot.lane.b32.xlu1 %v4744_v24, %s5328_s7 }
 0x855   : > { %v2371_v47 = vpop.xlane.xlu1 %2370 }
 0x856   : > { %v2385_v6 = vsub.f32 %v2335_v35, %v2371_v47  ;;  %v2369_v61 = vpop.xlane.xlu0 %2368 }
 0x857   : > { %v2384_v2 = vsub.f32 %v2330_v54, %v2369_v61 }
 0x858   : > { %v2394_v60 = vmul.f32 1.442695, %v2385_v6 }
 0x859   : > { %v2392_v51 = vmul.f32 1.442695, %v2384_v2  ;;  %v4731_v55 = vpop.permute.xlu1 %4730 }
 0x85a   : > { %4915 = vpow2.f32 %v2394_v60  ;;  %v4733_v36 = vunpack.i.h.bf16 %v4731_v55  ;;  %v4732_v20 = vunpack.i.l.bf16 %v4731_v55  ;;  %v2375_v49 = vpop.xlane.xlu0 %2374 }
 0x85b   : > { %4917 = vpow2.f32 %v2392_v51  ;;  %v2387_v10 = vsub.f32 %v2345_v46, %v2375_v49  ;;  %v4975_v49 = vld [vmem:[%s5798_s28 + $0x70] sm:$0xff] }
 0x85c   : > { %v4291_v21 = vpack.c.bf16 %v4733_v36, %v4732_v20 }
 0x85d   : > { %v2398_v29 = vmul.f32 1.442695, %v2387_v10  ;;  %v4976_v10 = vld [vmem:[%s5798_s28 + $0x78] sm:$0xff] }
 0x85e   : > { %4292 = vmatprep.subr.bf16.mxu0 %v4291_v21  ;;  %v2373_v16 = vpop.xlane.xlu0 %2372 }
 0x85f   : > { %4919 = vpow2.f32 %v2398_v29  ;;  %v2386_v9 = vsub.f32 %v2340_v0, %v2373_v16  ;;  %4294 = vmatpush3.bf16.msra.mxu0 %v4291_v21  ;;  %v4754_v21 = vpack.i.bf16 %v4976_v10, %v4975_v49  ;;  %v7422_v29 = vpack.i.bf16 %v6682_v25, %v6684_v15  ;;  %v4977_v16 = vld [vmem:[%s5798_s28 + $0x60] sm:$0xff]  ;;  %v7424_v25 = vld [vmem:[#allocation66_spill] sm:$0xff]  ;;  %v2725_v10 = vld [vmem:[#allocation10 + $0x10] sm:$0xff] }
 0x860   : > { %v7425_v15 = vpack.i.bf16 %v6700_v12, %v7424_v25 }
 0x861   : > { %v2396_v63 = vmul.f32 1.442695, %v2386_v9  ;;  %v4978_v9 = vld [vmem:[%s5798_s28 + $0x68] sm:$0xff]  ;;  %s7435_s28 = sld [smem:[#allocation26_spill]] }
 0x862   : > { %v2379_v35 = vpop.xlane.xlu0 %2378 }
 0x863   : > { %4921 = vpow2.f32 %v2396_v63  ;;  %v2389_v54 = vsub.f32 %v2355_v3, %v2379_v35  ;;  %v4749_v63 = vpack.i.bf16 %v4978_v9, %v4977_v16  ;;  %v7423_v35 = vpack.i.bf16 %v6694_v33, %v6696_v34  ;;  %v2728_v9 = vld [vmem:[#allocation10 + $0x28] sm:$0xff] }
 0x864   : > { %v6967_v19 = vpop.eup %4915 }
 0x865   : > { %v6969_v59 = vpop.eup %4917  ;;  %v2402_v27 = vmul.f32 1.442695, %v2389_v54  ;;  %2410 = vadd.xlane.f32.xlu0 %v6967_v19 }
 0x866   : > { %2408 = vadd.xlane.f32.xlu1 %v6969_v59  ;;  %v2383_v46 = vpop.xlane.xlu0 %2382 }
 0x867   : > { %4923 = vpow2.f32 %v2402_v27  ;;  %v2391_v23 = vsub.f32 %v2365_v52, %v2383_v46 }
 0x869   : > { %v6973_v26 = vpop.eup %4919  ;;  %v2406_v0 = vmul.f32 1.442695, %v2391_v23 }
 0x86a   : > { %2414 = vadd.xlane.f32.xlu0 %v6973_v26  ;;  %v4736_v50 = vpop.permute.xlu0 %4735 }
 0x86b   : > { %4925 = vpow2.f32 %v2406_v0  ;;  %v4738_v3 = vunpack.i.h.bf16 %v4736_v50  ;;  %v4737_v17 = vunpack.i.l.bf16 %v4736_v50 }
 0x86d   : > { %v6976_v40 = vpop.eup %4921  ;;  %v4295_v58 = vpack.c.bf16 %v4738_v3, %v4737_v17 }
 0x86e   : > { %2412 = vadd.xlane.f32.xlu0 %v6976_v40 }
 0x86f   : > { %4296 = vmatprep.subr.bf16.mxu0 %v4295_v58 }
 0x870   : > { %4298 = vmatpush3.bf16.msra.mxu0 %v4295_v58 }
 0x871   : > { %v6979_v18 = vpop.eup %4923 }
 0x872   : > { %2418 = vadd.xlane.f32.xlu0 %v6979_v18 }
 0x875   : > { %v6982_v52 = vpop.eup %4925 }
 0x876   : > { %2422 = vadd.xlane.f32.xlu0 %v6982_v52 }
 0x88a   : > { %v2377_v28 = vpop.xlane.xlu1 %2376 }
 0x88b   : > { %v2388_v32 = vsub.f32 %v6945_v39, %v2377_v28 }
 0x88d   : > { %v2400_v41 = vmul.f32 1.442695, %v2388_v32 }
 0x88e   : > { %v2381_v48 = vpop.xlane.xlu1 %2380 }
 0x88f   : > { %4927 = vpow2.f32 %v2400_v41  ;;  %v2390_v24 = vsub.f32 %v6958_v5, %v2381_v48 }
 0x891   : > { %v2404_v47 = vmul.f32 1.442695, %v2390_v24 }
 0x892   : > { %v4741_v6 = vpop.permute.xlu1 %4740 }
 0x893   : > { %4929 = vpow2.f32 %v2404_v47  ;;  %v4743_v61 = vunpack.i.h.bf16 %v4741_v6  ;;  %v4742_v2 = vunpack.i.l.bf16 %v4741_v6 }
 0x895   : > { %v4299_v60 = vpack.c.bf16 %v4743_v61, %v4742_v2 }
 0x896   : > { %v4746_v51 = vpop.permute.xlu1 %4745 }
 0x897   : > { %v4748_v55 = vunpack.i.h.bf16 %v4746_v51  ;;  %v4747_v36 = vunpack.i.l.bf16 %v4746_v51  ;;  %4300 = vmatprep.subr.bf16.mxu0 %v4299_v60 }
 0x898   : > { %4302 = vmatpush3.bf16.msra.mxu0 %v4299_v60 }
 0x899   : > { %v6987_v39 = vpop.eup %4927  ;;  %v4303_v20 = vpack.c.bf16 %v4748_v55, %v4747_v36 }
 0x89a   : > { %2416 = vadd.xlane.f32.xlu1 %v6987_v39 }
 0x89b   : > { %4304 = vmatprep.subr.bf16.mxu0 %v4303_v20 }
 0x89c   : > { %4306 = vmatpush3.bf16.msra.mxu0 %v4303_v20 }
 0x89d   : > { %v6990_v5 = vpop.eup %4929 }
 0x89e   : > { %2420 = vadd.xlane.f32.xlu0 %v6990_v5 }
 0x8ab   : > { %4755 = vrot.lane.b32.xlu1 %v4754_v21, %s5328_s7 }
 0x8af   : > { %4760 = vrot.lane.b32.xlu1 %v7422_v29, %s5328_s7  ;;  %v2726_v29 = vld [vmem:[#allocation10 + $0x18] sm:$0xff] }
 0x8b0   : > { %v4319_v16 = vpack.c.bf16 %v2726_v29, %v2725_v10 }
 0x8b3   : > { %4765 = vrot.lane.b32.xlu1 %v4764_v13, %s5327_s10 }
 0x8b4   : > { %4750 = vrot.lane.b32.xlu0 %v4749_v63, %s5328_s7  ;;  %v2729_v63 = vld [vmem:[#allocation10 + $0x30] sm:$0xff] }
 0x8b7   : > { %4770 = vrot.lane.b32.xlu1 %v7423_v35, %s5328_s7  ;;  %v2730_v35 = vld [vmem:[#allocation10 + $0x38] sm:$0xff] }
 0x8b8   : > { %4775 = vrot.lane.b32.xlu0 %v4774_v56, %s5327_s10  ;;  %v4327_v25 = vpack.c.bf16 %v2730_v35, %v2729_v63 }
 0x8bb   : > { %4785 = vrot.lane.b32.xlu1 %v4784_v43, %s5327_s10 }
 0x8bc   : > { %4780 = vrot.lane.b32.xlu0 %v7425_v15, %s5328_s7  ;;  %v2731_v15 = vld [vmem:[#allocation10 + $0x40] sm:$0xff] }
 0x8f2   : > { %v2411_v38 = vpop.xlane.xlu0 %2410 }
 0x8f3   : > { %4931 = vrcp.f32 %v2411_v38  ;;  %v2409_v1 = vpop.xlane.xlu1 %2408  ;;  %v2732_v38 = vld [vmem:[#allocation10 + $0x48] sm:$0xff] }
 0x8f4   : > { %4933 = vrcp.f32 %v2409_v1  ;;  %v4331_v1 = vpack.c.bf16 %v2732_v38, %v2731_v15 }
 0x8f7   : > { %v2415_v33 = vpop.xlane.xlu0 %2414 }
 0x8f8   : > { %4935 = vrcp.f32 %v2415_v33  ;;  %v2733_v33 = vld [vmem:[#allocation10 + $0x50] sm:$0xff] }
 0x8fb   : > { %v2413_v34 = vpop.xlane.xlu0 %2412 }
 0x8fc   : > { %4937 = vrcp.f32 %v2413_v34  ;;  %v2734_v34 = vld [vmem:[#allocation10 + $0x58] sm:$0xff] }
 0x8fd   : > { %v4932_v13 = vpop.eup %4931 }
 0x8fe   : > { %v4934_v42 = vpop.eup %4933  ;;  %v2433_v57 = vmul.f32 %v4932_v13, %v6967_v19  ;;  %v4335_v13 = vpack.c.bf16 %v2734_v34, %v2733_v33 }
 0x8ff   : > { %v2419_v56 = vpop.xlane.xlu0 %2418  ;;  %v2432_v14 = vmul.f32 %v4934_v42, %v6969_v59  ;;  %v2735_v42 = vld [vmem:[#allocation10 + $0x60] sm:$0xff] }
 0x900   : > { %v2441_v31 = vadd.f32 %v2433_v57, %v6818_v53  ;;  %4939 = vrcp.f32 %v2419_v56 }
 0x901   : > { %v2440_v12 = vadd.f32 %v2432_v14, %v6820_v11  ;;  %3931 = vmatprep.mubr.f32.mxu0 %v2432_v14  ;;  %v2737_v14 = vld [vmem:[#allocation10 + $0x70] sm:$0xff] }
 0x902   : > { %v4936_v43 = vpop.eup %4935  ;;  %v2860_v54 = vmul.f32 0.25, %v2441_v31  ;;  %v2738_v31 = vld [vmem:[#allocation10 + $0x78] sm:$0xff] }
 0x903   : > { %v2859_v27 = vmul.f32 0.25, %v2440_v12  ;;  %v2423_v46 = vpop.xlane.xlu0 %2422  ;;  %v2435_v23 = vmul.f32 %v4936_v43, %v6973_v26  ;;  %v4343_v12 = vpack.c.bf16 %v2738_v31, %v2737_v14  ;;  %v7434_v14 = vld [vmem:[#allocation62_spill] sm:$0xff] }
 0x904   : > { %2868 = vst [vmem:[%s7029_s27 + $0x8] sm:$0xff] %v2860_v54  ;;  %4941 = vrcp.f32 %v2423_v46 }
 0x905   : > { %2867 = vst [vmem:[%s7029_s27] sm:$0xff] %v2859_v27  ;;  %v2443_v53 = vadd.f32 %v2435_v23, %v6844_v8 }
 0x906   : > { %v4938_v11 = vpop.eup %4937 }
 0x907   : > { %v2434_v19 = vmul.f32 %v4938_v11, %v6976_v40  ;;  %v2862_v59 = vmul.f32 0.25, %v2443_v53 }
 0x909   : > { %v2442_v0 = vadd.f32 %v2434_v19, %v6849_v37  ;;  %2870 = vst [vmem:[%s7029_s27 + $0x18] sm:$0xff] %v2862_v59 }
 0x90a   : > { %v4940_v26 = vpop.eup %4939 }
 0x90b   : > { %v2861_v50 = vmul.f32 0.25, %v2442_v0  ;;  %v2437_v3 = vmul.f32 %v4940_v26, %v6979_v18  ;;  %v7426_v0 = vld [vmem:[#allocation67_spill] sm:$0xff]  ;;  %v7427_v26 = vld [vmem:[#allocation68_spill] sm:$0xff] }
 0x90d   : > { %2869 = vst [vmem:[%s7029_s27 + $0x10] sm:$0xff] %v2861_v50  ;;  %v2445_v17 = vadd.f32 %v2437_v3, %v6854_v4  ;;  %v7428_v50 = vpack.i.bf16 %v7426_v0, %v7427_v26 }
 0x90e   : > { %v4942_v58 = vpop.eup %4941 }
 0x90f   : > { %v2864_v28 = vmul.f32 0.25, %v2445_v17  ;;  %v2439_v32 = vmul.f32 %v4942_v58, %v6982_v52 }
 0x911   : > { %2872 = vst [vmem:[%s7029_s27 + $0x28] sm:$0xff] %v2864_v28  ;;  %v2447_v8 = vadd.f32 %v2439_v32, %v6868_v7 }
 0x913   : > { %v2866_v41 = vmul.f32 0.25, %v2447_v8 }
 0x915   : > { %2874 = vst [vmem:[%s7029_s27 + $0x38] sm:$0xff] %v2866_v41 }
 0x927   : > { %v2417_v40 = vpop.xlane.xlu1 %2416 }
 0x928   : > { %4943 = vrcp.f32 %v2417_v40 }
 0x92b   : > { %v2421_v37 = vpop.xlane.xlu0 %2420  ;;  %v4756_v48 = vpop.permute.xlu1 %4755 }
 0x92c   : > { %4945 = vrcp.f32 %v2421_v37  ;;  %v4758_v24 = vunpack.i.h.bf16 %v4756_v48  ;;  %v4757_v47 = vunpack.i.l.bf16 %v4756_v48 }
 0x92e   : > { %v4311_v2 = vpack.c.bf16 %v4758_v24, %v4757_v47 }
 0x92f   : > { %v4751_v18 = vpop.permute.xlu0 %4750  ;;  %v4761_v28 = vpop.permute.xlu1 %4760 }
 0x930   : > { %v4753_v6 = vunpack.i.h.bf16 %v4751_v18  ;;  %v4752_v4 = vunpack.i.l.bf16 %v4751_v18  ;;  %v4763_v37 = vunpack.i.h.bf16 %v4761_v28  ;;  %v4762_v48 = vunpack.i.l.bf16 %v4761_v28 }
 0x932   : > { %v4944_v61 = vpop.eup %4943  ;;  %v4307_v52 = vpack.c.bf16 %v4753_v6, %v4752_v4 }
 0x933   : > { %v2436_v60 = vmul.f32 %v4944_v61, %v6987_v39  ;;  %v2723_v39 = vld [vmem:[#allocation10] sm:$0xff]  ;;  %v4776_v41 = vpop.permute.xlu0 %4775 }
 0x934   : > { %4308 = vmatprep.subr.bf16.mxu0 %v4307_v52  ;;  %v7429_v61 = vld [vmem:[#allocation59_spill] sm:$0xff]  ;;  %v4778_v10 = vunpack.i.h.bf16 %v4776_v41 }
 0x935   : > { %4310 = vmatpush3.bf16.msra.mxu0 %v4307_v52  ;;  %v2444_v7 = vadd.f32 %v2436_v60, %v6859_v30  ;;  %v2724_v30 = vld [vmem:[#allocation10 + $0x8] sm:$0xff]  ;;  %v2698_v45 = vsel %vm591_vm0, %v7429_v61, %v4763_v37 }
 0x936   : > { %v4946_v51 = vpop.eup %4945  ;;  %4312 = vmatprep.subr.bf16.mxu0 %v4311_v2  ;;  %v4315_v21 = vpack.c.bf16 %v2724_v30, %v2723_v39  ;;  %v7432_v39 = vld [vmem:[#allocation36_spill] sm:$0xff] }
 0x937   : > { %v2863_v55 = vmul.f32 0.25, %v2444_v7  ;;  %v2438_v36 = vmul.f32 %v4946_v51, %v6990_v5  ;;  %v2727_v5 = vld [vmem:[#allocation10 + $0x20] sm:$0xff]  ;;  %v4781_v7 = vpop.permute.xlu0 %4780 }
 0x939   : > { %4314 = vmatpush3.bf16.msra.mxu0 %v4311_v2  ;;  %2871 = vst [vmem:[%s7029_s27 + $0x20] sm:$0xff] %v2863_v55  ;;  %v2446_v20 = vadd.f32 %v2438_v36, %v6875_v22  ;;  %v4323_v22 = vpack.c.bf16 %v2728_v9, %v2727_v5  ;;  %v7430_v2 = vld [vmem:[#allocation60_spill] sm:$0xff]  ;;  %v4782_v5 = vunpack.i.l.bf16 %v4781_v7 }
 0x93a   : > { %4316 = vmatprep.subr.bf16.mxu0 %v4315_v21  ;;  %v2697_v52 = vsel %vm591_vm0, %v7430_v2, %v4762_v48 }
 0x93b   : > { %v2865_v49 = vmul.f32 0.25, %v2446_v20  ;;  %v7431_v20 = vld [vmem:[#allocation61_spill] sm:$0xff] }
 0x93c   : > { %3932 = vmatmul.mubr.f32.vlgmr.msra.gmra.mrb[56].mxu0 %v2433_v57  ;;  %v2736_v57 = vld [vmem:[#allocation10 + $0x68] sm:$0xff] }
 0x93d   : > { %3934 = vmatprep.mubr.f32.mxu0 %v2434_v19  ;;  %2873 = vst [vmem:[%s7029_s27 + $0x30] sm:$0xff] %v2865_v49  ;;  %4318 = vmatpush3.bf16.msra.mxu0 %v4315_v21  ;;  %v4339_v56 = vpack.c.bf16 %v2736_v57, %v2735_v42  ;;  %v4777_v21 = vunpack.i.l.bf16 %v4776_v41  ;;  %v7433_v57 = vld [vmem:[#allocation63_spill] sm:$0xff] }
 0x93e   : > { %4320 = vmatprep.subr.bf16.mxu0 %v4319_v16 }
 0x940   : > { %3935 = vmatmul.mubr.f32.gmra.mrb[58].mxu0 %v2435_v23 }
 0x941   : > { %3937 = vmatprep.mubr.f32.mxu0 %v2436_v60  ;;  %4322 = vmatpush3.bf16.msra.mxu0 %v4319_v16  ;;  %v4783_v16 = vunpack.i.h.bf16 %v4781_v7 }
 0x942   : > { %4324 = vmatprep.subr.bf16.mxu0 %v4323_v22 }
 0x943   : > { %v2702_v31 = vsel %vm591_vm0, %v7434_v14, %v4783_v16 }
 0x944   : > { %3938 = vmatmul.mubr.f32.gmra.mrb[60].mxu0 %v2437_v3 }
 0x945   : > { %3940 = vmatprep.mubr.f32.mxu0 %v2438_v36  ;;  %4326 = vmatpush3.bf16.msra.mxu0 %v4323_v22 }
 0x946   : > { %4328 = vmatprep.subr.bf16.mxu0 %v4327_v25 }
 0x948   : > { %3941 = vmatmul.mubr.f32.gmra.mrb[62].mxu0 %v2439_v32  ;;  %v4766_v32 = vpop.permute.xlu1 %4765 }
 0x949   : > { %4330 = vmatpush3.bf16.msra.mxu0 %v4327_v25  ;;  %v4768_v24 = vunpack.i.h.bf16 %v4766_v32  ;;  %v4767_v47 = vunpack.i.l.bf16 %v4766_v32 }
 0x94a   : > { %4332 = vmatprep.subr.bf16.mxu0 %v4331_v1 }
 0x94b   : > { %v2707_v60 = vsel %vm2705_vm10, %v2698_v45, %v4768_v24  ;;  %v2706_v51 = vsel %vm2705_vm10, %v2697_v52, %v4767_v47 }
 0x94c   : > { %v4771_v8 = vpop.permute.xlu1 %4770 }
 0x94d   : > { %4334 = vmatpush3.bf16.msra.mxu0 %v4331_v1  ;;  %v4773_v18 = vunpack.i.h.bf16 %v4771_v8  ;;  %v4772_v6 = vunpack.i.l.bf16 %v4771_v8 }
 0x94e   : > { %4336 = vmatprep.subr.bf16.mxu0 %v4335_v13 }
 0x94f   : > { %v2699_v49 = vsel %vm591_vm0, %v7431_v20, %v4772_v6  ;;  %v2700_v30 = vsel %vm591_vm0, %v7432_v39, %v4773_v18 }
 0x950   : > { %v4786_v40 = vpop.permute.xlu1 %4785  ;;  %v2708_v25 = vsel %vm2705_vm10, %v2699_v49, %v4777_v21  ;;  %v2709_v15 = vsel %vm2705_vm10, %v2700_v30, %v4778_v10 }
 0x951   : > { %4338 = vmatpush3.bf16.msra.mxu0 %v4335_v13  ;;  %v4788_v63 = vunpack.i.h.bf16 %v4786_v40  ;;  %v4787_v35 = vunpack.i.l.bf16 %v4786_v40 }
 0x952   : > { %4340 = vmatprep.subr.bf16.mxu0 %v4339_v56 }
 0x955   : > { %4342 = vmatpush3.bf16.msra.mxu0 %v4339_v56  ;;  %v2701_v56 = vsel %vm591_vm0, %v7433_v57, %v4782_v5 }
 0x956   : > { %4344 = vmatprep.subr.bf16.mxu0 %v4343_v12 }
 0x959   : > { %4346 = vmatpush3.bf16.msra.mxu0 %v4343_v12 }
 0xa0f   : > { %v3933_v43 = vpop.f32.mrb[56].mxu0 }
 0xa10   : > { %v2562_v54 = vpop.f32.mrb[57].mxu0 }
 0xa11   : > { %v4789_v27 = vpack.i.bf16 %v3933_v43, %v2562_v54  ;;  %v2710_v54 = vsel %vm2705_vm10, %v2701_v56, %v4787_v35 }
 0xa13   : > { %4790 = vrot.lane.b32.xlu1 %v4789_v27, %s5326_s15  ;;  %v3936_v46 = vpop.f32.mrb[58].mxu0  ;;  %v2711_v27 = vsel %vm2705_vm10, %v2702_v31, %v4788_v63 }
 0xa14   : > { %v2572_v23 = vpop.f32.mrb[59].mxu0 }
 0xa15   : > { %v4794_v53 = vpack.i.bf16 %v3936_v46, %v2572_v23 }
 0xa17   : > { %4795 = vrot.lane.b32.xlu1 %v4794_v53, %s5326_s15  ;;  %v3939_v11 = vpop.f32.mrb[60].mxu0 }
 0xa18   : > { %v2582_v19 = vpop.f32.mrb[61].mxu0 }
 0xa19   : > { %v4804_v59 = vpack.i.bf16 %v3939_v11, %v2582_v19 }
 0xa1b   : > { %4800 = vrot.lane.b32.xlu1 %v7428_v50, %s5328_s7  ;;  %4805 = vrot.lane.b32.xlu0 %v4804_v59, %s5326_s15  ;;  %v3942_v3 = vpop.f32.mrb[62].mxu0  ;;  %v7436_v50 = vld [vmem:[#allocation65_spill] sm:$0xff] }
 0xa1c   : > { %v2592_v17 = vpop.f32.mrb[63].mxu0 }
 0xa1d   : > { %v4814_v58 = vpack.i.bf16 %v3942_v3, %v2592_v17  ;;  %v7437_v17 = vld [vmem:[#allocation64_spill] sm:$0xff] }
 0xa1f   : > { %4810 = vrot.lane.b32.xlu0 %v4809_v62, %s5327_s10  ;;  %4815 = vrot.lane.b32.xlu1 %v4814_v58, %s5326_s15  ;;  %s3273_s15 = sshll.u32 %s7435_s28, 4 }
 0xa20   : > { %s7096_s10 = sadd.s32 %s3273_s15, %s3272_s4 }
 0xa21   : > { %s3274_s7 = sshll.u32 %s7096_s10, 7 }
 0xa22   : > { %s7104_s11 = scalar_lea.hbm %s7439_s17, %s3274_s7 }
 0xa85   : > { %v4791_v4 = vpop.permute.xlu1 %4790 }
 0xa86   : > { %v4793_v44 = vunpack.i.h.bf16 %v4791_v4  ;;  %v4792_v62 = vunpack.i.l.bf16 %v4791_v4 }
 0xa88   : > { %v2715_v55 = vsel %vm2714_vm11, %v2706_v51, %v4792_v62  ;;  %v2716_v36 = vsel %vm2714_vm11, %v2707_v60, %v4793_v44 }
 0xa89   : > { %3975 = vmatprep.mubr.f32.mxu0 %v2715_v55  ;;  %v4796_v29 = vpop.permute.xlu1 %4795 }
 0xa8a   : > { %v4798_v9 = vunpack.i.h.bf16 %v4796_v29  ;;  %v4797_v22 = vunpack.i.l.bf16 %v4796_v29  ;;  %3976 = vmatmul.mubr.f32.vlgmr.msra.gmra.mrb[64].mxu0 %v2716_v36 }
 0xa8c   : > { %v2717_v38 = vsel %vm2714_vm11, %v2708_v25, %v4797_v22  ;;  %v2718_v1 = vsel %vm2714_vm11, %v2709_v15, %v4798_v9 }
 0xa8d   : > { %v4801_v33 = vpop.permute.xlu1 %4800  ;;  %3978 = vmatprep.mubr.f32.mxu0 %v2717_v38  ;;  %v4806_v34 = vpop.permute.xlu0 %4805 }
 0xa8e   : > { %v4808_v13 = vunpack.i.h.bf16 %v4806_v34  ;;  %v4807_v42 = vunpack.i.l.bf16 %v4806_v34  ;;  %3979 = vmatmul.mubr.f32.gmra.mrb[66].mxu0 %v2718_v1  ;;  %v4803_v12 = vunpack.i.h.bf16 %v4801_v33  ;;  %v4802_v43 = vunpack.i.l.bf16 %v4801_v33 }
 0xa90   : > { %v2719_v46 = vsel %vm2714_vm11, %v2710_v54, %v4807_v42  ;;  %v2720_v23 = vsel %vm2714_vm11, %v2711_v27, %v4808_v13  ;;  %v2703_v3 = vsel %vm591_vm0, %v7436_v50, %v4802_v43  ;;  %v2704_v58 = vsel %vm591_vm0, %v7437_v17, %v4803_v12 }
 0xa91   : > { %v4811_v53 = vpop.permute.xlu0 %4810  ;;  %3981 = vmatprep.mubr.f32.mxu0 %v2719_v46  ;;  %v4816_v11 = vpop.permute.xlu1 %4815 }
 0xa92   : > { %v4813_v19 = vunpack.i.h.bf16 %v4811_v53  ;;  %v4812_v59 = vunpack.i.l.bf16 %v4811_v53  ;;  %v4818_v0 = vunpack.i.h.bf16 %v4816_v11  ;;  %v4817_v26 = vunpack.i.l.bf16 %v4816_v11  ;;  %3982 = vmatmul.mubr.f32.gmra.mrb[68].mxu0 %v2720_v23 }
 0xa94   : > { %v2712_v28 = vsel %vm2705_vm10, %v2703_v3, %v4812_v59  ;;  %v2713_v32 = vsel %vm2705_vm10, %v2704_v58, %v4813_v19 }
 0xa95   : > { %v2721_v8 = vsel %vm2714_vm11, %v2712_v28, %v4817_v26  ;;  %v2722_v41 = vsel %vm2714_vm11, %v2713_v32, %v4818_v0 }
 0xa96   : > { %3984 = vmatprep.mubr.f32.mxu0 %v2721_v8 }
 0xa97   : > { %3985 = vmatmul.mubr.f32.gmra.mrb[70].mxu0 %v2722_v41 }
 0xa98   : > { %5140 = shalt.err (!%p5137_p12)
}
 0xa99   : > { %s5141_s27 = scalar_lea.hbm %s7104_s11, 1024  ;;  %s5145_s15 = scalar_lea.hbm %s7439_s17, 4096 }
 0xa9a   : > { %p5142_p2 = scmp.ne.s32.totalorder %s7104_s11, %s5141_s27  ;;  %p5146_p11 = scmp.lt.u32.totalorder %s7104_s11, %s7439_s17 }
 0xa9b   : > { %p5147_p8 = scmp.lt.u32.totalorder %s5145_s15, %s5141_s27  ;;  %p5149_p4 = scmp.lt.u32.totalorder %s5141_s27, %s7104_s11 }
 0xa9c   : > { %p5143_p10 = pnand %p5142_p2, %p7440_p9 }
 0xa9d   : > { %p5148_p7 = por %p5147_p8, %p5146_p11 }
 0xa9e   : > { %p5144_p1 = pneg %p5143_p10 }
 0xa9f   : > { %p5150_p5 = por %p5149_p4, %p5148_p7 }
 0xaa1   : > { %p5151_p0 = pnand %p5150_p5, %p5144_p1 }
 0xaa3   : > { %5154 = shalt.err (!%p5151_p0)
}
 0xaa4   : > { %s5338_s24 = smov 128   ;;  %s5339_s20 = smov 8  }
 0xaa5   : > { %4360 = dma.vmem_to_hbm [thread:$0]  (%p7440_p9), %s7107_s21, 1024, %s7104_s11, %s2881_s22, %s5338_s24, %s5338_s24, %s5339_s20  }
 0xaa6   : > { %s7441_s28 = sld [smem:[#allocation72_spill]]  ;;  %s451_s27 = scalar_lea.vmem [#allocation11], %s5779_s8 }
 0xaa7   : > { %s2896_s11 = sshll.u32 %s451_s27, 4  ;;  %s7442_s22 = sld [smem:[#allocation73_spill]]  ;;  %s7140_s11 = int_to_ptr.vmem [resolvable:$true] %s2896_s11 }
 0xaa8   : > { %s2876_s15 = scalar_lea.sflag [#allocation4], %s5776_s30  ;;  %s5155_s6 = scalar_lea.vmem %s7140_s11, 1024 }
 0xaa9   : > { %p5156_p3 = scmp.ne.s32.totalorder %s7140_s11, %s5155_s6  ;;  %s5340_s5 = smov [#allocation11]  }
 0xaaa   : > { %s5159_s1 = sshll.u32 %s5340_s5, 4  ;;  %s5160_s1 = int_to_ptr.vmem [resolvable:$false] %s5159_s1 }
 0xaab   : > { %p5157_p13 = pnand %p5156_p3, %p7440_p9  ;;  %s5161_s25 = scalar_lea.vmem %s5160_s1, 2048 }
 0xaac   : > { %v3269_v40 = vld [vmem:[%s7441_s28] ss:$0 sm:$0xff]  ;;  %p5162_p12 = scmp.lt.s32.totalorder %s7140_s11, %s5160_s1  ;;  %p5163_p2 = scmp.lt.s32.totalorder %s5161_s25, %s5155_s6 }
 0xaad   : > { %s7147_s4 = scalar_lea.hbm %s7442_s22, %s3274_s7  ;;  %p5158_p6 = pneg %p5157_p13 }
 0xaae   : > { %p5164_p10 = por %p5163_p2, %p5162_p12 }
 0xab0   : > { %p5165_p1 = pnand %p5164_p10, %p5158_p6 }
 0xb5d   : > { %v3977_v37 = vpop.f32.mrb[64].mxu0 }
 0xb5e   : > { %v2818_v48 = vadd.f32 %v3977_v37, %v3269_v40  ;;  %v2812_v24 = vpop.f32.mrb[65].mxu0 }
 0xb5f   : > { %v2813_v47 = vadd.f32 %v3269_v40, %v2812_v24 }
 0xb60   : > { %2852 = vst [vmem:[%s451_s27 + $0x8] sm:$0xff] %v2818_v48 }
 0xb61   : > { %2851 = vst [vmem:[%s451_s27] sm:$0xff] %v2813_v47  ;;  %v3980_v18 = vpop.f32.mrb[66].mxu0 }
 0xb62   : > { %v2828_v6 = vadd.f32 %v3980_v18, %v3269_v40  ;;  %v2822_v4 = vpop.f32.mrb[67].mxu0 }
 0xb63   : > { %v2823_v61 = vadd.f32 %v3269_v40, %v2822_v4 }
 0xb64   : > { %2854 = vst [vmem:[%s451_s27 + $0x18] sm:$0xff] %v2828_v6 }
 0xb65   : > { %2853 = vst [vmem:[%s451_s27 + $0x10] sm:$0xff] %v2823_v61  ;;  %v3983_v45 = vpop.f32.mrb[68].mxu0 }
 0xb66   : > { %v2838_v44 = vadd.f32 %v3983_v45, %v3269_v40  ;;  %v2832_v62 = vpop.f32.mrb[69].mxu0 }
 0xb67   : > { %v2833_v2 = vadd.f32 %v3269_v40, %v2832_v62 }
 0xb68   : > { %2856 = vst [vmem:[%s451_s27 + $0x28] sm:$0xff] %v2838_v44 }
 0xb69   : > { %2855 = vst [vmem:[%s451_s27 + $0x20] sm:$0xff] %v2833_v2 }
 0xb6a   : > { %v3986_v52 = vpop.f32.mrb[70].mxu0 }
 0xb6b   : > { %v2848_v60 = vadd.f32 %v3986_v52, %v3269_v40  ;;  %v2842_v7 = vpop.f32.mrb[71].mxu0 }
 0xb6c   : > { %v2843_v51 = vadd.f32 %v3269_v40, %v2842_v7 }
 0xb6d   : > { %2858 = vst [vmem:[%s451_s27 + $0x38] sm:$0xff] %v2848_v60 }
 0xb6e   : > { %2857 = vst [vmem:[%s451_s27 + $0x30] sm:$0xff] %v2843_v51 }
 0xb6f   : > { %5168 = shalt.err (!%p5165_p1)
}
 0xb70   : > { %s5169_s10 = scalar_lea.hbm %s7147_s4, 1024  ;;  %s5173_s27 = scalar_lea.hbm %s7442_s22, 4096 }
 0xb71   : > { %p5170_p11 = scmp.ne.s32.totalorder %s7147_s4, %s5169_s10  ;;  %p5174_p4 = scmp.lt.u32.totalorder %s7147_s4, %s7442_s22 }
 0xb72   : > { %p5175_p5 = scmp.lt.u32.totalorder %s5173_s27, %s5169_s10  ;;  %p5177_p3 = scmp.lt.u32.totalorder %s5169_s10, %s7147_s4 }
 0xb73   : > { %p5171_p8 = pnand %p5170_p11, %p7440_p9 }
 0xb74   : > { %p5176_p0 = por %p5175_p5, %p5174_p4 }
 0xb75   : > { %p5172_p7 = pneg %p5171_p8 }
 0xb76   : > { %p5178_p13 = por %p5177_p3, %p5176_p0 }
 0xb78   : > { %p5179_p6 = pnand %p5178_p13, %p5172_p7 }
 0xb7a   : > { %5182 = shalt.err (!%p5179_p6)
}
 0xb7b   : > { %4359 = dma.vmem_to_hbm [thread:$0]  (%p7440_p9), %s7140_s11, 1024, %s7147_s4, %s2876_s15, %s5338_s24, %s5338_s24, %s5339_s20  }
 0xb7c PF: > { %s7443_s6 = sld [smem:[#allocation23_spill]]  ;;  %p4390_p12 = scmp.ge.s32.totalorder %s5317_s14, 2 }
 0xb7d   : > { %s7444_s5 = sld [smem:[#allocation34_spill]] }
 0xb82   : > { %s2929_s1 = sand.u32 1, %s7443_s6  }
 0xb83   : > { %p7445_p2 = scmp.ne.s32.totalorder %s7444_s5, 0  ;;  %s2930_s25 = scalar_lea.sflag [#allocation4], %s2929_s1 }
 0xb85   : > { %p4381_p10 = pnand %p4390_p12, %p7445_p2 }
 0xb87   : > { %5256 = dma.done.wait (!%p4381_p10), %s2930_s25, 1024  }
 0xb88   : > { %5258 = vsyncadd (!%p4381_p10), %s2930_s25, 4294966272  ;;  %s2939_s18 = scalar_lea.sflag [#allocation13], %s2929_s1 }
 0xb89   : > { %5260 = dma.done.wait (!%p4381_p10), %s2939_s18, 1024  }
 0xb8a   : > { %5262 = vsyncadd (!%p4381_p10), %s2939_s18, 4294966272  ;;  %s33_s14 = sadd.s32 1, %s5317_s14   ;;  %s7447_s24 = sld [smem:[#allocation21_spill]] }
 0xb8b   : > { %p7181_p1 = scmp.ge.s32.totalorder %s33_s14, 6   ;;  %s7448_s27 = sld [smem:[#allocation22_spill]] }
 0xb8c   : > { %s7449_s20 = sld [smem:[#allocation24_spill]]  ;;  %s7450_s4 = sld [smem:[#allocation30_spill]] }
 0xb8d   : > { %s7451_s15 = sld [smem:[#allocation33_spill]]  ;;  %s7453_s25 = smov %s5273_s26 }
 0xb8e   : > { %s7454_s26 = smov %s5711_s19  ;;  %s7455_s28 = smov %s5285_s29 }
 0xb8f   : > { %s7456_s29 = smov %s5623_s16  ;;  %s7458_s8 = smov %s5297_s9 }
 0xb90   : > { %s7459_s9 = smov %s5626_s3  ;;  %s7460_s10 = smov %s5309_s12 }
 0xb91   : > { %s7461_s11 = smov %s5313_s13  ;;  %32 = sbr.rel (!%p7181_p1) target bundleno = 23 (0x17), region = 147 }
 0xb92   : > { %s7457_s30 = smov %s7449_s20  ;;  %s7462_s12 = smov %s7450_s4 }
 0xb93   : > { %s7463_s13 = smov %s7451_s15 }
 0xb98   :  { %2944 = vsyncpa [#allocation3], 1 }
 0xb99   :  { %2946 = vsyncpa [#allocation3 + $0x1], 1 }
 0xb9a   :  { %2947 = vsyncpa [#allocation6], 1 }
 0xb9b   :  { %2949 = vsyncpa [#allocation6 + $0x1], 1 }
 0xb9c   :  { %2950 = vsyncpa [#allocation9], 1 }
 0xb9d   :  { %2952 = vsyncpa [#allocation9 + $0x1], 1 }
 0xb9e   :  { %2953 = vsyncpa [#allocation4], 1 }
 0xb9f   :  { %2955 = vsyncpa [#allocation4 + $0x1], 1 }
 0xba0   :  { %2956 = vsyncpa [#allocation13], 1 }
 0xba1   :  { %2958 = vsyncpa [#allocation13 + $0x1], 1 }

</bundles_post_ra>
